<compile_context>
chip_gen: v6e
topology: v6e:2x2x1
jax: 0.10.0
libtpu: 0.0.40
codegen_flags: <defaults>
</compile_context>

<pallas_src>
import numpy as np
import jax
import jax.numpy as jnp
from jax.experimental import pallas as pl
from jax.experimental.pallas import tpu as pltpu

# ---------------------------------------------------------------------------
# constants of pytorch_msssim.MS_SSIM(data_range=1, channel=13)
# ---------------------------------------------------------------------------
WIN_SIZE = 11
WIN_SIGMA = 1.5
K1, K2 = 0.01, 0.03
DATA_RANGE = 1.0
C1 = float((K1 * DATA_RANGE) ** 2)
C2 = float((K2 * DATA_RANGE) ** 2)
MS_WEIGHTS = (0.0448, 0.2856, 0.3001, 0.2363, 0.1333)
LEVELS = len(MS_WEIGHTS)
_N_MATS = 2 * LEVELS + 2 * (LEVELS - 1)          # 10 filter mats + 8 pool mats


def _gauss_taps(size=WIN_SIZE, sigma=WIN_SIGMA):
    coords = np.arange(size, dtype=np.float32) - size // 2
    g = np.exp(-(coords ** 2) / np.float32(2.0 * sigma * sigma))
    return (g / g.sum()).astype(np.float32)


def _gauss_band(size_in, taps):
    """Banded (size_out, size_in) matrix for a 'valid' 1-D Gaussian filter."""
    n = len(taps)
    assert size_in >= n, "MS-SSIM level smaller than the Gaussian window"
    size_out = size_in - n + 1
    m = np.zeros((size_out, size_in), np.float32)
    for i in range(size_out):
        m[i, i:i + n] = taps
    return m


def _pool_band(size_in):
    """(size_out, size_in) matrix for 1-D avg-pool k=2, s=2, padding=size_in%2,
    count_include_pad=True (0.5 per included tap; zero pad contributes 0)."""
    pad = size_in % 2
    size_out = (size_in + 2 * pad - 2) // 2 + 1
    m = np.zeros((size_out, size_in), np.float32)
    for i in range(size_out):
        start = 2 * i - pad
        for k in (start, start + 1):
            if 0 <= k < size_in:
                m[i, k] = 0.5
    return m


def _level_shapes(H, W):
    shapes = [(H, W)]
    for _ in range(LEVELS - 1):
        h, w = shapes[-1]
        shapes.append((_pool_band(h).shape[0], _pool_band(w).shape[0]))
    return shapes


def _build_mats(H, W):
    """Flat list: [G_h_l, G_w_l for each level] + [P_h_l, P_w_l for each pool]."""
    taps = _gauss_taps()
    shapes = _level_shapes(H, W)
    mats = []
    for (h, w) in shapes:
        mats.append(jnp.asarray(_gauss_band(h, taps)))       # (h-10, h)
        mats.append(jnp.asarray(_gauss_band(w, taps).T))      # (w, w-10)
    for lvl in range(LEVELS - 1):
        h, w = shapes[lvl]
        mats.append(jnp.asarray(_pool_band(h)))               # (h', h)
        mats.append(jnp.asarray(_pool_band(w).T))              # (w, w')
    return mats, shapes


# ---------------------------------------------------------------------------
# fused Pallas kernel: one (b, c) plane per grid step
# ---------------------------------------------------------------------------
def _fused_kernel(*refs):
    p_ref, t_ref = refs[0], refs[1]
    mat_refs = refs[2:2 + _N_MATS]
    ssim_ref, cs_ref, l1_ref = refs[2 + _N_MATS:]

    gh_refs = [mat_refs[2 * l] for l in range(LEVELS)]
    gw_refs = [mat_refs[2 * l + 1] for l in range(LEVELS)]
    ph_refs = [mat_refs[2 * LEVELS + 2 * l] for l in range(LEVELS - 1)]
    pw_refs = [mat_refs[2 * LEVELS + 2 * l + 1] for l in range(LEVELS - 1)]

    x = p_ref[0, 0].astype(jnp.float32)      # (H, W)
    y = t_ref[0, 0].astype(jnp.float32)

    # --- fused SmoothL1 (beta=1.0) per-plane partial sum --------------------
    d = x - y
    ad = jnp.abs(d)
    sl1 = jnp.where(ad < 1.0, 0.5 * d * d, ad - 0.5)
    l1_ref[0, 0] = jnp.broadcast_to(jnp.sum(sl1, keepdims=True), (1, 128))

    # --- MS-SSIM pyramid, entirely in VMEM ----------------------------------
    ssim_rows = []
    cs_rows = []
    for lvl in range(LEVELS):
        H, W = x.shape
        g_h = gh_refs[lvl][...]                              # (Ho, H)
        g_w = gw_refs[lvl][...]                              # (W, Wo)

        # batched W-direction Gaussian filter of [x, y, x*x, y*y, x*y] (MXU)
        slab = jnp.concatenate([x, y, x * x, y * y, x * y], axis=0)   # (5H, W)
        slab_w = jnp.dot(slab, g_w, preferred_element_type=jnp.float32)  # (5H, Wo)
        # per-quantity H-direction Gaussian filter (MXU)
        filt = [jnp.dot(g_h, slab_w[i * H:(i + 1) * H, :],
                        preferred_element_type=jnp.float32) for i in range(5)]
        mu1, mu2, gxx, gyy, gxy = filt

        mu1_sq = mu1 * mu1
        mu2_sq = mu2 * mu2
        mu1_mu2 = mu1 * mu2
        sigma1_sq = gxx - mu1_sq
        sigma2_sq = gyy - mu2_sq
        sigma12 = gxy - mu1_mu2

        cs_map = (2.0 * sigma12 + C2) / (sigma1_sq + sigma2_sq + C2)
        ssim_map = ((2.0 * mu1_mu2 + C1) / (mu1_sq + mu2_sq + C1)) * cs_map

        ssim_rows.append(jnp.broadcast_to(jnp.mean(ssim_map, keepdims=True),
                                          (1, 128)))
        cs_rows.append(jnp.broadcast_to(jnp.mean(cs_map, keepdims=True),
                                        (1, 128)))

        if lvl < LEVELS - 1:
            # 2x2 average pooling of both planes as MXU matmuls
            p_h = ph_refs[lvl][...]                          # (H', H)
            p_w = pw_refs[lvl][...]                          # (W, W')
            xy = jnp.concatenate([x, y], axis=0)              # (2H, W)
            xy = jnp.dot(xy, p_w, preferred_element_type=jnp.float32)  # (2H, W')
            x = jnp.dot(p_h, xy[:H, :], preferred_element_type=jnp.float32)
            y = jnp.dot(p_h, xy[H:, :], preferred_element_type=jnp.float32)

    ssim_ref[0, 0] = jnp.concatenate(ssim_rows, axis=0)       # (LEVELS, 128)
    cs_ref[0, 0] = jnp.concatenate(cs_rows, axis=0)           # (LEVELS, 128)


# ---------------------------------------------------------------------------
# pallas_call wrapper
# ---------------------------------------------------------------------------
def _msssim_sl1_planes(pred, target):
    B, C, H, W = pred.shape
    mats, shapes = _build_mats(H, W)

    img_spec = pl.BlockSpec((1, 1, H, W), lambda b, c: (b, c, 0, 0))
    mat_specs = [pl.BlockSpec(tuple(m.shape), lambda b, c: (0, 0)) for m in mats]
    out_specs = (
        pl.BlockSpec((1, 1, LEVELS, 128), lambda b, c: (b, c, 0, 0)),
        pl.BlockSpec((1, 1, LEVELS, 128), lambda b, c: (b, c, 0, 0)),
        pl.BlockSpec((1, 1, 1, 128), lambda b, c: (b, c, 0, 0)),
    )
    out_shape = (
        jax.ShapeDtypeStruct((B, C, LEVELS, 128), jnp.float32),
        jax.ShapeDtypeStruct((B, C, LEVELS, 128), jnp.float32),
        jax.ShapeDtypeStruct((B, C, 1, 128), jnp.float32),
    )

    # cost estimate (matmul-dominated)
    plane_flops = 0
    for i, (h, w) in enumerate(shapes):
        ho, wo = h - WIN_SIZE + 1, w - WIN_SIZE + 1
        plane_flops += 2 * (5 * h) * w * wo          # batched W-dir filter matmul
        plane_flops += 5 * 2 * ho * h * wo           # five H-dir filter matmuls
        plane_flops += 20 * ho * wo                  # ssim/cs map math
        if i + 1 < len(shapes):
            hn, wn = shapes[i + 1]
            plane_flops += 2 * (2 * h) * w * wn + 2 * 2 * hn * h * wn  # pooling
    plane_flops += 6 * H * W                         # smooth-l1
    in_bytes = pred.dtype.itemsize + target.dtype.itemsize
    bytes_accessed = (B * C * H * W * in_bytes
                      + sum(int(np.prod(m.shape)) * 4 for m in mats)
                      + B * C * (2 * LEVELS + 1) * 128 * 4)
    cost = pl.CostEstimate(flops=int(B * C * plane_flops), transcendentals=0,
                           bytes_accessed=int(bytes_accessed))

    ssim, cs, l1 = pl.pallas_call(
        _fused_kernel,
        out_shape=out_shape,
        grid=(B, C),
        in_specs=[img_spec, img_spec] + mat_specs,
        out_specs=out_specs,
        compiler_params=pltpu.CompilerParams(
            dimension_semantics=("parallel", "parallel"),
            vmem_limit_bytes=32 * 1024 * 1024),
        cost_estimate=cost,
    )(pred, target, *mats)

    return ssim[:, :, :, 0], cs[:, :, :, 0], l1[:, :, 0, 0]   # (B,C,L),(B,C,L),(B,C)


def sl1_ssim_loss(loc_pred, loc_target):
    B, C, H, W = loc_pred.shape
    assert min(H, W) > (WIN_SIZE - 1) * 2 ** 4, \
        "MS-SSIM (5 levels, win=11) requires spatial side > 160"

    ssim_pc, cs_pc, l1_part = _msssim_sl1_planes(loc_pred, loc_target)

    # SmoothL1Loss(reduction='mean')
    l1_loss = jnp.sum(l1_part.astype(jnp.float32)) / (B * C * H * W)

    # MS-SSIM: relu(cs) of levels 0..3 and relu(ssim) of level 4, weighted prod
    weights = jnp.asarray(MS_WEIGHTS, jnp.float32)
    mcs_and_ssim = jnp.concatenate(
        [jax.nn.relu(cs_pc[:, :, :LEVELS - 1]),
         jax.nn.relu(ssim_pc[:, :, LEVELS - 1:])], axis=-1)     # (B, C, 5)
    ms_ssim_val = jnp.prod(mcs_and_ssim ** weights, axis=-1).mean()
    ssim_loss = 1.0 - ms_ssim_val

    l1 = l1_loss.reshape((-1, 1))                # (1, 1), as in the PyTorch module
    return 0.2 * l1 + 0.8 * ssim_loss            # (1, 1)


if __name__ == "__main__":
    key = jax.random.PRNGKey(0)
    k1, k2 = jax.random.split(key)
    # channel=13 (MS_SSIM(channel=13)); spatial must exceed 160 for 5 levels.
    B, C, H, W = 2, 13, 176, 176
    loc_pred = jax.random.uniform(k1, (B, C, H, W), dtype=jnp.float32)
    loc_target = jax.random.uniform(k2, (B, C, H, W), dtype=jnp.float32)

    out = jax.jit(sl1_ssim_loss)(loc_pred, loc_target)
    out = jax.block_until_ready(out)
    assert out.shape == (1, 1) and out.dtype == jnp.float32
    print("KERNEL_OK")
</pallas_src>

<mosaic_0001>
module attributes {stable_mosaic.version = 11 : i64} {
  func.func @_fused_kernel(%arg0: i32, %arg1: i32, %arg2: memref<1x1x176x176xf32, #tpu.memory_space<vmem>>, %arg3: memref<1x1x176x176xf32, #tpu.memory_space<vmem>>, %arg4: memref<166x176xf32, #tpu.memory_space<vmem>>, %arg5: memref<176x166xf32, #tpu.memory_space<vmem>>, %arg6: memref<78x88xf32, #tpu.memory_space<vmem>>, %arg7: memref<88x78xf32, #tpu.memory_space<vmem>>, %arg8: memref<34x44xf32, #tpu.memory_space<vmem>>, %arg9: memref<44x34xf32, #tpu.memory_space<vmem>>, %arg10: memref<12x22xf32, #tpu.memory_space<vmem>>, %arg11: memref<22x12xf32, #tpu.memory_space<vmem>>, %arg12: memref<1x11xf32, #tpu.memory_space<vmem>>, %arg13: memref<11x1xf32, #tpu.memory_space<vmem>>, %arg14: memref<88x176xf32, #tpu.memory_space<vmem>>, %arg15: memref<176x88xf32, #tpu.memory_space<vmem>>, %arg16: memref<44x88xf32, #tpu.memory_space<vmem>>, %arg17: memref<88x44xf32, #tpu.memory_space<vmem>>, %arg18: memref<22x44xf32, #tpu.memory_space<vmem>>, %arg19: memref<44x22xf32, #tpu.memory_space<vmem>>, %arg20: memref<11x22xf32, #tpu.memory_space<vmem>>, %arg21: memref<22x11xf32, #tpu.memory_space<vmem>>, %arg22: memref<1x1x5x128xf32, #tpu.memory_space<vmem>>, %arg23: memref<1x1x5x128xf32, #tpu.memory_space<vmem>>, %arg24: memref<1x1x1x128xf32, #tpu.memory_space<vmem>>) attributes {dimension_semantics = [#tpu.dimension_semantics<parallel>, #tpu.dimension_semantics<parallel>], iteration_bounds = array<i64: 2, 13>, scalar_prefetch = 0 : i64, scratch_operands = 0 : i64, tpu.core_type = #tpu.core_type<tc>, window_params = [{transform_indices = @transform_0, window_bounds = array<i64: 1, 1, 176, 176>}, {transform_indices = @transform_1, window_bounds = array<i64: 1, 1, 176, 176>}, {pipeline_mode = #tpu.pipeline_mode<synchronous>, transform_indices = @transform_2, window_bounds = array<i64: 166, 176>}, {pipeline_mode = #tpu.pipeline_mode<synchronous>, transform_indices = @transform_3, window_bounds = array<i64: 176, 166>}, {pipeline_mode = #tpu.pipeline_mode<synchronous>, transform_indices = @transform_4, window_bounds = array<i64: 78, 88>}, {pipeline_mode = #tpu.pipeline_mode<synchronous>, transform_indices = @transform_5, window_bounds = array<i64: 88, 78>}, {pipeline_mode = #tpu.pipeline_mode<synchronous>, transform_indices = @transform_6, window_bounds = array<i64: 34, 44>}, {pipeline_mode = #tpu.pipeline_mode<synchronous>, transform_indices = @transform_7, window_bounds = array<i64: 44, 34>}, {pipeline_mode = #tpu.pipeline_mode<synchronous>, transform_indices = @transform_8, window_bounds = array<i64: 12, 22>}, {pipeline_mode = #tpu.pipeline_mode<synchronous>, transform_indices = @transform_9, window_bounds = array<i64: 22, 12>}, {pipeline_mode = #tpu.pipeline_mode<synchronous>, transform_indices = @transform_10, window_bounds = array<i64: 1, 11>}, {pipeline_mode = #tpu.pipeline_mode<synchronous>, transform_indices = @transform_11, window_bounds = array<i64: 11, 1>}, {pipeline_mode = #tpu.pipeline_mode<synchronous>, transform_indices = @transform_12, window_bounds = array<i64: 88, 176>}, {pipeline_mode = #tpu.pipeline_mode<synchronous>, transform_indices = @transform_13, window_bounds = array<i64: 176, 88>}, {pipeline_mode = #tpu.pipeline_mode<synchronous>, transform_indices = @transform_14, window_bounds = array<i64: 44, 88>}, {pipeline_mode = #tpu.pipeline_mode<synchronous>, transform_indices = @transform_15, window_bounds = array<i64: 88, 44>}, {pipeline_mode = #tpu.pipeline_mode<synchronous>, transform_indices = @transform_16, window_bounds = array<i64: 22, 44>}, {pipeline_mode = #tpu.pipeline_mode<synchronous>, transform_indices = @transform_17, window_bounds = array<i64: 44, 22>}, {pipeline_mode = #tpu.pipeline_mode<synchronous>, transform_indices = @transform_18, window_bounds = array<i64: 11, 22>}, {pipeline_mode = #tpu.pipeline_mode<synchronous>, transform_indices = @transform_19, window_bounds = array<i64: 22, 11>}, {transform_indices = @transform_20, window_bounds = array<i64: 1, 1, 5, 128>}, {transform_indices = @transform_21, window_bounds = array<i64: 1, 1, 5, 128>}, {transform_indices = @transform_22, window_bounds = array<i64: 1, 1, 1, 128>}]} {
    %c0 = arith.constant 0 : index
    %c0_0 = arith.constant 0 : index
    %c0_1 = arith.constant 0 : index
    %c0_2 = arith.constant 0 : index
    %0 = vector.load %arg2[%c0, %c0_0, %c0_1, %c0_2] : memref<1x1x176x176xf32, #tpu.memory_space<vmem>>, vector<1x1x176x176xf32>
    %1 = vector.shape_cast %0 : vector<1x1x176x176xf32> to vector<176x176xf32>
    %c0_3 = arith.constant 0 : index
    %c0_4 = arith.constant 0 : index
    %c0_5 = arith.constant 0 : index
    %c0_6 = arith.constant 0 : index
    %2 = vector.load %arg3[%c0_3, %c0_4, %c0_5, %c0_6] : memref<1x1x176x176xf32, #tpu.memory_space<vmem>>, vector<1x1x176x176xf32>
    %3 = vector.shape_cast %2 : vector<1x1x176x176xf32> to vector<176x176xf32>
    %4 = arith.subf %1, %3 : vector<176x176xf32>
    %5 = math.absf %4 : vector<176x176xf32>
    %cst = arith.constant 1.000000e+00 : f32
    %6 = vector.broadcast %cst : f32 to vector<176x176xf32>
    %7 = arith.cmpf olt, %5, %6 : vector<176x176xf32>
    %cst_7 = arith.constant 5.000000e-01 : f32
    %8 = vector.broadcast %cst_7 : f32 to vector<176x176xf32>
    %9 = arith.mulf %8, %4 : vector<176x176xf32>
    %10 = arith.mulf %9, %4 : vector<176x176xf32>
    %cst_8 = arith.constant 5.000000e-01 : f32
    %11 = vector.broadcast %cst_8 : f32 to vector<176x176xf32>
    %12 = arith.subf %5, %11 : vector<176x176xf32>
    %13 = arith.select %7, %10, %12 : vector<176x176xi1>, vector<176x176xf32>
    %14 = vector.shape_cast %13 : vector<176x176xf32> to vector<1x176x176xf32>
    %cst_9 = arith.constant dense<0.000000e+00> : vector<1xf32>
    %15 = vector.multi_reduction <add>, %14, %cst_9 [1, 2] : vector<1x176x176xf32> to vector<1xf32>
    %16 = vector.shape_cast %15 : vector<1xf32> to vector<1x1x1xf32>
    %17 = vector.extract %16[0, 0, 0] : f32 from vector<1x1x1xf32>
    %18 = vector.broadcast %17 : f32 to vector<1x1xf32>
    %19 = vector.shape_cast %18 : vector<1x1xf32> to vector<1x1xf32>
    %20 = vector.broadcast %19 : vector<1x1xf32> to vector<1x128xf32>
    %c0_10 = arith.constant 0 : index
    %c0_11 = arith.constant 0 : index
    %c0_12 = arith.constant 0 : index
    %c0_13 = arith.constant 0 : index
    %21 = vector.load %arg24[%c0_10, %c0_11, %c0_12, %c0_13] : memref<1x1x1x128xf32, #tpu.memory_space<vmem>>, vector<1x1x1x128xf32>
    %22 = vector.shape_cast %21 : vector<1x1x1x128xf32> to vector<1x128xf32>
    %23 = vector.shape_cast %20 : vector<1x128xf32> to vector<1x1x1x128xf32>
    tpu.vector_store %arg24[%c0_10, %c0_11, %c0_12, %c0_13], %23 {strides = array<i32>} : memref<1x1x1x128xf32, #tpu.memory_space<vmem>>, vector<1x1x1x128xf32>,
    %c0_14 = arith.constant 0 : index
    %c0_15 = arith.constant 0 : index
    %24 = vector.load %arg4[%c0_14, %c0_15] : memref<166x176xf32, #tpu.memory_space<vmem>>, vector<166x176xf32>
    %c0_16 = arith.constant 0 : index
    %c0_17 = arith.constant 0 : index
    %25 = vector.load %arg5[%c0_16, %c0_17] : memref<176x166xf32, #tpu.memory_space<vmem>>, vector<176x166xf32>
    %26 = arith.mulf %1, %1 : vector<176x176xf32>
    %27 = arith.mulf %3, %3 : vector<176x176xf32>
    %28 = arith.mulf %1, %3 : vector<176x176xf32>
    %29 = tpu.concatenate %1, %3, %26, %27, %28 in 0 : vector<176x176xf32>, vector<176x176xf32>, vector<176x176xf32>, vector<176x176xf32>, vector<176x176xf32> -> vector<880x176xf32>
    %cst_18 = arith.constant dense<0.000000e+00> : vector<880x166xf32>
    %30 = tpu.matmul %29, %25, %cst_18 {dimension_numbers = #tpu.dot_dimension_numbers<[1], [0], [0], [1], [0, 0, 1, 1], [], []>} : vector<880x176xf32>, vector<176x166xf32>, vector<880x166xf32> -> vector<880x166xf32>
    %31 = vector.extract_strided_slice %30 {offsets = [0, 0], sizes = [176, 166], strides = [1, 1]} : vector<880x166xf32> to vector<176x166xf32>
    %cst_19 = arith.constant dense<0.000000e+00> : vector<166x166xf32>
    %32 = tpu.matmul %24, %31, %cst_19 {dimension_numbers = #tpu.dot_dimension_numbers<[1], [0], [0], [1], [0, 0, 1, 1], [], []>} : vector<166x176xf32>, vector<176x166xf32>, vector<166x166xf32> -> vector<166x166xf32>
    %33 = vector.extract_strided_slice %30 {offsets = [176, 0], sizes = [176, 166], strides = [1, 1]} : vector<880x166xf32> to vector<176x166xf32>
    %cst_20 = arith.constant dense<0.000000e+00> : vector<166x166xf32>
    %34 = tpu.matmul %24, %33, %cst_20 {dimension_numbers = #tpu.dot_dimension_numbers<[1], [0], [0], [1], [0, 0, 1, 1], [], []>} : vector<166x176xf32>, vector<176x166xf32>, vector<166x166xf32> -> vector<166x166xf32>
    %35 = vector.extract_strided_slice %30 {offsets = [352, 0], sizes = [176, 166], strides = [1, 1]} : vector<880x166xf32> to vector<176x166xf32>
    %cst_21 = arith.constant dense<0.000000e+00> : vector<166x166xf32>
    %36 = tpu.matmul %24, %35, %cst_21 {dimension_numbers = #tpu.dot_dimension_numbers<[1], [0], [0], [1], [0, 0, 1, 1], [], []>} : vector<166x176xf32>, vector<176x166xf32>, vector<166x166xf32> -> vector<166x166xf32>
    %37 = vector.extract_strided_slice %30 {offsets = [528, 0], sizes = [176, 166], strides = [1, 1]} : vector<880x166xf32> to vector<176x166xf32>
    %cst_22 = arith.constant dense<0.000000e+00> : vector<166x166xf32>
    %38 = tpu.matmul %24, %37, %cst_22 {dimension_numbers = #tpu.dot_dimension_numbers<[1], [0], [0], [1], [0, 0, 1, 1], [], []>} : vector<166x176xf32>, vector<176x166xf32>, vector<166x166xf32> -> vector<166x166xf32>
    %39 = vector.extract_strided_slice %30 {offsets = [704, 0], sizes = [176, 166], strides = [1, 1]} : vector<880x166xf32> to vector<176x166xf32>
    %cst_23 = arith.constant dense<0.000000e+00> : vector<166x166xf32>
    %40 = tpu.matmul %24, %39, %cst_23 {dimension_numbers = #tpu.dot_dimension_numbers<[1], [0], [0], [1], [0, 0, 1, 1], [], []>} : vector<166x176xf32>, vector<176x166xf32>, vector<166x166xf32> -> vector<166x166xf32>
    %41 = arith.mulf %32, %32 : vector<166x166xf32>
    %42 = arith.mulf %34, %34 : vector<166x166xf32>
    %43 = arith.mulf %32, %34 : vector<166x166xf32>
    %44 = arith.subf %36, %41 : vector<166x166xf32>
    %45 = arith.subf %38, %42 : vector<166x166xf32>
    %46 = arith.subf %40, %43 : vector<166x166xf32>
    %cst_24 = arith.constant 2.000000e+00 : f32
    %47 = vector.broadcast %cst_24 : f32 to vector<166x166xf32>
    %48 = arith.mulf %47, %46 : vector<166x166xf32>
    %cst_25 = arith.constant 8.99999984E-4 : f32
    %49 = vector.broadcast %cst_25 : f32 to vector<166x166xf32>
    %50 = arith.addf %48, %49 : vector<166x166xf32>
    %51 = arith.addf %44, %45 : vector<166x166xf32>
    %cst_26 = arith.constant 8.99999984E-4 : f32
    %52 = vector.broadcast %cst_26 : f32 to vector<166x166xf32>
    %53 = arith.addf %51, %52 : vector<166x166xf32>
    %54 = arith.divf %50, %53 : vector<166x166xf32>
    %cst_27 = arith.constant 2.000000e+00 : f32
    %55 = vector.broadcast %cst_27 : f32 to vector<166x166xf32>
    %56 = arith.mulf %55, %43 : vector<166x166xf32>
    %cst_28 = arith.constant 9.99999974E-5 : f32
    %57 = vector.broadcast %cst_28 : f32 to vector<166x166xf32>
    %58 = arith.addf %56, %57 : vector<166x166xf32>
    %59 = arith.addf %41, %42 : vector<166x166xf32>
    %cst_29 = arith.constant 9.99999974E-5 : f32
    %60 = vector.broadcast %cst_29 : f32 to vector<166x166xf32>
    %61 = arith.addf %59, %60 : vector<166x166xf32>
    %62 = arith.divf %58, %61 : vector<166x166xf32>
    %63 = arith.mulf %62, %54 : vector<166x166xf32>
    %64 = vector.shape_cast %63 : vector<166x166xf32> to vector<1x166x166xf32>
    %cst_30 = arith.constant dense<0.000000e+00> : vector<1xf32>
    %65 = vector.multi_reduction <add>, %64, %cst_30 [1, 2] : vector<1x166x166xf32> to vector<1xf32>
    %66 = vector.shape_cast %65 : vector<1xf32> to vector<1x1x1xf32>
    %67 = vector.extract %66[0, 0, 0] : f32 from vector<1x1x1xf32>
    %68 = vector.broadcast %67 : f32 to vector<1x1xf32>
    %cst_31 = arith.constant 2.755600e+04 : f32
    %69 = vector.broadcast %cst_31 : f32 to vector<1x1xf32>
    %70 = arith.divf %68, %69 : vector<1x1xf32>
    %71 = vector.shape_cast %70 : vector<1x1xf32> to vector<1x1xf32>
    %72 = vector.broadcast %71 : vector<1x1xf32> to vector<1x128xf32>
    %73 = vector.shape_cast %54 : vector<166x166xf32> to vector<1x166x166xf32>
    %cst_32 = arith.constant dense<0.000000e+00> : vector<1xf32>
    %74 = vector.multi_reduction <add>, %73, %cst_32 [1, 2] : vector<1x166x166xf32> to vector<1xf32>
    %75 = vector.shape_cast %74 : vector<1xf32> to vector<1x1x1xf32>
    %76 = vector.extract %75[0, 0, 0] : f32 from vector<1x1x1xf32>
    %77 = vector.broadcast %76 : f32 to vector<1x1xf32>
    %cst_33 = arith.constant 2.755600e+04 : f32
    %78 = vector.broadcast %cst_33 : f32 to vector<1x1xf32>
    %79 = arith.divf %77, %78 : vector<1x1xf32>
    %80 = vector.shape_cast %79 : vector<1x1xf32> to vector<1x1xf32>
    %81 = vector.broadcast %80 : vector<1x1xf32> to vector<1x128xf32>
    %c0_34 = arith.constant 0 : index
    %c0_35 = arith.constant 0 : index
    %82 = vector.load %arg14[%c0_34, %c0_35] : memref<88x176xf32, #tpu.memory_space<vmem>>, vector<88x176xf32>
    %c0_36 = arith.constant 0 : index
    %c0_37 = arith.constant 0 : index
    %83 = vector.load %arg15[%c0_36, %c0_37] : memref<176x88xf32, #tpu.memory_space<vmem>>, vector<176x88xf32>
    %84 = tpu.concatenate %1, %3 in 0 : vector<176x176xf32>, vector<176x176xf32> -> vector<352x176xf32>
    %cst_38 = arith.constant dense<0.000000e+00> : vector<352x88xf32>
    %85 = tpu.matmul %84, %83, %cst_38 {dimension_numbers = #tpu.dot_dimension_numbers<[1], [0], [0], [1], [0, 0, 1, 1], [], []>} : vector<352x176xf32>, vector<176x88xf32>, vector<352x88xf32> -> vector<352x88xf32>
    %86 = vector.extract_strided_slice %85 {offsets = [0, 0], sizes = [176, 88], strides = [1, 1]} : vector<352x88xf32> to vector<176x88xf32>
    %cst_39 = arith.constant dense<0.000000e+00> : vector<88x88xf32>
    %87 = tpu.matmul %82, %86, %cst_39 {dimension_numbers = #tpu.dot_dimension_numbers<[1], [0], [0], [1], [0, 0, 1, 1], [], []>} : vector<88x176xf32>, vector<176x88xf32>, vector<88x88xf32> -> vector<88x88xf32>
    %88 = vector.extract_strided_slice %85 {offsets = [176, 0], sizes = [176, 88], strides = [1, 1]} : vector<352x88xf32> to vector<176x88xf32>
    %cst_40 = arith.constant dense<0.000000e+00> : vector<88x88xf32>
    %89 = tpu.matmul %82, %88, %cst_40 {dimension_numbers = #tpu.dot_dimension_numbers<[1], [0], [0], [1], [0, 0, 1, 1], [], []>} : vector<88x176xf32>, vector<176x88xf32>, vector<88x88xf32> -> vector<88x88xf32>
    %c0_41 = arith.constant 0 : index
    %c0_42 = arith.constant 0 : index
    %90 = vector.load %arg6[%c0_41, %c0_42] : memref<78x88xf32, #tpu.memory_space<vmem>>, vector<78x88xf32>
    %c0_43 = arith.constant 0 : index
    %c0_44 = arith.constant 0 : index
    %91 = vector.load %arg7[%c0_43, %c0_44] : memref<88x78xf32, #tpu.memory_space<vmem>>, vector<88x78xf32>
    %92 = arith.mulf %87, %87 : vector<88x88xf32>
    %93 = arith.mulf %89, %89 : vector<88x88xf32>
    %94 = arith.mulf %87, %89 : vector<88x88xf32>
    %95 = tpu.concatenate %87, %89, %92, %93, %94 in 0 : vector<88x88xf32>, vector<88x88xf32>, vector<88x88xf32>, vector<88x88xf32>, vector<88x88xf32> -> vector<440x88xf32>
    %cst_45 = arith.constant dense<0.000000e+00> : vector<440x78xf32>
    %96 = tpu.matmul %95, %91, %cst_45 {dimension_numbers = #tpu.dot_dimension_numbers<[1], [0], [0], [1], [0, 0, 1, 1], [], []>} : vector<440x88xf32>, vector<88x78xf32>, vector<440x78xf32> -> vector<440x78xf32>
    %97 = vector.extract_strided_slice %96 {offsets = [0, 0], sizes = [88, 78], strides = [1, 1]} : vector<440x78xf32> to vector<88x78xf32>
    %cst_46 = arith.constant dense<0.000000e+00> : vector<78x78xf32>
    %98 = tpu.matmul %90, %97, %cst_46 {dimension_numbers = #tpu.dot_dimension_numbers<[1], [0], [0], [1], [0, 0, 1, 1], [], []>} : vector<78x88xf32>, vector<88x78xf32>, vector<78x78xf32> -> vector<78x78xf32>
    %99 = vector.extract_strided_slice %96 {offsets = [88, 0], sizes = [88, 78], strides = [1, 1]} : vector<440x78xf32> to vector<88x78xf32>
    %cst_47 = arith.constant dense<0.000000e+00> : vector<78x78xf32>
    %100 = tpu.matmul %90, %99, %cst_47 {dimension_numbers = #tpu.dot_dimension_numbers<[1], [0], [0], [1], [0, 0, 1, 1], [], []>} : vector<78x88xf32>, vector<88x78xf32>, vector<78x78xf32> -> vector<78x78xf32>
    %101 = vector.extract_strided_slice %96 {offsets = [176, 0], sizes = [88, 78], strides = [1, 1]} : vector<440x78xf32> to vector<88x78xf32>
    %cst_48 = arith.constant dense<0.000000e+00> : vector<78x78xf32>
    %102 = tpu.matmul %90, %101, %cst_48 {dimension_numbers = #tpu.dot_dimension_numbers<[1], [0], [0], [1], [0, 0, 1, 1], [], []>} : vector<78x88xf32>, vector<88x78xf32>, vector<78x78xf32> -> vector<78x78xf32>
    %103 = vector.extract_strided_slice %96 {offsets = [264, 0], sizes = [88, 78], strides = [1, 1]} : vector<440x78xf32> to vector<88x78xf32>
    %cst_49 = arith.constant dense<0.000000e+00> : vector<78x78xf32>
    %104 = tpu.matmul %90, %103, %cst_49 {dimension_numbers = #tpu.dot_dimension_numbers<[1], [0], [0], [1], [0, 0, 1, 1], [], []>} : vector<78x88xf32>, vector<88x78xf32>, vector<78x78xf32> -> vector<78x78xf32>
    %105 = vector.extract_strided_slice %96 {offsets = [352, 0], sizes = [88, 78], strides = [1, 1]} : vector<440x78xf32> to vector<88x78xf32>
    %cst_50 = arith.constant dense<0.000000e+00> : vector<78x78xf32>
    %106 = tpu.matmul %90, %105, %cst_50 {dimension_numbers = #tpu.dot_dimension_numbers<[1], [0], [0], [1], [0, 0, 1, 1], [], []>} : vector<78x88xf32>, vector<88x78xf32>, vector<78x78xf32> -> vector<78x78xf32>
    %107 = arith.mulf %98, %98 : vector<78x78xf32>
    %108 = arith.mulf %100, %100 : vector<78x78xf32>
    %109 = arith.mulf %98, %100 : vector<78x78xf32>
    %110 = arith.subf %102, %107 : vector<78x78xf32>
    %111 = arith.subf %104, %108 : vector<78x78xf32>
    %112 = arith.subf %106, %109 : vector<78x78xf32>
    %cst_51 = arith.constant 2.000000e+00 : f32
    %113 = vector.broadcast %cst_51 : f32 to vector<78x78xf32>
    %114 = arith.mulf %113, %112 : vector<78x78xf32>
    %cst_52 = arith.constant 8.99999984E-4 : f32
    %115 = vector.broadcast %cst_52 : f32 to vector<78x78xf32>
    %116 = arith.addf %114, %115 : vector<78x78xf32>
    %117 = arith.addf %110, %111 : vector<78x78xf32>
    %cst_53 = arith.constant 8.99999984E-4 : f32
    %118 = vector.broadcast %cst_53 : f32 to vector<78x78xf32>
    %119 = arith.addf %117, %118 : vector<78x78xf32>
    %120 = arith.divf %116, %119 : vector<78x78xf32>
    %cst_54 = arith.constant 2.000000e+00 : f32
    %121 = vector.broadcast %cst_54 : f32 to vector<78x78xf32>
    %122 = arith.mulf %121, %109 : vector<78x78xf32>
    %cst_55 = arith.constant 9.99999974E-5 : f32
    %123 = vector.broadcast %cst_55 : f32 to vector<78x78xf32>
    %124 = arith.addf %122, %123 : vector<78x78xf32>
    %125 = arith.addf %107, %108 : vector<78x78xf32>
    %cst_56 = arith.constant 9.99999974E-5 : f32
    %126 = vector.broadcast %cst_56 : f32 to vector<78x78xf32>
    %127 = arith.addf %125, %126 : vector<78x78xf32>
    %128 = arith.divf %124, %127 : vector<78x78xf32>
    %129 = arith.mulf %128, %120 : vector<78x78xf32>
    %130 = vector.shape_cast %129 : vector<78x78xf32> to vector<1x78x78xf32>
    %cst_57 = arith.constant dense<0.000000e+00> : vector<1xf32>
    %131 = vector.multi_reduction <add>, %130, %cst_57 [1, 2] : vector<1x78x78xf32> to vector<1xf32>
    %132 = vector.shape_cast %131 : vector<1xf32> to vector<1x1x1xf32>
    %133 = vector.extract %132[0, 0, 0] : f32 from vector<1x1x1xf32>
    %134 = vector.broadcast %133 : f32 to vector<1x1xf32>
    %cst_58 = arith.constant 6.084000e+03 : f32
    %135 = vector.broadcast %cst_58 : f32 to vector<1x1xf32>
    %136 = arith.divf %134, %135 : vector<1x1xf32>
    %137 = vector.shape_cast %136 : vector<1x1xf32> to vector<1x1xf32>
    %138 = vector.broadcast %137 : vector<1x1xf32> to vector<1x128xf32>
    %139 = vector.shape_cast %120 : vector<78x78xf32> to vector<1x78x78xf32>
    %cst_59 = arith.constant dense<0.000000e+00> : vector<1xf32>
    %140 = vector.multi_reduction <add>, %139, %cst_59 [1, 2] : vector<1x78x78xf32> to vector<1xf32>
    %141 = vector.shape_cast %140 : vector<1xf32> to vector<1x1x1xf32>
    %142 = vector.extract %141[0, 0, 0] : f32 from vector<1x1x1xf32>
    %143 = vector.broadcast %142 : f32 to vector<1x1xf32>
    %cst_60 = arith.constant 6.084000e+03 : f32
    %144 = vector.broadcast %cst_60 : f32 to vector<1x1xf32>
    %145 = arith.divf %143, %144 : vector<1x1xf32>
    %146 = vector.shape_cast %145 : vector<1x1xf32> to vector<1x1xf32>
    %147 = vector.broadcast %146 : vector<1x1xf32> to vector<1x128xf32>
    %c0_61 = arith.constant 0 : index
    %c0_62 = arith.constant 0 : index
    %148 = vector.load %arg16[%c0_61, %c0_62] : memref<44x88xf32, #tpu.memory_space<vmem>>, vector<44x88xf32>
    %c0_63 = arith.constant 0 : index
    %c0_64 = arith.constant 0 : index
    %149 = vector.load %arg17[%c0_63, %c0_64] : memref<88x44xf32, #tpu.memory_space<vmem>>, vector<88x44xf32>
    %150 = tpu.concatenate %87, %89 in 0 : vector<88x88xf32>, vector<88x88xf32> -> vector<176x88xf32>
    %cst_65 = arith.constant dense<0.000000e+00> : vector<176x44xf32>
    %151 = tpu.matmul %150, %149, %cst_65 {dimension_numbers = #tpu.dot_dimension_numbers<[1], [0], [0], [1], [0, 0, 1, 1], [], []>} : vector<176x88xf32>, vector<88x44xf32>, vector<176x44xf32> -> vector<176x44xf32>
    %152 = vector.extract_strided_slice %151 {offsets = [0, 0], sizes = [88, 44], strides = [1, 1]} : vector<176x44xf32> to vector<88x44xf32>
    %cst_66 = arith.constant dense<0.000000e+00> : vector<44x44xf32>
    %153 = tpu.matmul %148, %152, %cst_66 {dimension_numbers = #tpu.dot_dimension_numbers<[1], [0], [0], [1], [0, 0, 1, 1], [], []>} : vector<44x88xf32>, vector<88x44xf32>, vector<44x44xf32> -> vector<44x44xf32>
    %154 = vector.extract_strided_slice %151 {offsets = [88, 0], sizes = [88, 44], strides = [1, 1]} : vector<176x44xf32> to vector<88x44xf32>
    %cst_67 = arith.constant dense<0.000000e+00> : vector<44x44xf32>
    %155 = tpu.matmul %148, %154, %cst_67 {dimension_numbers = #tpu.dot_dimension_numbers<[1], [0], [0], [1], [0, 0, 1, 1], [], []>} : vector<44x88xf32>, vector<88x44xf32>, vector<44x44xf32> -> vector<44x44xf32>
    %c0_68 = arith.constant 0 : index
    %c0_69 = arith.constant 0 : index
    %156 = vector.load %arg8[%c0_68, %c0_69] : memref<34x44xf32, #tpu.memory_space<vmem>>, vector<34x44xf32>
    %c0_70 = arith.constant 0 : index
    %c0_71 = arith.constant 0 : index
    %157 = vector.load %arg9[%c0_70, %c0_71] : memref<44x34xf32, #tpu.memory_space<vmem>>, vector<44x34xf32>
    %158 = arith.mulf %153, %153 : vector<44x44xf32>
    %159 = arith.mulf %155, %155 : vector<44x44xf32>
    %160 = arith.mulf %153, %155 : vector<44x44xf32>
    %161 = tpu.concatenate %153, %155, %158, %159, %160 in 0 : vector<44x44xf32>, vector<44x44xf32>, vector<44x44xf32>, vector<44x44xf32>, vector<44x44xf32> -> vector<220x44xf32>
    %cst_72 = arith.constant dense<0.000000e+00> : vector<220x34xf32>
    %162 = tpu.matmul %161, %157, %cst_72 {dimension_numbers = #tpu.dot_dimension_numbers<[1], [0], [0], [1], [0, 0, 1, 1], [], []>} : vector<220x44xf32>, vector<44x34xf32>, vector<220x34xf32> -> vector<220x34xf32>
    %163 = vector.extract_strided_slice %162 {offsets = [0, 0], sizes = [44, 34], strides = [1, 1]} : vector<220x34xf32> to vector<44x34xf32>
    %cst_73 = arith.constant dense<0.000000e+00> : vector<34x34xf32>
    %164 = tpu.matmul %156, %163, %cst_73 {dimension_numbers = #tpu.dot_dimension_numbers<[1], [0], [0], [1], [0, 0, 1, 1], [], []>} : vector<34x44xf32>, vector<44x34xf32>, vector<34x34xf32> -> vector<34x34xf32>
    %165 = vector.extract_strided_slice %162 {offsets = [44, 0], sizes = [44, 34], strides = [1, 1]} : vector<220x34xf32> to vector<44x34xf32>
    %cst_74 = arith.constant dense<0.000000e+00> : vector<34x34xf32>
    %166 = tpu.matmul %156, %165, %cst_74 {dimension_numbers = #tpu.dot_dimension_numbers<[1], [0], [0], [1], [0, 0, 1, 1], [], []>} : vector<34x44xf32>, vector<44x34xf32>, vector<34x34xf32> -> vector<34x34xf32>
    %167 = vector.extract_strided_slice %162 {offsets = [88, 0], sizes = [44, 34], strides = [1, 1]} : vector<220x34xf32> to vector<44x34xf32>
    %cst_75 = arith.constant dense<0.000000e+00> : vector<34x34xf32>
    %168 = tpu.matmul %156, %167, %cst_75 {dimension_numbers = #tpu.dot_dimension_numbers<[1], [0], [0], [1], [0, 0, 1, 1], [], []>} : vector<34x44xf32>, vector<44x34xf32>, vector<34x34xf32> -> vector<34x34xf32>
    %169 = vector.extract_strided_slice %162 {offsets = [132, 0], sizes = [44, 34], strides = [1, 1]} : vector<220x34xf32> to vector<44x34xf32>
    %cst_76 = arith.constant dense<0.000000e+00> : vector<34x34xf32>
    %170 = tpu.matmul %156, %169, %cst_76 {dimension_numbers = #tpu.dot_dimension_numbers<[1], [0], [0], [1], [0, 0, 1, 1], [], []>} : vector<34x44xf32>, vector<44x34xf32>, vector<34x34xf32> -> vector<34x34xf32>
    %171 = vector.extract_strided_slice %162 {offsets = [176, 0], sizes = [44, 34], strides = [1, 1]} : vector<220x34xf32> to vector<44x34xf32>
    %cst_77 = arith.constant dense<0.000000e+00> : vector<34x34xf32>
    %172 = tpu.matmul %156, %171, %cst_77 {dimension_numbers = #tpu.dot_dimension_numbers<[1], [0], [0], [1], [0, 0, 1, 1], [], []>} : vector<34x44xf32>, vector<44x34xf32>, vector<34x34xf32> -> vector<34x34xf32>
    %173 = arith.mulf %164, %164 : vector<34x34xf32>
    %174 = arith.mulf %166, %166 : vector<34x34xf32>
    %175 = arith.mulf %164, %166 : vector<34x34xf32>
    %176 = arith.subf %168, %173 : vector<34x34xf32>
    %177 = arith.subf %170, %174 : vector<34x34xf32>
    %178 = arith.subf %172, %175 : vector<34x34xf32>
    %cst_78 = arith.constant 2.000000e+00 : f32
    %179 = vector.broadcast %cst_78 : f32 to vector<34x34xf32>
    %180 = arith.mulf %179, %178 : vector<34x34xf32>
    %cst_79 = arith.constant 8.99999984E-4 : f32
    %181 = vector.broadcast %cst_79 : f32 to vector<34x34xf32>
    %182 = arith.addf %180, %181 : vector<34x34xf32>
    %183 = arith.addf %176, %177 : vector<34x34xf32>
    %cst_80 = arith.constant 8.99999984E-4 : f32
    %184 = vector.broadcast %cst_80 : f32 to vector<34x34xf32>
    %185 = arith.addf %183, %184 : vector<34x34xf32>
    %186 = arith.divf %182, %185 : vector<34x34xf32>
    %cst_81 = arith.constant 2.000000e+00 : f32
    %187 = vector.broadcast %cst_81 : f32 to vector<34x34xf32>
    %188 = arith.mulf %187, %175 : vector<34x34xf32>
    %cst_82 = arith.constant 9.99999974E-5 : f32
    %189 = vector.broadcast %cst_82 : f32 to vector<34x34xf32>
    %190 = arith.addf %188, %189 : vector<34x34xf32>
    %191 = arith.addf %173, %174 : vector<34x34xf32>
    %cst_83 = arith.constant 9.99999974E-5 : f32
    %192 = vector.broadcast %cst_83 : f32 to vector<34x34xf32>
    %193 = arith.addf %191, %192 : vector<34x34xf32>
    %194 = arith.divf %190, %193 : vector<34x34xf32>
    %195 = arith.mulf %194, %186 : vector<34x34xf32>
    %196 = vector.shape_cast %195 : vector<34x34xf32> to vector<1x34x34xf32>
    %cst_84 = arith.constant dense<0.000000e+00> : vector<1xf32>
    %197 = vector.multi_reduction <add>, %196, %cst_84 [1, 2] : vector<1x34x34xf32> to vector<1xf32>
    %198 = vector.shape_cast %197 : vector<1xf32> to vector<1x1x1xf32>
    %199 = vector.extract %198[0, 0, 0] : f32 from vector<1x1x1xf32>
    %200 = vector.broadcast %199 : f32 to vector<1x1xf32>
    %cst_85 = arith.constant 1.156000e+03 : f32
    %201 = vector.broadcast %cst_85 : f32 to vector<1x1xf32>
    %202 = arith.divf %200, %201 : vector<1x1xf32>
    %203 = vector.shape_cast %202 : vector<1x1xf32> to vector<1x1xf32>
    %204 = vector.broadcast %203 : vector<1x1xf32> to vector<1x128xf32>
    %205 = vector.shape_cast %186 : vector<34x34xf32> to vector<1x34x34xf32>
    %cst_86 = arith.constant dense<0.000000e+00> : vector<1xf32>
    %206 = vector.multi_reduction <add>, %205, %cst_86 [1, 2] : vector<1x34x34xf32> to vector<1xf32>
    %207 = vector.shape_cast %206 : vector<1xf32> to vector<1x1x1xf32>
    %208 = vector.extract %207[0, 0, 0] : f32 from vector<1x1x1xf32>
    %209 = vector.broadcast %208 : f32 to vector<1x1xf32>
    %cst_87 = arith.constant 1.156000e+03 : f32
    %210 = vector.broadcast %cst_87 : f32 to vector<1x1xf32>
    %211 = arith.divf %209, %210 : vector<1x1xf32>
    %212 = vector.shape_cast %211 : vector<1x1xf32> to vector<1x1xf32>
    %213 = vector.broadcast %212 : vector<1x1xf32> to vector<1x128xf32>
    %c0_88 = arith.constant 0 : index
    %c0_89 = arith.constant 0 : index
    %214 = vector.load %arg18[%c0_88, %c0_89] : memref<22x44xf32, #tpu.memory_space<vmem>>, vector<22x44xf32>
    %c0_90 = arith.constant 0 : index
    %c0_91 = arith.constant 0 : index
    %215 = vector.load %arg19[%c0_90, %c0_91] : memref<44x22xf32, #tpu.memory_space<vmem>>, vector<44x22xf32>
    %216 = tpu.concatenate %153, %155 in 0 : vector<44x44xf32>, vector<44x44xf32> -> vector<88x44xf32>
    %cst_92 = arith.constant dense<0.000000e+00> : vector<88x22xf32>
    %217 = tpu.matmul %216, %215, %cst_92 {dimension_numbers = #tpu.dot_dimension_numbers<[1], [0], [0], [1], [0, 0, 1, 1], [], []>} : vector<88x44xf32>, vector<44x22xf32>, vector<88x22xf32> -> vector<88x22xf32>
    %218 = vector.extract_strided_slice %217 {offsets = [0, 0], sizes = [44, 22], strides = [1, 1]} : vector<88x22xf32> to vector<44x22xf32>
    %cst_93 = arith.constant dense<0.000000e+00> : vector<22x22xf32>
    %219 = tpu.matmul %214, %218, %cst_93 {dimension_numbers = #tpu.dot_dimension_numbers<[1], [0], [0], [1], [0, 0, 1, 1], [], []>} : vector<22x44xf32>, vector<44x22xf32>, vector<22x22xf32> -> vector<22x22xf32>
    %220 = vector.extract_strided_slice %217 {offsets = [44, 0], sizes = [44, 22], strides = [1, 1]} : vector<88x22xf32> to vector<44x22xf32>
    %cst_94 = arith.constant dense<0.000000e+00> : vector<22x22xf32>
    %221 = tpu.matmul %214, %220, %cst_94 {dimension_numbers = #tpu.dot_dimension_numbers<[1], [0], [0], [1], [0, 0, 1, 1], [], []>} : vector<22x44xf32>, vector<44x22xf32>, vector<22x22xf32> -> vector<22x22xf32>
    %c0_95 = arith.constant 0 : index
    %c0_96 = arith.constant 0 : index
    %222 = vector.load %arg10[%c0_95, %c0_96] : memref<12x22xf32, #tpu.memory_space<vmem>>, vector<12x22xf32>
    %c0_97 = arith.constant 0 : index
    %c0_98 = arith.constant 0 : index
    %223 = vector.load %arg11[%c0_97, %c0_98] : memref<22x12xf32, #tpu.memory_space<vmem>>, vector<22x12xf32>
    %224 = arith.mulf %219, %219 : vector<22x22xf32>
    %225 = arith.mulf %221, %221 : vector<22x22xf32>
    %226 = arith.mulf %219, %221 : vector<22x22xf32>
    %227 = tpu.concatenate %219, %221, %224, %225, %226 in 0 : vector<22x22xf32>, vector<22x22xf32>, vector<22x22xf32>, vector<22x22xf32>, vector<22x22xf32> -> vector<110x22xf32>
    %cst_99 = arith.constant dense<0.000000e+00> : vector<110x12xf32>
    %228 = tpu.matmul %227, %223, %cst_99 {dimension_numbers = #tpu.dot_dimension_numbers<[1], [0], [0], [1], [0, 0, 1, 1], [], []>} : vector<110x22xf32>, vector<22x12xf32>, vector<110x12xf32> -> vector<110x12xf32>
    %229 = vector.extract_strided_slice %228 {offsets = [0, 0], sizes = [22, 12], strides = [1, 1]} : vector<110x12xf32> to vector<22x12xf32>
    %cst_100 = arith.constant dense<0.000000e+00> : vector<12x12xf32>
    %230 = tpu.matmul %222, %229, %cst_100 {dimension_numbers = #tpu.dot_dimension_numbers<[1], [0], [0], [1], [0, 0, 1, 1], [], []>} : vector<12x22xf32>, vector<22x12xf32>, vector<12x12xf32> -> vector<12x12xf32>
    %231 = vector.extract_strided_slice %228 {offsets = [22, 0], sizes = [22, 12], strides = [1, 1]} : vector<110x12xf32> to vector<22x12xf32>
    %cst_101 = arith.constant dense<0.000000e+00> : vector<12x12xf32>
    %232 = tpu.matmul %222, %231, %cst_101 {dimension_numbers = #tpu.dot_dimension_numbers<[1], [0], [0], [1], [0, 0, 1, 1], [], []>} : vector<12x22xf32>, vector<22x12xf32>, vector<12x12xf32> -> vector<12x12xf32>
    %233 = vector.extract_strided_slice %228 {offsets = [44, 0], sizes = [22, 12], strides = [1, 1]} : vector<110x12xf32> to vector<22x12xf32>
    %cst_102 = arith.constant dense<0.000000e+00> : vector<12x12xf32>
    %234 = tpu.matmul %222, %233, %cst_102 {dimension_numbers = #tpu.dot_dimension_numbers<[1], [0], [0], [1], [0, 0, 1, 1], [], []>} : vector<12x22xf32>, vector<22x12xf32>, vector<12x12xf32> -> vector<12x12xf32>
    %235 = vector.extract_strided_slice %228 {offsets = [66, 0], sizes = [22, 12], strides = [1, 1]} : vector<110x12xf32> to vector<22x12xf32>
    %cst_103 = arith.constant dense<0.000000e+00> : vector<12x12xf32>
    %236 = tpu.matmul %222, %235, %cst_103 {dimension_numbers = #tpu.dot_dimension_numbers<[1], [0], [0], [1], [0, 0, 1, 1], [], []>} : vector<12x22xf32>, vector<22x12xf32>, vector<12x12xf32> -> vector<12x12xf32>
    %237 = vector.extract_strided_slice %228 {offsets = [88, 0], sizes = [22, 12], strides = [1, 1]} : vector<110x12xf32> to vector<22x12xf32>
    %cst_104 = arith.constant dense<0.000000e+00> : vector<12x12xf32>
    %238 = tpu.matmul %222, %237, %cst_104 {dimension_numbers = #tpu.dot_dimension_numbers<[1], [0], [0], [1], [0, 0, 1, 1], [], []>} : vector<12x22xf32>, vector<22x12xf32>, vector<12x12xf32> -> vector<12x12xf32>
    %239 = arith.mulf %230, %230 : vector<12x12xf32>
    %240 = arith.mulf %232, %232 : vector<12x12xf32>
    %241 = arith.mulf %230, %232 : vector<12x12xf32>
    %242 = arith.subf %234, %239 : vector<12x12xf32>
    %243 = arith.subf %236, %240 : vector<12x12xf32>
    %244 = arith.subf %238, %241 : vector<12x12xf32>
    %cst_105 = arith.constant 2.000000e+00 : f32
    %245 = vector.broadcast %cst_105 : f32 to vector<12x12xf32>
    %246 = arith.mulf %245, %244 : vector<12x12xf32>
    %cst_106 = arith.constant 8.99999984E-4 : f32
    %247 = vector.broadcast %cst_106 : f32 to vector<12x12xf32>
    %248 = arith.addf %246, %247 : vector<12x12xf32>
    %249 = arith.addf %242, %243 : vector<12x12xf32>
    %cst_107 = arith.constant 8.99999984E-4 : f32
    %250 = vector.broadcast %cst_107 : f32 to vector<12x12xf32>
    %251 = arith.addf %249, %250 : vector<12x12xf32>
    %252 = arith.divf %248, %251 : vector<12x12xf32>
    %cst_108 = arith.constant 2.000000e+00 : f32
    %253 = vector.broadcast %cst_108 : f32 to vector<12x12xf32>
    %254 = arith.mulf %253, %241 : vector<12x12xf32>
    %cst_109 = arith.constant 9.99999974E-5 : f32
    %255 = vector.broadcast %cst_109 : f32 to vector<12x12xf32>
    %256 = arith.addf %254, %255 : vector<12x12xf32>
    %257 = arith.addf %239, %240 : vector<12x12xf32>
    %cst_110 = arith.constant 9.99999974E-5 : f32
    %258 = vector.broadcast %cst_110 : f32 to vector<12x12xf32>
    %259 = arith.addf %257, %258 : vector<12x12xf32>
    %260 = arith.divf %256, %259 : vector<12x12xf32>
    %261 = arith.mulf %260, %252 : vector<12x12xf32>
    %262 = vector.shape_cast %261 : vector<12x12xf32> to vector<1x12x12xf32>
    %cst_111 = arith.constant dense<0.000000e+00> : vector<1xf32>
    %263 = vector.multi_reduction <add>, %262, %cst_111 [1, 2] : vector<1x12x12xf32> to vector<1xf32>
    %264 = vector.shape_cast %263 : vector<1xf32> to vector<1x1x1xf32>
    %265 = vector.extract %264[0, 0, 0] : f32 from vector<1x1x1xf32>
    %266 = vector.broadcast %265 : f32 to vector<1x1xf32>
    %cst_112 = arith.constant 1.440000e+02 : f32
    %267 = vector.broadcast %cst_112 : f32 to vector<1x1xf32>
    %268 = arith.divf %266, %267 : vector<1x1xf32>
    %269 = vector.shape_cast %268 : vector<1x1xf32> to vector<1x1xf32>
    %270 = vector.broadcast %269 : vector<1x1xf32> to vector<1x128xf32>
    %271 = vector.shape_cast %252 : vector<12x12xf32> to vector<1x12x12xf32>
    %cst_113 = arith.constant dense<0.000000e+00> : vector<1xf32>
    %272 = vector.multi_reduction <add>, %271, %cst_113 [1, 2] : vector<1x12x12xf32> to vector<1xf32>
    %273 = vector.shape_cast %272 : vector<1xf32> to vector<1x1x1xf32>
    %274 = vector.extract %273[0, 0, 0] : f32 from vector<1x1x1xf32>
    %275 = vector.broadcast %274 : f32 to vector<1x1xf32>
    %cst_114 = arith.constant 1.440000e+02 : f32
    %276 = vector.broadcast %cst_114 : f32 to vector<1x1xf32>
    %277 = arith.divf %275, %276 : vector<1x1xf32>
    %278 = vector.shape_cast %277 : vector<1x1xf32> to vector<1x1xf32>
    %279 = vector.broadcast %278 : vector<1x1xf32> to vector<1x128xf32>
    %c0_115 = arith.constant 0 : index
    %c0_116 = arith.constant 0 : index
    %280 = vector.load %arg20[%c0_115, %c0_116] : memref<11x22xf32, #tpu.memory_space<vmem>>, vector<11x22xf32>
    %c0_117 = arith.constant 0 : index
    %c0_118 = arith.constant 0 : index
    %281 = vector.load %arg21[%c0_117, %c0_118] : memref<22x11xf32, #tpu.memory_space<vmem>>, vector<22x11xf32>
    %282 = tpu.concatenate %219, %221 in 0 : vector<22x22xf32>, vector<22x22xf32> -> vector<44x22xf32>
    %cst_119 = arith.constant dense<0.000000e+00> : vector<44x11xf32>
    %283 = tpu.matmul %282, %281, %cst_119 {dimension_numbers = #tpu.dot_dimension_numbers<[1], [0], [0], [1], [0, 0, 1, 1], [], []>} : vector<44x22xf32>, vector<22x11xf32>, vector<44x11xf32> -> vector<44x11xf32>
    %284 = vector.extract_strided_slice %283 {offsets = [0, 0], sizes = [22, 11], strides = [1, 1]} : vector<44x11xf32> to vector<22x11xf32>
    %cst_120 = arith.constant dense<0.000000e+00> : vector<11x11xf32>
    %285 = tpu.matmul %280, %284, %cst_120 {dimension_numbers = #tpu.dot_dimension_numbers<[1], [0], [0], [1], [0, 0, 1, 1], [], []>} : vector<11x22xf32>, vector<22x11xf32>, vector<11x11xf32> -> vector<11x11xf32>
    %286 = vector.extract_strided_slice %283 {offsets = [22, 0], sizes = [22, 11], strides = [1, 1]} : vector<44x11xf32> to vector<22x11xf32>
    %cst_121 = arith.constant dense<0.000000e+00> : vector<11x11xf32>
    %287 = tpu.matmul %280, %286, %cst_121 {dimension_numbers = #tpu.dot_dimension_numbers<[1], [0], [0], [1], [0, 0, 1, 1], [], []>} : vector<11x22xf32>, vector<22x11xf32>, vector<11x11xf32> -> vector<11x11xf32>
    %c0_122 = arith.constant 0 : index
    %c0_123 = arith.constant 0 : index
    %288 = vector.load %arg12[%c0_122, %c0_123] : memref<1x11xf32, #tpu.memory_space<vmem>>, vector<1x11xf32>
    %c0_124 = arith.constant 0 : index
    %c0_125 = arith.constant 0 : index
    %289 = vector.load %arg13[%c0_124, %c0_125] : memref<11x1xf32, #tpu.memory_space<vmem>>, vector<11x1xf32>
    %290 = arith.mulf %285, %285 : vector<11x11xf32>
    %291 = arith.mulf %287, %287 : vector<11x11xf32>
    %292 = arith.mulf %285, %287 : vector<11x11xf32>
    %293 = tpu.concatenate %285, %287, %290, %291, %292 in 0 : vector<11x11xf32>, vector<11x11xf32>, vector<11x11xf32>, vector<11x11xf32>, vector<11x11xf32> -> vector<55x11xf32>
    %cst_126 = arith.constant dense<0.000000e+00> : vector<55x1xf32>
    %294 = tpu.matmul %293, %289, %cst_126 {dimension_numbers = #tpu.dot_dimension_numbers<[1], [0], [0], [1], [0, 0, 1, 1], [], []>} : vector<55x11xf32>, vector<11x1xf32>, vector<55x1xf32> -> vector<55x1xf32>
    %295 = vector.extract_strided_slice %294 {offsets = [0, 0], sizes = [11, 1], strides = [1, 1]} : vector<55x1xf32> to vector<11x1xf32>
    %cst_127 = arith.constant dense<0.000000e+00> : vector<1x1xf32>
    %296 = tpu.matmul %288, %295, %cst_127 {dimension_numbers = #tpu.dot_dimension_numbers<[1], [0], [0], [1], [0, 0, 1, 1], [], []>} : vector<1x11xf32>, vector<11x1xf32>, vector<1x1xf32> -> vector<1x1xf32>
    %297 = vector.extract_strided_slice %294 {offsets = [11, 0], sizes = [11, 1], strides = [1, 1]} : vector<55x1xf32> to vector<11x1xf32>
    %cst_128 = arith.constant dense<0.000000e+00> : vector<1x1xf32>
    %298 = tpu.matmul %288, %297, %cst_128 {dimension_numbers = #tpu.dot_dimension_numbers<[1], [0], [0], [1], [0, 0, 1, 1], [], []>} : vector<1x11xf32>, vector<11x1xf32>, vector<1x1xf32> -> vector<1x1xf32>
    %299 = vector.extract_strided_slice %294 {offsets = [22, 0], sizes = [11, 1], strides = [1, 1]} : vector<55x1xf32> to vector<11x1xf32>
    %cst_129 = arith.constant dense<0.000000e+00> : vector<1x1xf32>
    %300 = tpu.matmul %288, %299, %cst_129 {dimension_numbers = #tpu.dot_dimension_numbers<[1], [0], [0], [1], [0, 0, 1, 1], [], []>} : vector<1x11xf32>, vector<11x1xf32>, vector<1x1xf32> -> vector<1x1xf32>
    %301 = vector.extract_strided_slice %294 {offsets = [33, 0], sizes = [11, 1], strides = [1, 1]} : vector<55x1xf32> to vector<11x1xf32>
    %cst_130 = arith.constant dense<0.000000e+00> : vector<1x1xf32>
    %302 = tpu.matmul %288, %301, %cst_130 {dimension_numbers = #tpu.dot_dimension_numbers<[1], [0], [0], [1], [0, 0, 1, 1], [], []>} : vector<1x11xf32>, vector<11x1xf32>, vector<1x1xf32> -> vector<1x1xf32>
    %303 = vector.extract_strided_slice %294 {offsets = [44, 0], sizes = [11, 1], strides = [1, 1]} : vector<55x1xf32> to vector<11x1xf32>
    %cst_131 = arith.constant dense<0.000000e+00> : vector<1x1xf32>
    %304 = tpu.matmul %288, %303, %cst_131 {dimension_numbers = #tpu.dot_dimension_numbers<[1], [0], [0], [1], [0, 0, 1, 1], [], []>} : vector<1x11xf32>, vector<11x1xf32>, vector<1x1xf32> -> vector<1x1xf32>
    %305 = arith.mulf %296, %296 : vector<1x1xf32>
    %306 = arith.mulf %298, %298 : vector<1x1xf32>
    %307 = arith.mulf %296, %298 : vector<1x1xf32>
    %308 = arith.subf %300, %305 : vector<1x1xf32>
    %309 = arith.subf %302, %306 : vector<1x1xf32>
    %310 = arith.subf %304, %307 : vector<1x1xf32>
    %cst_132 = arith.constant 2.000000e+00 : f32
    %311 = vector.broadcast %cst_132 : f32 to vector<1x1xf32>
    %312 = arith.mulf %311, %310 : vector<1x1xf32>
    %cst_133 = arith.constant 8.99999984E-4 : f32
    %313 = vector.broadcast %cst_133 : f32 to vector<1x1xf32>
    %314 = arith.addf %312, %313 : vector<1x1xf32>
    %315 = arith.addf %308, %309 : vector<1x1xf32>
    %cst_134 = arith.constant 8.99999984E-4 : f32
    %316 = vector.broadcast %cst_134 : f32 to vector<1x1xf32>
    %317 = arith.addf %315, %316 : vector<1x1xf32>
    %318 = arith.divf %314, %317 : vector<1x1xf32>
    %cst_135 = arith.constant 2.000000e+00 : f32
    %319 = vector.broadcast %cst_135 : f32 to vector<1x1xf32>
    %320 = arith.mulf %319, %307 : vector<1x1xf32>
    %cst_136 = arith.constant 9.99999974E-5 : f32
    %321 = vector.broadcast %cst_136 : f32 to vector<1x1xf32>
    %322 = arith.addf %320, %321 : vector<1x1xf32>
    %323 = arith.addf %305, %306 : vector<1x1xf32>
    %cst_137 = arith.constant 9.99999974E-5 : f32
    %324 = vector.broadcast %cst_137 : f32 to vector<1x1xf32>
    %325 = arith.addf %323, %324 : vector<1x1xf32>
    %326 = arith.divf %322, %325 : vector<1x1xf32>
    %327 = arith.mulf %326, %318 : vector<1x1xf32>
    %328 = vector.shape_cast %327 : vector<1x1xf32> to vector<1x1x1xf32>
    %cst_138 = arith.constant dense<0.000000e+00> : vector<1xf32>
    %329 = vector.multi_reduction <add>, %328, %cst_138 [1, 2] : vector<1x1x1xf32> to vector<1xf32>
    %330 = vector.shape_cast %329 : vector<1xf32> to vector<1x1x1xf32>
    %331 = vector.extract %330[0, 0, 0] : f32 from vector<1x1x1xf32>
    %332 = vector.broadcast %331 : f32 to vector<1x1xf32>
    %cst_139 = arith.constant 1.000000e+00 : f32
    %333 = vector.broadcast %cst_139 : f32 to vector<1x1xf32>
    %334 = arith.divf %332, %333 : vector<1x1xf32>
    %335 = vector.shape_cast %334 : vector<1x1xf32> to vector<1x1xf32>
    %336 = vector.broadcast %335 : vector<1x1xf32> to vector<1x128xf32>
    %337 = vector.shape_cast %318 : vector<1x1xf32> to vector<1x1x1xf32>
    %cst_140 = arith.constant dense<0.000000e+00> : vector<1xf32>
    %338 = vector.multi_reduction <add>, %337, %cst_140 [1, 2] : vector<1x1x1xf32> to vector<1xf32>
    %339 = vector.shape_cast %338 : vector<1xf32> to vector<1x1x1xf32>
    %340 = vector.extract %339[0, 0, 0] : f32 from vector<1x1x1xf32>
    %341 = vector.broadcast %340 : f32 to vector<1x1xf32>
    %cst_141 = arith.constant 1.000000e+00 : f32
    %342 = vector.broadcast %cst_141 : f32 to vector<1x1xf32>
    %343 = arith.divf %341, %342 : vector<1x1xf32>
    %344 = vector.shape_cast %343 : vector<1x1xf32> to vector<1x1xf32>
    %345 = vector.broadcast %344 : vector<1x1xf32> to vector<1x128xf32>
    %346 = tpu.concatenate %72, %138, %204, %270, %336 in 0 : vector<1x128xf32>, vector<1x128xf32>, vector<1x128xf32>, vector<1x128xf32>, vector<1x128xf32> -> vector<5x128xf32>
    %c0_142 = arith.constant 0 : index
    %c0_143 = arith.constant 0 : index
    %c0_144 = arith.constant 0 : index
    %c0_145 = arith.constant 0 : index
    %347 = vector.load %arg22[%c0_142, %c0_143, %c0_144, %c0_145] : memref<1x1x5x128xf32, #tpu.memory_space<vmem>>, vector<1x1x5x128xf32>
    %348 = vector.shape_cast %347 : vector<1x1x5x128xf32> to vector<5x128xf32>
    %349 = vector.shape_cast %346 : vector<5x128xf32> to vector<1x1x5x128xf32>
    tpu.vector_store %arg22[%c0_142, %c0_143, %c0_144, %c0_145], %349 {strides = array<i32>} : memref<1x1x5x128xf32, #tpu.memory_space<vmem>>, vector<1x1x5x128xf32>,
    %350 = tpu.concatenate %81, %147, %213, %279, %345 in 0 : vector<1x128xf32>, vector<1x128xf32>, vector<1x128xf32>, vector<1x128xf32>, vector<1x128xf32> -> vector<5x128xf32>
    %c0_146 = arith.constant 0 : index
    %c0_147 = arith.constant 0 : index
    %c0_148 = arith.constant 0 : index
    %c0_149 = arith.constant 0 : index
    %351 = vector.load %arg23[%c0_146, %c0_147, %c0_148, %c0_149] : memref<1x1x5x128xf32, #tpu.memory_space<vmem>>, vector<1x1x5x128xf32>
    %352 = vector.shape_cast %351 : vector<1x1x5x128xf32> to vector<5x128xf32>
    %353 = vector.shape_cast %350 : vector<5x128xf32> to vector<1x1x5x128xf32>
    tpu.vector_store %arg23[%c0_146, %c0_147, %c0_148, %c0_149], %353 {strides = array<i32>} : memref<1x1x5x128xf32, #tpu.memory_space<vmem>>, vector<1x1x5x128xf32>,
    return
  }
  func.func @transform_0(%arg0: i32, %arg1: i32) -> (i32, i32, i32, i32) {
    %c0_i32 = arith.constant 0 : i32
    %c0_i32_0 = arith.constant 0 : i32
    %c0_i32_1 = arith.constant 0 : i32
    return %arg0, %arg1, %c0_i32, %c0_i32_0 : i32, i32, i32, i32
  }
  func.func @transform_1(%arg0: i32, %arg1: i32) -> (i32, i32, i32, i32) {
    %c0_i32 = arith.constant 0 : i32
    %c0_i32_0 = arith.constant 0 : i32
    %c0_i32_1 = arith.constant 0 : i32
    return %arg0, %arg1, %c0_i32, %c0_i32_0 : i32, i32, i32, i32
  }
  func.func @transform_2(%arg0: i32, %arg1: i32) -> (i32, i32) {
    %c0_i32 = arith.constant 0 : i32
    %c0_i32_0 = arith.constant 0 : i32
    %c0_i32_1 = arith.constant 0 : i32
    return %c0_i32, %c0_i32_0 : i32, i32
  }
  func.func @transform_3(%arg0: i32, %arg1: i32) -> (i32, i32) {
    %c0_i32 = arith.constant 0 : i32
    %c0_i32_0 = arith.constant 0 : i32
    %c0_i32_1 = arith.constant 0 : i32
    return %c0_i32, %c0_i32_0 : i32, i32
  }
  func.func @transform_4(%arg0: i32, %arg1: i32) -> (i32, i32) {
    %c0_i32 = arith.constant 0 : i32
    %c0_i32_0 = arith.constant 0 : i32
    %c0_i32_1 = arith.constant 0 : i32
    return %c0_i32, %c0_i32_0 : i32, i32
  }
  func.func @transform_5(%arg0: i32, %arg1: i32) -> (i32, i32) {
    %c0_i32 = arith.constant 0 : i32
    %c0_i32_0 = arith.constant 0 : i32
    %c0_i32_1 = arith.constant 0 : i32
    return %c0_i32, %c0_i32_0 : i32, i32
  }
  func.func @transform_6(%arg0: i32, %arg1: i32) -> (i32, i32) {
    %c0_i32 = arith.constant 0 : i32
    %c0_i32_0 = arith.constant 0 : i32
    %c0_i32_1 = arith.constant 0 : i32
    return %c0_i32, %c0_i32_0 : i32, i32
  }
  func.func @transform_7(%arg0: i32, %arg1: i32) -> (i32, i32) {
    %c0_i32 = arith.constant 0 : i32
    %c0_i32_0 = arith.constant 0 : i32
    %c0_i32_1 = arith.constant 0 : i32
    return %c0_i32, %c0_i32_0 : i32, i32
  }
  func.func @transform_8(%arg0: i32, %arg1: i32) -> (i32, i32) {
    %c0_i32 = arith.constant 0 : i32
    %c0_i32_0 = arith.constant 0 : i32
    %c0_i32_1 = arith.constant 0 : i32
    return %c0_i32, %c0_i32_0 : i32, i32
  }
  func.func @transform_9(%arg0: i32, %arg1: i32) -> (i32, i32) {
    %c0_i32 = arith.constant 0 : i32
    %c0_i32_0 = arith.constant 0 : i32
    %c0_i32_1 = arith.constant 0 : i32
    return %c0_i32, %c0_i32_0 : i32, i32
  }
  func.func @transform_10(%arg0: i32, %arg1: i32) -> (i32, i32) {
    %c0_i32 = arith.constant 0 : i32
    %c0_i32_0 = arith.constant 0 : i32
    %c0_i32_1 = arith.constant 0 : i32
    return %c0_i32, %c0_i32_0 : i32, i32
  }
  func.func @transform_11(%arg0: i32, %arg1: i32) -> (i32, i32) {
    %c0_i32 = arith.constant 0 : i32
    %c0_i32_0 = arith.constant 0 : i32
    %c0_i32_1 = arith.constant 0 : i32
    return %c0_i32, %c0_i32_0 : i32, i32
  }
  func.func @transform_12(%arg0: i32, %arg1: i32) -> (i32, i32) {
    %c0_i32 = arith.constant 0 : i32
    %c0_i32_0 = arith.constant 0 : i32
    %c0_i32_1 = arith.constant 0 : i32
    return %c0_i32, %c0_i32_0 : i32, i32
  }
  func.func @transform_13(%arg0: i32, %arg1: i32) -> (i32, i32) {
    %c0_i32 = arith.constant 0 : i32
    %c0_i32_0 = arith.constant 0 : i32
    %c0_i32_1 = arith.constant 0 : i32
    return %c0_i32, %c0_i32_0 : i32, i32
  }
  func.func @transform_14(%arg0: i32, %arg1: i32) -> (i32, i32) {
    %c0_i32 = arith.constant 0 : i32
    %c0_i32_0 = arith.constant 0 : i32
    %c0_i32_1 = arith.constant 0 : i32
    return %c0_i32, %c0_i32_0 : i32, i32
  }
  func.func @transform_15(%arg0: i32, %arg1: i32) -> (i32, i32) {
    %c0_i32 = arith.constant 0 : i32
    %c0_i32_0 = arith.constant 0 : i32
    %c0_i32_1 = arith.constant 0 : i32
    return %c0_i32, %c0_i32_0 : i32, i32
  }
  func.func @transform_16(%arg0: i32, %arg1: i32) -> (i32, i32) {
    %c0_i32 = arith.constant 0 : i32
    %c0_i32_0 = arith.constant 0 : i32
    %c0_i32_1 = arith.constant 0 : i32
    return %c0_i32, %c0_i32_0 : i32, i32
  }
  func.func @transform_17(%arg0: i32, %arg1: i32) -> (i32, i32) {
    %c0_i32 = arith.constant 0 : i32
    %c0_i32_0 = arith.constant 0 : i32
    %c0_i32_1 = arith.constant 0 : i32
    return %c0_i32, %c0_i32_0 : i32, i32
  }
  func.func @transform_18(%arg0: i32, %arg1: i32) -> (i32, i32) {
    %c0_i32 = arith.constant 0 : i32
    %c0_i32_0 = arith.constant 0 : i32
    %c0_i32_1 = arith.constant 0 : i32
    return %c0_i32, %c0_i32_0 : i32, i32
  }
  func.func @transform_19(%arg0: i32, %arg1: i32) -> (i32, i32) {
    %c0_i32 = arith.constant 0 : i32
    %c0_i32_0 = arith.constant 0 : i32
    %c0_i32_1 = arith.constant 0 : i32
    return %c0_i32, %c0_i32_0 : i32, i32
  }
  func.func @transform_20(%arg0: i32, %arg1: i32) -> (i32, i32, i32, i32) {
    %c0_i32 = arith.constant 0 : i32
    %c0_i32_0 = arith.constant 0 : i32
    %c0_i32_1 = arith.constant 0 : i32
    return %arg0, %arg1, %c0_i32, %c0_i32_0 : i32, i32, i32, i32
  }
  func.func @transform_21(%arg0: i32, %arg1: i32) -> (i32, i32, i32, i32) {
    %c0_i32 = arith.constant 0 : i32
    %c0_i32_0 = arith.constant 0 : i32
    %c0_i32_1 = arith.constant 0 : i32
    return %arg0, %arg1, %c0_i32, %c0_i32_0 : i32, i32, i32, i32
  }
  func.func @transform_22(%arg0: i32, %arg1: i32) -> (i32, i32, i32, i32) {
    %c0_i32 = arith.constant 0 : i32
    %c0_i32_0 = arith.constant 0 : i32
    %c0_i32_1 = arith.constant 0 : i32
    return %arg0, %arg1, %c0_i32, %c0_i32_0 : i32, i32, i32, i32
  }
}

</mosaic_0001>

<bundles_post_ra>
// kernel: sl1_ssim_loss.1
= control target key start
LH: loop header
LB: loop body
LE: loop exit
PB: predicated region body
PF: predicated region fallthrough
CT: control target
= control target key end

     0   :  { %s20174_s0 = inlined_call_operand.hbm [shape: f32[2,13,176,176], index: 0, kind: input, shape index: {}]   ;;  %s20175_s1 = inlined_call_operand.hbm [shape: f32[2,13,176,176], index: 1, kind: input, shape index: {}]   ;;  %s20176_s2 = inlined_call_operand.hbm [shape: f32[166,176], index: 2, kind: input, shape index: {}]   ;;  %s20177_s3 = inlined_call_operand.hbm [shape: f32[176,166], index: 3, kind: input, shape index: {}]   ;;  %s20178_s4 = inlined_call_operand.hbm [shape: f32[78,88], index: 4, kind: input, shape index: {}]   ;;  %s20179_s5 = inlined_call_operand.hbm [shape: f32[88,78], index: 5, kind: input, shape index: {}]   ;;  %s20180_s6 = inlined_call_operand.hbm [shape: f32[34,44], index: 6, kind: input, shape index: {}]   ;;  %s20181_s7 = inlined_call_operand.hbm [shape: f32[44,34], index: 7, kind: input, shape index: {}]   ;;  %s20182_s8 = inlined_call_operand.hbm [shape: f32[12,22], index: 8, kind: input, shape index: {}]   ;;  %s20183_s9 = inlined_call_operand.hbm [shape: f32[22,12], index: 9, kind: input, shape index: {}]   ;;  %s20184_s10 = inlined_call_operand.hbm [shape: f32[1,11], index: 10, kind: input, shape index: {}]   ;;  %s20185_s11 = inlined_call_operand.hbm [shape: f32[11,1], index: 11, kind: input, shape index: {}]   ;;  %s20186_s12 = inlined_call_operand.hbm [shape: f32[88,176], index: 12, kind: input, shape index: {}]   ;;  %s20187_s13 = inlined_call_operand.hbm [shape: f32[176,88], index: 13, kind: input, shape index: {}]   ;;  %s20188_s14 = inlined_call_operand.hbm [shape: f32[44,88], index: 14, kind: input, shape index: {}]   ;;  %s20189_s15 = inlined_call_operand.hbm [shape: f32[88,44], index: 15, kind: input, shape index: {}]   ;;  %s20190_s16 = inlined_call_operand.hbm [shape: f32[22,44], index: 16, kind: input, shape index: {}]   ;;  %s20191_s17 = inlined_call_operand.hbm [shape: f32[44,22], index: 17, kind: input, shape index: {}]   ;;  %s20192_s18 = inlined_call_operand.hbm [shape: f32[11,22], index: 18, kind: input, shape index: {}]   ;;  %s20193_s19 = inlined_call_operand.hbm [shape: f32[22,11], index: 19, kind: input, shape index: {}]   ;;  %s20194_s20 = inlined_call_operand.vmem [shape: f32[2,13,5,128], index: 20, kind: output, shape index: {0}]   ;;  %s20195_s21 = inlined_call_operand.vmem [shape: f32[2,13,5,128], index: 21, kind: output, shape index: {1}]   ;;  %s20196_s22 = inlined_call_operand.vmem [shape: f32[2,13,1,128], index: 22, kind: output, shape index: {2}]  }
   0x1   :  { %20521 = sst [smem:[#allocation230_spill]] %s20174_s0 }
   0x2   :  { %20522 = sst [smem:[#allocation231_spill]] %s20175_s1 }
   0x3   :  { %20523 = sst [smem:[#allocation232_spill]] %s20176_s2 }
   0x4   :  { %20524 = sst [smem:[#allocation233_spill]] %s20177_s3 }
   0x5   :  { %20525 = sst [smem:[#allocation234_spill]] %s20178_s4 }
   0x6   :  { %20526 = sst [smem:[#allocation235_spill]] %s20179_s5 }
   0x7   :  { %20527 = sst [smem:[#allocation236_spill]] %s20180_s6 }
   0x8   :  { %20528 = sst [smem:[#allocation237_spill]] %s20181_s7 }
   0x9   :  { %20529 = sst [smem:[#allocation238_spill]] %s20182_s8 }
   0xa   :  { %20530 = sst [smem:[#allocation239_spill]] %s20183_s9 }
   0xb   :  { %20531 = sst [smem:[#allocation240_spill]] %s20184_s10 }
   0xc   :  { %20532 = sst [smem:[#allocation241_spill]] %s20185_s11 }
   0xd   :  { %20533 = sst [smem:[#allocation242_spill]] %s20186_s12 }
   0xe   :  { %20534 = sst [smem:[#allocation243_spill]] %s20187_s13 }
   0xf   :  { %20535 = sst [smem:[#allocation244_spill]] %s20188_s14 }
  0x10   :  { %20536 = sst [smem:[#allocation245_spill]] %s20189_s15 }
  0x11   :  { %20537 = sst [smem:[#allocation246_spill]] %s20194_s20 }
  0x12   :  { %20538 = sst [smem:[#allocation247_spill]] %s20195_s21 }
  0x13   :  { %20539 = sst [smem:[#allocation248_spill]] %s20196_s22 }
  0x14   :  { %28 = vsyncpa [#allocation3], 0 }
  0x15   :  { %30 = vsyncpa [#allocation3 + $0x1], 0 }
  0x16   :  { %31 = vsyncpa [#allocation5], 0 }
  0x17   :  { %33 = vsyncpa [#allocation5 + $0x1], 0 }
  0x18   :  { %34 = vsyncpa [#allocation8], 0 }
  0x19   :  { %35 = vsyncpa [#allocation11], 0 }
  0x1a   :  { %36 = vsyncpa [#allocation14], 0 }
  0x1b   :  { %37 = vsyncpa [#allocation17], 0 }
  0x1c   :  { %38 = vsyncpa [#allocation20], 0 }
  0x1d   :  { %39 = vsyncpa [#allocation23], 0 }
  0x1e   :  { %40 = vsyncpa [#allocation26], 0 }
  0x1f   :  { %41 = vsyncpa [#allocation29], 0 }
  0x20   :  { %42 = vsyncpa [#allocation32], 0  ;;  %s14121_s3 = smov 0   ;;  %s14123_s28 = smov 0  }
  0x21   :  { %s14125_s29 = smov 0   ;;  %s14127_s30 = smov 0  }
  0x22   :  { %s14129_s4 = smov 0   ;;  %s14131_s0 = smov 0  }
  0x23   :  { %s14133_s23 = smov 0   ;;  %s14135_s1 = smov 0  }
  0x24 LB: > { %20540 = sst [smem:[#allocation45_spill]] %s13950_s3  ;;  %s20197_s5 = sadd.s32 4294967295, %s13978_s1   ;;  %s13978_s1 = sphi %s14135_s1, %s48_s1   ;;  %s13974_s23 = sphi %s14133_s23, %s21564_s23   ;;  %s13970_s0 = sphi %s14131_s0, %s21563_s0   ;;  %s13966_s4 = sphi %s14129_s4, %s21562_s4   ;;  %s13962_s30 = sphi %s14127_s30, %s21561_s30   ;;  %s13958_s29 = sphi %s14125_s29, %s21560_s29   ;;  %s13954_s28 = sphi %s14123_s28, %s21559_s28   ;;  %s13950_s3 = sphi %s14121_s3, %s21558_s3  }
  0x25   : > { %20541 = sst [smem:[#allocation46_spill]] %s13962_s30  ;;  %p10506_p0 = scmp.ge.s32.totalorder %s13978_s1, 1 }
  0x26   : > { %20542 = sst [smem:[#allocation47_spill]] %s13966_s4  ;;  %p14165_p1 = scmp.eq.s32.totalorder %s20197_s5, 0 }
  0x27   : > { %20543 = sst [smem:[#allocation48_spill]] %s13978_s1  ;;  %p583_p2 = scmp.lt.s32.totalorder %s13978_s1, 27 }
  0x28   : > { %s20544_s24 = scalar_select %p14165_p1, 1, 0 }
  0x29   : > { %p14170_p3 = pnand %p10506_p0, %p583_p2  ;;  %s13980_s25 = smov [#allocation6]  }
  0x2a   : > { %20545 = sst [smem:[#allocation49_spill]] %s20544_s24  ;;  %s595_s26 = sshll.u32 %s13980_s25, 4  ;;  %s596_s26 = int_to_ptr.vmem [resolvable:$true] %s595_s26 }
  0x2b   : > { %s20546_s6 = scalar_select %p14170_p3, 1, 0 }
  0x2c   : > { %p12638_p4 = pneg %p14170_p3  ;;  %s13981_s27 = smov [#allocation7]  }
  0x2d   : > { %20547 = sst [smem:[#allocation50_spill]] %s20546_s6  ;;  %s608_s5 = sshll.u32 %s13981_s27, 4  ;;  %s609_s5 = int_to_ptr.vmem [resolvable:$true] %s608_s5 }
  0x2e   : > { %p14178_p5 = pnand %p12638_p4, %p14165_p1  ;;  %s13355_s20 = scalar_lea.vmem %s596_s26, 5376 }
  0x2f   : > { %p13356_p7 = scmp.ne.s32.totalorder %s596_s26, %s13355_s20  ;;  %p13363_p10 = scmp.lt.s32.totalorder %s596_s26, %s596_s26 }
  0x30   : > { %p14184_p6 = pneg %p14178_p5  ;;  %p13364_p11 = scmp.lt.s32.totalorder %s13355_s20, %s13355_s20 }
  0x32   : > { %p13358_p8 = pnand %p13356_p7, %p14184_p6  ;;  %p13365_p12 = por %p13364_p11, %p13363_p10 }
  0x34   : > { %p13359_p9 = pneg %p13358_p8 }
  0x36   : > { %p13366_p13 = pnand %p13365_p12, %p13359_p9 }
  0x38   : > { %13369 = shalt.err (!%p13366_p13)
}
  0x39   : > { %s20205_s25 = smov 256   ;;  %s20210_s27 = smov 16  }
  0x3a   : > { %s20550_s4 = sld [smem:[#allocation232_spill]]  ;;  %s13381_s6 = scalar_lea.vmem %s609_s5, 5632 }
  0x3b   : > { %p13382_p0 = scmp.ne.s32.totalorder %s609_s5, %s13381_s6  ;;  %p13389_p7 = scmp.lt.s32.totalorder %s609_s5, %s609_s5 }
  0x3c   : > { %p13390_p8 = scmp.lt.s32.totalorder %s13381_s6, %s13381_s6 }
  0x3d   : > { %p13384_p2 = pnand %p13382_p0, %p14184_p6 }
  0x3e   : > { %p13391_p9 = por %p13390_p8, %p13389_p7 }
  0x3f   : > { %p13385_p4 = pneg %p13384_p2 }
  0x40   : > { %12641 = dma.hbm_to_vmem [thread:$0]  (!%p14178_p5), %s20550_s4, 5376, %s596_s26, [#allocation5], %s20205_s25, %s20205_s25, %s20210_s27  }
  0x41   : > { %p13392_p10 = pnand %p13391_p9, %p13385_p4 }
  0x43   : > { %13395 = shalt.err (!%p13392_p10)
}
  0x44   : > { %s20551_s3 = sld [smem:[#allocation233_spill]]  ;;  %s13984_s22 = smov [#allocation10]  }
  0x45   : > { %s634_s30 = sshll.u32 %s13984_s22, 4  ;;  %s13985_s4 = smov [#allocation13]   ;;  %s635_s30 = int_to_ptr.vmem [resolvable:$true] %s634_s30 }
  0x46   : > { %s660_s26 = sshll.u32 %s13985_s4, 4  ;;  %s13407_s6 = scalar_lea.vmem %s635_s30, 1408  ;;  %s661_s26 = int_to_ptr.vmem [resolvable:$true] %s660_s26 }
  0x47   : > { %p13408_p11 = scmp.ne.s32.totalorder %s635_s30, %s13407_s6  ;;  %p13415_p0 = scmp.lt.s32.totalorder %s635_s30, %s635_s30 }
  0x48   : > { %p13416_p2 = scmp.lt.s32.totalorder %s13407_s6, %s13407_s6 }
  0x49   : > { %p13410_p12 = pnand %p13408_p11, %p14184_p6 }
  0x4a   : > { %12644 = dma.hbm_to_vmem [thread:$0]  (!%p14178_p5), %s20551_s3, 5632, %s609_s5, [#allocation8], %s20205_s25, %s20205_s25, %s20210_s27  }
  0x4b   : > { %p13411_p13 = pneg %p13410_p12  ;;  %p13417_p4 = por %p13416_p2, %p13415_p0 }
  0x4d   : > { %p13418_p7 = pnand %p13417_p4, %p13411_p13 }
  0x4f   : > { %13421 = shalt.err (!%p13418_p7)
}
  0x50   : > { %s13986_s1 = smov 128   ;;  %s13987_s3 = smov 8  }
  0x51   : > { %s20552_s20 = sld [smem:[#allocation235_spill]]  ;;  %s13433_s22 = scalar_lea.vmem %s661_s26, 768 }
  0x52   : > { %p13434_p8 = scmp.ne.s32.totalorder %s661_s26, %s13433_s22  ;;  %p13441_p11 = scmp.lt.s32.totalorder %s661_s26, %s661_s26 }
  0x53   : > { %p13442_p12 = scmp.lt.s32.totalorder %s13433_s22, %s13433_s22 }
  0x54   : > { %p13436_p9 = pnand %p13434_p8, %p14184_p6 }
  0x55   : > { %p13443_p13 = por %p13442_p12, %p13441_p11 }
  0x56   : > { %p13437_p10 = pneg %p13436_p9 }
  0x57   : > { %12650 = dma.hbm_to_vmem [thread:$0]  (!%p14178_p5), %s20552_s20, 1408, %s635_s30, [#allocation11], %s13986_s1, %s13986_s1, %s13987_s3  }
  0x58   : > { %p13444_p0 = pnand %p13443_p13, %p13437_p10 }
  0x5a   : > { %13447 = shalt.err (!%p13444_p0)
}
  0x5b   : > { %s20553_s7 = sld [smem:[#allocation237_spill]]  ;;  %s13988_s30 = smov [#allocation16]  }
  0x5c   : > { %s686_s5 = sshll.u32 %s13988_s30, 4  ;;  %s13989_s24 = smov [#allocation19]   ;;  %s687_s5 = int_to_ptr.vmem [resolvable:$true] %s686_s5 }
  0x5d   : > { %s710_s20 = sshll.u32 %s13989_s24, 4  ;;  %s13459_s22 = scalar_lea.vmem %s687_s5, 384  ;;  %s711_s20 = int_to_ptr.vmem [resolvable:$true] %s710_s20 }
  0x5e   : > { %p13460_p2 = scmp.ne.s32.totalorder %s687_s5, %s13459_s22  ;;  %p13467_p8 = scmp.lt.s32.totalorder %s687_s5, %s687_s5 }
  0x5f   : > { %p13468_p9 = scmp.lt.s32.totalorder %s13459_s22, %s13459_s22 }
  0x60   : > { %p13462_p4 = pnand %p13460_p2, %p14184_p6 }
  0x61   : > { %12656 = dma.hbm_to_vmem [thread:$0]  (!%p14178_p5), %s20553_s7, 768, %s661_s26, [#allocation14], %s13986_s1, %s13986_s1, %s13987_s3  }
  0x62   : > { %p13463_p7 = pneg %p13462_p4  ;;  %p13469_p10 = por %p13468_p9, %p13467_p8 }
  0x64   : > { %p13470_p11 = pnand %p13469_p10, %p13463_p7 }
  0x66   : > { %13473 = shalt.err (!%p13470_p11)
}
  0x67   : > { %s20554_s9 = sld [smem:[#allocation239_spill]]  ;;  %s13485_s6 = scalar_lea.vmem %s711_s20, 256 }
  0x68   : > { %p13486_p12 = scmp.ne.s32.totalorder %s711_s20, %s13485_s6  ;;  %p13493_p2 = scmp.lt.s32.totalorder %s711_s20, %s711_s20 }
  0x69   : > { %p13494_p4 = scmp.lt.s32.totalorder %s13485_s6, %s13485_s6 }
  0x6a   : > { %p13488_p13 = pnand %p13486_p12, %p14184_p6 }
  0x6b   : > { %p13495_p8 = por %p13494_p4, %p13493_p2 }
  0x6c   : > { %p13489_p0 = pneg %p13488_p13 }
  0x6d   : > { %12662 = dma.hbm_to_vmem [thread:$0]  (!%p14178_p5), %s20554_s9, 384, %s687_s5, [#allocation17], %s13986_s1, %s13986_s1, %s13987_s3  }
  0x6e   : > { %p13496_p7 = pnand %p13495_p8, %p13489_p0 }
  0x70   : > { %13499 = shalt.err (!%p13496_p7)
}
  0x71   : > { %s20555_s11 = sld [smem:[#allocation241_spill]]  ;;  %s13990_s5 = smov [#allocation22]  }
  0x72   : > { %s736_s22 = sshll.u32 %s13990_s5, 4  ;;  %s13991_s26 = smov [#allocation25]   ;;  %s737_s22 = int_to_ptr.vmem [resolvable:$true] %s736_s22 }
  0x73   : > { %s762_s4 = sshll.u32 %s13991_s26, 4  ;;  %s13511_s6 = scalar_lea.vmem %s737_s22, 2816  ;;  %s763_s4 = int_to_ptr.vmem [resolvable:$true] %s762_s4 }
  0x74   : > { %p13512_p9 = scmp.ne.s32.totalorder %s737_s22, %s13511_s6  ;;  %p13519_p12 = scmp.lt.s32.totalorder %s737_s22, %s737_s22 }
  0x75   : > { %p13520_p13 = scmp.lt.s32.totalorder %s13511_s6, %s13511_s6 }
  0x76   : > { %p13514_p10 = pnand %p13512_p9, %p14184_p6 }
  0x77   : > { %12668 = dma.hbm_to_vmem [thread:$0]  (!%p14178_p5), %s20555_s11, 256, %s711_s20, [#allocation20], %s13986_s1, %s13986_s1, %s13987_s3  }
  0x78   : > { %p13515_p11 = pneg %p13514_p10  ;;  %p13521_p0 = por %p13520_p13, %p13519_p12 }
  0x7a   : > { %p13522_p2 = pnand %p13521_p0, %p13515_p11 }
  0x7c   : > { %13525 = shalt.err (!%p13522_p2)
}
  0x7d   : > { %s20556_s13 = sld [smem:[#allocation243_spill]]  ;;  %s13537_s24 = scalar_lea.vmem %s763_s4, 1408 }
  0x7e   : > { %p13538_p4 = scmp.ne.s32.totalorder %s763_s4, %s13537_s24  ;;  %p13545_p9 = scmp.lt.s32.totalorder %s763_s4, %s763_s4 }
  0x7f   : > { %p13546_p10 = scmp.lt.s32.totalorder %s13537_s24, %s13537_s24 }
  0x80   : > { %p13540_p8 = pnand %p13538_p4, %p14184_p6 }
  0x81   : > { %p13547_p12 = por %p13546_p10, %p13545_p9 }
  0x82   : > { %p13541_p7 = pneg %p13540_p8 }
  0x83   : > { %12674 = dma.hbm_to_vmem [thread:$0]  (!%p14178_p5), %s20556_s13, 2816, %s737_s22, [#allocation23], %s13986_s1, %s13986_s1, %s13987_s3  }
  0x84   : > { %p13548_p11 = pnand %p13547_p12, %p13541_p7 }
  0x86   : > { %13551 = shalt.err (!%p13548_p11)
}
  0x87   : > { %s20557_s15 = sld [smem:[#allocation245_spill]]  ;;  %s13992_s22 = smov [#allocation28]  }
  0x88   : > { %s788_s6 = sshll.u32 %s13992_s22, 4  ;;  %s13993_s20 = smov [#allocation9]   ;;  %s789_s6 = int_to_ptr.vmem [resolvable:$true] %s788_s6 }
  0x89   : > { %s621_s30 = sshll.u32 %s13993_s20, 4  ;;  %s13563_s24 = scalar_lea.vmem %s789_s6, 768  ;;  %s622_s30 = int_to_ptr.vmem [resolvable:$true] %s621_s30 }
  0x8a   : > { %p13564_p13 = scmp.ne.s32.totalorder %s789_s6, %s13563_s24  ;;  %p13571_p4 = scmp.lt.s32.totalorder %s789_s6, %s789_s6 }
  0x8b   : > { %p13572_p8 = scmp.lt.s32.totalorder %s13563_s24, %s13563_s24 }
  0x8c   : > { %p13566_p0 = pnand %p13564_p13, %p14184_p6 }
  0x8d   : > { %12680 = dma.hbm_to_vmem [thread:$0]  (!%p14178_p5), %s20557_s15, 1408, %s763_s4, [#allocation26], %s13986_s1, %s13986_s1, %s13987_s3  }
  0x8e   : > { %p13567_p2 = pneg %p13566_p0  ;;  %p13573_p7 = por %p13572_p8, %p13571_p4 }
  0x90   : > { %p13574_p9 = pnand %p13573_p7, %p13567_p2 }
  0x92   : > { %13577 = shalt.err (!%p13574_p9)
}
  0x93   : > { %12686 = dma.hbm_to_vmem [thread:$0]  (!%p14178_p5), %s20191_s17, 768, %s789_s6, [#allocation29], %s13986_s1, %s13986_s1, %s13987_s3  }
  0x94   : > { %s13589_s26 = scalar_lea.vmem %s622_s30, 1280  ;;  %p13597_p13 = scmp.lt.s32.totalorder %s622_s30, %s622_s30 }
  0x95   : > { %p13590_p10 = scmp.ne.s32.totalorder %s622_s30, %s13589_s26  ;;  %p13598_p0 = scmp.lt.s32.totalorder %s13589_s26, %s13589_s26 }
  0x97   : > { %p13592_p12 = pnand %p13590_p10, %p14184_p6  ;;  %p13599_p4 = por %p13598_p0, %p13597_p13 }
  0x99   : > { %p13593_p11 = pneg %p13592_p12 }
  0x9b   : > { %p13600_p2 = pnand %p13599_p4, %p13593_p11 }
  0x9d   : > { %13603 = shalt.err (!%p13600_p2)
}
  0x9e   : > { %s20558_s24 = sld [smem:[#allocation234_spill]]  ;;  %s13994_s6 = smov [#allocation12]  }
  0x9f   : > { %s647_s4 = sshll.u32 %s13994_s6, 4  ;;  %s13995_s5 = smov [#allocation15]   ;;  %s648_s4 = int_to_ptr.vmem [resolvable:$true] %s647_s4 }
  0xa0   : > { %s673_s25 = sshll.u32 %s13995_s5, 4  ;;  %s13615_s26 = scalar_lea.vmem %s648_s4, 640  ;;  %s674_s25 = int_to_ptr.vmem [resolvable:$true] %s673_s25 }
  0xa1   : > { %p13616_p8 = scmp.ne.s32.totalorder %s648_s4, %s13615_s26  ;;  %p13623_p10 = scmp.lt.s32.totalorder %s648_s4, %s648_s4 }
  0xa2   : > { %p13624_p12 = scmp.lt.s32.totalorder %s13615_s26, %s13615_s26 }
  0xa3   : > { %p13618_p7 = pnand %p13616_p8, %p14184_p6 }
  0xa4   : > { %12647 = dma.hbm_to_vmem [thread:$0]  (!%p14178_p5), %s20558_s24, 1280, %s622_s30, [#allocation8], %s13986_s1, %s13986_s1, %s13987_s3  }
  0xa5   : > { %p13619_p9 = pneg %p13618_p7  ;;  %p13625_p11 = por %p13624_p12, %p13623_p10 }
  0xa7   : > { %p13626_p13 = pnand %p13625_p11, %p13619_p9 }
  0xa9   : > { %13629 = shalt.err (!%p13626_p13)
}
  0xaa   : > { %s20559_s20 = sld [smem:[#allocation236_spill]]  ;;  %s13641_s24 = scalar_lea.vmem %s674_s25, 256 }
  0xab   : > { %p13642_p0 = scmp.ne.s32.totalorder %s674_s25, %s13641_s24  ;;  %p13649_p8 = scmp.lt.s32.totalorder %s674_s25, %s674_s25 }
  0xac   : > { %p13650_p7 = scmp.lt.s32.totalorder %s13641_s24, %s13641_s24 }
  0xad   : > { %p13644_p4 = pnand %p13642_p0, %p14184_p6 }
  0xae   : > { %p13651_p10 = por %p13650_p7, %p13649_p8 }
  0xaf   : > { %p13645_p2 = pneg %p13644_p4 }
  0xb0   : > { %12653 = dma.hbm_to_vmem [thread:$0]  (!%p14178_p5), %s20559_s20, 640, %s648_s4, [#allocation11], %s13986_s1, %s13986_s1, %s13987_s3  }
  0xb1   : > { %p13652_p9 = pnand %p13651_p10, %p13645_p2 }
  0xb3   : > { %13655 = shalt.err (!%p13652_p9)
}
  0xb4   : > { %s20560_s8 = sld [smem:[#allocation238_spill]]  ;;  %s13996_s4 = smov [#allocation18]  }
  0xb5   : > { %s700_s26 = sshll.u32 %s13996_s4, 4  ;;  %s13997_s30 = smov [#allocation21]   ;;  %s701_s26 = int_to_ptr.vmem [resolvable:$true] %s700_s26 }
  0xb6   : > { %s723_s22 = sshll.u32 %s13997_s30, 4  ;;  %s13667_s20 = scalar_lea.vmem %s701_s26, 16  ;;  %s724_s22 = int_to_ptr.vmem [resolvable:$true] %s723_s22 }
  0xb7   : > { %p13668_p12 = scmp.ne.s32.totalorder %s701_s26, %s13667_s20  ;;  %s13674_s24 = scalar_lea.vmem %s701_s26, 32 }
  0xb8   : > { %p13675_p0 = scmp.lt.s32.totalorder %s701_s26, %s701_s26  ;;  %p13676_p4 = scmp.lt.s32.totalorder %s13674_s24, %s13667_s20 }
  0xb9   : > { %p13670_p11 = pnand %p13668_p12, %p14184_p6 }
  0xba   : > { %12659 = dma.hbm_to_vmem [thread:$0]  (!%p14178_p5), %s20560_s8, 256, %s674_s25, [#allocation14], %s13986_s1, %s13986_s1, %s13987_s3  }
  0xbb   : > { %p13671_p13 = pneg %p13670_p11  ;;  %p13677_p2 = por %p13676_p4, %p13675_p0 }
  0xbd   : > { %p13678_p8 = pnand %p13677_p2, %p13671_p13 }
  0xbf   : > { %13681 = shalt.err (!%p13678_p8)
}
  0xc0   : > { %s20561_s10 = sld [smem:[#allocation240_spill]]  ;;  %s13693_s5 = scalar_lea.vmem %s724_s22, 2816 }
  0xc1   : > { %p13694_p7 = scmp.ne.s32.totalorder %s724_s22, %s13693_s5  ;;  %p13701_p12 = scmp.lt.s32.totalorder %s724_s22, %s724_s22 }
  0xc2   : > { %p13702_p11 = scmp.lt.s32.totalorder %s13693_s5, %s13693_s5 }
  0xc3   : > { %p13696_p10 = pnand %p13694_p7, %p14184_p6 }
  0xc4   : > { %p13703_p3 = por %p13702_p11, %p13701_p12 }
  0xc5   : > { %p13697_p9 = pneg %p13696_p10 }
  0xc6   : > { %12665 = dma.hbm_to_vmem [thread:$0]  (!%p14178_p5), %s20561_s10, 16, %s701_s26, [#allocation17]  }
  0xc7   : > { %p13704_p1 = pnand %p13703_p3, %p13697_p9 }
  0xc9   : > { %13707 = shalt.err (!%p13704_p1)
}
  0xca   : > { %s20562_s4 = smov 256   ;;  %s20563_s12 = sld [smem:[#allocation242_spill]] }
  0xcb   : > { %s13998_s26 = smov [#allocation24]   ;;  %s13999_s25 = smov [#allocation27]  }
  0xcc   : > { %s749_s24 = sshll.u32 %s13998_s26, 4  ;;  %s775_s6 = sshll.u32 %s13999_s25, 4  ;;  %s750_s24 = int_to_ptr.vmem [resolvable:$true] %s749_s24  ;;  %s776_s6 = int_to_ptr.vmem [resolvable:$true] %s775_s6 }
  0xcd   : > { %s13719_s5 = scalar_lea.vmem %s750_s24, 768  ;;  %p13727_p0 = scmp.lt.s32.totalorder %s750_s24, %s750_s24 }
  0xce   : > { %p13720_p13 = scmp.ne.s32.totalorder %s750_s24, %s13719_s5  ;;  %p13728_p4 = scmp.lt.s32.totalorder %s13719_s5, %s13719_s5 }
  0xd0   : > { %12671 = dma.hbm_to_vmem [thread:$0]  (!%p14178_p5), %s20563_s12, 2816, %s724_s22, [#allocation20], %s20562_s4, %s20562_s4, %s20210_s27  }
  0xd1   : > { %p13722_p1 = pnand %p13720_p13, %p14184_p6  ;;  %p13729_p2 = por %p13728_p4, %p13727_p0 }
  0xd3   : > { %p13723_p3 = pneg %p13722_p1 }
  0xd5   : > { %p13730_p8 = pnand %p13729_p2, %p13723_p3 }
  0xd7   : > { %13733 = shalt.err (!%p13730_p8)
}
  0xd8   : > { %s20564_s14 = sld [smem:[#allocation244_spill]]  ;;  %s13745_s20 = scalar_lea.vmem %s776_s6, 384 }
  0xd9   : > { %p13746_p7 = scmp.ne.s32.totalorder %s776_s6, %s13745_s20  ;;  %p13753_p12 = scmp.lt.s32.totalorder %s776_s6, %s776_s6 }
  0xda   : > { %p13754_p11 = scmp.lt.s32.totalorder %s13745_s20, %s13745_s20 }
  0xdb   : > { %p13748_p10 = pnand %p13746_p7, %p14184_p6 }
  0xdc   : > { %p13755_p13 = por %p13754_p11, %p13753_p12 }
  0xdd   : > { %p13749_p9 = pneg %p13748_p10 }
  0xde   : > { %12677 = dma.hbm_to_vmem [thread:$0]  (!%p14178_p5), %s20564_s14, 768, %s750_s24, [#allocation23], %s13986_s1, %s13986_s1, %s13987_s3  }
  0xdf   : > { %p13756_p1 = pnand %p13755_p13, %p13749_p9 }
  0xe1   : > { %13759 = shalt.err (!%p13756_p1)
}
  0xe2   : > { %12683 = dma.hbm_to_vmem [thread:$0]  (!%p14178_p5), %s20190_s16, 384, %s776_s6, [#allocation26], %s13986_s1, %s13986_s1, %s13987_s3  }
  0xe3   : > { %s14000_s24 = smov [#allocation30]   ;;  %s14001_s22 = smov [#allocation31]  }
  0xe4   : > { %s801_s5 = sshll.u32 %s14000_s24, 4  ;;  %s814_s30 = sshll.u32 %s14001_s22, 4  ;;  %s802_s5 = int_to_ptr.vmem [resolvable:$true] %s801_s5  ;;  %s815_s30 = int_to_ptr.vmem [resolvable:$true] %s814_s30 }
  0xe5   : > { %s13771_s20 = scalar_lea.vmem %s802_s5, 256  ;;  %p13779_p2 = scmp.lt.s32.totalorder %s802_s5, %s802_s5 }
  0xe6   : > { %p13772_p3 = scmp.ne.s32.totalorder %s802_s5, %s13771_s20  ;;  %p13780_p8 = scmp.lt.s32.totalorder %s13771_s20, %s13771_s20 }
  0xe8   : > { %p13774_p0 = pnand %p13772_p3, %p14184_p6  ;;  %p13781_p7 = por %p13780_p8, %p13779_p2 }
  0xea   : > { %p13775_p4 = pneg %p13774_p0 }
  0xec   : > { %p13782_p10 = pnand %p13781_p7, %p13775_p4 }
  0xee   : > { %13785 = shalt.err (!%p13782_p10)
}
  0xef   : > { %12689 = dma.hbm_to_vmem [thread:$0]  (!%p14178_p5), %s20192_s18, 256, %s802_s5, [#allocation29], %s13986_s1, %s13986_s1, %s13987_s3  }
  0xf0   : > { %s13797_s25 = scalar_lea.vmem %s815_s30, 384  ;;  %p13805_p13 = scmp.lt.s32.totalorder %s815_s30, %s815_s30 }
  0xf1   : > { %p13798_p9 = scmp.ne.s32.totalorder %s815_s30, %s13797_s25  ;;  %p13806_p1 = scmp.lt.s32.totalorder %s13797_s25, %s13797_s25 }
  0xf3   : > { %p13800_p12 = pnand %p13798_p9, %p14184_p6  ;;  %p13807_p3 = por %p13806_p1, %p13805_p13 }
  0xf5   : > { %p13801_p11 = pneg %p13800_p12 }
  0xf7   : > { %p13808_p0 = pnand %p13807_p3, %p13801_p11 }
  0xf9   : > { %13811 = shalt.err (!%p13808_p0)
}
  0xfa   : > { %s20565_s21 = sld [smem:[#allocation48_spill]]  ;;  %s57_s20 = sadd.s32 1, %s13970_s0 }
  0xfb   : > { %s20566_s5 = sld [smem:[#allocation45_spill]]  ;;  %s60_s6 = sadd.s32 1, %s13974_s23 }
  0xfc   : > { %12692 = dma.hbm_to_vmem [thread:$0]  (!%p14178_p5), %s20193_s19, 384, %s815_s30, [#allocation32], %s13986_s1, %s13986_s1, %s13987_s3  }
  0xfd   : > { %s20567_s2 = sld [smem:[#allocation49_spill]]  ;;  %p58_p6 = scmp.ge.s32.totalorder %s57_s20, 13 }
  0xfe   : > { %s69_s26 = sadd.s32 1, %s13958_s29  ;;  %p76_p4 = scmp.ne.s32.totalorder %s13958_s29, %s13954_s28 }
  0xff   : > { %s21566_s20 = smov (%p58_p6, %s57_s20), 0  ;;  %s21568_s6 = smov (!%p58_p6, %s60_s6), %s13974_s23 }
 0x100   : > { %p77_p2 = scmp.eq.s32.totalorder %s20565_s21, 0  ;;  %s65_s25 = ssub.s32 %s13970_s0, %s21566_s20 }
 0x101   : > { %p62_p5 = scmp.ge.s32.totalorder %s21568_s6, 2  ;;  %p82_p7 = scmp.ne.s32.totalorder %s13954_s28, %s20566_s5 }
 0x102   : > { %p14376_p8 = por %p77_p2, %p76_p4  ;;  %p12718_p10 = scmp.lt.s32.totalorder %s20565_s21, 26 }
 0x103   : > { %s828_s1 = sand.u32 1, %s13958_s29   ;;  %s21570_s6 = smov (%p62_p5, %s21568_s6), 0 }
 0x104   : > { %p20569_p9 = scmp.ne.s32.totalorder %s20567_s2, 0  ;;  %s64_s30 = ssub.s32 %s13974_s23, %s21570_s6 }
 0x105   : > { %s14394_s22 = smul.u32 352, %s828_s1  ;;  %s66_s27 = sor.u32 %s65_s25, %s64_s30 }
 0x106   : > { %p14388_p12 = por %p20569_p9, %p82_p7  ;;  %s12533_s7 = smul.u32 44, %s13970_s0 }
 0x107   : > { %p67_p11 = scmp.eq.s32.totalorder %s66_s27, 0  ;;  %s12534_s5 = smul.u32 572, %s13974_s23 }
 0x108   : > { %s832_s8 = scalar_lea.vmem [#allocation2], %s14394_s22  ;;  %p14406_p13 = pnand %p12718_p10, %p14376_p8 }
 0x109   : > { %s841_s9 = sshll.u32 %s832_s8, 4  ;;  %s838_s11 = sadd.s32 %s12534_s5, %s12533_s7  ;;  %s842_s9 = int_to_ptr.vmem [resolvable:$true] %s841_s9 }
 0x10a   : > { %s14400_s10 = scalar_select %p67_p11, %s13958_s29, %s69_s26  }
 0x10b   : > { %s10526_s2 = sshll.u32 %s838_s11, 7  ;;  %s20572_s15 = sld [smem:[#allocation230_spill]] }
 0x10c   : > { %s20573_s8 = sld [smem:[#allocation231_spill]]  ;;  %s851_s7 = sand.u32 1, %s20565_s21  }
 0x10d   : > { %s829_s5 = scalar_lea.sflag [#allocation3], %s828_s1  ;;  %p13814_p1 = pneg %p14406_p13 }
 0x10e   : > { %s13825_s11 = scalar_lea.vmem %s842_s9, 5632  ;;  %s14002_s24 = smov [#allocation2]  }
 0x10f   : > { %p13826_p3 = scmp.ne.s32.totalorder %s842_s9, %s13825_s11  ;;  %s13830_s13 = sshll.u32 %s14002_s24, 4  ;;  %s13831_s13 = int_to_ptr.vmem [resolvable:$false] %s13830_s13 }
 0x110   : > { %s13832_s14 = scalar_lea.vmem %s13831_s13, 11264  ;;  %p13833_p4 = scmp.lt.s32.totalorder %s842_s9, %s13831_s13 }
 0x111   : > { %s840_s27 = scalar_lea.hbm %s20572_s15, %s10526_s2  ;;  %p13828_p0 = pnand %p13826_p3, %p13814_p1 }
 0x112   : > { %s14416_s26 = scalar_lea.hbm %s20573_s8, %s10526_s2  ;;  %p13834_p2 = scmp.lt.s32.totalorder %s13832_s14, %s13825_s11 }
 0x113   : > { %p13829_p6 = pneg %p13828_p0 }
 0x114   : > { %p13835_p8 = por %p13834_p2, %p13833_p4 }
 0x116   : > { %p13836_p5 = pnand %p13835_p8, %p13829_p6 }
 0x118   : > { %13839 = shalt.err (!%p13836_p5)
}
 0x119   : > { %s20574_s15 = smov 16   ;;  %s855_s21 = scalar_lea.vmem [#allocation4], %s14394_s22 }
 0x11a   : > { %12696 = dma.hbm_to_vmem [thread:$0]  (!%p14406_p13), %s840_s27, 5632, %s842_s9, %s829_s5, %s20562_s4, %s20562_s4, %s20574_s15  }
 0x11b   : > { %s864_s1 = sshll.u32 %s855_s21, 4  ;;  %s852_s2 = scalar_lea.sflag [#allocation5], %s851_s7  ;;  %s865_s1 = int_to_ptr.vmem [resolvable:$true] %s864_s1 }
 0x11c   : > { %s13853_s25 = scalar_lea.vmem %s865_s1, 5632  ;;  %s14003_s30 = smov [#allocation4]  }
 0x11d   : > { %p13854_p7 = scmp.ne.s32.totalorder %s865_s1, %s13853_s25  ;;  %s13858_s8 = sshll.u32 %s14003_s30, 4  ;;  %s13859_s8 = int_to_ptr.vmem [resolvable:$false] %s13858_s8 }
 0x11e   : > { %s13860_s11 = scalar_lea.vmem %s13859_s8, 11264  ;;  %p13861_p11 = scmp.lt.s32.totalorder %s865_s1, %s13859_s8 }
 0x11f   : > { %p13856_p10 = pnand %p13854_p7, %p13814_p1  ;;  %p13862_p3 = scmp.lt.s32.totalorder %s13860_s11, %s13853_s25 }
 0x121   : > { %p13857_p9 = pneg %p13856_p10  ;;  %p13863_p0 = por %p13862_p3, %p13861_p11 }
 0x123   : > { %p13864_p6 = pnand %p13863_p0, %p13857_p9 }
 0x125   : > { %13867 = shalt.err (!%p13864_p6)
}
 0x126   : > { %12699 = dma.hbm_to_vmem [thread:$0]  (!%p14406_p13), %s14416_s26, 5632, %s865_s1, %s852_s2, %s20562_s4, %s20562_s4, %s20574_s15  }
 0x127   : > { %s20575_s9 = sld [smem:[#allocation50_spill]] }
 0x12d   : > { %p20576_p4 = scmp.ne.s32.totalorder %s20575_s9, 0 }
 0x12f   : > { %876 = sbr.rel (%p20576_p4) target bundleno = 4415 (0x113f), region = 100 }
 0x134   : > { %s878_s22 = sand.u32 1, %s13954_s28  }
 0x135   : > { %s12538_s27 = smul.u32 352, %s878_s22  ;;  %s879_s7 = scalar_lea.sflag [#allocation3], %s878_s22 }
 0x137   : > { %s14442_s5 = scalar_lea.vmem [#allocation2], %s12538_s27 }
 0x138   : > { %13901 = dma.done.wait (%p14388_p12), %s879_s7, 5632  }
 0x139   : > { %13903 = vsyncadd (%p14388_p12), %s879_s7, 4294961664  ;;  %s20577_s12 = sld [smem:[#allocation48_spill]]  ;;  %s14450_s26 = scalar_lea.vmem [#allocation4], %s12538_s27 }
 0x13f   : > { %s20578_s24 = sadd.s32 4294967295, %s20577_s12  }
 0x140   : > { %s887_s13 = sand.u32 1, %s20578_s24  }
 0x141   : > { %s888_s4 = scalar_lea.sflag [#allocation5], %s887_s13 }
 0x142   : > { %13905 = dma.done.wait (%p14388_p12), %s888_s4, 5632  }
 0x143   : > { %13907 = vsyncadd (%p14388_p12), %s888_s4, 4294961664  ;;  %s20579_s14 = sld [smem:[#allocation49_spill]] }
 0x149   : > { %p20580_p13 = scmp.ne.s32.totalorder %s20579_s14, 0 }
 0x14b   : > { %13909 = dma.done.wait (%p20580_p13), [#allocation5], 5376  }
 0x14c   : > { %13911 = vsyncadd (%p20580_p13), [#allocation5], 4294961920 }
 0x14d   : > { %13913 = dma.done.wait (%p20580_p13), [#allocation8], 6912  }
 0x14e   : > { %13915 = vsyncadd (%p20580_p13), [#allocation8], 4294960384 }
 0x14f   : > { %13917 = dma.done.wait (%p20580_p13), [#allocation11], 2048  }
 0x150   : > { %13919 = vsyncadd (%p20580_p13), [#allocation11], 4294965248 }
 0x151   : > { %13921 = dma.done.wait (%p20580_p13), [#allocation14], 1024  }
 0x152   : > { %13923 = vsyncadd (%p20580_p13), [#allocation14], 4294966272 }
 0x153   : > { %13925 = dma.done.wait (%p20580_p13), [#allocation17], 400  }
 0x154   : > { %13927 = vsyncadd (%p20580_p13), [#allocation17], 4294966896 }
 0x155   : > { %13929 = dma.done.wait (%p20580_p13), [#allocation20], 3072  }
 0x156   : > { %13931 = vsyncadd (%p20580_p13), [#allocation20], 4294964224 }
 0x157   : > { %13933 = dma.done.wait (%p20580_p13), [#allocation23], 3584  }
 0x158   : > { %13935 = vsyncadd (%p20580_p13), [#allocation23], 4294963712 }
 0x159   : > { %13937 = dma.done.wait (%p20580_p13), [#allocation26], 1792  }
 0x15a   : > { %13939 = vsyncadd (%p20580_p13), [#allocation26], 4294965504 }
 0x15b   : > { %13941 = dma.done.wait (%p20580_p13), [#allocation29], 1024  }
 0x15c   : > { %13943 = vsyncadd (%p20580_p13), [#allocation29], 4294966272 }
 0x15d   : > { %13945 = dma.done.wait (%p20580_p13), [#allocation32], 384  }
 0x15e   : > { %13947 = vsyncadd (%p20580_p13), [#allocation32], 4294966912  ;;  %v1616_v0 = vld [vmem:[#allocation7 + $0xf8] sm:$0xff]  ;;  %v1615_v1 = vld [vmem:[#allocation7 + $0xf0] sm:$0xff]  ;;  %vm1466_vm0 = vcmask 392192   ;;  %s21549_s3 = sld [smem:[#allocation47_spill]] }
 0x15f   : > { %v1614_v2 = vld [vmem:[#allocation7 + $0xe8] sm:$0xff]  ;;  %2091 = vmatprep.subr.mxu0 %v1616_v0  ;;  %v1613_v3 = vld [vmem:[#allocation7 + $0xe0] sm:$0xff]  ;;  %v1612_v4 = vld [vmem:[#allocation7 + $0xd8] sm:$0xff]  ;;  %s21550_s15 = sld [smem:[#allocation46_spill]] }
 0x160   : > { %2092 = vmatpush1.msra.mxu0 %v1615_v1  ;;  %v1611_v5 = vld [vmem:[#allocation7 + $0xd0] sm:$0xff]  ;;  %v1610_v6 = vld [vmem:[#allocation7 + $0xc8] sm:$0xff]  ;;  %v1609_v7 = vld [vmem:[#allocation7 + $0xc0] sm:$0xff]  ;;  %s21551_s30 = sld [smem:[#allocation248_spill]] }
 0x161   : > { %2093 = vmatprep.subr.mxu0 %v1614_v2  ;;  %v1608_v8 = vld [vmem:[#allocation7 + $0xb8] sm:$0xff]  ;;  %v1607_v9 = vld [vmem:[#allocation7 + $0xb0] sm:$0xff]  ;;  %v1606_v10 = vld [vmem:[#allocation7 + $0xa8] sm:$0xff]  ;;  %s21556_s25 = sld [smem:[#allocation247_spill]] }
 0x162   : > { %2094 = vmatpush1.msra.mxu0 %v1613_v3  ;;  %v1605_v11 = vld [vmem:[#allocation7 + $0xa0] sm:$0xff]  ;;  %v1604_v12 = vld [vmem:[#allocation7 + $0x98] sm:$0xff]  ;;  %v1603_v13 = vld [vmem:[#allocation7 + $0x90] sm:$0xff] }
 0x163   : > { %2095 = vmatprep.subr.mxu0 %v1612_v4  ;;  %v1602_v14 = vld [vmem:[#allocation7 + $0x88] sm:$0xff]  ;;  %v1601_v15 = vld [vmem:[#allocation7 + $0x80] sm:$0xff]  ;;  %v1600_v16 = vld [vmem:[#allocation7 + $0x78] sm:$0xff] }
 0x164   : > { %2096 = vmatpush1.msra.mxu0 %v1611_v5  ;;  %v14497_v17 = vld [vmem:[%s14442_s5 + $0x8] sm:$0xff]  ;;  %v1599_v18 = vld [vmem:[#allocation7 + $0x70] sm:$0xff]  ;;  %v1598_v19 = vld [vmem:[#allocation7 + $0x68] sm:$0xff]  ;;  %p1047_p12 = scmp.lt.s32.totalorder %s21549_s3, 1 }
 0x165   : > { %2097 = vmatprep.subr.mxu0 %v1610_v6  ;;  %10593 = vmatprep.mubr.msk.f32.mxu0 %vm1466_vm0, %v14497_v17  ;;  %v1597_v20 = vld [vmem:[#allocation7 + $0x60] sm:$0xff]  ;;  %v1596_v21 = vld [vmem:[#allocation7 + $0x58] sm:$0xff]  ;;  %v1595_v22 = vld [vmem:[#allocation7 + $0x50] sm:$0xff]  ;;  %p1049_p1 = scmp.lt.s32.totalorder %s21550_s15, 12 }
 0x166   : > { %2098 = vmatpush1.msra.mxu0 %v1609_v7  ;;  %v1594_v23 = vld [vmem:[#allocation7 + $0x48] sm:$0xff]  ;;  %v1593_v24 = vld [vmem:[#allocation7 + $0x40] sm:$0xff]  ;;  %v1592_v25 = vld [vmem:[#allocation7 + $0x38] sm:$0xff]  ;;  %s21572_s3 = smov (!%p1047_p12, %s21549_s3), 1 }
 0x167   : > { %2099 = vmatprep.subr.mxu0 %v1608_v8  ;;  %v1591_v26 = vld [vmem:[#allocation7 + $0x30] sm:$0xff]  ;;  %v1590_v27 = vld [vmem:[#allocation7 + $0x28] sm:$0xff]  ;;  %v1589_v28 = vld [vmem:[#allocation7 + $0x20] sm:$0xff]  ;;  %s21574_s15 = smov (!%p1049_p1, %s21550_s15), 12  ;;  %s12539_s21 = smul.u32 13, %s21572_s3 }
 0x168   : > { %2100 = vmatpush1.msra.mxu0 %v1607_v9  ;;  %v1588_v29 = vld [vmem:[#allocation7 + $0x18] sm:$0xff]  ;;  %v1587_v30 = vld [vmem:[#allocation7 + $0x10] sm:$0xff]  ;;  %v1586_v31 = vld [vmem:[#allocation7 + $0x8] sm:$0xff]  ;;  %s21555_s3 = sld [smem:[#allocation246_spill]] }
 0x169   : > { %2101 = vmatprep.subr.mxu0 %v1606_v10  ;;  %v1585_v32 = vld [vmem:[#allocation7] sm:$0xff]  ;;  %v1628_v33 = vld [vmem:[#allocation7 + $0x158] sm:$0xff]  ;;  %v1627_v34 = vld [vmem:[#allocation7 + $0x150] sm:$0xff]  ;;  %s18578_s1 = sadd.s32 %s12539_s21, %s21574_s15 }
 0x16a   : > { %2102 = vmatpush1.msra.mxu0 %v1605_v11  ;;  %v1626_v35 = vld [vmem:[#allocation7 + $0x148] sm:$0xff]  ;;  %v1625_v36 = vld [vmem:[#allocation7 + $0x140] sm:$0xff]  ;;  %v1624_v37 = vld [vmem:[#allocation7 + $0x138] sm:$0xff]  ;;  %s1069_s8 = scalar_lea.vmem %s21551_s30, %s18578_s1  ;;  %s10547_s4 = sshll.u32 %s18578_s1, 3 }
 0x16b   : > { %2103 = vmatprep.subr.mxu0 %v1604_v12  ;;  %v1623_v38 = vld [vmem:[#allocation7 + $0x130] sm:$0xff]  ;;  %v1622_v39 = vld [vmem:[#allocation7 + $0x128] sm:$0xff]  ;;  %v1621_v40 = vld [vmem:[#allocation7 + $0x120] sm:$0xff]  ;;  %s1062_s30 = scalar_lea.vmem %s21556_s25, %s10547_s4 }
 0x16c   : > { %2104 = vmatpush1.msra.mxu0 %v1603_v13  ;;  %v1620_v41 = vld [vmem:[#allocation7 + $0x118] sm:$0xff]  ;;  %v1619_v42 = vld [vmem:[#allocation7 + $0x110] sm:$0xff]  ;;  %v1618_v43 = vld [vmem:[#allocation7 + $0x108] sm:$0xff] }
 0x16d   : > { %2105 = vmatprep.subr.mxu0 %v1602_v14  ;;  %v1617_v44 = vld [vmem:[#allocation7 + $0x100] sm:$0xff]  ;;  %v14502_v45 = vld [vmem:[%s14442_s5] sm:$0xff]  ;;  %v14505_v46 = vld [vmem:[%s14442_s5 + $0x18] sm:$0xff] }
 0x16e   : > { %2106 = vmatpush1.msra.mxu0 %v1601_v15  ;;  %v14511_v47 = vld [vmem:[%s14442_s5 + $0x10] sm:$0xff]  ;;  %v14514_v48 = vld [vmem:[%s14442_s5 + $0x28] sm:$0xff]  ;;  %v14520_v49 = vld [vmem:[%s14442_s5 + $0x20] sm:$0xff]  ;;  %s1054_s15 = scalar_lea.vmem %s21555_s3, %s10547_s4 }
 0x16f   : > { %2107 = vmatprep.subr.mxu0 %v1600_v16  ;;  %v14523_v50 = vld [vmem:[%s14442_s5 + $0x38] sm:$0xff]  ;;  %v14529_v51 = vld [vmem:[%s14442_s5 + $0x30] sm:$0xff]  ;;  %v14532_v52 = vld [vmem:[%s14442_s5 + $0x48] sm:$0xff] }
 0x170   : > { %2108 = vmatpush1.msra.mxu0 %v1599_v18  ;;  %v14538_v53 = vld [vmem:[%s14442_s5 + $0x40] sm:$0xff]  ;;  %v14541_v54 = vld [vmem:[%s14442_s5 + $0x58] sm:$0xff]  ;;  %v14547_v55 = vld [vmem:[%s14442_s5 + $0x50] sm:$0xff] }
 0x171   : > { %2109 = vmatprep.subr.mxu0 %v1598_v19  ;;  %v14550_v56 = vld [vmem:[%s14442_s5 + $0x68] sm:$0xff]  ;;  %v14556_v57 = vld [vmem:[%s14442_s5 + $0x60] sm:$0xff]  ;;  %v14559_v58 = vld [vmem:[%s14442_s5 + $0x78] sm:$0xff] }
 0x172   : > { %2110 = vmatpush1.msra.mxu0 %v1597_v20  ;;  %v14565_v59 = vld [vmem:[%s14442_s5 + $0x70] sm:$0xff]  ;;  %v14568_v60 = vld [vmem:[%s14442_s5 + $0x88] sm:$0xff]  ;;  %v14574_v61 = vld [vmem:[%s14442_s5 + $0x80] sm:$0xff] }
 0x173   : > { %2111 = vmatprep.subr.mxu0 %v1596_v21  ;;  %v14577_v62 = vld [vmem:[%s14442_s5 + $0x98] sm:$0xff]  ;;  %v14583_v63 = vld [vmem:[%s14442_s5 + $0x90] sm:$0xff]  ;;  %v14586_v0 = vld [vmem:[%s14442_s5 + $0xa8] sm:$0xff] }
 0x174   : > { %2112 = vmatpush1.msra.mxu0 %v1595_v22  ;;  %v14592_v1 = vld [vmem:[%s14442_s5 + $0xa0] sm:$0xff]  ;;  %v14595_v2 = vld [vmem:[%s14442_s5 + $0xb8] sm:$0xff]  ;;  %v14601_v3 = vld [vmem:[%s14442_s5 + $0xb0] sm:$0xff] }
 0x175   : > { %2113 = vmatprep.subr.mxu0 %v1594_v23  ;;  %v14604_v4 = vld [vmem:[%s14442_s5 + $0xc8] sm:$0xff]  ;;  %v14610_v5 = vld [vmem:[%s14442_s5 + $0xc0] sm:$0xff]  ;;  %v14613_v6 = vld [vmem:[%s14442_s5 + $0xd8] sm:$0xff] }
 0x176   : > { %2114 = vmatpush1.msra.mxu0 %v1593_v24  ;;  %v14619_v7 = vld [vmem:[%s14442_s5 + $0xd0] sm:$0xff]  ;;  %v14622_v8 = vld [vmem:[%s14442_s5 + $0xe8] sm:$0xff]  ;;  %v14628_v9 = vld [vmem:[%s14442_s5 + $0xe0] sm:$0xff] }
 0x177   : > { %2115 = vmatprep.subr.mxu0 %v1592_v25  ;;  %v14631_v10 = vld [vmem:[%s14442_s5 + $0xf8] sm:$0xff]  ;;  %v14637_v11 = vld [vmem:[%s14442_s5 + $0xf0] sm:$0xff]  ;;  %v14640_v12 = vld [vmem:[%s14442_s5 + $0x108] sm:$0xff] }
 0x178   : > { %2116 = vmatpush1.msra.mxu0 %v1591_v26  ;;  %v14646_v13 = vld [vmem:[%s14442_s5 + $0x100] sm:$0xff]  ;;  %v14649_v14 = vld [vmem:[%s14442_s5 + $0x118] sm:$0xff]  ;;  %v14655_v15 = vld [vmem:[%s14442_s5 + $0x110] sm:$0xff] }
 0x179   : > { %2117 = vmatprep.subr.mxu0 %v1590_v27  ;;  %v14658_v16 = vld [vmem:[%s14442_s5 + $0x128] sm:$0xff]  ;;  %v14664_v18 = vld [vmem:[%s14442_s5 + $0x120] sm:$0xff]  ;;  %v14667_v19 = vld [vmem:[%s14442_s5 + $0x138] sm:$0xff] }
 0x17a   : > { %2118 = vmatpush1.msra.mxu0 %v1589_v28  ;;  %v14673_v20 = vld [vmem:[%s14442_s5 + $0x130] sm:$0xff]  ;;  %v14676_v21 = vld [vmem:[%s14442_s5 + $0x148] sm:$0xff]  ;;  %v14682_v22 = vld [vmem:[%s14442_s5 + $0x140] sm:$0xff] }
 0x17b   : > { %2119 = vmatprep.subr.mxu0 %v1588_v29  ;;  %v14685_v23 = vld [vmem:[%s14442_s5 + $0x158] sm:$0xff]  ;;  %v14691_v24 = vld [vmem:[%s14442_s5 + $0x150] sm:$0xff]  ;;  %v14694_v25 = vld [vmem:[%s14450_s26 + $0x8] sm:$0xff] }
 0x17c   : > { %2120 = vmatpush1.msra.mxu0 %v1587_v30  ;;  %v14700_v26 = vld [vmem:[%s14450_s26] sm:$0xff]  ;;  %v14703_v27 = vld [vmem:[%s14450_s26 + $0x18] sm:$0xff]  ;;  %v14709_v28 = vld [vmem:[%s14450_s26 + $0x10] sm:$0xff] }
 0x17d   : > { %2121 = vmatprep.subr.mxu0 %v1586_v31  ;;  %v14712_v29 = vld [vmem:[%s14450_s26 + $0x28] sm:$0xff]  ;;  %v14718_v30 = vld [vmem:[%s14450_s26 + $0x20] sm:$0xff]  ;;  %v14721_v31 = vld [vmem:[%s14450_s26 + $0x38] sm:$0xff] }
 0x17e   : > { %2122 = vmatpush1.msra.mxu0 %v1585_v32  ;;  %v14727_v32 = vld [vmem:[%s14450_s26 + $0x30] sm:$0xff] }
 0x17f   : > { %2143 = vmatprep.subr.mxu0 %v1628_v33  ;;  %v14730_v33 = vld [vmem:[%s14450_s26 + $0x48] sm:$0xff] }
 0x180   : > { %2144 = vmatpush2.msra.mxu0 %v1627_v34  ;;  %v14736_v34 = vld [vmem:[%s14450_s26 + $0x40] sm:$0xff] }
 0x181   : > { %2145 = vmatprep.subr.mxu0 %v1626_v35  ;;  %v14739_v35 = vld [vmem:[%s14450_s26 + $0x58] sm:$0xff] }
 0x182   : > { %2146 = vmatpush2.msra.mxu0 %v1625_v36  ;;  %v14745_v36 = vld [vmem:[%s14450_s26 + $0x50] sm:$0xff] }
 0x183   : > { %2147 = vmatprep.subr.mxu0 %v1624_v37  ;;  %v14748_v37 = vld [vmem:[%s14450_s26 + $0x68] sm:$0xff] }
 0x184   : > { %2148 = vmatpush2.msra.mxu0 %v1623_v38  ;;  %v14754_v38 = vld [vmem:[%s14450_s26 + $0x60] sm:$0xff] }
 0x185   : > { %2149 = vmatprep.subr.mxu0 %v1622_v39  ;;  %20581 = vst [vmem:[#allocation51_spill] sm:$0xff] %v14754_v38  ;;  %v14757_v39 = vld [vmem:[%s14450_s26 + $0x78] sm:$0xff] }
 0x186   : > { %2150 = vmatpush2.msra.mxu0 %v1621_v40  ;;  %20582 = vst [vmem:[#allocation52_spill] sm:$0xff] %v14757_v39  ;;  %v14763_v40 = vld [vmem:[%s14450_s26 + $0x70] sm:$0xff] }
 0x187   : > { %2151 = vmatprep.subr.mxu0 %v1620_v41  ;;  %20583 = vst [vmem:[#allocation53_spill] sm:$0xff] %v14763_v40  ;;  %v14766_v41 = vld [vmem:[%s14450_s26 + $0x88] sm:$0xff] }
 0x188   : > { %2152 = vmatpush2.msra.mxu0 %v1619_v42  ;;  %20584 = vst [vmem:[#allocation54_spill] sm:$0xff] %v14766_v41  ;;  %v14772_v42 = vld [vmem:[%s14450_s26 + $0x80] sm:$0xff] }
 0x189   : > { %2153 = vmatprep.subr.mxu0 %v1618_v43  ;;  %20585 = vst [vmem:[#allocation55_spill] sm:$0xff] %v14772_v42  ;;  %v14775_v43 = vld [vmem:[%s14450_s26 + $0x98] sm:$0xff] }
 0x18a   : > { %2154 = vmatpush2.msra.mxu0 %v1617_v44  ;;  %20586 = vst [vmem:[#allocation56_spill] sm:$0xff] %v14775_v43  ;;  %v14781_v44 = vld [vmem:[%s14450_s26 + $0x90] sm:$0xff] }
 0x18b   : > { %2156 = vmatmul.mubr.f32.vlgmr.msra.gmra.mxu0 %v14502_v45  ;;  %20587 = vst [vmem:[#allocation57_spill] sm:$0xff] %v14781_v44 }
 0x18c   : > { %10594 = vmatprep.mubr.msk.f32.mxu0 %vm1466_vm0, %v14505_v46 }
 0x18f   : > { %2162 = vmatmul.mubr.f32.gmra.mxu0 %v14511_v47 }
 0x190   : > { %10595 = vmatprep.mubr.msk.f32.mxu0 %vm1466_vm0, %v14514_v48 }
 0x193   : > { %2168 = vmatmul.mubr.f32.gmra.mxu0 %v14520_v49 }
 0x194   : > { %10596 = vmatprep.mubr.msk.f32.mxu0 %vm1466_vm0, %v14523_v50 }
 0x197   : > { %2174 = vmatmul.mubr.f32.gmra.mxu0 %v14529_v51 }
 0x198   : > { %10597 = vmatprep.mubr.msk.f32.mxu0 %vm1466_vm0, %v14532_v52 }
 0x19b   : > { %2180 = vmatmul.mubr.f32.gmra.mxu0 %v14538_v53 }
 0x19c   : > { %10598 = vmatprep.mubr.msk.f32.mxu0 %vm1466_vm0, %v14541_v54 }
 0x19f   : > { %2186 = vmatmul.mubr.f32.gmra.mxu0 %v14547_v55 }
 0x1a0   : > { %10599 = vmatprep.mubr.msk.f32.mxu0 %vm1466_vm0, %v14550_v56 }
 0x1a3   : > { %2192 = vmatmul.mubr.f32.gmra.mxu0 %v14556_v57 }
 0x1a4   : > { %10600 = vmatprep.mubr.msk.f32.mxu0 %vm1466_vm0, %v14559_v58 }
 0x1a7   : > { %2198 = vmatmul.mubr.f32.gmra.mxu0 %v14565_v59 }
 0x1a8   : > { %10601 = vmatprep.mubr.msk.f32.mxu0 %vm1466_vm0, %v14568_v60 }
 0x1ab   : > { %2204 = vmatmul.mubr.f32.gmra.mxu0 %v14574_v61 }
 0x1ac   : > { %10602 = vmatprep.mubr.msk.f32.mxu0 %vm1466_vm0, %v14577_v62 }
 0x1af   : > { %2210 = vmatmul.mubr.f32.gmra.mxu0 %v14583_v63 }
 0x1b0   : > { %10603 = vmatprep.mubr.msk.f32.mxu0 %vm1466_vm0, %v14586_v0 }
 0x1b3   : > { %2216 = vmatmul.mubr.f32.gmra.mxu0 %v14592_v1 }
 0x1b4   : > { %10604 = vmatprep.mubr.msk.f32.mxu0 %vm1466_vm0, %v14595_v2 }
 0x1b7   : > { %2222 = vmatmul.mubr.f32.gmra.mxu0 %v14601_v3 }
 0x1b8   : > { %10605 = vmatprep.mubr.msk.f32.mxu0 %vm1466_vm0, %v14604_v4 }
 0x1bb   : > { %2228 = vmatmul.mubr.f32.gmra.mxu0 %v14610_v5 }
 0x1bc   : > { %10606 = vmatprep.mubr.msk.f32.mxu0 %vm1466_vm0, %v14613_v6 }
 0x1bf   : > { %2234 = vmatmul.mubr.f32.gmra.mxu0 %v14619_v7 }
 0x1c0   : > { %10607 = vmatprep.mubr.msk.f32.mxu0 %vm1466_vm0, %v14622_v8 }
 0x1c3   : > { %2240 = vmatmul.mubr.f32.gmra.mxu0 %v14628_v9 }
 0x1c4   : > { %10608 = vmatprep.mubr.msk.f32.mxu0 %vm1466_vm0, %v14631_v10 }
 0x1c7   : > { %2246 = vmatmul.mubr.f32.gmra.mxu0 %v14637_v11 }
 0x1c8   : > { %10609 = vmatprep.mubr.msk.f32.mxu0 %vm1466_vm0, %v14640_v12 }
 0x1cb   : > { %2252 = vmatmul.mubr.f32.gmra.mxu0 %v14646_v13 }
 0x1cc   : > { %10610 = vmatprep.mubr.msk.f32.mxu0 %vm1466_vm0, %v14649_v14 }
 0x1cf   : > { %2258 = vmatmul.mubr.f32.gmra.mxu0 %v14655_v15 }
 0x1d0   : > { %10611 = vmatprep.mubr.msk.f32.mxu0 %vm1466_vm0, %v14658_v16 }
 0x1d3   : > { %2264 = vmatmul.mubr.f32.gmra.mxu0 %v14664_v18 }
 0x1d4   : > { %10612 = vmatprep.mubr.msk.f32.mxu0 %vm1466_vm0, %v14667_v19 }
 0x1d7   : > { %2270 = vmatmul.mubr.f32.gmra.mxu0 %v14673_v20 }
 0x1d8   : > { %10613 = vmatprep.mubr.msk.f32.mxu0 %vm1466_vm0, %v14676_v21 }
 0x1db   : > { %2276 = vmatmul.mubr.f32.gmra.mxu0 %v14682_v22 }
 0x1dc   : > { %10614 = vmatprep.mubr.msk.f32.mxu0 %vm1466_vm0, %v14685_v23 }
 0x1df   : > { %2282 = vmatmul.mubr.f32.gmra.mxu0 %v14691_v24 }
 0x1e0   : > { %10615 = vmatprep.mubr.msk.f32.mxu0 %vm1466_vm0, %v14694_v25 }
 0x1e3   : > { %2288 = vmatmul.mubr.f32.gmra.mxu0 %v14700_v26 }
 0x1e4   : > { %10616 = vmatprep.mubr.msk.f32.mxu0 %vm1466_vm0, %v14703_v27 }
 0x1e7   : > { %2294 = vmatmul.mubr.f32.gmra.mxu0 %v14709_v28 }
 0x1e8   : > { %10617 = vmatprep.mubr.msk.f32.mxu0 %vm1466_vm0, %v14712_v29 }
 0x1eb   : > { %2300 = vmatmul.mubr.f32.gmra.mxu0 %v14718_v30 }
 0x1ec   : > { %10618 = vmatprep.mubr.msk.f32.mxu0 %vm1466_vm0, %v14721_v31 }
 0x1ef   : > { %2306 = vmatmul.mubr.f32.gmra.mxu0 %v14727_v32 }
 0x1f0   : > { %10619 = vmatprep.mubr.msk.f32.mxu0 %vm1466_vm0, %v14730_v33 }
 0x1f3   : > { %2312 = vmatmul.mubr.f32.gmra.mxu0 %v14736_v34 }
 0x1f4   : > { %10620 = vmatprep.mubr.msk.f32.mxu0 %vm1466_vm0, %v14739_v35 }
 0x1f7   : > { %2318 = vmatmul.mubr.f32.gmra.mxu0 %v14745_v36 }
 0x1f8   : > { %10621 = vmatprep.mubr.msk.f32.mxu0 %vm1466_vm0, %v14748_v37 }
 0x1fb   : > { %2324 = vmatmul.mubr.f32.gmra.mxu0 %v14754_v38  ;;  %v14899_v38 = vld [vmem:[#allocation6 + $0x8] sm:$0xff] }
 0x1fc   : > { %10622 = vmatprep.mubr.msk.f32.mxu0 %vm1466_vm0, %v14757_v39  ;;  %v14784_v39 = vld [vmem:[%s14450_s26 + $0xa8] sm:$0xff]  ;;  %10703 = vmatprep.mubr.msk.f32.mxu1 %vm1466_vm0, %v14899_v38 }
 0x1fd   : > { %20588 = vst [vmem:[#allocation58_spill] sm:$0xff] %v14784_v39 }
 0x1ff   : > { %2330 = vmatmul.mubr.f32.gmra.mxu0 %v14763_v40  ;;  %v14793_v40 = vld [vmem:[%s14450_s26 + $0xb8] sm:$0xff] }
 0x200   : > { %10623 = vmatprep.mubr.msk.f32.mxu0 %vm1466_vm0, %v14766_v41  ;;  %v14790_v41 = vld [vmem:[%s14450_s26 + $0xa0] sm:$0xff]  ;;  %20590 = vst [vmem:[#allocation60_spill] sm:$0xff] %v14793_v40 }
 0x201   : > { %20589 = vst [vmem:[#allocation59_spill] sm:$0xff] %v14790_v41 }
 0x203   : > { %2336 = vmatmul.mubr.f32.gmra.mxu0 %v14772_v42  ;;  %v14802_v42 = vld [vmem:[%s14450_s26 + $0xc8] sm:$0xff] }
 0x204   : > { %10624 = vmatprep.mubr.msk.f32.mxu0 %vm1466_vm0, %v14775_v43  ;;  %v14799_v43 = vld [vmem:[%s14450_s26 + $0xb0] sm:$0xff]  ;;  %20592 = vst [vmem:[#allocation62_spill] sm:$0xff] %v14802_v42 }
 0x205   : > { %20591 = vst [vmem:[#allocation61_spill] sm:$0xff] %v14799_v43 }
 0x207   : > { %2342 = vmatmul.mubr.f32.gmra.mxu0 %v14781_v44  ;;  %v14811_v44 = vld [vmem:[%s14450_s26 + $0xd8] sm:$0xff] }
 0x208   : > { %10625 = vmatprep.mubr.msk.f32.mxu0 %vm1466_vm0, %v14784_v39  ;;  %v14808_v39 = vld [vmem:[%s14450_s26 + $0xc0] sm:$0xff]  ;;  %20594 = vst [vmem:[#allocation64_spill] sm:$0xff] %v14811_v44 }
 0x209   : > { %20593 = vst [vmem:[#allocation63_spill] sm:$0xff] %v14808_v39 }
 0x20b   : > { %2348 = vmatmul.mubr.f32.gmra.mxu0 %v14790_v41  ;;  %v14820_v41 = vld [vmem:[%s14450_s26 + $0xe8] sm:$0xff] }
 0x20c   : > { %10626 = vmatprep.mubr.msk.f32.mxu0 %vm1466_vm0, %v14793_v40  ;;  %v14817_v40 = vld [vmem:[%s14450_s26 + $0xd0] sm:$0xff]  ;;  %20596 = vst [vmem:[#allocation66_spill] sm:$0xff] %v14820_v41 }
 0x20d   : > { %20595 = vst [vmem:[#allocation65_spill] sm:$0xff] %v14817_v40 }
 0x20f   : > { %2354 = vmatmul.mubr.f32.gmra.mxu0 %v14799_v43  ;;  %v14829_v43 = vld [vmem:[%s14450_s26 + $0xf8] sm:$0xff] }
 0x210   : > { %10627 = vmatprep.mubr.msk.f32.mxu0 %vm1466_vm0, %v14802_v42  ;;  %v14826_v42 = vld [vmem:[%s14450_s26 + $0xe0] sm:$0xff]  ;;  %20598 = vst [vmem:[#allocation68_spill] sm:$0xff] %v14829_v43 }
 0x211   : > { %20597 = vst [vmem:[#allocation67_spill] sm:$0xff] %v14826_v42 }
 0x213   : > { %2360 = vmatmul.mubr.f32.gmra.mxu0 %v14808_v39  ;;  %v14838_v39 = vld [vmem:[%s14450_s26 + $0x108] sm:$0xff] }
 0x214   : > { %10628 = vmatprep.mubr.msk.f32.mxu0 %vm1466_vm0, %v14811_v44  ;;  %v14835_v44 = vld [vmem:[%s14450_s26 + $0xf0] sm:$0xff]  ;;  %20600 = vst [vmem:[#allocation70_spill] sm:$0xff] %v14838_v39 }
 0x215   : > { %20599 = vst [vmem:[#allocation69_spill] sm:$0xff] %v14835_v44 }
 0x217   : > { %2366 = vmatmul.mubr.f32.gmra.mxu0 %v14817_v40  ;;  %v14847_v40 = vld [vmem:[%s14450_s26 + $0x118] sm:$0xff] }
 0x218   : > { %10629 = vmatprep.mubr.msk.f32.mxu0 %vm1466_vm0, %v14820_v41  ;;  %v14844_v41 = vld [vmem:[%s14450_s26 + $0x100] sm:$0xff]  ;;  %20602 = vst [vmem:[#allocation72_spill] sm:$0xff] %v14847_v40 }
 0x219   : > { %20601 = vst [vmem:[#allocation71_spill] sm:$0xff] %v14844_v41 }
 0x21b   : > { %2372 = vmatmul.mubr.f32.gmra.mxu0 %v14826_v42  ;;  %v14856_v42 = vld [vmem:[%s14450_s26 + $0x128] sm:$0xff] }
 0x21c   : > { %10630 = vmatprep.mubr.msk.f32.mxu0 %vm1466_vm0, %v14829_v43  ;;  %v14853_v43 = vld [vmem:[%s14450_s26 + $0x110] sm:$0xff]  ;;  %20604 = vst [vmem:[#allocation74_spill] sm:$0xff] %v14856_v42 }
 0x21d   : > { %20603 = vst [vmem:[#allocation73_spill] sm:$0xff] %v14853_v43 }
 0x21f   : > { %2378 = vmatmul.mubr.f32.gmra.mxu0 %v14835_v44  ;;  %v14865_v44 = vld [vmem:[%s14450_s26 + $0x138] sm:$0xff] }
 0x220   : > { %10631 = vmatprep.mubr.msk.f32.mxu0 %vm1466_vm0, %v14838_v39  ;;  %v14862_v39 = vld [vmem:[%s14450_s26 + $0x120] sm:$0xff]  ;;  %20606 = vst [vmem:[#allocation76_spill] sm:$0xff] %v14865_v44 }
 0x221   : > { %20605 = vst [vmem:[#allocation75_spill] sm:$0xff] %v14862_v39 }
 0x223   : > { %2384 = vmatmul.mubr.f32.gmra.mxu0 %v14844_v41  ;;  %v14874_v41 = vld [vmem:[%s14450_s26 + $0x148] sm:$0xff] }
 0x224   : > { %10632 = vmatprep.mubr.msk.f32.mxu0 %vm1466_vm0, %v14847_v40  ;;  %v14871_v40 = vld [vmem:[%s14450_s26 + $0x130] sm:$0xff]  ;;  %20608 = vst [vmem:[#allocation78_spill] sm:$0xff] %v14874_v41 }
 0x225   : > { %20607 = vst [vmem:[#allocation77_spill] sm:$0xff] %v14871_v40 }
 0x227   : > { %2390 = vmatmul.mubr.f32.gmra.mxu0 %v14853_v43  ;;  %v14880_v43 = vld [vmem:[%s14450_s26 + $0x140] sm:$0xff] }
 0x228   : > { %10633 = vmatprep.mubr.msk.f32.mxu0 %vm1466_vm0, %v14856_v42  ;;  %v14883_v42 = vld [vmem:[%s14450_s26 + $0x158] sm:$0xff] }
 0x229   : > { %20609 = vst [vmem:[#allocation79_spill] sm:$0xff] %v14883_v42 }
 0x22b   : > { %2396 = vmatmul.mubr.f32.gmra.mxu0 %v14862_v39  ;;  %v14889_v39 = vld [vmem:[%s14450_s26 + $0x150] sm:$0xff] }
 0x22c   : > { %10634 = vmatprep.mubr.msk.f32.mxu0 %vm1466_vm0, %v14865_v44  ;;  %v1630_v44 = vmul.f32 %v14497_v17, %v14497_v17  ;;  %v1634_v17 = vmul.f32 %v14514_v48, %v14514_v48  ;;  %v1637_v48 = vmul.f32 %v14538_v53, %v14538_v53  ;;  %v1641_v53 = vmul.f32 %v14556_v57, %v14556_v57 }
 0x22f   : > { %2402 = vmatmul.mubr.f32.gmra.mxu0 %v14871_v40  ;;  %v1629_v40 = vmul.f32 %v14502_v45, %v14502_v45  ;;  %v1633_v45 = vmul.f32 %v14520_v49, %v14520_v49  ;;  %v1640_v49 = vmul.f32 %v14541_v54, %v14541_v54  ;;  %v1644_v54 = vmul.f32 %v14559_v58, %v14559_v58 }
 0x230   : > { %10635 = vmatprep.mubr.msk.f32.mxu0 %vm1466_vm0, %v14874_v41  ;;  %v1632_v41 = vmul.f32 %v14505_v46, %v14505_v46  ;;  %v1636_v46 = vmul.f32 %v14523_v50, %v14523_v50  ;;  %v1639_v50 = vmul.f32 %v14547_v55, %v14547_v55  ;;  %v1645_v58 = vmul.f32 %v14574_v61, %v14574_v61 }
 0x233   : > { %2408 = vmatmul.mubr.f32.gmra.mxu0 %v14880_v43 }
 0x234   : > { %10636 = vmatprep.mubr.msk.f32.mxu0 %vm1466_vm0, %v14883_v42  ;;  %v1631_v42 = vmul.f32 %v14511_v47, %v14511_v47  ;;  %v1638_v47 = vmul.f32 %v14532_v52, %v14532_v52 }
 0x237   : > { %2414 = vmatmul.mubr.f32.gmra.mxu0 %v14889_v39 }
 0x238   : > { %10637 = vmatprep.mubr.msk.f32.mxu0 %vm1466_vm0, %v1630_v44 }
 0x23b   : > { %2420 = vmatmul.mubr.f32.gmra.mxu0 %v1629_v40  ;;  %v1635_v40 = vmul.f32 %v14529_v51, %v14529_v51  ;;  %v1642_v51 = vmul.f32 %v14550_v56, %v14550_v56  ;;  %v1643_v56 = vmul.f32 %v14565_v59, %v14565_v59 }
 0x23c   : > { %10638 = vmatprep.mubr.msk.f32.mxu0 %vm1466_vm0, %v1632_v41 }
 0x23f   : > { %2426 = vmatmul.mubr.f32.gmra.mxu0 %v1631_v42 }
 0x240   : > { %10639 = vmatprep.mubr.msk.f32.mxu0 %vm1466_vm0, %v1634_v17  ;;  %v1646_v17 = vmul.f32 %v14568_v60, %v14568_v60  ;;  %v1647_v60 = vmul.f32 %v14583_v63, %v14583_v63 }
 0x243   : > { %2432 = vmatmul.mubr.f32.gmra.mxu0 %v1633_v45 }
 0x244   : > { %10640 = vmatprep.mubr.msk.f32.mxu0 %vm1466_vm0, %v1636_v46  ;;  %v1648_v46 = vmul.f32 %v14577_v62, %v14577_v62  ;;  %v1649_v62 = vmul.f32 %v14592_v1, %v14592_v1 }
 0x247   : > { %2438 = vmatmul.mubr.f32.gmra.mxu0 %v1635_v40 }
 0x248   : > { %10641 = vmatprep.mubr.msk.f32.mxu0 %vm1466_vm0, %v1638_v47  ;;  %v1650_v47 = vmul.f32 %v14586_v0, %v14586_v0  ;;  %v1651_v0 = vmul.f32 %v14601_v3, %v14601_v3 }
 0x24b   : > { %v14923_v41 = vpop.f32.mrf.mxu0  ;;  %2444 = vmatmul.mubr.f32.gmra.mxu0 %v1637_v48 }
 0x24c   : > { %10642 = vmatprep.mubr.msk.f32.mxu0 %vm1466_vm0, %v1640_v49  ;;  %v1652_v49 = vmul.f32 %v14595_v2, %v14595_v2  ;;  %v1653_v2 = vmul.f32 %v14610_v5, %v14610_v5 }
 0x24d   : > { %v14930_v52 = vpop.f32.mrf.mxu0 }
 0x24f   : > { %v14932_v42 = vpop.f32.mrf.mxu0  ;;  %2450 = vmatmul.mubr.f32.gmra.mxu0 %v1639_v50 }
 0x250   : > { %10643 = vmatprep.mubr.msk.f32.mxu0 %vm1466_vm0, %v1642_v51  ;;  %v1654_v51 = vmul.f32 %v14604_v4, %v14604_v4  ;;  %v1655_v4 = vmul.f32 %v14619_v7, %v14619_v7 }
 0x251   : > { %v14939_v44 = vpop.f32.mrf.mxu0 }
 0x253   : > { %v14941_v55 = vpop.f32.mrf.mxu0  ;;  %2456 = vmatmul.mubr.f32.gmra.mxu0 %v1641_v53 }
 0x254   : > { %10644 = vmatprep.mubr.msk.f32.mxu0 %vm1466_vm0, %v1644_v54  ;;  %v1656_v54 = vmul.f32 %v14613_v6, %v14613_v6  ;;  %v1657_v6 = vmul.f32 %v14628_v9, %v14628_v9 }
 0x255   : > { %v14948_v45 = vpop.f32.mrf.mxu0 }
 0x257   : > { %v14950_v57 = vpop.f32.mrf.mxu0  ;;  %2462 = vmatmul.mubr.f32.gmra.mxu0 %v1643_v56 }
 0x258   : > { %10645 = vmatprep.mubr.msk.f32.mxu0 %vm1466_vm0, %v1646_v17  ;;  %v1658_v17 = vmul.f32 %v14622_v8, %v14622_v8  ;;  %v1659_v8 = vmul.f32 %v14637_v11, %v14637_v11  ;;  %v1663_v11 = vmul.f32 %v14655_v15, %v14655_v15  ;;  %v1667_v15 = vmul.f32 %v14673_v20, %v14673_v20 }
 0x259   : > { %v14957_v40 = vpop.f32.mrf.mxu0  ;;  %v1671_v20 = vmul.f32 %v14691_v24, %v14691_v24  ;;  %v1676_v24 = vmul.f32 %v14703_v27, %v14703_v27 }
 0x25b   : > { %v14959_v59 = vpop.f32.mrf.mxu0  ;;  %2468 = vmatmul.mubr.f32.gmra.mxu0 %v1645_v58 }
 0x25c   : > { %10646 = vmatprep.mubr.msk.f32.mxu0 %vm1466_vm0, %v1648_v46  ;;  %v1660_v46 = vmul.f32 %v14631_v10, %v14631_v10  ;;  %v1664_v10 = vmul.f32 %v14649_v14, %v14649_v14  ;;  %v1668_v14 = vmul.f32 %v14667_v19, %v14667_v19  ;;  %v1672_v19 = vmul.f32 %v14685_v23, %v14685_v23 }
 0x25d   : > { %v14966_v48 = vpop.f32.mrf.mxu0 }
 0x25f   : > { %v14968_v61 = vpop.f32.mrf.mxu0  ;;  %2474 = vmatmul.mubr.f32.gmra.mxu0 %v1647_v60 }
 0x260   : > { %10647 = vmatprep.mubr.msk.f32.mxu0 %vm1466_vm0, %v1650_v47  ;;  %v1662_v47 = vmul.f32 %v14640_v12, %v14640_v12  ;;  %v1666_v12 = vmul.f32 %v14658_v16, %v14658_v16  ;;  %v1670_v16 = vmul.f32 %v14676_v21, %v14676_v21  ;;  %v1674_v21 = vmul.f32 %v14694_v25, %v14694_v25 }
 0x261   : > { %v14975_v50 = vpop.f32.mrf.mxu0 }
 0x263   : > { %v14977_v63 = vpop.f32.mrf.mxu0  ;;  %2480 = vmatmul.mubr.f32.gmra.mxu0 %v1649_v62 }
 0x264   : > { %10648 = vmatprep.mubr.msk.f32.mxu0 %vm1466_vm0, %v1652_v49  ;;  %v1661_v49 = vmul.f32 %v14646_v13, %v14646_v13  ;;  %v1665_v13 = vmul.f32 %v14664_v18, %v14664_v18  ;;  %v1669_v18 = vmul.f32 %v14682_v22, %v14682_v22 }
 0x265   : > { %v14984_v53 = vpop.f32.mrf.mxu0 }
 0x267   : > { %v14986_v1 = vpop.f32.mrf.mxu0  ;;  %2486 = vmatmul.mubr.f32.gmra.mxu0 %v1651_v0 }
 0x268   : > { %10649 = vmatprep.mubr.msk.f32.mxu0 %vm1466_vm0, %v1654_v51 }
 0x269   : > { %v14993_v56 = vpop.f32.mrf.mxu0 }
 0x26b   : > { %v14995_v3 = vpop.f32.mrf.mxu0  ;;  %2492 = vmatmul.mubr.f32.gmra.mxu0 %v1653_v2 }
 0x26c   : > { %10650 = vmatprep.mubr.msk.f32.mxu0 %vm1466_vm0, %v1656_v54 }
 0x26d   : > { %v15002_v58 = vpop.f32.mrf.mxu0 }
 0x26f   : > { %v15004_v5 = vpop.f32.mrf.mxu0  ;;  %2498 = vmatmul.mubr.f32.gmra.mxu0 %v1655_v4 }
 0x270   : > { %10651 = vmatprep.mubr.msk.f32.mxu0 %vm1466_vm0, %v1658_v17 }
 0x271   : > { %v15011_v60 = vpop.f32.mrf.mxu0 }
 0x273   : > { %v15013_v7 = vpop.f32.mrf.mxu0  ;;  %2504 = vmatmul.mubr.f32.gmra.mxu0 %v1657_v6 }
 0x274   : > { %10652 = vmatprep.mubr.msk.f32.mxu0 %vm1466_vm0, %v1660_v46 }
 0x275   : > { %v2219_v62 = vpop.f32.mrf.mxu0 }
 0x277   : > { %v2223_v9 = vpop.f32.mrf.mxu0  ;;  %2510 = vmatmul.mubr.f32.gmra.mxu0 %v1659_v8 }
 0x278   : > { %10653 = vmatprep.mubr.msk.f32.mxu0 %vm1466_vm0, %v1662_v47 }
 0x279   : > { %v2225_v0 = vpop.f32.mrf.mxu0 }
 0x27b   : > { %v2229_v51 = vpop.f32.mrf.mxu0  ;;  %2516 = vmatmul.mubr.f32.gmra.mxu0 %v1661_v49  ;;  %v1673_v49 = vmul.f32 %v14700_v26, %v14700_v26 }
 0x27c   : > { %10654 = vmatprep.mubr.msk.f32.mxu0 %vm1466_vm0, %v1664_v10 }
 0x27d   : > { %v2231_v2 = vpop.f32.mrf.mxu0 }
 0x27f   : > { %v2235_v54 = vpop.f32.mrf.mxu0  ;;  %2522 = vmatmul.mubr.f32.gmra.mxu0 %v1663_v11 }
 0x280   : > { %10655 = vmatprep.mubr.msk.f32.mxu0 %vm1466_vm0, %v1666_v12  ;;  %v1675_v12 = vmul.f32 %v14709_v28, %v14709_v28 }
 0x281   : > { %v2237_v4 = vpop.f32.mrf.mxu0 }
 0x283   : > { %v2241_v17 = vpop.f32.mrf.mxu0  ;;  %2528 = vmatmul.mubr.f32.gmra.mxu0 %v1665_v13 }
 0x284   : > { %10656 = vmatprep.mubr.msk.f32.mxu0 %vm1466_vm0, %v1668_v14 }
 0x285   : > { %v2243_v6 = vpop.f32.mrf.mxu0 }
 0x287   : > { %v2247_v46 = vpop.f32.mrf.mxu0  ;;  %2534 = vmatmul.mubr.f32.gmra.mxu0 %v1667_v15 }
 0x288   : > { %10657 = vmatprep.mubr.msk.f32.mxu0 %vm1466_vm0, %v1670_v16 }
 0x289   : > { %v2249_v8 = vpop.f32.mrf.mxu0 }
 0x28a   : > { %2879 = vmatprep.subr.mxu1 %v2249_v8  ;;  %v20616_v8 = vld [vmem:[#allocation57_spill] sm:$0xff] }
 0x28b   : > { %v15045_v47 = vpop.f32.mrf.mxu0  ;;  %2540 = vmatmul.mubr.f32.gmra.mxu0 %v1669_v18  ;;  %2880 = vmatpush1.msra.mxu1 %v2247_v46 }
 0x28c   : > { %2881 = vmatprep.subr.mxu1 %v2243_v6  ;;  %10658 = vmatprep.mubr.msk.f32.mxu0 %vm1466_vm0, %v1672_v19  ;;  %v20615_v6 = vld [vmem:[#allocation56_spill] sm:$0xff] }
 0x28d   : > { %v15052_v22 = vpop.f32.mrf.mxu0  ;;  %2882 = vmatpush1.msra.mxu1 %v2241_v17  ;;  %v1692_v46 = vmul.f32 %v20615_v6, %v20615_v6  ;;  %v20633_v6 = vld [vmem:[#allocation66_spill] sm:$0xff] }
 0x28e   : > { %2883 = vmatprep.subr.mxu1 %v2237_v4 }
 0x28f   : > { %v15054_v23 = vpop.f32.mrf.mxu0  ;;  %2546 = vmatmul.mubr.f32.gmra.mxu0 %v1671_v20  ;;  %2884 = vmatpush1.msra.mxu1 %v2235_v54  ;;  %v1691_v20 = vmul.f32 %v20616_v8, %v20616_v8  ;;  %v15223_v8 = vld [vmem:[#allocation6 + $0x58] sm:$0xff] }
 0x290   : > { %2885 = vmatprep.subr.mxu1 %v2231_v2  ;;  %10659 = vmatprep.mubr.msk.f32.mxu0 %vm1466_vm0, %v1674_v21  ;;  %v1678_v2 = vmul.f32 %v14712_v29, %v14712_v29  ;;  %v15152_v21 = vld [vmem:[#allocation6] sm:$0xff] }
 0x291   : > { %v15061_v10 = vpop.f32.mrf.mxu0  ;;  %2886 = vmatpush1.msra.mxu1 %v2229_v51 }
 0x292   : > { %2887 = vmatprep.subr.mxu1 %v2225_v0 }
 0x293   : > { %v15063_v11 = vpop.f32.mrf.mxu0  ;;  %2552 = vmatmul.mubr.f32.gmra.mxu0 %v1673_v49  ;;  %2888 = vmatpush1.msra.mxu1 %v2223_v9  ;;  %v1677_v9 = vmul.f32 %v14718_v30, %v14718_v30  ;;  %v20617_v49 = vld [vmem:[#allocation58_spill] sm:$0xff] }
 0x294   : > { %2889 = vmatprep.subr.mxu1 %v2219_v62  ;;  %10660 = vmatprep.mubr.msk.f32.mxu0 %vm1466_vm0, %v1676_v24  ;;  %v1680_v62 = vmul.f32 %v14721_v31, %v14721_v31  ;;  %v1694_v24 = vmul.f32 %v20617_v49, %v20617_v49 }
 0x295   : > { %v15070_v54 = vpop.f32.mrf.mxu0  ;;  %2890 = vmatpush1.msra.mxu1 %v15013_v7 }
 0x296   : > { %2891 = vmatprep.subr.mxu1 %v15011_v60 }
 0x297   : > { %v2271_v0 = vpop.f32.mrf.mxu0  ;;  %2558 = vmatmul.mubr.f32.gmra.mxu0 %v1675_v12  ;;  %2892 = vmatpush1.msra.mxu1 %v15004_v5  ;;  %v1679_v5 = vmul.f32 %v14727_v32, %v14727_v32  ;;  %v20619_v12 = vld [vmem:[#allocation59_spill] sm:$0xff] }
 0x298   : > { %2893 = vmatprep.subr.mxu1 %v15002_v58  ;;  %10661 = vmatprep.mubr.msk.f32.mxu0 %vm1466_vm0, %v1678_v2  ;;  %v1682_v58 = vmul.f32 %v14730_v33, %v14730_v33  ;;  %v1693_v2 = vmul.f32 %v20619_v12, %v20619_v12  ;;  %20634 = vst [vmem:[#allocation59_spill] sm:$0xff] %v15223_v8 }
 0x299   : > { %v2273_v51 = vpop.f32.mrf.mxu0  ;;  %2894 = vmatpush1.msra.mxu1 %v14995_v3 }
 0x29a   : > { %2895 = vmatprep.subr.mxu1 %v14993_v56 }
 0x29b   : > { %v2277_v60 = vpop.f32.mrf.mxu0  ;;  %2564 = vmatmul.mubr.f32.gmra.mxu0 %v1677_v9  ;;  %2896 = vmatpush1.msra.mxu1 %v14986_v1  ;;  %v1681_v1 = vmul.f32 %v14736_v34, %v14736_v34  ;;  %v15175_v9 = vld [vmem:[#allocation6 + $0x28] sm:$0xff] }
 0x29c   : > { %2897 = vmatprep.subr.mxu1 %v14984_v53  ;;  %10662 = vmatprep.mubr.msk.f32.mxu0 %vm1466_vm0, %v1680_v62  ;;  %v1684_v53 = vmul.f32 %v14739_v35, %v14739_v35 }
 0x29d   : > { %v2279_v7 = vpop.f32.mrf.mxu0  ;;  %2898 = vmatpush1.msra.mxu1 %v14977_v63 }
 0x29e   : > { %2899 = vmatprep.subr.mxu1 %v14975_v50 }
 0x29f   : > { %v2283_v56 = vpop.f32.mrf.mxu0  ;;  %2570 = vmatmul.mubr.f32.gmra.mxu0 %v1679_v5  ;;  %2900 = vmatpush1.msra.mxu1 %v14968_v61  ;;  %v1683_v61 = vmul.f32 %v14745_v36, %v14745_v36  ;;  %v15186_v5 = vld [vmem:[#allocation6 + $0x20] sm:$0xff] }
 0x2a0   : > { %2901 = vmatprep.subr.mxu1 %v14966_v48  ;;  %10663 = vmatprep.mubr.msk.f32.mxu0 %vm1466_vm0, %v1682_v58  ;;  %v1686_v48 = vmul.f32 %v14748_v37, %v14748_v37  ;;  %v20625_v58 = vld [vmem:[#allocation62_spill] sm:$0xff] }
 0x2a1   : > { %v2285_v3 = vpop.f32.mrf.mxu0  ;;  %2902 = vmatpush1.msra.mxu1 %v14959_v59 }
 0x2a2   : > { %2903 = vmatprep.subr.mxu1 %v14957_v40 }
 0x2a3   : > { %v15101_v50 = vpop.f32.mrf.mxu0  ;;  %2576 = vmatmul.mubr.f32.gmra.mxu0 %v1681_v1  ;;  %2904 = vmatpush1.msra.mxu1 %v14950_v57  ;;  %v20610_v57 = vld [vmem:[#allocation51_spill] sm:$0xff] }
 0x2a4   : > { %2905 = vmatprep.subr.mxu1 %v14948_v45  ;;  %10664 = vmatprep.mubr.msk.f32.mxu0 %vm1466_vm0, %v1684_v53  ;;  %v1685_v59 = vmul.f32 %v20610_v57, %v20610_v57  ;;  %v20611_v45 = vld [vmem:[#allocation52_spill] sm:$0xff] }
 0x2a5   : > { %v15110_v63 = vpop.f32.mrf.mxu0  ;;  %2906 = vmatpush1.msra.mxu1 %v14941_v55  ;;  %v1688_v13 = vmul.f32 %v20611_v45, %v20611_v45 }
 0x2a6   : > { %2907 = vmatprep.subr.mxu1 %v14939_v44 }
 0x2a7   : > { %v15114_v40 = vpop.f32.mrf.mxu0  ;;  %2582 = vmatmul.mubr.f32.gmra.mxu0 %v1683_v61  ;;  %2908 = vmatpush1.msra.mxu1 %v14932_v42  ;;  %v20612_v42 = vld [vmem:[#allocation53_spill] sm:$0xff] }
 0x2a8   : > { %2909 = vmatprep.subr.mxu1 %v14930_v52  ;;  %10665 = vmatprep.mubr.msk.f32.mxu0 %vm1466_vm0, %v1686_v48  ;;  %v1687_v55 = vmul.f32 %v20612_v42, %v20612_v42  ;;  %v20613_v52 = vld [vmem:[#allocation54_spill] sm:$0xff]  ;;  %20622 = vst [vmem:[#allocation53_spill] sm:$0xff] %v15175_v9  ;;  %v15202_v48 = vld [vmem:[#allocation6 + $0x30] sm:$0xff]  ;;  %v15207_v42 = vld [vmem:[#allocation6 + $0x48] sm:$0xff] }
 0x2a9   : > { %v15123_v14 = vpop.f32.mrf.mxu0  ;;  %2910 = vmatpush1.msra.mxu1 %v14923_v41  ;;  %v1690_v4 = vmul.f32 %v20613_v52, %v20613_v52  ;;  %v20614_v41 = vld [vmem:[#allocation55_spill] sm:$0xff]  ;;  %20624 = vst [vmem:[#allocation54_spill] sm:$0xff] %v15186_v5  ;;  %20628 = vst [vmem:[#allocation56_spill] sm:$0xff] %v15202_v48 }
 0x2aa   : > { %2931 = vmatprep.subr.mxu1 %v2285_v3  ;;  %v1689_v16 = vmul.f32 %v20614_v41, %v20614_v41  ;;  %v20627_v3 = vld [vmem:[#allocation63_spill] sm:$0xff]  ;;  %20630 = vst [vmem:[#allocation57_spill] sm:$0xff] %v15207_v42 }
 0x2ab   : > { %v15126_v44 = vpop.f32.mrf.mxu0  ;;  %2588 = vmatmul.mubr.f32.gmra.mxu0 %v1685_v59  ;;  %2932 = vmatpush2.msra.mxu1 %v2283_v56  ;;  %v15191_v56 = vld [vmem:[#allocation6 + $0x38] sm:$0xff]  ;;  %v1697_v61 = vmul.f32 %v20627_v3, %v20627_v3  ;;  %v20629_v59 = vld [vmem:[#allocation64_spill] sm:$0xff] }
 0x2ac   : > { %2933 = vmatprep.subr.mxu1 %v2279_v7  ;;  %10666 = vmatprep.mubr.msk.f32.mxu0 %vm1466_vm0, %v1688_v13  ;;  %v1698_v7 = vmul.f32 %v20625_v58, %v20625_v58  ;;  %20626 = vst [vmem:[#allocation55_spill] sm:$0xff] %v15191_v56  ;;  %v1700_v13 = vmul.f32 %v20629_v59, %v20629_v59  ;;  %v20641_v59 = vld [vmem:[#allocation70_spill] sm:$0xff] }
 0x2ad   : > { %v15133_v17 = vpop.f32.mrf.mxu0  ;;  %2934 = vmatpush2.msra.mxu1 %v2277_v60 }
 0x2ae   : > { %2935 = vmatprep.subr.mxu1 %v2273_v51  ;;  %v20623_v51 = vld [vmem:[#allocation61_spill] sm:$0xff] }
 0x2af   : > { %v15135_v15 = vpop.f32.mrf.mxu0  ;;  %2594 = vmatmul.mubr.f32.gmra.mxu0 %v1687_v55  ;;  %2936 = vmatpush2.msra.mxu1 %v2271_v0  ;;  %v1695_v60 = vmul.f32 %v20623_v51, %v20623_v51  ;;  %v15239_v51 = vld [vmem:[#allocation6 + $0x68] sm:$0xff] }
 0x2b0   : > { %2937 = vmatprep.subr.mxu1 %v15070_v54  ;;  %10667 = vmatprep.mubr.msk.f32.mxu0 %vm1466_vm0, %v1690_v4  ;;  %v20621_v54 = vld [vmem:[#allocation60_spill] sm:$0xff]  ;;  %v20631_v4 = vld [vmem:[#allocation65_spill] sm:$0xff]  ;;  %20638 = vst [vmem:[#allocation61_spill] sm:$0xff] %v15239_v51 }
 0x2b1   : > { %v15143_v18 = vpop.f32.mrf.mxu0  ;;  %2938 = vmatpush2.msra.mxu1 %v15063_v11  ;;  %v15158_v11 = vld [vmem:[#allocation6 + $0x18] sm:$0xff]  ;;  %v1696_v0 = vmul.f32 %v20621_v54, %v20621_v54  ;;  %v1699_v41 = vmul.f32 %v20631_v4, %v20631_v4  ;;  %v20637_v54 = vld [vmem:[#allocation68_spill] sm:$0xff] }
 0x2b2   : > { %2939 = vmatprep.subr.mxu1 %v15061_v10  ;;  %20618 = vst [vmem:[#allocation51_spill] sm:$0xff] %v15158_v11  ;;  %v15255_v4 = vld [vmem:[#allocation6 + $0x78] sm:$0xff] }
 0x2b3   : > { %v15147_v19 = vpop.f32.mrf.mxu0  ;;  %2600 = vmatmul.mubr.f32.gmra.mxu0 %v1689_v16  ;;  %2940 = vmatpush2.msra.mxu1 %v15054_v23  ;;  %v15218_v16 = vld [vmem:[#allocation6 + $0x40] sm:$0xff]  ;;  %20642 = vst [vmem:[#allocation63_spill] sm:$0xff] %v15255_v4 }
 0x2b4   : > { %2941 = vmatprep.subr.mxu1 %v15052_v22  ;;  %10668 = vmatprep.mubr.msk.f32.mxu0 %vm1466_vm0, %v1692_v46  ;;  %v15170_v22 = vld [vmem:[#allocation6 + $0x10] sm:$0xff]  ;;  %20632 = vst [vmem:[#allocation58_spill] sm:$0xff] %v15218_v16  ;;  %v1702_v46 = vmul.f32 %v20633_v6, %v20633_v6 }
 0x2b5   : > { %v15160_v10 = vpop.f32.mrf.mxu0  ;;  %2942 = vmatpush2.msra.mxu1 %v15045_v47  ;;  %20620 = vst [vmem:[#allocation52_spill] sm:$0xff] %v15170_v22 }
 0x2b6   : > { %2944 = vmatmul.mubr.f32.vlgmr.msra.gmra.mxu1 %v15152_v21 }
 0x2b7   : > { %v15164_v23 = vpop.f32.mrf.mxu0  ;;  %2606 = vmatmul.mubr.f32.gmra.mxu0 %v1691_v20  ;;  %10704 = vmatprep.mubr.msk.f32.mxu1 %vm1466_vm0, %v15158_v11 }
 0x2b8   : > { %10669 = vmatprep.mubr.msk.f32.mxu0 %vm1466_vm0, %v1694_v24  ;;  %v20635_v24 = vld [vmem:[#allocation67_spill] sm:$0xff] }
 0x2b9   : > { %v15177_v47 = vpop.f32.mrf.mxu0  ;;  %v1701_v12 = vmul.f32 %v20635_v24, %v20635_v24 }
 0x2ba   : > { %2950 = vmatmul.mubr.f32.gmra.mxu1 %v15170_v22 }
 0x2bb   : > { %v15180_v62 = vpop.f32.mrf.mxu0  ;;  %2612 = vmatmul.mubr.f32.gmra.mxu0 %v1693_v2  ;;  %10705 = vmatprep.mubr.msk.f32.mxu1 %vm1466_vm0, %v15175_v9  ;;  %v15234_v2 = vld [vmem:[#allocation6 + $0x50] sm:$0xff] }
 0x2bc   : > { %10670 = vmatprep.mubr.msk.f32.mxu0 %vm1466_vm0, %v1696_v0  ;;  %20636 = vst [vmem:[#allocation60_spill] sm:$0xff] %v15234_v2  ;;  %v1704_v0 = vmul.f32 %v20637_v54, %v20637_v54  ;;  %v20645_v54 = vld [vmem:[#allocation72_spill] sm:$0xff] }
 0x2bd   : > { %v15193_v1 = vpop.f32.mrf.mxu0 }
 0x2be   : > { %2956 = vmatmul.mubr.f32.gmra.mxu1 %v15186_v5 }
 0x2bf   : > { %v15196_v53 = vpop.f32.mrf.mxu0  ;;  %2618 = vmatmul.mubr.f32.gmra.mxu0 %v1695_v60  ;;  %10706 = vmatprep.mubr.msk.f32.mxu1 %vm1466_vm0, %v15191_v56 }
 0x2c0   : > { %10671 = vmatprep.mubr.msk.f32.mxu0 %vm1466_vm0, %v1698_v7  ;;  %v20639_v7 = vld [vmem:[#allocation69_spill] sm:$0xff] }
 0x2c1   : > { %v15209_v55 = vpop.f32.mrf.mxu0  ;;  %v1703_v3 = vmul.f32 %v20639_v7, %v20639_v7  ;;  %v15271_v7 = vld [vmem:[#allocation6 + $0x88] sm:$0xff] }
 0x2c2   : > { %2962 = vmatmul.mubr.f32.gmra.mxu1 %v15202_v48  ;;  %20646 = vst [vmem:[#allocation65_spill] sm:$0xff] %v15271_v7 }
 0x2c3   : > { %v15212_v52 = vpop.f32.mrf.mxu0  ;;  %2624 = vmatmul.mubr.f32.gmra.mxu0 %v1697_v61  ;;  %10707 = vmatprep.mubr.msk.f32.mxu1 %vm1466_vm0, %v15207_v42  ;;  %v15250_v61 = vld [vmem:[#allocation6 + $0x60] sm:$0xff]  ;;  %v15311_v42 = vld [vmem:[#allocation6 + $0xb8] sm:$0xff] }
 0x2c4   : > { %10672 = vmatprep.mubr.msk.f32.mxu0 %vm1466_vm0, %v1700_v13  ;;  %20640 = vst [vmem:[#allocation62_spill] sm:$0xff] %v15250_v61  ;;  %v1706_v13 = vmul.f32 %v20641_v59, %v20641_v59 }
 0x2c5   : > { %v15225_v20 = vpop.f32.mrf.mxu0 }
 0x2c6   : > { %2968 = vmatmul.mubr.f32.gmra.mxu1 %v15218_v16 }
 0x2c7   : > { %v15228_v49 = vpop.f32.mrf.mxu0  ;;  %2630 = vmatmul.mubr.f32.gmra.mxu0 %v1699_v41  ;;  %10708 = vmatprep.mubr.msk.f32.mxu1 %vm1466_vm0, %v15223_v8  ;;  %v15299_v8 = vld [vmem:[#allocation6 + $0xa8] sm:$0xff] }
 0x2c8   : > { %10673 = vmatprep.mubr.msk.f32.mxu0 %vm1466_vm0, %v1702_v46  ;;  %v20643_v46 = vld [vmem:[#allocation71_spill] sm:$0xff]  ;;  %20654 = vst [vmem:[#allocation69_spill] sm:$0xff] %v15299_v8 }
 0x2c9   : > { %v15241_v60 = vpop.f32.mrf.mxu0  ;;  %v1705_v24 = vmul.f32 %v20643_v46, %v20643_v46  ;;  %v20647_v46 = vld [vmem:[#allocation73_spill] sm:$0xff]  ;;  %20658 = vst [vmem:[#allocation71_spill] sm:$0xff] %v15311_v42 }
 0x2ca   : > { %2974 = vmatmul.mubr.f32.gmra.mxu1 %v15234_v2 }
 0x2cb   : > { %v15244_v58 = vpop.f32.mrf.mxu0  ;;  %2636 = vmatmul.mubr.f32.gmra.mxu0 %v1701_v12  ;;  %10709 = vmatprep.mubr.msk.f32.mxu1 %vm1466_vm0, %v15239_v51  ;;  %v15266_v12 = vld [vmem:[#allocation6 + $0x70] sm:$0xff]  ;;  %v15287_v51 = vld [vmem:[#allocation6 + $0x98] sm:$0xff] }
 0x2cc   : > { %10674 = vmatprep.mubr.msk.f32.mxu0 %vm1466_vm0, %v1704_v0  ;;  %20644 = vst [vmem:[#allocation64_spill] sm:$0xff] %v15266_v12  ;;  %v1708_v0 = vmul.f32 %v20645_v54, %v20645_v54  ;;  %20650 = vst [vmem:[#allocation67_spill] sm:$0xff] %v15287_v51 }
 0x2cd   : > { %v15257_v41 = vpop.f32.mrf.mxu0 }
 0x2ce   : > { %2980 = vmatmul.mubr.f32.gmra.mxu1 %v15250_v61  ;;  %v1707_v61 = vmul.f32 %v20647_v46, %v20647_v46 }
 0x2cf   : > { %v15260_v6 = vpop.f32.mrf.mxu0  ;;  %2642 = vmatmul.mubr.f32.gmra.mxu0 %v1703_v3  ;;  %10710 = vmatprep.mubr.msk.f32.mxu1 %vm1466_vm0, %v15255_v4  ;;  %v15282_v4 = vld [vmem:[#allocation6 + $0x80] sm:$0xff] }
 0x2d0   : > { %10675 = vmatprep.mubr.msk.f32.mxu0 %vm1466_vm0, %v1706_v13  ;;  %20648 = vst [vmem:[#allocation66_spill] sm:$0xff] %v15282_v4  ;;  %v20649_v13 = vld [vmem:[#allocation74_spill] sm:$0xff] }
 0x2d1   : > { %v15273_v59 = vpop.f32.mrf.mxu0  ;;  %v1710_v54 = vmul.f32 %v20649_v13, %v20649_v13 }
 0x2d2   : > { %2986 = vmatmul.mubr.f32.gmra.mxu1 %v15266_v12 }
 0x2d3   : > { %v15276_v3 = vpop.f32.mrf.mxu0  ;;  %2648 = vmatmul.mubr.f32.gmra.mxu0 %v1705_v24  ;;  %10711 = vmatprep.mubr.msk.f32.mxu1 %vm1466_vm0, %v15271_v7  ;;  %v20651_v24 = vld [vmem:[#allocation75_spill] sm:$0xff]  ;;  %v15294_v7 = vld [vmem:[#allocation6 + $0x90] sm:$0xff] }
 0x2d4   : > { %10676 = vmatprep.mubr.msk.f32.mxu0 %vm1466_vm0, %v1708_v0  ;;  %v1709_v46 = vmul.f32 %v20651_v24, %v20651_v24  ;;  %20652 = vst [vmem:[#allocation68_spill] sm:$0xff] %v15294_v7  ;;  %v20653_v0 = vld [vmem:[#allocation76_spill] sm:$0xff] }
 0x2d5   : > { %v2363_v2 = vpop.f32.mrf.mxu0  ;;  %v1712_v13 = vmul.f32 %v20653_v0, %v20653_v0 }
 0x2d6   : > { %2992 = vmatmul.mubr.f32.gmra.mxu1 %v15282_v4 }
 0x2d7   : > { %v2367_v12 = vpop.f32.mrf.mxu0  ;;  %2654 = vmatmul.mubr.f32.gmra.mxu0 %v1707_v61  ;;  %10712 = vmatprep.mubr.msk.f32.mxu1 %vm1466_vm0, %v15287_v51  ;;  %v20655_v61 = vld [vmem:[#allocation77_spill] sm:$0xff]  ;;  %v15306_v51 = vld [vmem:[#allocation6 + $0xa0] sm:$0xff] }
 0x2d8   : > { %10677 = vmatprep.mubr.msk.f32.mxu0 %vm1466_vm0, %v1710_v54  ;;  %v1711_v24 = vmul.f32 %v20655_v61, %v20655_v61  ;;  %20656 = vst [vmem:[#allocation70_spill] sm:$0xff] %v15306_v51  ;;  %v20657_v54 = vld [vmem:[#allocation78_spill] sm:$0xff]  ;;  %v15318_v61 = vld [vmem:[#allocation6 + $0xb0] sm:$0xff] }
 0x2d9   : > { %v2369_v16 = vpop.f32.mrf.mxu0  ;;  %v1714_v0 = vmul.f32 %v20657_v54, %v20657_v54 }
 0x2da   : > { %2998 = vmatmul.mubr.f32.gmra.mxu1 %v15294_v7 }
 0x2db   : > { %v2373_v4 = vpop.f32.mrf.mxu0  ;;  %2660 = vmatmul.mubr.f32.gmra.mxu0 %v1709_v46  ;;  %10713 = vmatprep.mubr.msk.f32.mxu1 %vm1466_vm0, %v15299_v8  ;;  %v1713_v46 = vmul.f32 %v14880_v43, %v14880_v43  ;;  %v1715_v43 = vmul.f32 %v14889_v39, %v14889_v39  ;;  %v15343_v39 = vld [vmem:[#allocation6 + $0xd8] sm:$0xff] }
 0x2dc   : > { %10678 = vmatprep.mubr.msk.f32.mxu0 %vm1466_vm0, %v1712_v13  ;;  %v20659_v13 = vld [vmem:[#allocation79_spill] sm:$0xff] }
 0x2dd   : > { %v2375_v48 = vpop.f32.mrf.mxu0  ;;  %v1716_v54 = vmul.f32 %v20659_v13, %v20659_v13 }
 0x2de   : > { %3004 = vmatmul.mubr.f32.gmra.mxu1 %v15306_v51  ;;  %v15324_v51 = vld [vmem:[#allocation6 + $0xc8] sm:$0xff] }
 0x2df   : > { %v2379_v7 = vpop.f32.mrf.mxu0  ;;  %2666 = vmatmul.mubr.f32.gmra.mxu0 %v1711_v24  ;;  %10714 = vmatprep.mubr.msk.f32.mxu1 %vm1466_vm0, %v15311_v42  ;;  %v15330_v42 = vld [vmem:[#allocation6 + $0xc0] sm:$0xff] }
 0x2e0   : > { %10679 = vmatprep.mubr.msk.f32.mxu0 %vm1466_vm0, %v1714_v0  ;;  %v15334_v0 = vld [vmem:[%s14442_s5 + $0x8] sm:$0xff] }
 0x2e1   : > { %v2381_v8 = vpop.f32.mrf.mxu0  ;;  %20660 = vst [vmem:[#allocation72_spill] sm:$0xff] %v15334_v0 }
 0x2e2   : > { %3070 = vmatprep.subr.mxu1 %v2381_v8  ;;  %3010 = vmatmul.mubr.f32.gmra.mxu1 %v15318_v61  ;;  %v1718_v8 = vmul.f32 %v15334_v0, %v14694_v25  ;;  %v13116_v0 = vld [vmem:[%s14442_s5 + $0x100] sm:$0xff] }
 0x2e3   : > { %v15326_v24 = vpop.f32.mrf.mxu0  ;;  %2672 = vmatmul.mubr.f32.gmra.mxu0 %v1713_v46  ;;  %3071 = vmatpush1.msra.mxu1 %v2379_v7  ;;  %v15348_v7 = vld [vmem:[%s14442_s5] sm:$0xff]  ;;  %v15352_v46 = vld [vmem:[#allocation6 + $0xd0] sm:$0xff] }
 0x2e4   : > { %3072 = vmatprep.subr.mxu1 %v2375_v48  ;;  %10680 = vmatprep.mubr.msk.f32.mxu0 %vm1466_vm0, %v1716_v54  ;;  %20661 = vst [vmem:[#allocation73_spill] sm:$0xff] %v15348_v7  ;;  %v1717_v25 = vmul.f32 %v15348_v7, %v14700_v26  ;;  %v15367_v26 = vld [vmem:[#allocation6 + $0xe8] sm:$0xff] }
 0x2e5   : > { %v15338_v13 = vpop.f32.mrf.mxu0  ;;  %3073 = vmatpush1.msra.mxu1 %v2373_v4  ;;  %10715 = vmatprep.mubr.msk.f32.mxu1 %vm1466_vm0, %v15324_v51 }
 0x2e6   : > { %3074 = vmatprep.subr.mxu1 %v2369_v16  ;;  %3016 = vmatmul.mubr.f32.gmra.mxu1 %v15330_v42  ;;  %v15356_v16 = vld [vmem:[%s14442_s5 + $0x18] sm:$0xff] }
 0x2e7   : > { %v15345_v48 = vpop.f32.mrf.mxu0  ;;  %2678 = vmatmul.mubr.f32.gmra.mxu0 %v1715_v43  ;;  %3075 = vmatpush1.msra.mxu1 %v2367_v12  ;;  %20662 = vst [vmem:[#allocation74_spill] sm:$0xff] %v15356_v16  ;;  %v1720_v4 = vmul.f32 %v15356_v16, %v14703_v27  ;;  %v15373_v12 = vld [vmem:[%s14442_s5 + $0x10] sm:$0xff] }
 0x2e8   : > { %3076 = vmatprep.subr.mxu1 %v2363_v2  ;;  %10681 = vmatprep.mubr.msk.f32.mxu0 %vm1466_vm0, %v1718_v8  ;;  %20663 = vst [vmem:[#allocation75_spill] sm:$0xff] %v15373_v12  ;;  %v1719_v27 = vmul.f32 %v15373_v12, %v14709_v28  ;;  %v15393_v28 = vld [vmem:[#allocation6 + $0xf8] sm:$0xff] }
 0x2e9   : > { %v15360_v54 = vpop.f32.mrf.mxu0  ;;  %3077 = vmatpush1.msra.mxu1 %v15276_v3  ;;  %10716 = vmatprep.mubr.msk.f32.mxu1 %vm1466_vm0, %v15343_v39  ;;  %v15377_v3 = vld [vmem:[#allocation6 + $0xe0] sm:$0xff] }
 0x2ea   : > { %3078 = vmatprep.subr.mxu1 %v15273_v59  ;;  %3022 = vmatmul.mubr.f32.gmra.mxu1 %v15352_v46  ;;  %v15382_v59 = vld [vmem:[%s14442_s5 + $0x28] sm:$0xff]  ;;  %v20677_v12 = vld [vmem:[#allocation62_spill] sm:$0xff] }
 0x2eb   : > { %v15369_v2 = vpop.f32.mrf.mxu0  ;;  %2684 = vmatmul.mubr.f32.gmra.mxu0 %v1717_v25  ;;  %3079 = vmatpush1.msra.mxu1 %v15260_v6  ;;  %20664 = vst [vmem:[#allocation76_spill] sm:$0xff] %v15382_v59  ;;  %v1722_v43 = vmul.f32 %v15382_v59, %v14712_v29  ;;  %v15399_v6 = vld [vmem:[%s14442_s5 + $0x20] sm:$0xff] }
 0x2ec   : > { %3080 = vmatprep.subr.mxu1 %v15257_v41  ;;  %10682 = vmatprep.mubr.msk.f32.mxu0 %vm1466_vm0, %v1720_v4  ;;  %20665 = vst [vmem:[#allocation77_spill] sm:$0xff] %v15399_v6  ;;  %v1721_v29 = vmul.f32 %v15399_v6, %v14718_v30  ;;  %v15419_v30 = vld [vmem:[#allocation6 + $0x108] sm:$0xff]  ;;  %v13112_v6 = vld [vmem:[%s14442_s5 + $0xf0] sm:$0xff] }
 0x2ed   : > { %v15386_v8 = vpop.f32.mrf.mxu0  ;;  %3081 = vmatpush1.msra.mxu1 %v15244_v58  ;;  %10717 = vmatprep.mubr.msk.f32.mxu1 %vm1466_vm0, %v15367_v26  ;;  %v15403_v58 = vld [vmem:[#allocation6 + $0xf0] sm:$0xff] }
 0x2ee   : > { %3082 = vmatprep.subr.mxu1 %v15241_v60  ;;  %3028 = vmatmul.mubr.f32.gmra.mxu1 %v15377_v3  ;;  %v15408_v60 = vld [vmem:[%s14442_s5 + $0x38] sm:$0xff] }
 0x2ef   : > { %v15395_v41 = vpop.f32.mrf.mxu0  ;;  %2690 = vmatmul.mubr.f32.gmra.mxu0 %v1719_v27  ;;  %3083 = vmatpush1.msra.mxu1 %v15228_v49  ;;  %20666 = vst [vmem:[#allocation78_spill] sm:$0xff] %v15408_v60  ;;  %v1724_v25 = vmul.f32 %v15408_v60, %v14721_v31  ;;  %v15425_v49 = vld [vmem:[%s14442_s5 + $0x30] sm:$0xff] }
 0x2f0   : > { %3084 = vmatprep.subr.mxu1 %v15225_v20  ;;  %10683 = vmatprep.mubr.msk.f32.mxu0 %vm1466_vm0, %v1722_v43  ;;  %20667 = vst [vmem:[#allocation79_spill] sm:$0xff] %v15425_v49  ;;  %v1723_v31 = vmul.f32 %v15425_v49, %v14727_v32  ;;  %v15443_v32 = vld [vmem:[#allocation6 + $0x118] sm:$0xff]  ;;  %v20675_v49 = vld [vmem:[#allocation60_spill] sm:$0xff] }
 0x2f1   : > { %v15412_v4 = vpop.f32.mrf.mxu0  ;;  %3085 = vmatpush1.msra.mxu1 %v15212_v52  ;;  %10718 = vmatprep.mubr.msk.f32.mxu1 %vm1466_vm0, %v15393_v28  ;;  %v15429_v52 = vld [vmem:[#allocation6 + $0x100] sm:$0xff] }
 0x2f2   : > { %3086 = vmatprep.subr.mxu1 %v15209_v55  ;;  %3034 = vmatmul.mubr.f32.gmra.mxu1 %v15403_v58  ;;  %v15434_v55 = vld [vmem:[%s14442_s5 + $0x48] sm:$0xff] }
 0x2f3   : > { %v15421_v20 = vpop.f32.mrf.mxu0  ;;  %2696 = vmatmul.mubr.f32.gmra.mxu0 %v1721_v29  ;;  %3087 = vmatpush1.msra.mxu1 %v15196_v53  ;;  %20668 = vst [vmem:[#allocation80_spill] sm:$0xff] %v15434_v55  ;;  %v1726_v27 = vmul.f32 %v15434_v55, %v14730_v33  ;;  %v15447_v53 = vld [vmem:[%s14442_s5 + $0x40] sm:$0xff] }
 0x2f4   : > { %3088 = vmatprep.subr.mxu1 %v15193_v1  ;;  %10684 = vmatprep.mubr.msk.f32.mxu0 %vm1466_vm0, %v1724_v25  ;;  %20669 = vst [vmem:[#allocation81_spill] sm:$0xff] %v15447_v53  ;;  %v1725_v33 = vmul.f32 %v15447_v53, %v14736_v34  ;;  %v15462_v34 = vld [vmem:[#allocation6 + $0x128] sm:$0xff]  ;;  %v13108_v53 = vld [vmem:[%s14442_s5 + $0xe0] sm:$0xff] }
 0x2f5   : > { %v2411_v43 = vpop.f32.mrf.mxu0  ;;  %3089 = vmatpush1.msra.mxu1 %v15180_v62  ;;  %10719 = vmatprep.mubr.msk.f32.mxu1 %vm1466_vm0, %v15419_v30  ;;  %v15451_v62 = vld [vmem:[#allocation6 + $0x110] sm:$0xff] }
 0x2f6   : > { %3090 = vmatprep.subr.mxu1 %v15177_v47  ;;  %3040 = vmatmul.mubr.f32.gmra.mxu1 %v15429_v52  ;;  %v13075_v47 = vld [vmem:[%s14442_s5 + $0x58] sm:$0xff] }
 0x2f7   : > { %v2415_v1 = vpop.f32.mrf.mxu0  ;;  %2702 = vmatmul.mubr.f32.gmra.mxu0 %v1723_v31  ;;  %3091 = vmatpush1.msra.mxu1 %v15164_v23  ;;  %v1728_v29 = vmul.f32 %v13075_v47, %v14739_v35 }
 0x2f8   : > { %3092 = vmatprep.subr.mxu1 %v15160_v10  ;;  %10685 = vmatprep.mubr.msk.f32.mxu0 %vm1466_vm0, %v1726_v27  ;;  %v15468_v10 = vld [vmem:[%s14442_s5 + $0x50] sm:$0xff] }
 0x2f9   : > { %v2417_v25 = vpop.f32.mrf.mxu0  ;;  %3093 = vmatpush1.msra.mxu1 %v15147_v19  ;;  %10720 = vmatprep.mubr.msk.f32.mxu1 %vm1466_vm0, %v15443_v32  ;;  %20670 = vst [vmem:[#allocation82_spill] sm:$0xff] %v15468_v10  ;;  %v1727_v35 = vmul.f32 %v15468_v10, %v14745_v36  ;;  %v15472_v19 = vld [vmem:[#allocation6 + $0x120] sm:$0xff]  ;;  %v15485_v36 = vld [vmem:[#allocation6 + $0x138] sm:$0xff] }
 0x2fa   : > { %3094 = vmatprep.subr.mxu1 %v15143_v18  ;;  %3046 = vmatmul.mubr.f32.gmra.mxu1 %v15451_v62  ;;  %v13077_v18 = vld [vmem:[%s14442_s5 + $0x68] sm:$0xff]  ;;  %v20673_v10 = vld [vmem:[#allocation58_spill] sm:$0xff] }
 0x2fb   : > { %v15464_v23 = vpop.f32.mrf.mxu0  ;;  %2708 = vmatmul.mubr.f32.gmra.mxu0 %v1725_v33  ;;  %3095 = vmatpush1.msra.mxu1 %v15135_v15  ;;  %v1730_v31 = vmul.f32 %v13077_v18, %v14748_v37  ;;  %v13078_v15 = vld [vmem:[%s14442_s5 + $0x60] sm:$0xff] }
 0x2fc   : > { %3096 = vmatprep.subr.mxu1 %v15133_v17  ;;  %10686 = vmatprep.mubr.msk.f32.mxu0 %vm1466_vm0, %v1728_v29  ;;  %v1729_v37 = vmul.f32 %v13078_v15, %v20610_v57  ;;  %v13080_v57 = vld [vmem:[%s14442_s5 + $0x70] sm:$0xff]  ;;  %v13085_v15 = vld [vmem:[%s14450_s26 + $0x80] sm:$0xff] }
 0x2fd   : > { %v15478_v27 = vpop.f32.mrf.mxu0  ;;  %3097 = vmatpush1.msra.mxu1 %v15126_v44  ;;  %10721 = vmatprep.mubr.msk.f32.mxu1 %vm1466_vm0, %v15462_v34  ;;  %v15492_v44 = vld [vmem:[#allocation6 + $0x130] sm:$0xff] }
 0x2fe   : > { %3098 = vmatprep.subr.mxu1 %v15123_v14  ;;  %3052 = vmatmul.mubr.f32.gmra.mxu1 %v15472_v19  ;;  %v13079_v14 = vld [vmem:[%s14442_s5 + $0x78] sm:$0xff] }
 0x2ff   : > { %v15487_v17 = vpop.f32.mrf.mxu0  ;;  %2714 = vmatmul.mubr.f32.gmra.mxu0 %v1727_v35  ;;  %3099 = vmatpush1.msra.mxu1 %v15114_v40  ;;  %v1732_v33 = vmul.f32 %v13079_v14, %v20611_v45  ;;  %v15504_v40 = vld [vmem:[#allocation6 + $0x148] sm:$0x3f]  ;;  %v13081_v45 = vld [vmem:[%s14450_s26 + $0x70] sm:$0xff]  ;;  %v15510_v35 = vld [vmem:[#allocation6 + $0x140] sm:$0x3f] }
 0x300   : > { %3100 = vmatprep.subr.mxu1 %v15110_v63  ;;  %10687 = vmatprep.mubr.msk.f32.mxu0 %vm1466_vm0, %v1730_v31  ;;  %v1731_v29 = vmul.f32 %v13081_v45, %v13080_v57  ;;  %v13089_v57 = vld [vmem:[%s14450_s26 + $0x90] sm:$0xff] }
 0x301   : > { %v15498_v47 = vpop.f32.mrf.mxu0  ;;  %3101 = vmatpush1.msra.mxu1 %v15101_v50  ;;  %10722 = vmatprep.mubr.msk.f32.mxu1 %vm1466_vm0, %v15485_v36  ;;  %v13082_v50 = vld [vmem:[%s14442_s5 + $0x88] sm:$0xff] }
 0x302   : > { %3122 = vmatprep.subr.mxu1 %v2417_v25  ;;  %3058 = vmatmul.mubr.f32.gmra.mxu1 %v15492_v44  ;;  %v13083_v25 = vld [vmem:[%s14450_s26 + $0x88] sm:$0xff] }
 0x303   : > { %v15506_v63 = vpop.f32.mrf.mxu0  ;;  %2720 = vmatmul.mubr.f32.gmra.mxu0 %v1729_v37  ;;  %3123 = vmatpush2.msra.mxu1 %v2415_v1  ;;  %v1734_v18 = vmul.f32 %v13083_v25, %v13082_v50  ;;  %v13093_v50 = vld [vmem:[%s14450_s26 + $0xa0] sm:$0xff] }
 0x304   : > { %3124 = vmatprep.subr.mxu1 %v2411_v43  ;;  %10688 = vmatprep.mubr.msk.f32.mxu0 %vm1466_vm0, %v1732_v33  ;;  %v13084_v43 = vld [vmem:[%s14442_s5 + $0x80] sm:$0xff] }
 0x305   : > { %v15515_v31 = vpop.f32.mrf.mxu0  ;;  %3125 = vmatpush2.msra.mxu1 %v15421_v20  ;;  %10723 = vmatprep.mubr.msk.f32.mxu1 %vm1466_vm0, %v15504_v40  ;;  %v1733_v37 = vmul.f32 %v13085_v15, %v13084_v43  ;;  %v13086_v20 = vld [vmem:[%s14442_s5 + $0x98] sm:$0xff] }
 0x306   : > { %3126 = vmatprep.subr.mxu1 %v15412_v4  ;;  %3064 = vmatmul.mubr.f32.gmra.mxu1 %v15510_v35  ;;  %v13087_v4 = vld [vmem:[%s14450_s26 + $0x98] sm:$0xff] }
 0x307   : > { %v15522_v1 = vpop.f32.mrf.mxu0  ;;  %2726 = vmatmul.mubr.f32.gmra.mxu0 %v1731_v29  ;;  %3127 = vmatpush2.msra.mxu1 %v15395_v41  ;;  %v1736_v14 = vmul.f32 %v13087_v4, %v13086_v20  ;;  %v13095_v43 = vld [vmem:[%s14450_s26 + $0xb8] sm:$0xff]  ;;  %v13096_v20 = vld [vmem:[%s14442_s5 + $0xb0] sm:$0xff] }
 0x308   : > { %3128 = vmatprep.subr.mxu1 %v15386_v8  ;;  %10689 = vmatprep.mubr.msk.f32.mxu0 %vm1466_vm0, %v1734_v18  ;;  %v13088_v8 = vld [vmem:[%s14442_s5 + $0x90] sm:$0xff]  ;;  %v13094_v18 = vld [vmem:[%s14442_s5 + $0xb8] sm:$0xff] }
 0x309   : > { %v15531_v33 = vpop.f32.mrf.mxu0  ;;  %3129 = vmatpush2.msra.mxu1 %v15369_v2  ;;  %10724 = vmatprep.mubr.msk.f32.mxu1 %vm1466_vm0, %v14899_v38  ;;  %v1735_v45 = vmul.f32 %v13089_v57, %v13088_v8  ;;  %v13090_v2 = vld [vmem:[%s14442_s5 + $0xa8] sm:$0xff]  ;;  %v13097_v4 = vld [vmem:[%s14450_s26 + $0xb0] sm:$0xff] }
 0x30a   : > { %3130 = vmatprep.subr.mxu1 %v15360_v54  ;;  %v13091_v38 = vld [vmem:[%s14450_s26 + $0xa8] sm:$0xff] }
 0x30b   : > { %v15537_v41 = vpop.f32.mrf.mxu0  ;;  %2732 = vmatmul.mubr.f32.gmra.mxu0 %v1733_v37  ;;  %3131 = vmatpush2.msra.mxu1 %v15345_v48  ;;  %v1738_v29 = vmul.f32 %v13091_v38, %v13090_v2  ;;  %v13098_v8 = vld [vmem:[%s14442_s5 + $0xc8] sm:$0xff] }
 0x30c   : > { %3132 = vmatprep.subr.mxu1 %v15338_v13  ;;  %10690 = vmatprep.mubr.msk.f32.mxu0 %vm1466_vm0, %v1736_v14  ;;  %v13092_v13 = vld [vmem:[%s14442_s5 + $0xa0] sm:$0xff]  ;;  %v1739_v14 = vmul.f32 %v13097_v4, %v13096_v20  ;;  %v13099_v57 = vld [vmem:[%s14450_s26 + $0xc8] sm:$0xff] }
 0x30d   : > { %v15546_v54 = vpop.f32.mrf.mxu0  ;;  %3133 = vmatpush2.msra.mxu1 %v15326_v24  ;;  %v1737_v25 = vmul.f32 %v13093_v50, %v13092_v13  ;;  %v1740_v24 = vmul.f32 %v13095_v43, %v13094_v18  ;;  %v13101_v13 = vld [vmem:[%s14450_s26 + $0xc0] sm:$0xff]  ;;  %v13103_v18 = vld [vmem:[%s14450_s26 + $0xd8] sm:$0xff]  ;;  %v20671_v20 = vld [vmem:[#allocation56_spill] sm:$0xff] }
 0x30e   : > { %3135 = vmatmul.mubr.f32.vlgmr.msra.gmra.mxu1 %v15152_v21 }
 0x30f   : > { %v15550_v48 = vpop.f32.mrf.mxu0  ;;  %2738 = vmatmul.mubr.f32.gmra.mxu0 %v1735_v45  ;;  %10725 = vmatprep.mubr.msk.f32.mxu1 %vm1466_vm0, %v15158_v11  ;;  %v1742_v45 = vmul.f32 %v13099_v57, %v13098_v8  ;;  %v13104_v8 = vld [vmem:[%s14442_s5 + $0xd0] sm:$0xff] }
 0x310   : > { %10691 = vmatprep.mubr.msk.f32.mxu0 %vm1466_vm0, %v1738_v29  ;;  %v13100_v29 = vld [vmem:[%s14442_s5 + $0xc0] sm:$0xff]  ;;  %v13105_v57 = vld [vmem:[%s14450_s26 + $0xd0] sm:$0xff] }
 0x311   : > { %v15559_v15 = vpop.f32.mrf.mxu0  ;;  %v1741_v50 = vmul.f32 %v13101_v13, %v13100_v29  ;;  %v13106_v29 = vld [vmem:[%s14442_s5 + $0xe8] sm:$0xff] }
 0x312   : > { %3141 = vmatmul.mubr.f32.gmra.mxu1 %v15170_v22  ;;  %v13107_v13 = vld [vmem:[%s14450_s26 + $0xe8] sm:$0xff]  ;;  %v13135_v22 = vld [vmem:[%s14450_s26 + $0x158] sm:$0xff] }
 0x313   : > { %v15562_v37 = vpop.f32.mrf.mxu0  ;;  %2744 = vmatmul.mubr.f32.gmra.mxu0 %v1737_v25  ;;  %10726 = vmatprep.mubr.msk.f32.mxu1 %vm1466_vm0, %v15175_v9  ;;  %v13102_v25 = vld [vmem:[%s14442_s5 + $0xd8] sm:$0xff]  ;;  %v20686_v9 = vld [vmem:[#allocation71_spill] sm:$0xff] }
 0x314   : > { %10692 = vmatprep.mubr.msk.f32.mxu0 %vm1466_vm0, %v1740_v24  ;;  %v1744_v43 = vmul.f32 %v13103_v18, %v13102_v25  ;;  %v1746_v25 = vmul.f32 %v13107_v13, %v13106_v29  ;;  %v13111_v29 = vld [vmem:[%s14450_s26 + $0xf8] sm:$0xff] }
 0x315   : > { %v15571_v2 = vpop.f32.mrf.mxu0 }
 0x316   : > { %3147 = vmatmul.mubr.f32.gmra.mxu1 %v15186_v5 }
 0x317   : > { %v15574_v38 = vpop.f32.mrf.mxu0  ;;  %2750 = vmatmul.mubr.f32.gmra.mxu0 %v1739_v14  ;;  %10727 = vmatprep.mubr.msk.f32.mxu1 %vm1466_vm0, %v15191_v56  ;;  %v20672_v14 = vld [vmem:[#allocation57_spill] sm:$0xff] }
 0x318   : > { %10693 = vmatprep.mubr.msk.f32.mxu0 %vm1466_vm0, %v1742_v45  ;;  %v1743_v45 = vmul.f32 %v13105_v57, %v13104_v8  ;;  %v13109_v8 = vld [vmem:[%s14450_s26 + $0xe0] sm:$0xff]  ;;  %v13110_v57 = vld [vmem:[%s14442_s5 + $0xf8] sm:$0xff] }
 0x319   : > { %v15583_v24 = vpop.f32.mrf.mxu0  ;;  %v1748_v13 = vmul.f32 %v13111_v29, %v13110_v57  ;;  %v13115_v57 = vld [vmem:[%s14450_s26 + $0x108] sm:$0xff]  ;;  %v20684_v56 = vld [vmem:[#allocation69_spill] sm:$0xff] }
 0x31a   : > { %3153 = vmatmul.mubr.f32.gmra.mxu1 %v20671_v20  ;;  %v20683_v20 = vld [vmem:[#allocation68_spill] sm:$0xff] }
 0x31b   : > { %v15586_v4 = vpop.f32.mrf.mxu0  ;;  %2756 = vmatmul.mubr.f32.gmra.mxu0 %v1741_v50  ;;  %10728 = vmatprep.mubr.msk.f32.mxu1 %vm1466_vm0, %v20672_v14  ;;  %v20674_v50 = vld [vmem:[#allocation59_spill] sm:$0xff] }
 0x31c   : > { %10694 = vmatprep.mubr.msk.f32.mxu0 %vm1466_vm0, %v1744_v43  ;;  %v1745_v43 = vmul.f32 %v13109_v8, %v13108_v53  ;;  %v13113_v53 = vld [vmem:[%s14450_s26 + $0xf0] sm:$0xff]  ;;  %v13114_v8 = vld [vmem:[%s14442_s5 + $0x108] sm:$0xff] }
 0x31d   : > { %v15595_v18 = vpop.f32.mrf.mxu0  ;;  %v1750_v29 = vmul.f32 %v13115_v57, %v13114_v8  ;;  %v13119_v8 = vld [vmem:[%s14450_s26 + $0x118] sm:$0xff]  ;;  %v20682_v14 = vld [vmem:[#allocation67_spill] sm:$0xff] }
 0x31e   : > { %3159 = vmatmul.mubr.f32.gmra.mxu1 %v20673_v10 }
 0x31f   : > { %v15598_v55 = vpop.f32.mrf.mxu0  ;;  %2762 = vmatmul.mubr.f32.gmra.mxu0 %v1743_v45  ;;  %10729 = vmatprep.mubr.msk.f32.mxu1 %vm1466_vm0, %v20674_v50  ;;  %v20676_v45 = vld [vmem:[#allocation61_spill] sm:$0xff] }
 0x320   : > { %10695 = vmatprep.mubr.msk.f32.mxu0 %vm1466_vm0, %v1746_v25  ;;  %v1747_v25 = vmul.f32 %v13113_v53, %v13112_v6  ;;  %v13117_v6 = vld [vmem:[%s14450_s26 + $0x100] sm:$0xff]  ;;  %v13118_v53 = vld [vmem:[%s14442_s5 + $0x118] sm:$0xff] }
 0x321   : > { %v15607_v60 = vpop.f32.mrf.mxu0  ;;  %v1752_v57 = vmul.f32 %v13119_v8, %v13118_v53  ;;  %v13123_v53 = vld [vmem:[%s14450_s26 + $0x128] sm:$0xff] }
 0x322   : > { %3165 = vmatmul.mubr.f32.gmra.mxu1 %v20675_v49 }
 0x323   : > { %v15610_v59 = vpop.f32.mrf.mxu0  ;;  %2768 = vmatmul.mubr.f32.gmra.mxu0 %v1745_v43  ;;  %10730 = vmatprep.mubr.msk.f32.mxu1 %vm1466_vm0, %v20676_v45  ;;  %v20678_v43 = vld [vmem:[#allocation63_spill] sm:$0xff] }
 0x324   : > { %10696 = vmatprep.mubr.msk.f32.mxu0 %vm1466_vm0, %v1748_v13  ;;  %v1749_v13 = vmul.f32 %v13117_v6, %v13116_v0  ;;  %v13121_v0 = vld [vmem:[%s14450_s26 + $0x110] sm:$0xff]  ;;  %v13122_v6 = vld [vmem:[%s14442_s5 + $0x128] sm:$0xff] }
 0x325   : > { %v15619_v16 = vpop.f32.mrf.mxu0  ;;  %v1754_v8 = vmul.f32 %v13123_v53, %v13122_v6 }
 0x326   : > { %3171 = vmatmul.mubr.f32.gmra.mxu1 %v20677_v12  ;;  %v20679_v12 = vld [vmem:[#allocation64_spill] sm:$0xff] }
 0x327   : > { %v15622_v7 = vpop.f32.mrf.mxu0  ;;  %2774 = vmatmul.mubr.f32.gmra.mxu0 %v1747_v25  ;;  %10731 = vmatprep.mubr.msk.f32.mxu1 %vm1466_vm0, %v20678_v43  ;;  %v20680_v25 = vld [vmem:[#allocation65_spill] sm:$0xff] }
 0x328   : > { %10697 = vmatprep.mubr.msk.f32.mxu0 %vm1466_vm0, %v1750_v29  ;;  %v13120_v43 = vld [vmem:[%s14442_s5 + $0x110] sm:$0xff] }
 0x329   : > { %v15631_v45 = vpop.f32.mrf.mxu0  ;;  %v1751_v29 = vmul.f32 %v13121_v0, %v13120_v43  ;;  %v13127_v0 = vld [vmem:[%s14450_s26 + $0x138] sm:$0xff] }
 0x32a   : > { %3177 = vmatmul.mubr.f32.gmra.mxu1 %v20679_v12  ;;  %v20681_v12 = vld [vmem:[#allocation66_spill] sm:$0xff] }
 0x32b   : > { %v15634_v49 = vpop.f32.mrf.mxu0  ;;  %10732 = vmatprep.mubr.msk.f32.mxu1 %vm1466_vm0, %v20680_v25  ;;  %2780 = vmatmul.mubr.f32.gmra.mxu0 %v1749_v13  ;;  %v13124_v13 = vld [vmem:[%s14442_s5 + $0x120] sm:$0xff] }
 0x32c   : > { %10698 = vmatprep.mubr.msk.f32.mxu0 %vm1466_vm0, %v1752_v57  ;;  %v13125_v25 = vld [vmem:[%s14450_s26 + $0x120] sm:$0xff]  ;;  %v13126_v57 = vld [vmem:[%s14442_s5 + $0x138] sm:$0xff] }
 0x32d   : > { %v2495_v50 = vpop.f32.mrf.mxu0  ;;  %v1753_v43 = vmul.f32 %v13125_v25, %v13124_v13  ;;  %v1756_v6 = vmul.f32 %v13127_v0, %v13126_v57  ;;  %v13130_v25 = vld [vmem:[%s14442_s5 + $0x148] sm:$0xff]  ;;  %v20685_v0 = vld [vmem:[#allocation70_spill] sm:$0xff] }
 0x32e   : > { %3183 = vmatmul.mubr.f32.gmra.mxu1 %v20681_v12 }
 0x32f   : > { %v2499_v10 = vpop.f32.mrf.mxu0  ;;  %10733 = vmatprep.mubr.msk.f32.mxu1 %vm1466_vm0, %v20682_v14  ;;  %2786 = vmatmul.mubr.f32.gmra.mxu0 %v1751_v29  ;;  %v13128_v29 = vld [vmem:[%s14442_s5 + $0x130] sm:$0xff] }
 0x330   : > { %10699 = vmatprep.mubr.msk.f32.mxu0 %vm1466_vm0, %v1754_v8  ;;  %v13129_v14 = vld [vmem:[%s14450_s26 + $0x130] sm:$0xff]  ;;  %v13131_v8 = vld [vmem:[%s14450_s26 + $0x148] sm:$0xff] }
 0x331   : > { %v2501_v53 = vpop.f32.mrf.mxu0  ;;  %v1755_v5 = vmul.f32 %v13129_v14, %v13128_v29  ;;  %v1758_v13 = vmul.f32 %v13131_v8, %v13130_v25  ;;  %v13133_v14 = vld [vmem:[%s14450_s26 + $0x140] sm:$0xff]  ;;  %v13137_v8 = vld [vmem:[%s14450_s26 + $0x150] sm:$0xff] }
 0x332   : > { %3189 = vmatmul.mubr.f32.gmra.mxu1 %v20683_v20 }
 0x333   : > { %v2505_v12 = vpop.f32.mrf.mxu0  ;;  %10734 = vmatprep.mubr.msk.f32.mxu1 %vm1466_vm0, %v20684_v56  ;;  %2792 = vmatmul.mubr.f32.gmra.mxu0 %v1753_v43  ;;  %v13132_v43 = vld [vmem:[%s14442_s5 + $0x140] sm:$0xff] }
 0x334   : > { %10700 = vmatprep.mubr.msk.f32.mxu0 %vm1466_vm0, %v1756_v6  ;;  %v1757_v29 = vmul.f32 %v13133_v14, %v13132_v43  ;;  %v13134_v6 = vld [vmem:[%s14442_s5 + $0x158] sm:$0xff] }
 0x335   : > { %v2507_v57 = vpop.f32.mrf.mxu0  ;;  %v1760_v11 = vmul.f32 %v13135_v22, %v13134_v6  ;;  %v20694_v43 = vld [vmem:[#allocation58_spill] sm:$0xff]  ;;  %v20696_v6 = vld [vmem:[#allocation59_spill] sm:$0xff] }
 0x336   : > { %3195 = vmatmul.mubr.f32.gmra.mxu1 %v20685_v0 }
 0x337   : > { %v2511_v20 = vpop.f32.mrf.mxu0  ;;  %10735 = vmatprep.mubr.msk.f32.mxu1 %vm1466_vm0, %v20686_v9  ;;  %2798 = vmatmul.mubr.f32.gmra.mxu0 %v1755_v5  ;;  %v13136_v5 = vld [vmem:[%s14442_s5 + $0x150] sm:$0xff] }
 0x338   : > { %10701 = vmatprep.mubr.msk.f32.mxu0 %vm1466_vm0, %v1758_v13  ;;  %v1759_v13 = vmul.f32 %v13137_v8, %v13136_v5  ;;  %v20698_v8 = vld [vmem:[#allocation60_spill] sm:$0xff] }
 0x339   : > { %v2513_v56 = vpop.f32.mrf.mxu0 }
 0x33a   : > { %3201 = vmatmul.mubr.f32.gmra.mxu1 %v15318_v61  ;;  %3261 = vmatprep.subr.mxu1 %v2513_v56 }
 0x33b   : > { %v15668_v25 = vpop.f32.mrf.mxu0  ;;  %3262 = vmatpush1.msra.mxu1 %v2511_v20  ;;  %10736 = vmatprep.mubr.msk.f32.mxu1 %vm1466_vm0, %v15324_v51  ;;  %v20690_v20 = vld [vmem:[#allocation54_spill] sm:$0xff] }
 0x33c   : > { %3263 = vmatprep.subr.mxu1 %v2507_v57  ;;  %2804 = vmatmul.mubr.f32.gmra.mxu0 %v1757_v29 }
 0x33d   : > { %v15674_v9 = vpop.f32.mrf.mxu0  ;;  %3264 = vmatpush1.msra.mxu1 %v2505_v12  ;;  %10702 = vmatprep.mubr.msk.f32.mxu0 %vm1466_vm0, %v1760_v11 }
 0x33e   : > { %3207 = vmatmul.mubr.f32.gmra.mxu1 %v15330_v42  ;;  %3265 = vmatprep.subr.mxu1 %v2501_v53  ;;  %v20693_v53 = vld [vmem:[#allocation57_spill] sm:$0xff] }
 0x33f   : > { %v15678_v22 = vpop.f32.mrf.mxu0  ;;  %3266 = vmatpush1.msra.mxu1 %v2499_v10  ;;  %10737 = vmatprep.mubr.msk.f32.mxu1 %vm1466_vm0, %v15343_v39 }
 0x340   : > { %3267 = vmatprep.subr.mxu1 %v2495_v50  ;;  %2810 = vmatmul.mubr.f32.gmra.mxu0 %v1759_v13  ;;  %v20692_v50 = vld [vmem:[#allocation56_spill] sm:$0xff] }
 0x341   : > { %v15682_v56 = vpop.f32.mrf.mxu0  ;;  %3268 = vmatpush1.msra.mxu1 %v15634_v49 }
 0x342   : > { %3213 = vmatmul.mubr.f32.gmra.mxu1 %v15352_v46  ;;  %3269 = vmatprep.subr.mxu1 %v15631_v45 }
 0x343   : > { %v2529_v11 = vpop.f32.mrf.mxu0  ;;  %3270 = vmatpush1.msra.mxu1 %v15622_v7  ;;  %10738 = vmatprep.mubr.msk.f32.mxu1 %vm1466_vm0, %v15367_v26 }
 0x344   : > { %3271 = vmatprep.subr.mxu1 %v15619_v16 }
 0x345   : > { %v2531_v12 = vpop.f32.mrf.mxu0  ;;  %3272 = vmatpush1.msra.mxu1 %v15610_v59 }
 0x346   : > { %3219 = vmatmul.mubr.f32.gmra.mxu1 %v15377_v3  ;;  %3273 = vmatprep.subr.mxu1 %v15607_v60 }
 0x347   : > { %v2535_v49 = vpop.f32.mrf.mxu0  ;;  %3274 = vmatpush1.msra.mxu1 %v15598_v55  ;;  %10739 = vmatprep.mubr.msk.f32.mxu1 %vm1466_vm0, %v15393_v28 }
 0x348   : > { %3275 = vmatprep.subr.mxu1 %v15595_v18 }
 0x349   : > { %v2537_v7 = vpop.f32.mrf.mxu0  ;;  %3276 = vmatpush1.msra.mxu1 %v15586_v4 }
 0x34a   : > { %3225 = vmatmul.mubr.f32.gmra.mxu1 %v15403_v58  ;;  %3277 = vmatprep.subr.mxu1 %v15583_v24  ;;  %v20689_v24 = vld [vmem:[#allocation53_spill] sm:$0xff] }
 0x34b   : > { %v2541_v16 = vpop.f32.mrf.mxu0  ;;  %3278 = vmatpush1.msra.mxu1 %v15574_v38  ;;  %10740 = vmatprep.mubr.msk.f32.mxu1 %vm1466_vm0, %v15419_v30 }
 0x34c   : > { %3279 = vmatprep.subr.mxu1 %v15571_v2  ;;  %v20688_v2 = vld [vmem:[#allocation52_spill] sm:$0xff] }
 0x34d   : > { %v2543_v59 = vpop.f32.mrf.mxu0  ;;  %3280 = vmatpush1.msra.mxu1 %v15562_v37 }
 0x34e   : > { %3231 = vmatmul.mubr.f32.gmra.mxu1 %v15429_v52  ;;  %3281 = vmatprep.subr.mxu1 %v15559_v15  ;;  %v20687_v15 = vld [vmem:[#allocation51_spill] sm:$0xff] }
 0x34f   : > { %v2547_v60 = vpop.f32.mrf.mxu0  ;;  %3282 = vmatpush1.msra.mxu1 %v15550_v48  ;;  %10741 = vmatprep.mubr.msk.f32.mxu1 %vm1466_vm0, %v15443_v32 }
 0x350   : > { %3283 = vmatprep.subr.mxu1 %v15546_v54 }
 0x351   : > { %v2549_v55 = vpop.f32.mrf.mxu0  ;;  %3284 = vmatpush1.msra.mxu1 %v15537_v41 }
 0x352   : > { %3237 = vmatmul.mubr.f32.gmra.mxu1 %v15451_v62  ;;  %3285 = vmatprep.subr.mxu1 %v15531_v33 }
 0x353   : > { %v15715_v10 = vpop.f32.mrf.mxu0  ;;  %3286 = vmatpush1.msra.mxu1 %v15522_v1  ;;  %10742 = vmatprep.mubr.msk.f32.mxu1 %vm1466_vm0, %v15462_v34 }
 0x354   : > { %3287 = vmatprep.subr.mxu1 %v15515_v31 }
 0x355   : > { %v15721_v48 = vpop.f32.mrf.mxu0  ;;  %3288 = vmatpush1.msra.mxu1 %v15506_v63 }
 0x356   : > { %3243 = vmatmul.mubr.f32.gmra.mxu1 %v15472_v19  ;;  %3289 = vmatprep.subr.mxu1 %v15498_v47 }
 0x357   : > { %v15726_v41 = vpop.f32.mrf.mxu0  ;;  %3290 = vmatpush1.msra.mxu1 %v15487_v17  ;;  %10743 = vmatprep.mubr.msk.f32.mxu1 %vm1466_vm0, %v15485_v36 }
 0x358   : > { %3291 = vmatprep.subr.mxu1 %v15478_v27 }
 0x359   : > { %v15732_v1 = vpop.f32.mrf.mxu0  ;;  %3292 = vmatpush1.msra.mxu1 %v15464_v23  ;;  %v15745_v23 = vld [vmem:[#allocation6 + $0x8] sm:$0xff] }
 0x35a   : > { %3249 = vmatmul.mubr.f32.gmra.mxu1 %v15492_v44  ;;  %3313 = vmatprep.subr.mxu1 %v2549_v55 }
 0x35b   : > { %v15736_v63 = vpop.f32.mrf.mxu0  ;;  %3314 = vmatpush2.msra.mxu1 %v2547_v60  ;;  %10744 = vmatprep.mubr.msk.f32.mxu1 %vm1466_vm0, %v15504_v40 }
 0x35c   : > { %3315 = vmatprep.subr.mxu1 %v2543_v59  ;;  %v20704_v59 = vld [vmem:[#allocation63_spill] sm:$0xff] }
 0x35d   : > { %v15740_v17 = vpop.f32.mrf.mxu0  ;;  %3316 = vmatpush2.msra.mxu1 %v2541_v16 }
 0x35e   : > { %3255 = vmatmul.mubr.f32.gmra.mxu1 %v15510_v35  ;;  %3317 = vmatprep.subr.mxu1 %v2537_v7 }
 0x35f   : > { %v15743_v27 = vpop.f32.mrf.mxu0  ;;  %3318 = vmatpush2.msra.mxu1 %v2535_v49  ;;  %10745 = vmatprep.mubr.msk.f32.mxu1 %vm1466_vm0, %v15745_v23  ;;  %v20702_v49 = vld [vmem:[#allocation62_spill] sm:$0xff] }
 0x360   : > { %3319 = vmatprep.subr.mxu1 %v2531_v12 }
 0x361   : > { %v15749_v47 = vpop.f32.mrf.mxu0  ;;  %3320 = vmatpush2.msra.mxu1 %v2529_v11 }
 0x362   : > { %3321 = vmatprep.subr.mxu1 %v15682_v56  ;;  %v20700_v56 = vld [vmem:[#allocation61_spill] sm:$0xff] }
 0x363   : > { %v15752_v31 = vpop.f32.mrf.mxu0  ;;  %3322 = vmatpush2.msra.mxu1 %v15678_v22 }
 0x364   : > { %3323 = vmatprep.subr.mxu1 %v15674_v9 }
 0x365   : > { %v15756_v33 = vpop.f32.mrf.mxu0  ;;  %3324 = vmatpush2.msra.mxu1 %v15668_v25 }
 0x366   : > { %3326 = vmatmul.mubr.f32.vlgmr.msra.gmra.mxu1 %v15152_v21  ;;  %v20691_v21 = vld [vmem:[#allocation55_spill] sm:$0xff] }
 0x367   : > { %v15760_v54 = vpop.f32.mrf.mxu0  ;;  %10746 = vmatprep.mubr.msk.f32.mxu1 %vm1466_vm0, %v20687_v15  ;;  %v20706_v15 = vld [vmem:[#allocation64_spill] sm:$0xff] }
 0x369   : > { %v15764_v37 = vpop.f32.mrf.mxu0 }
 0x36a   : > { %3332 = vmatmul.mubr.f32.gmra.mxu1 %v20688_v2 }
 0x36b   : > { %v15767_v38 = vpop.f32.mrf.mxu0  ;;  %10747 = vmatprep.mubr.msk.f32.mxu1 %vm1466_vm0, %v20689_v24 }
 0x36d   : > { %v15771_v9 = vpop.f32.mrf.mxu0 }
 0x36e   : > { %3338 = vmatmul.mubr.f32.gmra.mxu1 %v20690_v20  ;;  %v20708_v20 = vld [vmem:[#allocation65_spill] sm:$0xff] }
 0x36f   : > { %v15774_v4 = vpop.f32.mrf.mxu0  ;;  %10748 = vmatprep.mubr.msk.f32.mxu1 %vm1466_vm0, %v20691_v21 }
 0x371   : > { %v15778_v18 = vpop.f32.mrf.mxu0 }
 0x372   : > { %3344 = vmatmul.mubr.f32.gmra.mxu1 %v20692_v50 }
 0x373   : > { %v15781_v45 = vpop.f32.mrf.mxu0  ;;  %10749 = vmatprep.mubr.msk.f32.mxu1 %vm1466_vm0, %v20693_v53  ;;  %v20710_v53 = vld [vmem:[#allocation66_spill] sm:$0xff] }
 0x375   : > { %v15785_v57 = vpop.f32.mrf.mxu0 }
 0x376   : > { %3350 = vmatmul.mubr.f32.gmra.mxu1 %v20694_v43  ;;  %v15788_v14 = vpop.f32.mrf.mxu1 }
 0x377   : > { %20695 = vst [vmem:[#allocation70_spill] sm:$0xff] %v15788_v14  ;;  %v15790_v29 = vpop.f32.mrf.mxu0  ;;  %10750 = vmatprep.mubr.msk.f32.mxu1 %vm1466_vm0, %v20696_v6 }
 0x378   : > { %v15794_v25 = vpop.f32.mrf.mxu1 }
 0x379   : > { %20697 = vst [vmem:[#allocation51_spill] sm:$0xff] %v15794_v25  ;;  %v15796_v5 = vpop.f32.mrf.mxu0 }
 0x37a   : > { %3356 = vmatmul.mubr.f32.gmra.mxu1 %v20698_v8  ;;  %v15799_v13 = vpop.f32.mrf.mxu1  ;;  %v20712_v8 = vld [vmem:[#allocation67_spill] sm:$0xff] }
 0x37b   : > { %20699 = vst [vmem:[#allocation52_spill] sm:$0xff] %v15799_v13  ;;  %v2613_v22 = vpop.f32.mrf.mxu0  ;;  %10751 = vmatprep.mubr.msk.f32.mxu1 %vm1466_vm0, %v20700_v56  ;;  %v16205_v13 = vld [vmem:[#allocation6 + $0x80] sm:$0xff] }
 0x37c   : > { %v15803_v11 = vpop.f32.mrf.mxu1  ;;  %20800 = vst [vmem:[#allocation109_spill] sm:$0xff] %v16205_v13 }
 0x37d   : > { %20701 = vst [vmem:[#allocation53_spill] sm:$0xff] %v15803_v11  ;;  %v2615_v12 = vpop.f32.mrf.mxu0 }
 0x37e   : > { %3362 = vmatmul.mubr.f32.gmra.mxu1 %v20702_v49  ;;  %v15806_v7 = vpop.f32.mrf.mxu1 }
 0x37f   : > { %20703 = vst [vmem:[#allocation54_spill] sm:$0xff] %v15806_v7  ;;  %v2619_v16 = vpop.f32.mrf.mxu0  ;;  %10752 = vmatprep.mubr.msk.f32.mxu1 %vm1466_vm0, %v20704_v59  ;;  %v20714_v59 = vld [vmem:[#allocation68_spill] sm:$0xff] }
 0x380   : > { %v15810_v60 = vpop.f32.mrf.mxu1  ;;  %v13169_v7 = vld [vmem:[%s14450_s26 + $0x68] sm:$0xff] }
 0x381   : > { %20705 = vst [vmem:[#allocation55_spill] sm:$0xff] %v15810_v60  ;;  %v2621_v55 = vpop.f32.mrf.mxu0 }
 0x382   : > { %3368 = vmatmul.mubr.f32.gmra.mxu1 %v20706_v15  ;;  %v15813_v2 = vpop.f32.mrf.mxu1 }
 0x383   : > { %20707 = vst [vmem:[#allocation56_spill] sm:$0xff] %v15813_v2  ;;  %v2625_v24 = vpop.f32.mrf.mxu0  ;;  %10753 = vmatprep.mubr.msk.f32.mxu1 %vm1466_vm0, %v20708_v20  ;;  %v20716_v20 = vld [vmem:[#allocation69_spill] sm:$0xff] }
 0x384   : > { %v15817_v21 = vpop.f32.mrf.mxu1 }
 0x385   : > { %20709 = vst [vmem:[#allocation57_spill] sm:$0xff] %v15817_v21  ;;  %v2627_v50 = vpop.f32.mrf.mxu0 }
 0x386   : > { %3374 = vmatmul.mubr.f32.gmra.mxu1 %v20710_v53  ;;  %v15820_v43 = vpop.f32.mrf.mxu1 }
 0x387   : > { %20711 = vst [vmem:[#allocation58_spill] sm:$0xff] %v15820_v43  ;;  %v2631_v6 = vpop.f32.mrf.mxu0  ;;  %10754 = vmatprep.mubr.msk.f32.mxu1 %vm1466_vm0, %v20712_v8  ;;  %v20719_v8 = vld [vmem:[#allocation71_spill] sm:$0xff] }
 0x388   : > { %v15824_v56 = vpop.f32.mrf.mxu1 }
 0x389   : > { %20713 = vst [vmem:[#allocation59_spill] sm:$0xff] %v15824_v56  ;;  %v2633_v49 = vpop.f32.mrf.mxu0 }
 0x38a   : > { %3380 = vmatmul.mubr.f32.gmra.mxu1 %v20714_v59  ;;  %v15827_v15 = vpop.f32.mrf.mxu1 }
 0x38b   : > { %20715 = vst [vmem:[#allocation60_spill] sm:$0xff] %v15827_v15  ;;  %v2637_v2 = vpop.f32.mrf.mxu0  ;;  %10755 = vmatprep.mubr.msk.f32.mxu1 %vm1466_vm0, %v20716_v20 }
 0x38c   : > { %v15831_v21 = vpop.f32.mrf.mxu1 }
 0x38d   : > { %20717 = vst [vmem:[#allocation61_spill] sm:$0xff] %v15831_v21  ;;  %v2639_v53 = vpop.f32.mrf.mxu0 }
 0x38e   : > { %3386 = vmatmul.mubr.f32.gmra.mxu1 %v20685_v0  ;;  %v15834_v43 = vpop.f32.mrf.mxu1 }
 0x38f   : > { %20718 = vst [vmem:[#allocation62_spill] sm:$0xff] %v15834_v43  ;;  %v2643_v60 = vpop.f32.mrf.mxu0  ;;  %10756 = vmatprep.mubr.msk.f32.mxu1 %vm1466_vm0, %v20719_v8 }
 0x390   : > { %v15838_v56 = vpop.f32.mrf.mxu1 }
 0x391   : > { %20720 = vst [vmem:[#allocation63_spill] sm:$0xff] %v15838_v56  ;;  %v2645_v59 = vpop.f32.mrf.mxu0 }
 0x392   : > { %3392 = vmatmul.mubr.f32.gmra.mxu1 %v15318_v61  ;;  %3452 = vmatprep.subr.mxu1 %v2645_v59  ;;  %v15841_v15 = vpop.f32.mrf.mxu1 }
 0x393   : > { %20721 = vst [vmem:[#allocation64_spill] sm:$0xff] %v15841_v15  ;;  %v15843_v20 = vpop.f32.mrf.mxu0  ;;  %3453 = vmatpush1.msra.mxu1 %v2643_v60  ;;  %10757 = vmatprep.mubr.msk.f32.mxu1 %vm1466_vm0, %v15324_v51 }
 0x394   : > { %3454 = vmatprep.subr.mxu1 %v2639_v53  ;;  %v15847_v0 = vpop.f32.mrf.mxu1  ;;  %v13142_v53 = vld [vmem:[%s14450_s26 + $0x18] sm:$0xff] }
 0x395   : > { %20722 = vst [vmem:[#allocation65_spill] sm:$0xff] %v15847_v0  ;;  %v15849_v43 = vpop.f32.mrf.mxu0  ;;  %3455 = vmatpush1.msra.mxu1 %v2637_v2  ;;  %v16158_v0 = vld [vmem:[#allocation6 + $0x60] sm:$0xff] }
 0x396   : > { %3398 = vmatmul.mubr.f32.gmra.mxu1 %v15330_v42  ;;  %3456 = vmatprep.subr.mxu1 %v2633_v49  ;;  %v15852_v8 = vpop.f32.mrf.mxu1  ;;  %20788 = vst [vmem:[#allocation101_spill] sm:$0xff] %v16158_v0 }
 0x397   : > { %20723 = vst [vmem:[#allocation66_spill] sm:$0xff] %v15852_v8  ;;  %v15854_v61 = vpop.f32.mrf.mxu0  ;;  %3457 = vmatpush1.msra.mxu1 %v2631_v6  ;;  %10758 = vmatprep.mubr.msk.f32.mxu1 %vm1466_vm0, %v15343_v39 }
 0x398   : > { %3458 = vmatprep.subr.mxu1 %v2627_v50  ;;  %v15858_v60 = vpop.f32.mrf.mxu1 }
 0x399   : > { %20724 = vst [vmem:[#allocation67_spill] sm:$0xff] %v15858_v60  ;;  %v15860_v51 = vpop.f32.mrf.mxu0  ;;  %3459 = vmatpush1.msra.mxu1 %v2625_v24  ;;  %v16135_v60 = vld [vmem:[#allocation6 + $0x50] sm:$0xff] }
 0x39a   : > { %3404 = vmatmul.mubr.f32.gmra.mxu1 %v15352_v46  ;;  %3460 = vmatprep.subr.mxu1 %v2621_v55  ;;  %v15863_v2 = vpop.f32.mrf.mxu1  ;;  %20782 = vst [vmem:[#allocation97_spill] sm:$0xff] %v16135_v60 }
 0x39b   : > { %20725 = vst [vmem:[#allocation68_spill] sm:$0xff] %v15863_v2  ;;  %v15865_v42 = vpop.f32.mrf.mxu0  ;;  %3461 = vmatpush1.msra.mxu1 %v2619_v16  ;;  %10759 = vmatprep.mubr.msk.f32.mxu1 %vm1466_vm0, %v15367_v26  ;;  %v13161_v2 = vld [vmem:[%s14450_s26 + $0x58] sm:$0xff] }
 0x39c   : > { %3462 = vmatprep.subr.mxu1 %v2615_v12  ;;  %v15869_v6 = vpop.f32.mrf.mxu1 }
 0x39d   : > { %20726 = vst [vmem:[#allocation69_spill] sm:$0xff] %v15869_v6  ;;  %v15871_v39 = vpop.f32.mrf.mxu0  ;;  %3463 = vmatpush1.msra.mxu1 %v2613_v22  ;;  %v20738_v22 = vld [vmem:[#allocation75_spill] sm:$0xff]  ;;  %v13160_v6 = vld [vmem:[%s14442_s5 + $0x58] sm:$0xff] }
 0x39e   : > { %3410 = vmatmul.mubr.f32.gmra.mxu1 %v15377_v3  ;;  %3464 = vmatprep.subr.mxu1 %v15796_v5  ;;  %v15875_v46 = vpop.f32.mrf.mxu1 }
 0x39f   : > { %20727 = vst [vmem:[#allocation71_spill] sm:$0xff] %v15875_v46  ;;  %v15877_v55 = vpop.f32.mrf.mxu0  ;;  %3465 = vmatpush1.msra.mxu1 %v15790_v29  ;;  %10760 = vmatprep.mubr.msk.f32.mxu1 %vm1466_vm0, %v15393_v28 }
 0x3a0   : > { %3466 = vmatprep.subr.mxu1 %v15785_v57  ;;  %v15883_v26 = vpop.f32.mrf.mxu1 }
 0x3a1   : > { %20728 = vst [vmem:[#allocation83_spill] sm:$0xff] %v15883_v26  ;;  %v15885_v12 = vpop.f32.mrf.mxu0  ;;  %3467 = vmatpush1.msra.mxu1 %v15781_v45 }
 0x3a2   : > { %3416 = vmatmul.mubr.f32.gmra.mxu1 %v15403_v58  ;;  %3468 = vmatprep.subr.mxu1 %v15778_v18  ;;  %v15890_v3 = vpop.f32.mrf.mxu1 }
 0x3a3   : > { %20729 = vst [vmem:[#allocation84_spill] sm:$0xff] %v15890_v3  ;;  %v15892_v5 = vpop.f32.mrf.mxu0  ;;  %3469 = vmatpush1.msra.mxu1 %v15774_v4  ;;  %10761 = vmatprep.mubr.msk.f32.mxu1 %vm1466_vm0, %v15419_v30 }
 0x3a4   : > { %3470 = vmatprep.subr.mxu1 %v15771_v9  ;;  %v15898_v28 = vpop.f32.mrf.mxu1 }
 0x3a5   : > { %20730 = vst [vmem:[#allocation85_spill] sm:$0xff] %v15898_v28  ;;  %v2675_v57 = vpop.f32.mrf.mxu0  ;;  %3471 = vmatpush1.msra.mxu1 %v15767_v38  ;;  %v13139_v38 = vld [vmem:[%s14450_s26 + $0x8] sm:$0xff] }
 0x3a6   : > { %3422 = vmatmul.mubr.f32.gmra.mxu1 %v15429_v52  ;;  %3472 = vmatprep.subr.mxu1 %v15764_v37  ;;  %v15903_v58 = vpop.f32.mrf.mxu1  ;;  %v20733_v52 = vld [vmem:[#allocation72_spill] sm:$0xff] }
 0x3a7   : > { %20731 = vst [vmem:[#allocation86_spill] sm:$0xff] %v15903_v58  ;;  %v2679_v18 = vpop.f32.mrf.mxu0  ;;  %3473 = vmatpush1.msra.mxu1 %v15760_v54  ;;  %10762 = vmatprep.mubr.msk.f32.mxu1 %vm1466_vm0, %v15443_v32  ;;  %v1159_v4 = vsub.f32 %v20733_v52, %v13139_v38 }
 0x3a8   : > { %3474 = vmatprep.subr.mxu1 %v15756_v33  ;;  %v15909_v30 = vpop.f32.mrf.mxu1  ;;  %v20736_v33 = vld [vmem:[#allocation73_spill] sm:$0xff] }
 0x3a9   : > { %20732 = vst [vmem:[#allocation87_spill] sm:$0xff] %v15909_v30  ;;  %v2681_v9 = vpop.f32.mrf.mxu0  ;;  %3475 = vmatpush1.msra.mxu1 %v15752_v31  ;;  %v13140_v31 = vld [vmem:[%s14450_s26] sm:$0xff]  ;;  %v1291_v29 = vmul.f32 0.5, %v1159_v4 }
 0x3aa   : > { %3428 = vmatmul.mubr.f32.gmra.mxu1 %v15451_v62  ;;  %3476 = vmatprep.subr.mxu1 %v15749_v47  ;;  %v15916_v37 = vpop.f32.mrf.mxu1  ;;  %v1158_v45 = vsub.f32 %v20736_v33, %v13140_v31  ;;  %v1203_v47 = vand.u32 2147483647, %v1159_v4  ;;  %v20778_v30 = vld [vmem:[#allocation82_spill] sm:$0xff] }
 0x3ab   : > { %20734 = vst [vmem:[#allocation72_spill] sm:$0xff] %v15916_v37  ;;  %v15918_v54 = vpop.f32.mrf.mxu0  ;;  %3477 = vmatpush1.msra.mxu1 %v15743_v27  ;;  %10763 = vmatprep.mubr.msk.f32.mxu1 %vm1466_vm0, %v15462_v34  ;;  %v16088_v37 = vld [vmem:[#allocation6 + $0x30] sm:$0xff] }
 0x3ac   : > { %3478 = vmatprep.subr.mxu1 %v15740_v17  ;;  %v15924_v32 = vpop.f32.mrf.mxu1  ;;  %v13141_v17 = vld [vmem:[%s14450_s26 + $0x10] sm:$0xff]  ;;  %v1290_v24 = vmul.f32 0.5, %v1158_v45  ;;  %v10550_v49 = vadd.f32 -0.5, %v1203_v47  ;;  %vm15953_vm1 = vcmp.lt.f32.partialorder %v1203_v47, 1.0 }
 0x3ad   : > { %20735 = vst [vmem:[#allocation88_spill] sm:$0xff] %v15924_v32  ;;  %v15928_v62 = vpop.f32.mrf.mxu0  ;;  %3479 = vmatpush1.msra.mxu1 %v15736_v63  ;;  %v1160_v16 = vsub.f32 %v20738_v22, %v13141_v17  ;;  %v13143_v22 = vld [vmem:[%s14450_s26 + $0x20] sm:$0xff] }
 0x3ae   : > { %3434 = vmatmul.mubr.f32.gmra.mxu1 %v15472_v19  ;;  %3480 = vmatprep.subr.mxu1 %v15732_v1  ;;  %v15933_v27 = vpop.f32.mrf.mxu1  ;;  %v1202_v19 = vand.u32 2147483647, %v1158_v45  ;;  %v1335_v1 = vmul.f32 %v1291_v29, %v1159_v4  ;;  %v1334_v4 = vmul.f32 %v1290_v24, %v1158_v45 }
 0x3af   : > { %20737 = vst [vmem:[#allocation73_spill] sm:$0xff] %v15933_v27  ;;  %v15935_v34 = vpop.f32.mrf.mxu0  ;;  %3481 = vmatpush1.msra.mxu1 %v15726_v41  ;;  %10764 = vmatprep.mubr.msk.f32.mxu1 %vm1466_vm0, %v15485_v36  ;;  %v20740_v41 = vld [vmem:[#allocation74_spill] sm:$0xff]  ;;  %v20771_v27 = vld [vmem:[#allocation80_spill] sm:$0xff] }
 0x3b0   : > { %3482 = vmatprep.subr.mxu1 %v15721_v48  ;;  %v15943_v63 = vpop.f32.mrf.mxu1  ;;  %v1161_v59 = vsub.f32 %v20740_v41, %v13142_v53  ;;  %v10549_v31 = vadd.f32 -0.5, %v1202_v19  ;;  %v1423_v33 = vsel %vm15953_vm1, %v1335_v1, %v10550_v49  ;;  %vm15968_vm2 = vcmp.lt.f32.partialorder %v1202_v19, 1.0  ;;  %v20749_v19 = vld [vmem:[#allocation77_spill] sm:$0xff]  ;;  %v20752_v49 = vld [vmem:[#allocation76_spill] sm:$0xff] }
 0x3b1   : > { %20739 = vst [vmem:[#allocation75_spill] sm:$0xff] %v15943_v63  ;;  %v15945_v50 = vpop.f32.mrf.mxu0  ;;  %3483 = vmatpush1.msra.mxu1 %v15715_v10  ;;  %v1292_v10 = vmul.f32 0.5, %v1160_v16  ;;  %v1467_v17 = vsel %vm1466_vm0, %v1423_v33, 0.0  ;;  %v1162_v24 = vsub.f32 %v20749_v19, %v13143_v22  ;;  %v13154_v63 = vld [vmem:[%s14450_s26 + $0x48] sm:$0xff] }
 0x3b2   : > { %3440 = vmatmul.mubr.f32.gmra.mxu1 %v15492_v44  ;;  %3504 = vmatprep.subr.mxu1 %v2681_v9  ;;  %v15951_v36 = vpop.f32.mrf.mxu1  ;;  %v1204_v44 = vand.u32 2147483647, %v1160_v16  ;;  %v1293_v47 = vmul.f32 0.5, %v1161_v59  ;;  %v1167_v32 = vsub.f32 %v20771_v27, %v13154_v63 }
 0x3b3   : > { %20741 = vst [vmem:[#allocation74_spill] sm:$0xff] %v15951_v36  ;;  %v15957_v38 = vpop.f32.mrf.mxu0  ;;  %3505 = vmatpush2.msra.mxu1 %v2679_v18  ;;  %10765 = vmatprep.mubr.msk.f32.mxu1 %vm1466_vm0, %v15504_v40  ;;  %v1205_v40 = vand.u32 2147483647, %v1161_v59 }
 0x3b4   : > { %3506 = vmatprep.subr.mxu1 %v2675_v57  ;;  %v15961_v52 = vpop.f32.mrf.mxu1  ;;  %vm15992_vm3 = vcmp.lt.f32.partialorder %v1204_v44, 1.0 }
 0x3b5   : > { %20744 = vst [vmem:[#allocation89_spill] sm:$0xff] %v15961_v52  ;;  %v15963_v9 = vpop.f32.mrf.mxu0  ;;  %3507 = vmatpush2.msra.mxu1 %v15892_v5  ;;  %v1336_v5 = vmul.f32 %v1292_v10, %v1160_v16  ;;  %vm16001_vm4 = vcmp.lt.f32.partialorder %v1205_v40, 1.0 }
 0x3b6   : > { %3446 = vmatmul.mubr.f32.gmra.mxu1 %v15510_v35  ;;  %3508 = vmatprep.subr.mxu1 %v15885_v12  ;;  %v15974_v57 = vpop.f32.mrf.mxu1  ;;  %v1422_v35 = vsel %vm15968_vm2, %v1334_v4, %v10549_v31  ;;  %v10551_v12 = vadd.f32 -0.5, %v1204_v44  ;;  %v1206_v31 = vand.u32 2147483647, %v1162_v24 }
 0x3b7   : > { %20747 = vst [vmem:[#allocation90_spill] sm:$0xff] %v15974_v57  ;;  %v15976_v45 = vpop.f32.mrf.mxu0  ;;  %3509 = vmatpush2.msra.mxu1 %v15877_v55  ;;  %10766 = vmatprep.mubr.msk.f32.mxu1 %vm1466_vm0, %v15745_v23  ;;  %v1337_v55 = vmul.f32 %v1293_v47, %v1161_v59  ;;  %v10552_v23 = vadd.f32 -0.5, %v1205_v40  ;;  %v16018_v40 = vld [vmem:[#allocation6] sm:$0xff] }
 0x3b8   : > { %3510 = vmatprep.subr.mxu1 %v15871_v39  ;;  %v15982_v29 = vpop.f32.mrf.mxu1  ;;  %v13144_v39 = vld [vmem:[%s14450_s26 + $0x28] sm:$0xff]  ;;  %v1424_v4 = vsel %vm15992_vm3, %v1336_v5, %v10551_v12  ;;  %v16025_v5 = vld [vmem:[#allocation6 + $0x18] sm:$0xff]  ;;  %v10553_v19 = vadd.f32 -0.5, %v1206_v31  ;;  %vm16037_vm5 = vcmp.lt.f32.partialorder %v1206_v31, 1.0 }
 0x3b9   : > { %20748 = vst [vmem:[#allocation91_spill] sm:$0xff] %v15982_v29  ;;  %v15989_v1 = vpop.f32.mrf.mxu0  ;;  %3511 = vmatpush2.msra.mxu1 %v15865_v42  ;;  %v1163_v53 = vsub.f32 %v20752_v49, %v13144_v39  ;;  %v1468_v42 = vadd.f32 %v1467_v17, %v1422_v35  ;;  %v1425_v33 = vsel %vm16001_vm4, %v1337_v55, %v10552_v23  ;;  %v20301_v35 = vmov 0.0   ;;  %v13147_v55 = vld [vmem:[%s14450_s26 + $0x30] sm:$0xff]  ;;  %v20759_v23 = vld [vmem:[#allocation79_spill] sm:$0xff] }
 0x3ba   : > { %3512 = vmatprep.subr.mxu1 %v15860_v51  ;;  %v15999_v41 = vpop.f32.mrf.mxu1  ;;  %v1294_v51 = vmul.f32 0.5, %v1162_v24  ;;  %5146 = vmatprep.subr.mxu0 %v20301_v35  ;;  %v1470_v12 = vsel %vm1466_vm0, %v1425_v33, 0.0  ;;  %v1164_v16 = vsub.f32 %v20759_v23, %v13147_v55 }
 0x3bb   : > { %20753 = vst [vmem:[#allocation77_spill] sm:$0xff] %v15999_v41  ;;  %v16005_v10 = vpop.f32.mrf.mxu0  ;;  %3513 = vmatpush2.msra.mxu1 %v15854_v61  ;;  %v1207_v18 = vand.u32 2147483647, %v1163_v53  ;;  %v1295_v61 = vmul.f32 0.5, %v1163_v53  ;;  %v16066_v41 = vld [vmem:[#allocation6 + $0x20] sm:$0xff] }
 0x3bc   : > { %3514 = vmatprep.subr.mxu1 %v15849_v43  ;;  %v16009_v59 = vpop.f32.mrf.mxu1  ;;  %v1338_v22 = vmul.f32 %v1294_v51, %v1162_v24  ;;  %v1208_v23 = vand.u32 2147483647, %v1164_v16  ;;  %v13153_v51 = vld [vmem:[%s14450_s26 + $0x40] sm:$0xff] }
 0x3bd   : > { %20756 = vst [vmem:[#allocation76_spill] sm:$0xff] %v16009_v59  ;;  %v16013_v44 = vpop.f32.mrf.mxu0  ;;  %3515 = vmatpush2.msra.mxu1 %v15843_v20  ;;  %v1469_v20 = vadd.f32 %v1468_v42, %v1424_v4  ;;  %v1339_v49 = vmul.f32 %v1295_v61, %v1163_v53  ;;  %v10554_v48 = vadd.f32 -0.5, %v1207_v18  ;;  %v13148_v42 = vld [vmem:[%s14450_s26 + $0x38] sm:$0xff]  ;;  %v16043_v59 = vld [vmem:[#allocation6 + $0x10] sm:$0xff]  ;;  %vm16048_vm6 = vcmp.lt.f32.partialorder %v1207_v18, 1.0  ;;  %v16054_v53 = vld [vmem:[#allocation6 + $0x28] sm:$0xff] }
 0x3be   : > { %3517 = vmatmul.mubr.f32.vlgmr.msra.gmra.mxu1 %v16018_v40  ;;  %v16021_v43 = vpop.f32.mrf.mxu1  ;;  %v20762_v4 = vld [vmem:[#allocation78_spill] sm:$0xff]  ;;  %v1426_v55 = vsel %vm16037_vm5, %v1338_v22, %v10553_v19  ;;  %vm16082_vm7 = vcmp.lt.f32.partialorder %v1208_v23, 1.0 }
 0x3bf   : > { %20757 = vst [vmem:[#allocation92_spill] sm:$0xff] %v16021_v43  ;;  %v16023_v47 = vpop.f32.mrf.mxu0  ;;  %10767 = vmatprep.mubr.msk.f32.mxu1 %vm1466_vm0, %v16025_v5  ;;  %v1471_v31 = vadd.f32 %v1470_v12, %v1469_v20  ;;  %v16073_v43 = vld [vmem:[#allocation6 + $0x38] sm:$0xff] }
 0x3c0   : > { %v16029_v17 = vpop.f32.mrf.mxu1 }
 0x3c1   : > { %20758 = vst [vmem:[#allocation93_spill] sm:$0xff] %v16029_v17  ;;  %v16035_v39 = vpop.f32.mrf.mxu0  ;;  %v1165_v17 = vsub.f32 %v20762_v4, %v13148_v42  ;;  %v1296_v42 = vmul.f32 0.5, %v1164_v16  ;;  %v1427_v4 = vsel %vm16048_vm6, %v1339_v49, %v10554_v48  ;;  %v1472_v22 = vadd.f32 %v1471_v31, %v1426_v55  ;;  %v13159_v31 = vld [vmem:[%s14450_s26 + $0x50] sm:$0xff] }
 0x3c2   : > { %3523 = vmatmul.mubr.f32.gmra.mxu1 %v16043_v59  ;;  %v16046_v24 = vpop.f32.mrf.mxu1  ;;  %v1473_v19 = vsel %vm1466_vm0, %v1427_v4, 0.0  ;;  %v10555_v48 = vadd.f32 -0.5, %v1208_v23  ;;  %v1299_v4 = vmul.f32 0.5, %v1167_v32  ;;  %v1168_v58 = vsub.f32 %v20778_v30, %v13159_v31 }
 0x3c3   : > { %20763 = vst [vmem:[#allocation79_spill] sm:$0xff] %v16046_v24  ;;  %v16052_v33 = vpop.f32.mrf.mxu0  ;;  %10768 = vmatprep.mubr.msk.f32.mxu1 %vm1466_vm0, %v16054_v53  ;;  %v1209_v35 = vand.u32 2147483647, %v1165_v17  ;;  %v1297_v24 = vmul.f32 0.5, %v1165_v17  ;;  %v1340_v49 = vmul.f32 %v1296_v42, %v1164_v16  ;;  %v1211_v42 = vand.u32 2147483647, %v1167_v32 }
 0x3c4   : > { %v16058_v61 = vpop.f32.mrf.mxu1  ;;  %v1343_v3 = vmul.f32 %v1299_v4, %v1167_v32  ;;  %v16144_v32 = vld [vmem:[#allocation6 + $0x68] sm:$0xff] }
 0x3c5   : > { %20766 = vst [vmem:[#allocation78_spill] sm:$0xff] %v16058_v61  ;;  %v16062_v18 = vpop.f32.mrf.mxu0  ;;  %v20768_v61 = vld [vmem:[#allocation81_spill] sm:$0xff]  ;;  %v1341_v52 = vmul.f32 %v1297_v24, %v1165_v17  ;;  %v10556_v36 = vadd.f32 -0.5, %v1209_v35  ;;  %vm16093_vm8 = vcmp.lt.f32.partialorder %v1209_v35, 1.0  ;;  %v16099_v17 = vld [vmem:[#allocation6 + $0x48] sm:$0xff]  ;;  %v1474_v24 = vadd.f32 %v1473_v19, %v1472_v22  ;;  %20785 = vst [vmem:[#allocation98_spill] sm:$0xff] %v16144_v32 }
 0x3c6   : > { %3529 = vmatmul.mubr.f32.gmra.mxu1 %v16066_v41  ;;  %v16069_v20 = vpop.f32.mrf.mxu1  ;;  %v1166_v29 = vsub.f32 %v20768_v61, %v13153_v51  ;;  %v1428_v27 = vsel %vm16082_vm7, %v1340_v49, %v10555_v48  ;;  %v16116_v22 = vld [vmem:[#allocation6 + $0x58] sm:$0xff]  ;;  %v10558_v26 = vadd.f32 -0.5, %v1211_v42  ;;  %vm16138_vm10 = vcmp.lt.f32.partialorder %v1211_v42, 1.0 }
 0x3c7   : > { %20767 = vst [vmem:[#allocation94_spill] sm:$0xff] %v16069_v20  ;;  %v16071_v12 = vpop.f32.mrf.mxu0  ;;  %10769 = vmatprep.mubr.msk.f32.mxu1 %vm1466_vm0, %v16073_v43  ;;  %v1429_v35 = vsel %vm16093_vm8, %v1341_v52, %v10556_v36  ;;  %20776 = vst [vmem:[#allocation95_spill] sm:$0xff] %v16116_v22  ;;  %v1475_v19 = vadd.f32 %v1474_v24, %v1428_v27  ;;  %v1169_v24 = vsub.f32 %v13160_v6, %v13161_v2 }
 0x3c8   : > { %v16091_v16 = vpop.f32.mrf.mxu1  ;;  %v1210_v63 = vand.u32 2147483647, %v1166_v29  ;;  %v1298_v55 = vmul.f32 0.5, %v1166_v29  ;;  %v1476_v36 = vsel %vm1466_vm0, %v1429_v35, 0.0  ;;  %v1212_v6 = vand.u32 2147483647, %v1168_v58 }
 0x3c9   : > { %v16080_v57 = vpop.f32.mrf.mxu0  ;;  %20772 = vst [vmem:[#allocation81_spill] sm:$0xff] %v16091_v16  ;;  %v16111_v16 = vld [vmem:[#allocation6 + $0x40] sm:$0xff]  ;;  %v1300_v35 = vmul.f32 0.5, %v1168_v58  ;;  %v1431_v4 = vsel %vm16138_vm10, %v1343_v3, %v10558_v26  ;;  %v1213_v31 = vand.u32 2147483647, %v1169_v24 }
 0x3ca   : > { %3535 = vmatmul.mubr.f32.gmra.mxu1 %v16088_v37  ;;  %v1342_v52 = vmul.f32 %v1298_v55, %v1166_v29  ;;  %v10557_v48 = vadd.f32 -0.5, %v1210_v63  ;;  %vm16127_vm9 = vcmp.lt.f32.partialorder %v1210_v63, 1.0  ;;  %v1477_v63 = vadd.f32 %v1476_v36, %v1475_v19  ;;  %v16163_v19 = vld [vmem:[#allocation6 + $0x78] sm:$0xff]  ;;  %v13166_v29 = vld [vmem:[%s14442_s5 + $0x60] sm:$0xff] }
 0x3cb   : > { %v16097_v61 = vpop.f32.mrf.mxu0  ;;  %10770 = vmatprep.mubr.msk.f32.mxu1 %vm1466_vm0, %v16099_v17  ;;  %20789 = vst [vmem:[#allocation102_spill] sm:$0xff] %v16163_v19  ;;  %v1479_v26 = vsel %vm1466_vm0, %v1431_v4, 0.0  ;;  %v1344_v3 = vmul.f32 %v1300_v35, %v1168_v58  ;;  %vm16174_vm11 = vcmp.lt.f32.partialorder %v1212_v6, 1.0  ;;  %vm16185_vm12 = vcmp.lt.f32.partialorder %v1213_v31, 1.0  ;;  %v13174_v58 = vld [vmem:[%s14442_s5 + $0x70] sm:$0xff] }
 0x3cc   : > { %v1430_v2 = vsel %vm16127_vm9, %v1342_v52, %v10557_v48  ;;  %v10559_v48 = vadd.f32 -0.5, %v1212_v6 }
 0x3cd   : > { %v16105_v23 = vpop.f32.mrf.mxu0  ;;  %v1478_v36 = vadd.f32 %v1477_v63, %v1430_v2 }
 0x3ce   : > { %v16109_v51 = vpop.f32.mrf.mxu1  ;;  %3541 = vmatmul.mubr.f32.gmra.mxu1 %v16111_v16 }
 0x3cf   : > { %20775 = vst [vmem:[#allocation80_spill] sm:$0xff] %v16109_v51  ;;  %v16114_v20 = vpop.f32.mrf.mxu0  ;;  %10771 = vmatprep.mubr.msk.f32.mxu1 %vm1466_vm0, %v16116_v22  ;;  %v13168_v51 = vld [vmem:[%s14442_s5 + $0x68] sm:$0xff] }
 0x3d0   : > { %v16120_v49 = vpop.f32.mrf.mxu1  ;;  %v1171_v63 = vsub.f32 %v13168_v51, %v13169_v7  ;;  %v1432_v7 = vsel %vm16174_vm11, %v1344_v3, %v10559_v48  ;;  %v13185_v22 = vld [vmem:[%s14450_s26 + $0x88] sm:$0xff] }
 0x3d1   : > { %20777 = vst [vmem:[#allocation96_spill] sm:$0xff] %v16120_v49  ;;  %v16125_v28 = vpop.f32.mrf.mxu0  ;;  %v10560_v49 = vadd.f32 -0.5, %v1213_v31 }
 0x3d2   : > { %v16133_v27 = vpop.f32.mrf.mxu1  ;;  %3547 = vmatmul.mubr.f32.gmra.mxu1 %v16135_v60  ;;  %v13184_v60 = vld [vmem:[%s14442_s5 + $0x88] sm:$0xff] }
 0x3d3   : > { %20781 = vst [vmem:[#allocation82_spill] sm:$0xff] %v16133_v27  ;;  %v16142_v30 = vpop.f32.mrf.mxu0  ;;  %10772 = vmatprep.mubr.msk.f32.mxu1 %vm1466_vm0, %v16144_v32  ;;  %v1301_v27 = vmul.f32 0.5, %v1169_v24  ;;  %v16296_v32 = vld [vmem:[#allocation6 + $0xd8] sm:$0xff] }
 0x3d4   : > { %v16148_v55 = vpop.f32.mrf.mxu1 }
 0x3d5   : > { %20786 = vst [vmem:[#allocation99_spill] sm:$0xff] %v16148_v55  ;;  %v16152_v42 = vpop.f32.mrf.mxu0  ;;  %v1345_v56 = vmul.f32 %v1301_v27, %v1169_v24  ;;  %v16191_v24 = vld [vmem:[#allocation6 + $0x88] sm:$0xff]  ;;  %v1480_v27 = vadd.f32 %v1479_v26, %v1478_v36  ;;  %v16210_v36 = vld [vmem:[#allocation6 + $0x98] sm:$0xff] }
 0x3d6   : > { %v16156_v8 = vpop.f32.mrf.mxu1  ;;  %3553 = vmatmul.mubr.f32.gmra.mxu1 %v16158_v0  ;;  %20797 = vst [vmem:[#allocation106_spill] sm:$0xff] %v16191_v24  ;;  %20801 = vst [vmem:[#allocation110_spill] sm:$0xff] %v16210_v36 }
 0x3d7   : > { %20787 = vst [vmem:[#allocation100_spill] sm:$0xff] %v16156_v8  ;;  %v16161_v46 = vpop.f32.mrf.mxu0  ;;  %10773 = vmatprep.mubr.msk.f32.mxu1 %vm1466_vm0, %v16163_v19  ;;  %v13167_v8 = vld [vmem:[%s14450_s26 + $0x60] sm:$0xff]  ;;  %v1433_v31 = vsel %vm16185_vm12, %v1345_v56, %v10560_v49  ;;  %v1481_v26 = vadd.f32 %v1480_v27, %v1432_v7 }
 0x3d8   : > { %v16167_v52 = vpop.f32.mrf.mxu1  ;;  %v1170_v55 = vsub.f32 %v13166_v29, %v13167_v8  ;;  %v1215_v29 = vand.u32 2147483647, %v1171_v63  ;;  %v1482_v56 = vsel %vm1466_vm0, %v1433_v31, 0.0  ;;  %v16248_v19 = vld [vmem:[#allocation6 + $0xa0] sm:$0xff] }
 0x3d9   : > { %20790 = vst [vmem:[#allocation103_spill] sm:$0xff] %v16167_v52  ;;  %v16172_v15 = vpop.f32.mrf.mxu0  ;;  %v16182_v52 = vld [vmem:[#allocation6 + $0x70] sm:$0xff]  ;;  %20812 = vst [vmem:[#allocation117_spill] sm:$0xff] %v16248_v19 }
 0x3da   : > { %v16180_v2 = vpop.f32.mrf.mxu1  ;;  %20794 = vst [vmem:[#allocation105_spill] sm:$0xff] %v16182_v52  ;;  %3559 = vmatmul.mubr.f32.gmra.mxu1 %v16182_v52  ;;  %v1214_v51 = vand.u32 2147483647, %v1170_v55  ;;  %v1302_v35 = vmul.f32 0.5, %v1170_v55  ;;  %v13176_v52 = vld [vmem:[%s14442_s5 + $0x78] sm:$0xff]  ;;  %vm16232_vm14 = vcmp.lt.f32.partialorder %v1215_v29, 1.0 }
 0x3db   : > { %20793 = vst [vmem:[#allocation104_spill] sm:$0xff] %v16180_v2  ;;  %v16189_v8 = vpop.f32.mrf.mxu0  ;;  %10774 = vmatprep.mubr.msk.f32.mxu1 %vm1466_vm0, %v16191_v24  ;;  %v1303_v2 = vmul.f32 0.5, %v1171_v63  ;;  %v16251_v24 = vld [vmem:[#allocation6 + $0xb8] sm:$0xff] }
 0x3dc   : > { %v16195_v6 = vpop.f32.mrf.mxu1  ;;  %v1346_v49 = vmul.f32 %v1302_v35, %v1170_v55  ;;  %v10561_v48 = vadd.f32 -0.5, %v1214_v51  ;;  %vm16221_vm13 = vcmp.lt.f32.partialorder %v1214_v51, 1.0  ;;  %20813 = vst [vmem:[#allocation118_spill] sm:$0xff] %v16251_v24  ;;  %v13182_v55 = vld [vmem:[%s14442_s5 + $0x80] sm:$0xff] }
 0x3dd   : > { %20798 = vst [vmem:[#allocation107_spill] sm:$0xff] %v16195_v6  ;;  %v16199_v4 = vpop.f32.mrf.mxu0  ;;  %v1347_v14 = vmul.f32 %v1303_v2, %v1171_v63  ;;  %v16236_v63 = vld [vmem:[#allocation6 + $0xa8] sm:$0xff]  ;;  %v1483_v2 = vadd.f32 %v1482_v56, %v1481_v26 }
 0x3de   : > { %v16203_v11 = vpop.f32.mrf.mxu1  ;;  %3565 = vmatmul.mubr.f32.gmra.mxu1 %v16205_v13  ;;  %v10562_v13 = vadd.f32 -0.5, %v1215_v29  ;;  %20809 = vst [vmem:[#allocation114_spill] sm:$0xff] %v16236_v63 }
 0x3df   : > { %20799 = vst [vmem:[#allocation108_spill] sm:$0xff] %v16203_v11  ;;  %v16208_v21 = vpop.f32.mrf.mxu0  ;;  %10775 = vmatprep.mubr.msk.f32.mxu1 %vm1466_vm0, %v16210_v36  ;;  %v13175_v11 = vld [vmem:[%s14450_s26 + $0x70] sm:$0xff]  ;;  %v13177_v36 = vld [vmem:[%s14450_s26 + $0x78] sm:$0xff] }
 0x3e0   : > { %v16214_v3 = vpop.f32.mrf.mxu1  ;;  %v1172_v6 = vsub.f32 %v13174_v58, %v13175_v11  ;;  %v1173_v27 = vsub.f32 %v13176_v52, %v13177_v36  ;;  %v1434_v52 = vsel %vm16221_vm13, %v1346_v49, %v10561_v48  ;;  %v1435_v29 = vsel %vm16232_vm14, %v1347_v14, %v10562_v13 }
 0x3e1   : > { %20802 = vst [vmem:[#allocation111_spill] sm:$0xff] %v16214_v3  ;;  %v16219_v25 = vpop.f32.mrf.mxu0  ;;  %v16229_v3 = vld [vmem:[#allocation6 + $0x90] sm:$0xff]  ;;  %v1484_v56 = vadd.f32 %v1483_v2, %v1434_v52  ;;  %v1485_v14 = vsel %vm1466_vm0, %v1435_v29, 0.0 }
 0x3e2   : > { %v16227_v7 = vpop.f32.mrf.mxu1  ;;  %20806 = vst [vmem:[#allocation113_spill] sm:$0xff] %v16229_v3  ;;  %3571 = vmatmul.mubr.f32.gmra.mxu1 %v16229_v3  ;;  %v1216_v35 = vand.u32 2147483647, %v1172_v6  ;;  %v1304_v31 = vmul.f32 0.5, %v1172_v6  ;;  %v1217_v58 = vand.u32 2147483647, %v1173_v27 }
 0x3e3   : > { %20805 = vst [vmem:[#allocation112_spill] sm:$0xff] %v16227_v7  ;;  %v2769_v11 = vpop.f32.mrf.mxu0  ;;  %10776 = vmatprep.mubr.msk.f32.mxu1 %vm1466_vm0, %v16236_v63  ;;  %v1305_v7 = vmul.f32 0.5, %v1173_v27  ;;  %v16268_v52 = vld [vmem:[#allocation6 + $0xb0] sm:$0xff] }
 0x3e4   : > { %v16240_v51 = vpop.f32.mrf.mxu1  ;;  %v1348_v13 = vmul.f32 %v1304_v31, %v1172_v6  ;;  %v10563_v48 = vadd.f32 -0.5, %v1216_v35  ;;  %v10564_v0 = vadd.f32 -0.5, %v1217_v58  ;;  %vm16260_vm15 = vcmp.lt.f32.partialorder %v1216_v35, 1.0 }
 0x3e5   : > { %20810 = vst [vmem:[#allocation115_spill] sm:$0xff] %v16240_v51  ;;  %v2771_v36 = vpop.f32.mrf.mxu0  ;;  %vm16271_vm1 = vcmp.lt.f32.partialorder %v1217_v58, 1.0 }
 0x3e6   : > { %v16246_v3 = vpop.f32.mrf.mxu1  ;;  %3577 = vmatmul.mubr.f32.gmra.mxu1 %v16248_v19  ;;  %v1349_v19 = vmul.f32 %v1305_v7, %v1173_v27  ;;  %v1436_v7 = vsel %vm16260_vm15, %v1348_v13, %v10563_v48  ;;  %v13190_v13 = vld [vmem:[%s14442_s5 + $0x90] sm:$0xff] }
 0x3e7   : > { %20811 = vst [vmem:[#allocation116_spill] sm:$0xff] %v16246_v3  ;;  %v2775_v26 = vpop.f32.mrf.mxu0  ;;  %10777 = vmatprep.mubr.msk.f32.mxu1 %vm1466_vm0, %v16251_v24  ;;  %v13183_v3 = vld [vmem:[%s14450_s26 + $0x80] sm:$0xff]  ;;  %v1175_v24 = vsub.f32 %v13184_v60, %v13185_v22  ;;  %v1486_v60 = vadd.f32 %v1485_v14, %v1484_v56 }
 0x3e8   : > { %v16255_v49 = vpop.f32.mrf.mxu1  ;;  %v1174_v51 = vsub.f32 %v13182_v55, %v13183_v3  ;;  %v16275_v3 = vld [vmem:[#allocation6 + $0xc8] sm:$0xff]  ;;  %v1437_v29 = vsel %vm16271_vm1, %v1349_v19, %v10564_v0  ;;  %v16291_v56 = vld [vmem:[#allocation6 + $0xc0] sm:$0xff] }
 0x3e9   : > { %v2777_v63 = vpop.f32.mrf.mxu0  ;;  %v1219_v58 = vand.u32 2147483647, %v1175_v24  ;;  %v1487_v19 = vadd.f32 %v1486_v60, %v1436_v7  ;;  %v13192_v60 = vld [vmem:[%s14442_s5 + $0x98] sm:$0xff] }
 0x3ea   : > { %v16266_v2 = vpop.f32.mrf.mxu1  ;;  %3583 = vmatmul.mubr.f32.gmra.mxu1 %v16268_v52  ;;  %3643 = vmatprep.subr.mxu1 %v2777_v63  ;;  %v1218_v63 = vand.u32 2147483647, %v1174_v51  ;;  %v1306_v35 = vmul.f32 0.5, %v1174_v51  ;;  %v13193_v7 = vld [vmem:[%s14450_s26 + $0x98] sm:$0xff] }
 0x3eb   : > { %20816 = vst [vmem:[#allocation119_spill] sm:$0xff] %v16266_v2  ;;  %3644 = vmatpush1.msra.mxu1 %v2775_v26  ;;  %10778 = vmatprep.mubr.msk.f32.mxu1 %vm1466_vm0, %v16275_v3  ;;  %v16279_v27 = vpop.f32.mrf.mxu0  ;;  %v1307_v26 = vmul.f32 0.5, %v1175_v24  ;;  %vm16323_vm3 = vcmp.lt.f32.partialorder %v1219_v58, 1.0 }
 0x3ec   : > { %v16281_v22 = vpop.f32.mrf.mxu1  ;;  %3645 = vmatprep.subr.mxu1 %v2771_v36  ;;  %v1488_v36 = vsel %vm1466_vm0, %v1437_v29, 0.0  ;;  %v1350_v14 = vmul.f32 %v1306_v35, %v1174_v51  ;;  %vm16311_vm2 = vcmp.lt.f32.partialorder %v1218_v63, 1.0  ;;  %v16319_v51 = vld [vmem:[#allocation6 + $0xd0] sm:$0xff] }
 0x3ed   : > { %20819 = vst [vmem:[#allocation120_spill] sm:$0xff] %v16281_v22  ;;  %3646 = vmatpush1.msra.mxu1 %v2769_v11  ;;  %v16285_v31 = vpop.f32.mrf.mxu0  ;;  %v10566_v22 = vadd.f32 -0.5, %v1219_v58  ;;  %v1489_v35 = vadd.f32 %v1488_v36, %v1487_v19  ;;  %v16346_v36 = vld [vmem:[#allocation6 + $0xe0] sm:$0xff] }
 0x3ee   : > { %v16289_v55 = vpop.f32.mrf.mxu1  ;;  %3589 = vmatmul.mubr.f32.gmra.mxu1 %v16291_v56  ;;  %3647 = vmatprep.subr.mxu1 %v16219_v25  ;;  %v10565_v25 = vadd.f32 -0.5, %v1218_v63 }
 0x3ef   : > { %20820 = vst [vmem:[#allocation121_spill] sm:$0xff] %v16289_v55  ;;  %3648 = vmatpush1.msra.mxu1 %v16208_v21  ;;  %10779 = vmatprep.mubr.msk.f32.mxu1 %vm1466_vm0, %v16296_v32  ;;  %v16300_v0 = vpop.f32.mrf.mxu0  ;;  %v13191_v21 = vld [vmem:[%s14450_s26 + $0x90] sm:$0xff]  ;;  %v1351_v55 = vmul.f32 %v1307_v26, %v1175_v24  ;;  %v16328_v24 = vld [vmem:[#allocation6 + $0xe8] sm:$0xff] }
 0x3f0   : > { %v16302_v11 = vpop.f32.mrf.mxu1  ;;  %3649 = vmatprep.subr.mxu1 %v16199_v4  ;;  %v1176_v48 = vsub.f32 %v13190_v13, %v13191_v21  ;;  %v1177_v4 = vsub.f32 %v13192_v60, %v13193_v7 }
 0x3f1   : > { %20821 = vst [vmem:[#allocation122_spill] sm:$0xff] %v16302_v11  ;;  %3650 = vmatpush1.msra.mxu1 %v16189_v8  ;;  %v16309_v6 = vpop.f32.mrf.mxu0  ;;  %v1439_v13 = vsel %vm16323_vm3, %v1351_v55, %v10566_v22 }
 0x3f2   : > { %v16317_v11 = vpop.f32.mrf.mxu1  ;;  %3595 = vmatmul.mubr.f32.gmra.mxu1 %v16319_v51  ;;  %3651 = vmatprep.subr.mxu1 %v16172_v15  ;;  %v1438_v15 = vsel %vm16311_vm2, %v1350_v14, %v10565_v25  ;;  %v1220_v58 = vand.u32 2147483647, %v1176_v48  ;;  %v1308_v26 = vmul.f32 0.5, %v1176_v48  ;;  %v1221_v21 = vand.u32 2147483647, %v1177_v4  ;;  %v13198_v25 = vld [vmem:[%s14442_s5 + $0xa0] sm:$0xff] }
 0x3f3   : > { %20824 = vst [vmem:[#allocation123_spill] sm:$0xff] %v16317_v11  ;;  %3652 = vmatpush1.msra.mxu1 %v16161_v46  ;;  %10780 = vmatprep.mubr.msk.f32.mxu1 %vm1466_vm0, %v16328_v24  ;;  %v16332_v63 = vpop.f32.mrf.mxu0  ;;  %v1309_v60 = vmul.f32 0.5, %v1177_v4  ;;  %v1490_v2 = vadd.f32 %v1489_v35, %v1438_v15  ;;  %v1491_v55 = vsel %vm1466_vm0, %v1439_v13, 0.0  ;;  %v13200_v35 = vld [vmem:[%s14442_s5 + $0xa8] sm:$0xff] }
 0x3f4   : > { %v16334_v29 = vpop.f32.mrf.mxu1  ;;  %3653 = vmatprep.subr.mxu1 %v16152_v42  ;;  %v1352_v14 = vmul.f32 %v1308_v26, %v1176_v48  ;;  %vm16366_vm4 = vcmp.lt.f32.partialorder %v1220_v58, 1.0  ;;  %v13201_v15 = vld [vmem:[%s14450_s26 + $0xa8] sm:$0xff]  ;;  %v16374_v48 = vld [vmem:[#allocation6 + $0xf0] sm:$0xff]  ;;  %vm16378_vm5 = vcmp.lt.f32.partialorder %v1221_v21, 1.0 }
 0x3f5   : > { %20827 = vst [vmem:[#allocation124_spill] sm:$0xff] %v16334_v29  ;;  %3654 = vmatpush1.msra.mxu1 %v16142_v30  ;;  %v16340_v46 = vpop.f32.mrf.mxu0  ;;  %v16351_v30 = vld [vmem:[#allocation6 + $0xf8] sm:$0xff]  ;;  %v10568_v29 = vadd.f32 -0.5, %v1221_v21 }
 0x3f6   : > { %v16344_v19 = vpop.f32.mrf.mxu1  ;;  %3601 = vmatmul.mubr.f32.gmra.mxu1 %v16346_v36  ;;  %3655 = vmatprep.subr.mxu1 %v16125_v28  ;;  %v10567_v28 = vadd.f32 -0.5, %v1220_v58  ;;  %v1492_v58 = vadd.f32 %v1491_v55, %v1490_v2 }
 0x3f7   : > { %20828 = vst [vmem:[#allocation125_spill] sm:$0xff] %v16344_v19  ;;  %3656 = vmatpush1.msra.mxu1 %v16114_v20  ;;  %10781 = vmatprep.mubr.msk.f32.mxu1 %vm1466_vm0, %v16351_v30  ;;  %v16355_v42 = vpop.f32.mrf.mxu0  ;;  %v13199_v20 = vld [vmem:[%s14450_s26 + $0xa0] sm:$0xff]  ;;  %v1353_v19 = vmul.f32 %v1309_v60, %v1177_v4  ;;  %v16383_v4 = vld [vmem:[#allocation6 + $0x108] sm:$0xff] }
 0x3f8   : > { %v16357_v22 = vpop.f32.mrf.mxu1  ;;  %3657 = vmatprep.subr.mxu1 %v16105_v23  ;;  %v1178_v7 = vsub.f32 %v13198_v25, %v13199_v20  ;;  %v1179_v23 = vsub.f32 %v13200_v35, %v13201_v15  ;;  %v1440_v13 = vsel %vm16366_vm4, %v1352_v14, %v10567_v28 }
 0x3f9   : > { %20829 = vst [vmem:[#allocation126_spill] sm:$0xff] %v16357_v22  ;;  %3658 = vmatpush1.msra.mxu1 %v16097_v61  ;;  %v16364_v8 = vpop.f32.mrf.mxu0  ;;  %v1441_v60 = vsel %vm16378_vm5, %v1353_v19, %v10568_v29  ;;  %v1493_v11 = vadd.f32 %v1492_v58, %v1440_v13  ;;  %v13206_v29 = vld [vmem:[%s14442_s5 + $0xb8] sm:$0xff]  ;;  %v13209_v61 = vld [vmem:[%s14450_s26 + $0xb0] sm:$0xff] }
 0x3fa   : > { %v16372_v22 = vpop.f32.mrf.mxu1  ;;  %3607 = vmatmul.mubr.f32.gmra.mxu1 %v16374_v48  ;;  %3659 = vmatprep.subr.mxu1 %v16080_v57  ;;  %v1222_v57 = vand.u32 2147483647, %v1178_v7  ;;  %v1310_v21 = vmul.f32 0.5, %v1178_v7  ;;  %v1223_v25 = vand.u32 2147483647, %v1179_v23  ;;  %v1311_v2 = vmul.f32 0.5, %v1179_v23 }
 0x3fb   : > { %20832 = vst [vmem:[#allocation127_spill] sm:$0xff] %v16372_v22  ;;  %3660 = vmatpush1.msra.mxu1 %v16071_v12  ;;  %10782 = vmatprep.mubr.msk.f32.mxu1 %vm1466_vm0, %v16383_v4  ;;  %v13207_v19 = vld [vmem:[%s14450_s26 + $0xb8] sm:$0xff]  ;;  %v1494_v20 = vsel %vm1466_vm0, %v1441_v60, 0.0 }
 0x3fc   : > { %v16387_v26 = vpop.f32.mrf.mxu1  ;;  %3661 = vmatprep.subr.mxu1 %v16062_v18  ;;  %v16393_v12 = vpop.f32.mrf.mxu0  ;;  %v16399_v18 = vld [vmem:[#allocation6 + $0x100] sm:$0xff]  ;;  %v1181_v14 = vsub.f32 %v13206_v29, %v13207_v19  ;;  %v1354_v35 = vmul.f32 %v1310_v21, %v1178_v7  ;;  %v10569_v15 = vadd.f32 -0.5, %v1222_v57  ;;  %v10570_v22 = vadd.f32 -0.5, %v1223_v25  ;;  %v16423_v29 = vld [vmem:[#allocation6 + $0x110] sm:$0xff] }
 0x3fd   : > { %20835 = vst [vmem:[#allocation128_spill] sm:$0xff] %v16387_v26  ;;  %3662 = vmatpush1.msra.mxu1 %v16052_v33  ;;  %v16404_v33 = vld [vmem:[#allocation6 + $0x118] sm:$0xff]  ;;  %v1355_v26 = vmul.f32 %v1311_v2, %v1179_v23  ;;  %vm16417_vm6 = vcmp.lt.f32.partialorder %v1222_v57, 1.0  ;;  %vm16427_vm7 = vcmp.lt.f32.partialorder %v1223_v25, 1.0  ;;  %v1495_v7 = vadd.f32 %v1494_v20, %v1493_v11  ;;  %v16446_v19 = vld [vmem:[#allocation6 + $0x120] sm:$0xff]  ;;  %v13214_v20 = vld [vmem:[%s14450_s26 + $0xc8] sm:$0xff] }
 0x3fe   : > { %v16397_v55 = vpop.f32.mrf.mxu1  ;;  %3613 = vmatmul.mubr.f32.gmra.mxu1 %v16399_v18  ;;  %3663 = vmatprep.subr.mxu1 %v16035_v39  ;;  %v13208_v39 = vld [vmem:[%s14442_s5 + $0xb0] sm:$0xff]  ;;  %v1225_v23 = vand.u32 2147483647, %v1181_v14  ;;  %v1313_v57 = vmul.f32 0.5, %v1181_v14 }
 0x3ff   : > { %20836 = vst [vmem:[#allocation129_spill] sm:$0xff] %v16397_v55  ;;  %3664 = vmatpush1.msra.mxu1 %v16023_v47  ;;  %10783 = vmatprep.mubr.msk.f32.mxu1 %vm1466_vm0, %v16404_v33  ;;  %v1180_v47 = vsub.f32 %v13208_v39, %v13209_v61  ;;  %v2807_v55 = vpop.f32.mrf.mxu0  ;;  %v1443_v2 = vsel %vm16427_vm7, %v1355_v26, %v10570_v22  ;;  %v13216_v39 = vld [vmem:[%s14442_s5 + $0xc0] sm:$0xff] }
 0x400   : > { %v16410_v28 = vpop.f32.mrf.mxu1  ;;  %3665 = vmatprep.subr.mxu1 %v16013_v44  ;;  %v1357_v22 = vmul.f32 %v1313_v57, %v1181_v14  ;;  %v10572_v26 = vadd.f32 -0.5, %v1225_v23  ;;  %v13217_v61 = vld [vmem:[%s14450_s26 + $0xc0] sm:$0xff]  ;;  %vm16463_vm8 = vcmp.lt.f32.partialorder %v1225_v23, 1.0  ;;  %v16474_v57 = vld [vmem:[#allocation6 + $0x130] sm:$0xff] }
 0x401   : > { %20837 = vst [vmem:[#allocation130_spill] sm:$0xff] %v16410_v28  ;;  %3666 = vmatpush1.msra.mxu1 %v16005_v10  ;;  %v16432_v10 = vld [vmem:[#allocation6 + $0x128] sm:$0xff]  ;;  %v1224_v60 = vand.u32 2147483647, %v1180_v47  ;;  %v1312_v25 = vmul.f32 0.5, %v1180_v47  ;;  %v1182_v58 = vsub.f32 %v13216_v39, %v13217_v61  ;;  %20851 = vst [vmem:[#allocation136_spill] sm:$0xff] %v16474_v57 }
 0x402   : > { %v16421_v13 = vpop.f32.mrf.mxu1  ;;  %3619 = vmatmul.mubr.f32.gmra.mxu1 %v16423_v29  ;;  %3667 = vmatprep.subr.mxu1 %v15989_v1  ;;  %v1442_v1 = vsel %vm16417_vm6, %v1354_v35, %v10569_v15  ;;  %v16453_v15 = vld [vmem:[#allocation6 + $0x138] sm:$0xff]  ;;  %v16490_v39 = vld [vmem:[#allocation6 + $0x140] sm:$0x3f]  ;;  %v13224_v14 = vld [vmem:[%s14442_s5 + $0xd0] sm:$0xff] }
 0x403   : > { %20840 = vst [vmem:[#allocation131_spill] sm:$0xff] %v16421_v13  ;;  %3668 = vmatpush1.msra.mxu1 %v15976_v45  ;;  %10784 = vmatprep.mubr.msk.f32.mxu1 %vm1466_vm0, %v16432_v10  ;;  %v2811_v45 = vpop.f32.mrf.mxu0  ;;  %vm16468_vm9 = vcmp.lt.f32.partialorder %v1224_v60, 1.0  ;;  %20855 = vst [vmem:[#allocation140_spill] sm:$0xff] %v16490_v39  ;;  %v13223_v61 = vld [vmem:[%s14450_s26 + $0xd8] sm:$0xff]  ;;  %v20962_v28 = vld [vmem:[#allocation68_spill] sm:$0xff] }
 0x404   : > { %v16436_v21 = vpop.f32.mrf.mxu1  ;;  %3669 = vmatprep.subr.mxu1 %v15963_v9  ;;  %v13213_v9 = vld [vmem:[%s14442_s5 + $0xc8] sm:$0xff] }
 0x405   : > { %20843 = vst [vmem:[#allocation132_spill] sm:$0xff] %v16436_v21  ;;  %3670 = vmatpush1.msra.mxu1 %v15957_v38  ;;  %v1183_v35 = vsub.f32 %v13213_v9, %v13214_v20  ;;  %v1496_v38 = vadd.f32 %v1495_v7, %v1442_v1  ;;  %v10571_v20 = vadd.f32 -0.5, %v1224_v60 }
 0x406   : > { %v16444_v11 = vpop.f32.mrf.mxu1  ;;  %3625 = vmatmul.mubr.f32.gmra.mxu1 %v16446_v19  ;;  %3671 = vmatprep.subr.mxu1 %v15945_v50  ;;  %v1497_v50 = vsel %vm1466_vm0, %v1443_v2, 0.0  ;;  %v1314_v2 = vmul.f32 0.5, %v1182_v58 }
 0x407   : > { %20844 = vst [vmem:[#allocation133_spill] sm:$0xff] %v16444_v11  ;;  %3672 = vmatpush1.msra.mxu1 %v15935_v34  ;;  %10785 = vmatprep.mubr.msk.f32.mxu1 %vm1466_vm0, %v16453_v15  ;;  %v1356_v34 = vmul.f32 %v1312_v25, %v1180_v47  ;;  %v2813_v11 = vpop.f32.mrf.mxu0  ;;  %v1498_v47 = vadd.f32 %v1497_v50, %v1496_v38  ;;  %v1227_v23 = vand.u32 2147483647, %v1183_v35  ;;  %v1315_v25 = vmul.f32 0.5, %v1183_v35 }
 0x408   : > { %v16459_v44 = vpop.f32.mrf.mxu1  ;;  %3673 = vmatprep.subr.mxu1 %v15928_v62  ;;  %v16477_v62 = vld [vmem:[#allocation6 + $0x148] sm:$0x3f] }
 0x409   : > { %20845 = vst [vmem:[#allocation134_spill] sm:$0xff] %v16459_v44  ;;  %3674 = vmatpush1.msra.mxu1 %v15918_v54  ;;  %20852 = vst [vmem:[#allocation137_spill] sm:$0xff] %v16477_v62  ;;  %v1445_v54 = vsel %vm16463_vm8, %v1357_v22, %v10572_v26  ;;  %v1444_v60 = vsel %vm16468_vm9, %v1356_v34, %v10571_v20  ;;  %v10574_v26 = vadd.f32 -0.5, %v1227_v23  ;;  %vm16505_vm10 = vcmp.lt.f32.partialorder %v1227_v23, 1.0  ;;  %v4821_v23 = vld [vmem:[#allocation22 + $0x78] sm:$0xff]  ;;  %v20958_v44 = vld [vmem:[#allocation66_spill] sm:$0xff] }
 0x40a   : > { %v16472_v7 = vpop.f32.mrf.mxu1  ;;  %3631 = vmatmul.mubr.f32.gmra.mxu1 %v16474_v57  ;;  %3695 = vmatprep.subr.mxu1 %v2813_v11  ;;  %v1500_v38 = vsel %vm1466_vm0, %v1445_v54, 0.0  ;;  %v1499_v22 = vadd.f32 %v1498_v47, %v1444_v60  ;;  %v1359_v34 = vmul.f32 %v1315_v25, %v1183_v35  ;;  %v1358_v20 = vmul.f32 %v1314_v2, %v1182_v58  ;;  %v13229_v54 = vld [vmem:[%s14450_s26 + $0xe0] sm:$0xff] }
 0x40b   : > { %20850 = vst [vmem:[#allocation135_spill] sm:$0xff] %v16472_v7  ;;  %3696 = vmatpush2.msra.mxu1 %v2811_v45  ;;  %10786 = vmatprep.mubr.msk.f32.mxu1 %vm1466_vm0, %v16477_v62  ;;  %v1226_v45 = vand.u32 2147483647, %v1182_v58  ;;  %v20864_v2 = vmov 0.0   ;;  %v16830_v21 = vmul.f32 %v20958_v44, %v20958_v44  ;;  %v20964_v57 = vld [vmem:[#allocation82_spill] sm:$0xff]  ;;  %v20966_v44 = vld [vmem:[#allocation69_spill] sm:$0xff] }
 0x40c   : > { %v16483_v1 = vpop.f32.mrf.mxu1  ;;  %3697 = vmatprep.subr.mxu1 %v2807_v55  ;;  %v13221_v55 = vld [vmem:[#allocation6 + $0x8] sm:$0xff]  ;;  %v1447_v60 = vsel %vm16505_vm10, %v1359_v34, %v10574_v26 }
 0x40d   : > { %20853 = vst [vmem:[#allocation138_spill] sm:$0xff] %v16483_v1  ;;  %3698 = vmatpush2.msra.mxu1 %v16393_v12  ;;  %v13222_v12 = vld [vmem:[%s14442_s5 + $0xd8] sm:$0xff]  ;;  %vm16509_vm11 = vcmp.lt.f32.partialorder %v1226_v45, 1.0  ;;  %v1503_v26 = vsel %vm1466_vm0, %v1447_v60, 0.0  ;;  %v20955_v1 = vld [vmem:[#allocation63_spill] sm:$0xff] }
 0x40e   : > { %v16488_v11 = vpop.f32.mrf.mxu1  ;;  %3637 = vmatmul.mubr.f32.gmra.mxu1 %v16490_v39  ;;  %3699 = vmatprep.subr.mxu1 %v16364_v8  ;;  %v1185_v50 = vsub.f32 %v13222_v12, %v13223_v61  ;;  %v10573_v8 = vadd.f32 -0.5, %v1226_v45  ;;  %v16841_v39 = vmul.f32 %v20962_v28, %v20962_v28 }
 0x40f   : > { %20854 = vst [vmem:[#allocation139_spill] sm:$0xff] %v16488_v11  ;;  %3700 = vmatpush2.msra.mxu1 %v16355_v42  ;;  %10787 = vmatprep.mubr.msk.f32.mxu1 %vm1466_vm0, %v13221_v55  ;;  %v13225_v11 = vld [vmem:[%s14450_s26 + $0xd0] sm:$0xff]  ;;  %v13228_v55 = vld [vmem:[%s14442_s5 + $0xe0] sm:$0xff] }
 0x410   : > { %v16499_v9 = vpop.f32.mrf.mxu1  ;;  %3701 = vmatprep.subr.mxu1 %v16340_v46  ;;  %v1184_v42 = vsub.f32 %v13224_v14, %v13225_v11  ;;  %v1501_v46 = vadd.f32 %v1500_v38, %v1499_v22  ;;  %v1229_v35 = vand.u32 2147483647, %v1185_v50  ;;  %v1317_v58 = vmul.f32 0.5, %v1185_v50  ;;  %v4820_v11 = vld [vmem:[#allocation22 + $0x70] sm:$0xff] }
 0x411   : > { %20856 = vst [vmem:[#allocation141_spill] sm:$0xff] %v16499_v9  ;;  %3702 = vmatpush2.msra.mxu1 %v16332_v63  ;;  %v1446_v25 = vsel %vm16509_vm11, %v1358_v20, %v10573_v8  ;;  %v13227_v38 = vld [vmem:[%s14450_s26 + $0xe8] sm:$0xff] }
 0x412   : > { %v16513_v47 = vpop.f32.mrf.mxu1  ;;  %3703 = vmatprep.subr.mxu1 %v16309_v6  ;;  %v1228_v45 = vand.u32 2147483647, %v1184_v42  ;;  %v1316_v6 = vmul.f32 0.5, %v1184_v42  ;;  %v1502_v12 = vadd.f32 %v1501_v46, %v1446_v25  ;;  %v10576_v61 = vadd.f32 -0.5, %v1229_v35  ;;  %v4818_v46 = vld [vmem:[#allocation22 + $0x60] sm:$0xff] }
 0x413   : > { %20861 = vst [vmem:[#allocation142_spill] sm:$0xff] %v16513_v47  ;;  %3704 = vmatpush2.msra.mxu1 %v16300_v0  ;;  %vm16537_vm12 = vcmp.lt.f32.partialorder %v1229_v35, 1.0 }
 0x414   : > { %v16517_v63 = vpop.f32.mrf.mxu1  ;;  %3705 = vmatprep.subr.mxu1 %v16285_v31  ;;  %v13226_v31 = vld [vmem:[%s14442_s5 + $0xe8] sm:$0xff]  ;;  %v1360_v8 = vmul.f32 %v1316_v6, %v1184_v42  ;;  %v10575_v14 = vadd.f32 -0.5, %v1228_v45  ;;  %vm16543_vm13 = vcmp.lt.f32.partialorder %v1228_v45, 1.0  ;;  %v1504_v35 = vadd.f32 %v1503_v26, %v1502_v12 }
 0x415   : > { %20862 = vst [vmem:[#allocation143_spill] sm:$0xff] %v16517_v63  ;;  %3706 = vmatpush2.msra.mxu1 %v16279_v27  ;;  %v1187_v22 = vsub.f32 %v13226_v31, %v13227_v38  ;;  %v1361_v27 = vmul.f32 %v1317_v58, %v1185_v50  ;;  %v20945_v63 = vld [vmem:[#allocation60_spill] sm:$0xff] }
 0x416   : > { %v16525_v0 = vpop.f32.mrf.mxu1  ;;  %3708 = vmatmul.mubr.f32.vlgmr.msra.gmra.mxu1 %v16018_v40  ;;  %4828 = vmatprep.subr.mxu1 %v20864_v2  ;;  %v4819_v40 = vld [vmem:[#allocation22 + $0x68] sm:$0xff]  ;;  %v1448_v45 = vsel %vm16543_vm13, %v1360_v8, %v10575_v14 }
 0x417   : > { %20863 = vst [vmem:[#allocation144_spill] sm:$0xff] %v16525_v0  ;;  %10788 = vmatprep.mubr.msk.f32.mxu1 %vm1466_vm0, %v16025_v5  ;;  %4829 = vmatpush1.msra.mxu1 %v4821_v23  ;;  %v1186_v5 = vsub.f32 %v13228_v55, %v13229_v54  ;;  %v1449_v42 = vsel %vm16537_vm12, %v1361_v27, %v10576_v61  ;;  %v1231_v58 = vand.u32 2147483647, %v1187_v22  ;;  %v1319_v60 = vmul.f32 0.5, %v1187_v22  ;;  %v13230_v27 = vld [vmem:[%s14442_s5 + $0xf8] sm:$0xff]  ;;  %v13232_v54 = vld [vmem:[%s14442_s5 + $0xf0] sm:$0xff] }
 0x418   : > { %v16534_v34 = vpop.f32.mrf.mxu1  ;;  %4830 = vmatprep.subr.mxu1 %v20864_v2  ;;  %v1506_v31 = vsel %vm1466_vm0, %v1449_v42, 0.0  ;;  %v1505_v38 = vadd.f32 %v1504_v35, %v1448_v45  ;;  %v13231_v61 = vld [vmem:[%s14450_s26 + $0xf8] sm:$0xff]  ;;  %v20944_v0 = vld [vmem:[#allocation59_spill] sm:$0xff] }
 0x419   : > { %20865 = vst [vmem:[#allocation145_spill] sm:$0xff] %v16534_v34  ;;  %4831 = vmatpush1.msra.mxu1 %v4820_v11  ;;  %v1230_v6 = vand.u32 2147483647, %v1186_v5  ;;  %v1318_v11 = vmul.f32 0.5, %v1186_v5  ;;  %v1363_v26 = vmul.f32 %v1319_v60, %v1187_v22  ;;  %v10578_v12 = vadd.f32 -0.5, %v1231_v58  ;;  %v4813_v60 = vld [vmem:[#allocation22 + $0x38] sm:$0xff] }
 0x41a   : > { %v16547_v50 = vpop.f32.mrf.mxu1  ;;  %3714 = vmatmul.mubr.f32.gmra.mxu1 %v16043_v59  ;;  %4832 = vmatprep.subr.mxu1 %v20864_v2  ;;  %v4817_v59 = vld [vmem:[#allocation22 + $0x58] sm:$0xff]  ;;  %vm16570_vm14 = vcmp.lt.f32.partialorder %v1231_v58, 1.0  ;;  %v1507_v42 = vadd.f32 %v1506_v31, %v1505_v38  ;;  %v20943_v34 = vld [vmem:[#allocation58_spill] sm:$0xff]  ;;  %20963 = vst [vmem:[#allocation59_spill] sm:$0xff] %v16841_v39  ;;  %v20972_v39 = vld [vmem:[#allocation84_spill] sm:$0xff] }
 0x41b   : > { %20870 = vst [vmem:[#allocation146_spill] sm:$0xff] %v16547_v50  ;;  %10789 = vmatprep.mubr.msk.f32.mxu1 %vm1466_vm0, %v16054_v53  ;;  %4833 = vmatpush1.msra.mxu1 %v4819_v40  ;;  %v4816_v53 = vld [vmem:[#allocation22 + $0x50] sm:$0xff]  ;;  %v1189_v40 = vsub.f32 %v13230_v27, %v13231_v61  ;;  %v1362_v14 = vmul.f32 %v1318_v11, %v1186_v5  ;;  %v10577_v55 = vadd.f32 -0.5, %v1230_v6  ;;  %vm16576_vm15 = vcmp.lt.f32.partialorder %v1230_v6, 1.0 }
 0x41c   : > { %v16555_v25 = vpop.f32.mrf.mxu1  ;;  %4834 = vmatprep.subr.mxu1 %v20864_v2  ;;  %v1451_v5 = vsel %vm16570_vm14, %v1363_v26, %v10578_v12  ;;  %v4812_v11 = vld [vmem:[#allocation22 + $0x30] sm:$0xff]  ;;  %v13234_v26 = vld [vmem:[%s14442_s5 + $0x100] sm:$0xff] }
 0x41d   : > { %20871 = vst [vmem:[#allocation147_spill] sm:$0xff] %v16555_v25  ;;  %4835 = vmatpush1.msra.mxu1 %v4818_v46  ;;  %v4814_v46 = vld [vmem:[#allocation22 + $0x40] sm:$0xff]  ;;  %v1233_v35 = vand.u32 2147483647, %v1189_v40  ;;  %v1509_v31 = vsel %vm1466_vm0, %v1451_v5, 0.0 }
 0x41e   : > { %3720 = vmatmul.mubr.f32.gmra.mxu1 %v16066_v41  ;;  %4836 = vmatprep.subr.mxu1 %v20864_v2  ;;  %v16567_v20 = vpop.f32.mrf.mxu1  ;;  %v4815_v41 = vld [vmem:[#allocation22 + $0x48] sm:$0xff]  ;;  %v4810_v5 = vld [vmem:[#allocation22 + $0x20] sm:$0xff] }
 0x41f   : > { %10790 = vmatprep.mubr.msk.f32.mxu1 %vm1466_vm0, %v16073_v43  ;;  %4837 = vmatpush1.msra.mxu1 %v4817_v59  ;;  %20872 = vst [vmem:[#allocation148_spill] sm:$0xff] %v16567_v20  ;;  %v13233_v43 = vld [vmem:[%s14450_s26 + $0xf0] sm:$0xff]  ;;  %v1321_v59 = vmul.f32 0.5, %v1189_v40  ;;  %v13235_v12 = vld [vmem:[%s14450_s26 + $0x100] sm:$0xff]  ;;  %v10580_v8 = vadd.f32 -0.5, %v1233_v35  ;;  %vm16603_vm1 = vcmp.lt.f32.partialorder %v1233_v35, 1.0 }
 0x420   : > { %4838 = vmatprep.subr.mxu1 %v20864_v2  ;;  %v1188_v23 = vsub.f32 %v13232_v54, %v13233_v43  ;;  %v16586_v58 = vpop.f32.mrf.mxu1  ;;  %v1190_v27 = vsub.f32 %v13234_v26, %v13235_v12  ;;  %v13237_v35 = vld [vmem:[%s14450_s26 + $0x108] sm:$0xff]  ;;  %v20891_v12 = vld [vmem:[#allocation102_spill] sm:$0xff] }
 0x421   : > { %4839 = vmatpush1.msra.mxu1 %v4816_v53  ;;  %20877 = vst [vmem:[#allocation149_spill] sm:$0xff] %v16586_v58  ;;  %v20879_v53 = vld [vmem:[#allocation95_spill] sm:$0xff] }
 0x422   : > { %3726 = vmatmul.mubr.f32.gmra.mxu1 %v16088_v37  ;;  %4840 = vmatprep.subr.mxu1 %v20864_v2  ;;  %v1450_v37 = vsel %vm16576_vm15, %v1362_v14, %v10577_v55  ;;  %v1232_v45 = vand.u32 2147483647, %v1188_v23  ;;  %v1320_v6 = vmul.f32 0.5, %v1188_v23  ;;  %v4807_v54 = vld [vmem:[#allocation22 + $0x8] sm:$0xff]  ;;  %vm4632_vm15 = vcmask 310272  }
 0x423   : > { %10791 = vmatprep.mubr.msk.f32.mxu1 %vm1466_vm0, %v16099_v17  ;;  %4841 = vmatpush1.msra.mxu1 %v4815_v41  ;;  %v1508_v38 = vadd.f32 %v1507_v42, %v1450_v37  ;;  %v4811_v41 = vld [vmem:[#allocation22 + $0x28] sm:$0xff] }
 0x424   : > { %4842 = vmatprep.subr.mxu1 %v20864_v2  ;;  %v1364_v14 = vmul.f32 %v1320_v6, %v1188_v23  ;;  %v10579_v55 = vadd.f32 -0.5, %v1232_v45  ;;  %vm16607_vm2 = vcmp.lt.f32.partialorder %v1232_v45, 1.0  ;;  %v13236_v42 = vld [vmem:[%s14442_s5 + $0x108] sm:$0xff]  ;;  %v13245_v58 = vld [vmem:[%s14450_s26 + $0x120] sm:$0xff] }
 0x425   : > { %4843 = vmatpush1.msra.mxu1 %v4814_v46  ;;  %v20886_v46 = vld [vmem:[#allocation97_spill] sm:$0xff]  ;;  %v1510_v23 = vadd.f32 %v1509_v31, %v1508_v38  ;;  %v4808_v38 = vld [vmem:[#allocation22 + $0x10] sm:$0xff]  ;;  %v4827_v20 = vld [vmem:[#allocation22 + $0xa8] sm:$0xff] }
 0x426   : > { %v16591_v17 = vpop.f32.mrf.mxu1  ;;  %3732 = vmatmul.mubr.f32.gmra.mxu1 %v16111_v16  ;;  %4844 = vmatprep.subr.mxu1 %v20864_v2  ;;  %v1365_v16 = vmul.f32 %v1321_v59, %v1189_v40  ;;  %v20887_v40 = vld [vmem:[#allocation98_spill] sm:$0xff]  ;;  %v4809_v59 = vld [vmem:[#allocation22 + $0x18] sm:$0xff]  ;;  %v1452_v6 = vsel %vm16607_vm2, %v1364_v14, %v10579_v55  ;;  %vm4695_vm2 = vcmask 308224  }
 0x427   : > { %20878 = vst [vmem:[#allocation150_spill] sm:$0xff] %v16591_v17  ;;  %10792 = vmatprep.mubr.msk.f32.mxu1 %vm1466_vm0, %v20879_v53  ;;  %4845 = vmatpush1.msra.mxu1 %v4813_v60  ;;  %v1191_v60 = vsub.f32 %v13236_v42, %v13237_v35  ;;  %v1322_v53 = vmul.f32 0.5, %v1190_v27  ;;  %v20890_v31 = vld [vmem:[#allocation101_spill] sm:$0xff] }
 0x428   : > { %v16600_v61 = vpop.f32.mrf.mxu1  ;;  %4846 = vmatprep.subr.mxu1 %v20864_v2  ;;  %v1453_v45 = vsel %vm16603_vm1, %v1365_v16, %v10580_v8  ;;  %v1511_v16 = vadd.f32 %v1510_v23, %v1452_v6  ;;  %v13240_v35 = vld [vmem:[%s14442_s5 + $0x110] sm:$0xff]  ;;  %v13242_v6 = vld [vmem:[%s14442_s5 + $0x128] sm:$0xff]  ;;  %vm4692_vm1 = vcmask 1045504  }
 0x429   : > { %20880 = vst [vmem:[#allocation95_spill] sm:$0xff] %v16600_v61  ;;  %4847 = vmatpush1.msra.mxu1 %v4812_v11  ;;  %v1234_v11 = vand.u32 2147483647, %v1190_v27  ;;  %v1235_v8 = vand.u32 2147483647, %v1191_v60  ;;  %v1323_v14 = vmul.f32 0.5, %v1191_v60  ;;  %v1366_v43 = vmul.f32 %v1322_v53, %v1190_v27 }
 0x42a   : > { %v16611_v22 = vpop.f32.mrf.mxu1  ;;  %3738 = vmatmul.mubr.f32.gmra.mxu1 %v20886_v46  ;;  %4848 = vmatprep.subr.mxu1 %v20864_v2  ;;  %v20899_v53 = vld [vmem:[#allocation105_spill] sm:$0xff]  ;;  %v20952_v61 = vld [vmem:[#allocation96_spill] sm:$0xff] }
 0x42b   : > { %20885 = vst [vmem:[#allocation151_spill] sm:$0xff] %v16611_v22  ;;  %10793 = vmatprep.mubr.msk.f32.mxu1 %vm1466_vm0, %v20887_v40  ;;  %4849 = vmatpush1.msra.mxu1 %v4811_v41  ;;  %v1512_v41 = vsel %vm1466_vm0, %v1453_v45, 0.0  ;;  %v10581_v46 = vadd.f32 -0.5, %v1234_v11  ;;  %v13239_v40 = vld [vmem:[%s14450_s26 + $0x118] sm:$0xff]  ;;  %vm16644_vm3 = vcmp.lt.f32.partialorder %v1234_v11, 1.0  ;;  %vm16662_vm4 = vcmp.lt.f32.partialorder %v1235_v8, 1.0 }
 0x42c   : > { %v16619_v37 = vpop.f32.mrf.mxu1  ;;  %4850 = vmatprep.subr.mxu1 %v20864_v2  ;;  %v20902_v11 = vmov 0  ;;  %v20957_v17 = vld [vmem:[#allocation65_spill] sm:$0xff] }
 0x42d   : > { %20888 = vst [vmem:[#allocation97_spill] sm:$0xff] %v16619_v37  ;;  %4851 = vmatpush1.msra.mxu1 %v4810_v5  ;;  %v13238_v5 = vld [vmem:[%s14442_s5 + $0x118] sm:$0xff]  ;;  %v20903_v11 = vsel %vm16662_vm4, 4294967295, %v20902_v11  ;;  %v16826_v7 = vmul.f32 %v20957_v17, %v20957_v17  ;;  %v16847_v17 = vmul.f32 %v20964_v57, %v20964_v57 }
 0x42e   : > { %v16626_v26 = vpop.f32.mrf.mxu1  ;;  %3744 = vmatmul.mubr.f32.gmra.mxu1 %v20890_v31  ;;  %4852 = vmatprep.subr.mxu1 %v20864_v2  ;;  %v16638_v42 = vsub.f32 %v13238_v5, %v13239_v40  ;;  %v13243_v31 = vld [vmem:[%s14450_s26 + $0x128] sm:$0xff]  ;;  %v4806_v5 = vld [vmem:[#allocation22] sm:$0xff] }
 0x42f   : > { %20889 = vst [vmem:[#allocation98_spill] sm:$0xff] %v16626_v26  ;;  %10794 = vmatprep.mubr.msk.f32.mxu1 %vm1466_vm0, %v20891_v12  ;;  %4853 = vmatpush1.msra.mxu1 %v4809_v59  ;;  %v13241_v59 = vld [vmem:[%s14450_s26 + $0x110] sm:$0xff]  ;;  %v16650_v12 = vsub.f32 %v13242_v6, %v13243_v31  ;;  %v13244_v40 = vld [vmem:[%s14442_s5 + $0x120] sm:$0xff]  ;;  %v16668_v6 = vadd.f32 -0.5, %v1235_v8  ;;  %v1513_v31 = vadd.f32 %v1512_v41, %v1511_v16  ;;  %20965 = vst [vmem:[#allocation60_spill] sm:$0xff] %v16847_v17 }
 0x430   : > { %v16633_v55 = vpop.f32.mrf.mxu1  ;;  %4854 = vmatprep.subr.mxu1 %v20864_v2  ;;  %20893 = vst [vmem:[#allocation102_spill] sm:$0xff] %v16638_v42  ;;  %v16642_v23 = vsub.f32 %v13240_v35, %v13241_v59  ;;  %v16658_v35 = vsub.f32 %v13244_v40, %v13245_v58  ;;  %v16666_v59 = vmul.f32 %v1323_v14, %v1191_v60  ;;  %v20909_v16 = vld [vmem:[#allocation109_spill] sm:$0xff]  ;;  %v4826_v14 = vld [vmem:[#allocation22 + $0xa0] sm:$0xff] }
 0x431   : > { %20892 = vst [vmem:[#allocation101_spill] sm:$0xff] %v16633_v55  ;;  %4855 = vmatpush1.msra.mxu1 %v4808_v38  ;;  %20897 = vst [vmem:[#allocation153_spill] sm:$0xff] %v16650_v12  ;;  %v20901_v38 = vld [vmem:[#allocation106_spill] sm:$0xff]  ;;  %v1454_v58 = vsel %vm16644_vm3, %v1366_v43, %v10581_v46  ;;  %v1327_v8 = vmul.f32 0.5, %v16650_v12  ;;  %v4825_v40 = vld [vmem:[#allocation22 + $0x98] sm:$0xff]  ;;  %vm14005_vm3 = vmmov 0  }
 0x432   : > { %20894 = vst [vmem:[#allocation152_spill] sm:$0xff] %v16642_v23  ;;  %v16652_v27 = vpop.f32.mrf.mxu1  ;;  %3750 = vmatmul.mubr.f32.gmra.mxu1 %v20899_v53  ;;  %4856 = vmatprep.subr.mxu1 %v20864_v2  ;;  %20900 = vst [vmem:[#allocation105_spill] sm:$0xff] %v16658_v35  ;;  %v1326_v43 = vmul.f32 0.5, %v16658_v35  ;;  %v20910_v46 = vld [vmem:[#allocation110_spill] sm:$0xff]  ;;  %v20947_v55 = vld [vmem:[#allocation117_spill] sm:$0xff] }
 0x433   : > { %20898 = vst [vmem:[#allocation154_spill] sm:$0xff] %v16652_v27  ;;  %10795 = vmatprep.mubr.msk.f32.mxu1 %vm1466_vm0, %v20901_v38  ;;  %4857 = vmatpush1.msra.mxu1 %v4807_v54  ;;  %20904 = vst [vmem:[#allocation106_spill] sm:$0xff] %v20903_v11  ;;  %v1325_v54 = vmul.f32 0.5, %v16638_v42  ;;  %v1324_v38 = vmul.f32 0.5, %v16642_v23  ;;  %v16792_v27 = vmul.f32 %v20945_v63, %v20945_v63  ;;  %v20950_v26 = vld [vmem:[#allocation61_spill] sm:$0xff]  ;;  %v20951_v37 = vld [vmem:[#allocation62_spill] sm:$0xff] }
 0x434   : > { %20905 = vst [vmem:[#allocation155_spill] sm:$0xff] %v16666_v59  ;;  %20906 = vst [vmem:[#allocation156_spill] sm:$0xff] %v16668_v6  ;;  %v16670_v53 = vpop.f32.mrf.mxu1  ;;  %4858 = vmatprep.subr.mxu1 %v20864_v2  ;;  %v16804_v9 = vmul.f32 %v20950_v26, %v20950_v26  ;;  %v16808_v22 = vmul.f32 %v20951_v37, %v20951_v37 }
 0x435   : > { %20907 = vst [vmem:[#allocation157_spill] sm:$0xff] %v16670_v53  ;;  %4859 = vmatpush1.msra.mxu1 %v4806_v5  ;;  %v16691_v5 = vadd.f32 %v1513_v31, %v1454_v58  ;;  %v16705_v45 = vmul.f32 %v1324_v38, %v16642_v23  ;;  %v13246_v31 = vld [vmem:[%s14442_s5 + $0x138] sm:$0xff]  ;;  %v13250_v38 = vld [vmem:[%s14442_s5 + $0x148] sm:$0xff]  ;;  %v16788_v53 = vmul.f32 %v20944_v0, %v20944_v0 }
 0x436   : > { %v16680_v41 = vpop.f32.mrf.mxu1  ;;  %3756 = vmatmul.mubr.f32.gmra.mxu1 %v20909_v16  ;;  %4880 = vmatprep.subr.mxu1 %v20864_v2  ;;  %v13247_v58 = vld [vmem:[%s14450_s26 + $0x138] sm:$0xff] }
 0x437   : > { %20908 = vst [vmem:[#allocation158_spill] sm:$0xff] %v16680_v41  ;;  %10796 = vmatprep.mubr.msk.f32.mxu1 %vm1466_vm0, %v20910_v46  ;;  %4881 = vmatpush2.msra.mxu1 %v4827_v20  ;;  %20911 = vst [vmem:[#allocation109_spill] sm:$0xff] %v16691_v5  ;;  %v16698_v20 = vmul.f32 %v1325_v54, %v16638_v42  ;;  %v20914_v46 = vand.u32 2147483647, %v16638_v42  ;;  %v16709_v16 = vsub.f32 %v13246_v31, %v13247_v58  ;;  %v20924_v58 = vld [vmem:[#allocation113_spill] sm:$0xff]  ;;  %v20938_v42 = vld [vmem:[#allocation56_spill] sm:$0xff] }
 0x438   : > { %v16694_v60 = vpop.f32.mrf.mxu1  ;;  %4882 = vmatprep.subr.mxu1 %v20864_v2  ;;  %20916 = vst [vmem:[#allocation161_spill] sm:$0xff] %v16705_v45  ;;  %v20918_v5 = vand.u32 2147483647, %v16642_v23  ;;  %v16716_v54 = vmul.f32 %v1327_v8, %v16650_v12  ;;  %v13251_v45 = vld [vmem:[%s14450_s26 + $0x148] sm:$0xff]  ;;  %v16732_v8 = vmul.f32 %v1326_v43, %v16658_v35  ;;  %v13253_v12 = vld [vmem:[%s14450_s26 + $0x140] sm:$0xff]  ;;  %v16769_v23 = vmul.f32 %v20938_v42, %v20938_v42 }
 0x439   : > { %20912 = vst [vmem:[#allocation110_spill] sm:$0xff] %v16694_v60  ;;  %20913 = vst [vmem:[#allocation159_spill] sm:$0xff] %v16698_v20  ;;  %v16702_v11 = vadd.f32 -0.5, %v20914_v46  ;;  %4883 = vmatpush2.msra.mxu1 %v4826_v14  ;;  %v13248_v20 = vld [vmem:[%s14442_s5 + $0x130] sm:$0xff]  ;;  %v16724_v59 = vsub.f32 %v13250_v38, %v13251_v45  ;;  %v20929_v38 = vld [vmem:[#allocation114_spill] sm:$0xff]  ;;  %v16784_v41 = vmul.f32 %v20943_v34, %v20943_v34 }
 0x43a   : > { %20917 = vst [vmem:[#allocation162_spill] sm:$0xff] %v16709_v16  ;;  %v16713_v6 = vadd.f32 -0.5, %v20918_v5  ;;  %20920 = vst [vmem:[#allocation164_spill] sm:$0xff] %v16716_v54  ;;  %v13249_v46 = vld [vmem:[%s14450_s26 + $0x130] sm:$0xff]  ;;  %v16726_v31 = vpop.f32.mrf.mxu1  ;;  %3762 = vmatmul.mubr.f32.gmra.mxu1 %v20924_v58  ;;  %4884 = vmatprep.subr.mxu1 %v20864_v2  ;;  %v13252_v54 = vld [vmem:[%s14442_s5 + $0x140] sm:$0xff] }
 0x43b   : > { %20915 = vst [vmem:[#allocation160_spill] sm:$0xff] %v16702_v11  ;;  %v16720_v11 = vsub.f32 %v13248_v20, %v13249_v46  ;;  %20922 = vst [vmem:[#allocation166_spill] sm:$0xff] %v16724_v59  ;;  %v4824_v14 = vld [vmem:[#allocation22 + $0x90] sm:$0xff]  ;;  %v16736_v20 = vsub.f32 %v13252_v54, %v13253_v12  ;;  %v20927_v46 = vld [vmem:[#allocation70_spill] sm:$0xff]  ;;  %10797 = vmatprep.mubr.msk.f32.mxu1 %vm1466_vm0, %v20929_v38  ;;  %4885 = vmatpush2.msra.mxu1 %v4825_v40 }
 0x43c   : > { %20919 = vst [vmem:[#allocation163_spill] sm:$0xff] %v16713_v6  ;;  %20923 = vst [vmem:[#allocation167_spill] sm:$0xff] %v16726_v31  ;;  %v16740_v45 = vmul.f32 %v20927_v46, %v20927_v46  ;;  %v20930_v58 = vld [vmem:[#allocation51_spill] sm:$0xff]  ;;  %v20932_v5 = vld [vmem:[#allocation52_spill] sm:$0xff]  ;;  %v16760_v16 = vpop.f32.mrf.mxu1  ;;  %4886 = vmatprep.subr.mxu1 %v20864_v2 }
 0x43d   : > { %20921 = vst [vmem:[#allocation165_spill] sm:$0xff] %v16720_v11  ;;  %20925 = vst [vmem:[#allocation113_spill] sm:$0xff] %v16732_v8  ;;  %v16746_v59 = vmul.f32 %v20930_v58, %v20930_v58  ;;  %v16750_v43 = vmul.f32 %v20932_v5, %v20932_v5  ;;  %v20934_v8 = vld [vmem:[#allocation53_spill] sm:$0xff]  ;;  %v20935_v54 = vld [vmem:[#allocation54_spill] sm:$0xff]  ;;  %4887 = vmatpush2.msra.mxu1 %v4824_v14 }
 0x43e   : > { %20926 = vst [vmem:[#allocation168_spill] sm:$0xff] %v16736_v20  ;;  %20928 = vst [vmem:[#allocation70_spill] sm:$0xff] %v16740_v45  ;;  %v16754_v12 = vmul.f32 %v20934_v8, %v20934_v8  ;;  %v16758_v20 = vmul.f32 %v20935_v54, %v20935_v54  ;;  %v4823_v40 = vld [vmem:[#allocation22 + $0x88] sm:$0xff]  ;;  %v20939_v31 = vld [vmem:[#allocation57_spill] sm:$0xff]  ;;  %v16794_v47 = vpop.f32.mrf.mxu1  ;;  %3768 = vmatmul.mubr.f32.gmra.mxu1 %v20947_v55  ;;  %4888 = vmatprep.subr.mxu1 %v20864_v2 }
 0x43f   : > { %20931 = vst [vmem:[#allocation114_spill] sm:$0xff] %v16746_v59  ;;  %20933 = vst [vmem:[#allocation51_spill] sm:$0xff] %v16750_v43  ;;  %v20937_v38 = vld [vmem:[#allocation55_spill] sm:$0xff]  ;;  %v16773_v25 = vmul.f32 %v20939_v31, %v20939_v31  ;;  %v20940_v60 = vld [vmem:[#allocation80_spill] sm:$0xff]  ;;  %4889 = vmatpush2.msra.mxu1 %v4823_v40 }
 0x440   : > { %20936 = vst [vmem:[#allocation52_spill] sm:$0xff] %v16760_v16  ;;  %v16765_v6 = vmul.f32 %v20937_v38, %v20937_v38  ;;  %v16777_v50 = vmul.f32 %v20940_v60, %v20940_v60  ;;  %v16780_v16 = vmul.f32 0.5, %v16720_v11  ;;  %20946 = vst [vmem:[#allocation55_spill] sm:$0xff] %v16794_v47  ;;  %v4822_v14 = vld [vmem:[#allocation22 + $0x80] sm:$0xff]  ;;  %v16812_v47 = vmul.f32 %v20952_v61, %v20952_v61  ;;  %v16832_v13 = vpop.f32.mrf.mxu1  ;;  %v20960_v40 = vld [vmem:[#allocation67_spill] sm:$0xff] }
 0x441   : > { %v20954_v55 = vld [vmem:[#allocation118_spill] sm:$0xff]  ;;  %20959 = vst [vmem:[#allocation80_spill] sm:$0xff] %v16832_v13  ;;  %4890 = vmatprep.subr.mxu1 %v20864_v2  ;;  %v16851_v13 = vmul.f32 %v20966_v44, %v20966_v44  ;;  %v20968_v2 = vld [vmem:[#allocation71_spill] sm:$0xff] }
 0x442   : > { %20941 = vst [vmem:[#allocation53_spill] sm:$0xff] %v16777_v50  ;;  %20942 = vst [vmem:[#allocation54_spill] sm:$0xff] %v16780_v16  ;;  %v20948_v16 = vand.u32 2147483647, %v16658_v35  ;;  %10798 = vmatprep.mubr.msk.f32.mxu1 %vm1466_vm0, %v20954_v55  ;;  %v16837_v55 = vmul.f32 %v20960_v40, %v20960_v40  ;;  %v4422_v62 = vadd.f32 %v16777_v50, %v16740_v45  ;;  %4891 = vmatpush2.msra.mxu1 %v4822_v14  ;;  %v16865_v45 = vpop.f32.mrf.mxu1  ;;  %v20975_v14 = vld [vmem:[#allocation85_spill] sm:$0xff] }
 0x443   : > { %20953 = vst [vmem:[#allocation57_spill] sm:$0xff] %v16812_v47  ;;  %20967 = vst [vmem:[#allocation117_spill] sm:$0xff] %v16851_v13  ;;  %v16855_v40 = vmul.f32 %v20968_v2, %v20968_v2  ;;  %v16863_v50 = vmul.f32 %v20972_v39, %v20972_v39  ;;  %3774 = vmatmul.mubr.f32.gmra.mxu1 %v16268_v52  ;;  %v16870_v44 = vmul.f32 %v20975_v14, %v20975_v14  ;;  %v20977_v13 = vld [vmem:[#allocation86_spill] sm:$0xff]  ;;  %v20983_v14 = vld [vmem:[#allocation72_spill] sm:$0xff] }
 0x444   : > { %v16800_v11 = vadd.f32 -0.5, %v20948_v16  ;;  %v16818_v16 = vmul.f32 %v20955_v1, %v20955_v1  ;;  %20961 = vst [vmem:[#allocation58_spill] sm:$0xff] %v16837_v55  ;;  %v20970_v55 = vld [vmem:[#allocation83_spill] sm:$0xff]  ;;  %20974 = vst [vmem:[#allocation118_spill] sm:$0xff] %v16865_v45  ;;  %v16874_v2 = vmul.f32 %v20977_v13, %v20977_v13  ;;  %10799 = vmatprep.mubr.msk.f32.mxu1 %vm1466_vm0, %v16275_v3  ;;  %v20985_v13 = vld [vmem:[#allocation88_spill] sm:$0xff]  ;;  %v16900_v39 = vpop.f32.mrf.mxu1 }
 0x445   : > { %20969 = vst [vmem:[#allocation61_spill] sm:$0xff] %v16855_v40  ;;  %v16859_v28 = vmul.f32 %v20970_v55, %v20970_v55  ;;  %20973 = vst [vmem:[#allocation96_spill] sm:$0xff] %v16863_v50  ;;  %v4423_v55 = vadd.f32 %v16812_v47, %v16746_v59  ;;  %v20981_v45 = vld [vmem:[#allocation87_spill] sm:$0xff]  ;;  %v20987_v47 = vld [vmem:[#allocation73_spill] sm:$0xff] }
 0x446   : > { %20949 = vst [vmem:[#allocation56_spill] sm:$0xff] %v16800_v11  ;;  %v20956_v11 = vld [vmem:[#allocation64_spill] sm:$0xff]  ;;  %20976 = vst [vmem:[#allocation63_spill] sm:$0xff] %v16870_v44  ;;  %v16886_v52 = vmul.f32 %v20981_v45, %v20981_v45  ;;  %v16890_v44 = vmul.f32 %v20983_v14, %v20983_v14  ;;  %v16898_v59 = vmul.f32 %v20987_v47, %v20987_v47  ;;  %v20990_v50 = vld [vmem:[#allocation75_spill] sm:$0xff]  ;;  %v4464_v14 = vadd.f32 0.0001, %v4422_v62  ;;  %v16928_v62 = vpop.f32.mrf.mxu1 }
 0x447   : > { %v16822_v35 = vmul.f32 %v20956_v11, %v20956_v11  ;;  %20971 = vst [vmem:[#allocation62_spill] sm:$0xff] %v16859_v28  ;;  %20978 = vst [vmem:[#allocation64_spill] sm:$0xff] %v16874_v2  ;;  %v20979_v28 = vld [vmem:[#allocation99_spill] sm:$0xff]  ;;  %v16894_v2 = vmul.f32 %v20985_v13, %v20985_v13  ;;  %v16904_v3 = vmul.f32 %v20990_v50, %v20990_v50  ;;  %v20992_v45 = vld [vmem:[#allocation74_spill] sm:$0xff]  ;;  %3780 = vmatmul.mubr.f32.gmra.mxu1 %v16291_v56 }
 0x448   : > { %v16880_v40 = vmul.f32 %v20979_v28, %v20979_v28  ;;  %20982 = vst [vmem:[#allocation99_spill] sm:$0xff] %v16886_v52  ;;  %20984 = vst [vmem:[#allocation169_spill] sm:$0xff] %v16890_v44  ;;  %v16908_v52 = vmul.f32 %v20992_v45, %v20992_v45  ;;  %v4424_v44 = vadd.f32 %v16847_v17, %v16750_v43  ;;  %v20994_v13 = vld [vmem:[#allocation89_spill] sm:$0xff]  ;;  %v20996_v47 = vld [vmem:[#allocation90_spill] sm:$0xff]  ;;  %10800 = vmatprep.mubr.msk.f32.mxu1 %vm1466_vm0, %v16296_v32 }
 0x449   : > { %20986 = vst [vmem:[#allocation170_spill] sm:$0xff] %v16894_v2  ;;  %20988 = vst [vmem:[#allocation171_spill] sm:$0xff] %v16898_v59  ;;  %v16914_v2 = vmul.f32 %v20994_v13, %v20994_v13  ;;  %v16918_v59 = vmul.f32 %v20996_v47, %v20996_v47  ;;  %v21002_v17 = vld [vmem:[#allocation77_spill] sm:$0xff]  ;;  %v21004_v47 = vld [vmem:[#allocation103_spill] sm:$0xff]  ;;  %12825 = vrcp.f32 %v4464_v14 }
 0x44a   : > { %20980 = vst [vmem:[#allocation82_spill] sm:$0xff] %v16880_v40  ;;  %20989 = vst [vmem:[#allocation172_spill] sm:$0xff] %v16900_v39  ;;  %v20998_v39 = vld [vmem:[#allocation91_spill] sm:$0xff]  ;;  %v16933_v43 = vmul.f32 %v21002_v17, %v21002_v17  ;;  %v21007_v56 = vld [vmem:[#allocation92_spill] sm:$0xff]  ;;  %v16959_v17 = vpop.f32.mrf.mxu1 }
 0x44b   : > { %20991 = vst [vmem:[#allocation173_spill] sm:$0xff] %v16904_v3  ;;  %20993 = vst [vmem:[#allocation174_spill] sm:$0xff] %v16908_v52  ;;  %v16922_v50 = vmul.f32 %v20998_v39, %v20998_v39  ;;  %v21000_v3 = vld [vmem:[#allocation100_spill] sm:$0xff]  ;;  %v16939_v39 = vmul.f32 %v21004_v47, %v21004_v47  ;;  %v16949_v13 = vmul.f32 %v21007_v56, %v21007_v56  ;;  %v4466_v56 = vadd.f32 0.0001, %v4424_v44 }
 0x44c   : > { %20995 = vst [vmem:[#allocation175_spill] sm:$0xff] %v16914_v2  ;;  %20997 = vst [vmem:[#allocation176_spill] sm:$0xff] %v16918_v59  ;;  %v16926_v45 = vmul.f32 %v21000_v3, %v21000_v3  ;;  %v4465_v2 = vadd.f32 0.0001, %v4423_v55  ;;  %v4425_v59 = vadd.f32 %v16880_v40, %v16754_v12  ;;  %v16953_v55 = vmul.f32 %v20940_v60, %v20927_v46  ;;  %v21012_v40 = vld [vmem:[#allocation93_spill] sm:$0xff]  ;;  %v16983_v14 = vpop.f32.mrf.mxu1 }
 0x44d   : > { %20999 = vst [vmem:[#allocation177_spill] sm:$0xff] %v16922_v50  ;;  %21001 = vst [vmem:[#allocation100_spill] sm:$0xff] %v16928_v62  ;;  %v21005_v50 = vld [vmem:[#allocation76_spill] sm:$0xff]  ;;  %v16963_v32 = vmul.f32 %v21012_v40, %v21012_v40  ;;  %3786 = vmatmul.mubr.f32.gmra.mxu1 %v16319_v51 }
 0x44e   : > { %21003 = vst [vmem:[#allocation178_spill] sm:$0xff] %v16933_v43  ;;  %v16945_v62 = vmul.f32 %v21005_v50, %v21005_v50  ;;  %21008 = vst [vmem:[#allocation76_spill] sm:$0xff] %v16949_v13  ;;  %v16957_v43 = vmul.f32 %v20952_v61, %v20930_v58  ;;  %v21015_v13 = vld [vmem:[#allocation79_spill] sm:$0xff]  ;;  %v16975_v61 = vmul.f32 %v20979_v28, %v20934_v8  ;;  %v21018_v58 = vld [vmem:[#allocation104_spill] sm:$0xff]  ;;  %12827 = vrcp.f32 %v4465_v2 }
 0x44f   : > { %21009 = vst [vmem:[#allocation179_spill] sm:$0xff] %v16953_v55  ;;  %21011 = vst [vmem:[#allocation181_spill] sm:$0xff] %v16959_v17  ;;  %v16971_v60 = vmul.f32 %v21015_v13, %v21015_v13  ;;  %v4426_v46 = vadd.f32 %v16926_v45, %v16758_v20  ;;  %v16981_v17 = vmul.f32 %v21018_v58, %v21018_v58  ;;  %v4467_v44 = vadd.f32 0.0001, %v4425_v59  ;;  %v21021_v8 = vld [vmem:[#allocation78_spill] sm:$0xff]  ;;  %v17004_v59 = vpop.f32.mrf.mxu1 }
 0x450   : > { %21006 = vst [vmem:[#allocation103_spill] sm:$0xff] %v16945_v62  ;;  %21010 = vst [vmem:[#allocation180_spill] sm:$0xff] %v16957_v43  ;;  %v16967_v62 = vmul.f32 %v20964_v57, %v20932_v5  ;;  %v4427_v57 = vadd.f32 %v16939_v39, %v16765_v6  ;;  %v21020_v5 = vld [vmem:[#allocation107_spill] sm:$0xff]  ;;  %10801 = vmatprep.mubr.msk.f32.mxu1 %vm1466_vm0, %v16328_v24  ;;  %v16996_v13 = vmul.f32 %v21021_v8, %v21021_v8 }
 0x451   : > { %21013 = vst [vmem:[#allocation182_spill] sm:$0xff] %v16963_v32  ;;  %21016 = vst [vmem:[#allocation184_spill] sm:$0xff] %v16971_v60  ;;  %v16990_v28 = vmul.f32 %v21020_v5, %v21020_v5  ;;  %v4339_v51 = vmul.f32 2.0, %v16957_v43  ;;  %v17002_v2 = vmul.f32 %v21000_v3, %v20935_v54  ;;  %12829 = vrcp.f32 %v4466_v56  ;;  %v21026_v60 = vld [vmem:[#allocation108_spill] sm:$0xff]  ;;  %3792 = vmatmul.mubr.f32.gmra.mxu1 %v16346_v36 }
 0x452   : > { %21014 = vst [vmem:[#allocation183_spill] sm:$0xff] %v16967_v62  ;;  %21017 = vst [vmem:[#allocation185_spill] sm:$0xff] %v16975_v61  ;;  %v4340_v40 = vmul.f32 2.0, %v16967_v62  ;;  %v17009_v24 = vmul.f32 %v21004_v47, %v20937_v38  ;;  %v17013_v8 = vmul.f32 %v21026_v60, %v21026_v60  ;;  %v4341_v54 = vmul.f32 2.0, %v16975_v61  ;;  %v17022_v62 = vpop.f32.mrf.mxu1  ;;  %10802 = vmatprep.mubr.msk.f32.mxu1 %vm1466_vm0, %v16351_v30 }
 0x453   : > { %21019 = vst [vmem:[#allocation104_spill] sm:$0xff] %v16983_v14  ;;  %21022 = vst [vmem:[#allocation107_spill] sm:$0xff] %v16996_v13  ;;  %v4338_v14 = vmul.f32 2.0, %v16953_v55  ;;  %v21027_v55 = vld [vmem:[#allocation94_spill] sm:$0xff]  ;;  %v4468_v3 = vadd.f32 0.0001, %v4426_v46  ;;  %12831 = vrcp.f32 %v4467_v44  ;;  %v17027_v38 = vmul.f32 %v21018_v58, %v20938_v42 }
 0x454   : > { %21023 = vst [vmem:[#allocation186_spill] sm:$0xff] %v17002_v2  ;;  %21024 = vst [vmem:[#allocation187_spill] sm:$0xff] %v17004_v59  ;;  %v17017_v43 = vmul.f32 %v21027_v55, %v21027_v55  ;;  %v4428_v59 = vadd.f32 %v16981_v17, %v16769_v23  ;;  %v4469_v47 = vadd.f32 0.0001, %v4427_v57  ;;  %v4429_v56 = vadd.f32 %v16990_v28, %v16773_v25  ;;  %v17038_v36 = vpop.f32.mrf.mxu1  ;;  %v21050_v13 = vld [vmem:[#allocation120_spill] sm:$0xff] }
 0x455   : > { %21025 = vst [vmem:[#allocation188_spill] sm:$0xff] %v17009_v24  ;;  %21029 = vst [vmem:[#allocation189_spill] sm:$0xff] %v17022_v62  ;;  %v4380_v46 = vadd.f32 0.0001, %v4338_v14  ;;  %v4381_v61 = vadd.f32 0.0001, %v4339_v51  ;;  %v17045_v58 = vmul.f32 %v21020_v5, %v20939_v31  ;;  %v4430_v30 = vadd.f32 %v17013_v8, %v16784_v41  ;;  %3798 = vmatmul.mubr.f32.gmra.mxu1 %v16374_v48 }
 0x456   : > { %21028 = vst [vmem:[#allocation108_spill] sm:$0xff] %v17017_v43  ;;  %21030 = vst [vmem:[#allocation190_spill] sm:$0xff] %v17027_v38  ;;  %v4342_v55 = vmul.f32 2.0, %v17002_v2  ;;  %v21031_v43 = vld [vmem:[#allocation111_spill] sm:$0xff]  ;;  %v17040_v44 = vadd.f32 0.0001, %v4340_v40  ;;  %12833 = vrcp.f32 %v4468_v3  ;;  %v17061_v5 = vmul.f32 %v21026_v60, %v20943_v34  ;;  %10803 = vmatprep.mubr.msk.f32.mxu1 %vm1466_vm0, %v16383_v4 }
 0x457   : > { %v17036_v62 = vmul.f32 %v21031_v43, %v21031_v43  ;;  %21032 = vst [vmem:[#allocation111_spill] sm:$0xff] %v17038_v36  ;;  %v4343_v42 = vmul.f32 2.0, %v17009_v24  ;;  %21033 = vst [vmem:[#allocation191_spill] sm:$0xff] %v17045_v58  ;;  %v17049_v14 = vadd.f32 0.0001, %v4341_v54  ;;  %v21034_v51 = vld [vmem:[#allocation112_spill] sm:$0xff]  ;;  %v17055_v36 = vpop.f32.mrf.mxu1  ;;  %12835 = vrcp.f32 %v4469_v47 }
 0x458   : > { %v4470_v57 = vadd.f32 0.0001, %v4428_v59  ;;  %v17053_v2 = vmul.f32 %v21034_v51, %v21034_v51  ;;  %21035 = vst [vmem:[#allocation112_spill] sm:$0xff] %v17055_v36  ;;  %v4344_v40 = vmul.f32 2.0, %v17027_v38  ;;  %v4471_v31 = vadd.f32 0.0001, %v4429_v56 }
 0x459   : > { %21036 = vst [vmem:[#allocation192_spill] sm:$0xff] %v17061_v5  ;;  %v17065_v59 = vadd.f32 0.0001, %v4342_v55  ;;  %v17069_v54 = vmul.f32 %v21031_v43, %v20944_v0  ;;  %v4431_v48 = vadd.f32 %v17036_v62, %v16788_v53  ;;  %v21038_v3 = vld [vmem:[#allocation115_spill] sm:$0xff]  ;;  %v17077_v56 = vpop.f32.mrf.mxu1  ;;  %v21041_v34 = vld [vmem:[#allocation81_spill] sm:$0xff]  ;;  %v4345_v55 = vmul.f32 2.0, %v17045_v58  ;;  %v12826_v0 = vpop.eup %12825  ;;  %3804 = vmatmul.mubr.f32.gmra.mxu1 %v16399_v18 }
 0x45a   : > { %v17075_v47 = vmul.f32 %v21038_v3, %v21038_v3  ;;  %21040 = vst [vmem:[#allocation194_spill] sm:$0xff] %v17077_v56  ;;  %v17081_v60 = vmul.f32 %v21041_v34, %v21041_v34  ;;  %v17083_v4 = vadd.f32 0.0001, %v4343_v42  ;;  %v4472_v38 = vadd.f32 0.0001, %v4430_v30  ;;  %v21044_v36 = vld [vmem:[#allocation116_spill] sm:$0xff]  ;;  %10804 = vmatprep.mubr.msk.f32.mxu1 %vm1466_vm0, %v16404_v33 }
 0x45b   : > { %21037 = vst [vmem:[#allocation193_spill] sm:$0xff] %v17069_v54  ;;  %12837 = vrcp.f32 %v4470_v57  ;;  %v17088_v43 = vmul.f32 %v21034_v51, %v20945_v63  ;;  %v4432_v24 = vadd.f32 %v17053_v2, %v16792_v27  ;;  %v17094_v56 = vmul.f32 %v21044_v36, %v21044_v36  ;;  %v17096_v34 = vpop.f32.mrf.mxu1  ;;  %v12828_v57 = vpop.eup %12827 }
 0x45c   : > { %21039 = vst [vmem:[#allocation115_spill] sm:$0xff] %v17075_v47  ;;  %21042 = vst [vmem:[#allocation195_spill] sm:$0xff] %v17081_v60  ;;  %v17099_v42 = vadd.f32 0.0001, %v4344_v40  ;;  %12839 = vrcp.f32 %v4471_v31  ;;  %v4346_v30 = vmul.f32 2.0, %v17061_v5  ;;  %v17104_v63 = vmul.f32 %v21038_v3, %v20950_v26  ;;  %v21049_v3 = vld [vmem:[#allocation119_spill] sm:$0xff] }
 0x45d   : > { %21043 = vst [vmem:[#allocation196_spill] sm:$0xff] %v17088_v43  ;;  %21045 = vst [vmem:[#allocation116_spill] sm:$0xff] %v17096_v34  ;;  %v4347_v51 = vmul.f32 2.0, %v17069_v54  ;;  %v4473_v58 = vadd.f32 0.0001, %v4431_v48  ;;  %v4433_v34 = vadd.f32 %v17075_v47, %v16804_v9  ;;  %v17113_v18 = vmul.f32 %v16255_v49, %v16255_v49  ;;  %v17115_v40 = vpop.f32.mrf.mxu1  ;;  %3810 = vmatmul.mubr.f32.gmra.mxu1 %v16423_v29 }
 0x45e   : > { %21046 = vst [vmem:[#allocation197_spill] sm:$0xff] %v17104_v63  ;;  %21047 = vst [vmem:[#allocation198_spill] sm:$0xff] %v17115_v40  ;;  %v17117_v31 = vmul.f32 %v12826_v0, %v4380_v46  ;;  %v17119_v26 = vadd.f32 0.0001, %v4345_v55  ;;  %12841 = vrcp.f32 %v4472_v38  ;;  %v17123_v33 = vmul.f32 %v21049_v3, %v21049_v3  ;;  %v12830_v54 = vpop.eup %12829  ;;  %10805 = vmatprep.mubr.msk.f32.mxu1 %vm1466_vm0, %v16432_v10 }
 0x45f   : > { %v4348_v48 = vmul.f32 2.0, %v17088_v43  ;;  %v4474_v5 = vadd.f32 0.0001, %v4432_v24  ;;  %v4434_v60 = vadd.f32 %v17094_v56, %v16808_v22  ;;  %v17130_v47 = vmul.f32 %v21050_v13, %v21050_v13  ;;  %v17132_v46 = vpop.f32.mrf.mxu1 }
 0x460   : > { %21048 = vst [vmem:[#allocation199_spill] sm:$0xff] %v17117_v31  ;;  %21051 = vst [vmem:[#allocation119_spill] sm:$0xff] %v17132_v46  ;;  %v17135_v38 = vmul.f32 %v12828_v57, %v4381_v61  ;;  %v17137_v55 = vadd.f32 0.0001, %v4346_v30  ;;  %v4349_v0 = vmul.f32 2.0, %v17104_v63  ;;  %v17142_v24 = vmul.f32 %v21044_v36, %v20951_v37  ;;  %v12832_v43 = vpop.eup %12831  ;;  %v21057_v36 = vld [vmem:[#allocation121_spill] sm:$0xff] }
 0x461   : > { %v17146_v31 = vadd.f32 0.0001, %v4347_v51  ;;  %12843 = vrcp.f32 %v4473_v58  ;;  %v4475_v46 = vadd.f32 0.0001, %v4433_v34  ;;  %v4435_v29 = vadd.f32 %v17113_v18, %v16818_v16  ;;  %v17150_v61 = vpop.f32.mrf.mxu1  ;;  %3816 = vmatmul.mubr.f32.gmra.mxu1 %v16446_v19 }
 0x462   : > { %21052 = vst [vmem:[#allocation120_spill] sm:$0xff] %v17135_v38  ;;  %21053 = vst [vmem:[#allocation200_spill] sm:$0xff] %v17142_v24  ;;  %v17153_v30 = vmul.f32 %v12830_v54, %v17040_v44  ;;  %v17157_v37 = vmul.f32 %v16255_v49, %v20955_v1  ;;  %v4436_v10 = vadd.f32 %v17123_v33, %v16822_v35  ;;  %v17165_v58 = vadd.f32 0.0001, %v4348_v48 }
 0x463   : > { %21054 = vst [vmem:[#allocation201_spill] sm:$0xff] %v17150_v61  ;;  %v17163_v57 = vmul.f32 %v21057_v36, %v21057_v36  ;;  %12845 = vrcp.f32 %v4474_v5  ;;  %v4476_v34 = vadd.f32 0.0001, %v4434_v60  ;;  %v4437_v51 = vadd.f32 %v17130_v47, %v16826_v7  ;;  %v17169_v44 = vpop.f32.mrf.mxu1  ;;  %v12834_v49 = vpop.eup %12833  ;;  %10806 = vmatprep.mubr.msk.f32.mxu1 %vm1466_vm0, %v16453_v15  ;;  %v21067_v15 = vld [vmem:[#allocation124_spill] sm:$0xff] }
 0x464   : > { %21055 = vst [vmem:[#allocation202_spill] sm:$0xff] %v17153_v30  ;;  %21056 = vst [vmem:[#allocation203_spill] sm:$0xff] %v17157_v37  ;;  %v17173_v1 = vmul.f32 %v12832_v43, %v17049_v14  ;;  %v17175_v54 = vadd.f32 0.0001, %v4349_v0  ;;  %v4350_v63 = vmul.f32 2.0, %v17142_v24  ;;  %v21061_v30 = vld [vmem:[#allocation122_spill] sm:$0xff]  ;;  %v12836_v5 = vpop.eup %12835  ;;  %12847 = vrcp.f32 %v4475_v46 }
 0x465   : > { %21058 = vst [vmem:[#allocation121_spill] sm:$0xff] %v17163_v57  ;;  %21059 = vst [vmem:[#allocation204_spill] sm:$0xff] %v17169_v44  ;;  %v17180_v48 = vmul.f32 %v21061_v30, %v21061_v30  ;;  %v4477_v60 = vadd.f32 0.0001, %v4435_v29  ;;  %v17186_v19 = vmul.f32 %v21049_v3, %v20956_v11  ;;  %v21064_v14 = vld [vmem:[#allocation123_spill] sm:$0xff]  ;;  %v17192_v0 = vpop.f32.mrf.mxu1  ;;  %v4351_v24 = vmul.f32 2.0, %v17157_v37 }
 0x466   : > { %21060 = vst [vmem:[#allocation205_spill] sm:$0xff] %v17173_v1  ;;  %v17190_v43 = vmul.f32 %v21064_v14, %v21064_v14  ;;  %21066 = vst [vmem:[#allocation207_spill] sm:$0xff] %v17192_v0  ;;  %v4478_v1 = vadd.f32 0.0001, %v4436_v10  ;;  %v4438_v38 = vadd.f32 %v17163_v57, %v16830_v21  ;;  %v17199_v46 = vmul.f32 %v21067_v15, %v21067_v15  ;;  %v21070_v11 = vld [vmem:[#allocation65_spill] sm:$0xff]  ;;  %v21073_v37 = vld [vmem:[#allocation136_spill] sm:$0xff] }
 0x467   : > { %21062 = vst [vmem:[#allocation122_spill] sm:$0xff] %v17180_v48  ;;  %21063 = vst [vmem:[#allocation206_spill] sm:$0xff] %v17186_v19  ;;  %v17202_v29 = vmul.f32 %v12834_v49, %v17065_v59  ;;  %12849 = vrcp.f32 %v4476_v34  ;;  %v17206_v3 = vmul.f32 %v21050_v13, %v21070_v11  ;;  %v4479_v44 = vadd.f32 0.0001, %v4437_v51  ;;  %v17208_v0 = vpop.f32.mrf.mxu1  ;;  %3822 = vmatmul.mubr.f32.gmra.mxu1 %v21073_v37  ;;  %v21075_v57 = vld [vmem:[#allocation58_spill] sm:$0xff]  ;;  %v21076_v49 = vld [vmem:[#allocation125_spill] sm:$0xff] }
 0x468   : > { %21065 = vst [vmem:[#allocation123_spill] sm:$0xff] %v17190_v43  ;;  %21068 = vst [vmem:[#allocation124_spill] sm:$0xff] %v17199_v46  ;;  %v12838_v10 = vpop.eup %12837  ;;  %v17212_v61 = vmul.f32 %v12836_v5, %v17083_v4  ;;  %v17214_v40 = vadd.f32 0.0001, %v4350_v63  ;;  %v4439_v59 = vadd.f32 %v17180_v48, %v21075_v57  ;;  %v17220_v34 = vmul.f32 %v21076_v49, %v21076_v49  ;;  %v21078_v13 = vld [vmem:[#allocation137_spill] sm:$0xff]  ;;  %v21079_v11 = vld [vmem:[#allocation66_spill] sm:$0xff] }
 0x469   : > { %21069 = vst [vmem:[#allocation208_spill] sm:$0xff] %v17202_v29  ;;  %21071 = vst [vmem:[#allocation65_spill] sm:$0xff] %v17206_v3  ;;  %10807 = vmatprep.mubr.msk.f32.mxu1 %vm1466_vm0, %v21078_v13  ;;  %v12840_v51 = vpop.eup %12839  ;;  %12851 = vrcp.f32 %v4477_v60  ;;  %v4352_v37 = vmul.f32 2.0, %v17186_v19  ;;  %v17227_v4 = vmul.f32 %v21057_v36, %v21079_v11  ;;  %v21081_v63 = vld [vmem:[#allocation59_spill] sm:$0xff]  ;;  %v17233_v29 = vadd.f32 0.0001, %v4351_v24 }
 0x46a   : > { %21072 = vst [vmem:[#allocation209_spill] sm:$0xff] %v17208_v0  ;;  %21074 = vst [vmem:[#allocation136_spill] sm:$0xff] %v17212_v61  ;;  %v4440_v5 = vadd.f32 %v17190_v43, %v21081_v63  ;;  %v17231_v61 = vpop.f32.mrf.mxu1  ;;  %12853 = vrcp.f32 %v4478_v1  ;;  %v4480_v0 = vadd.f32 0.0001, %v4438_v38  ;;  %v21083_v48 = vld [vmem:[#allocation117_spill] sm:$0xff]  ;;  %v17238_v19 = vmul.f32 %v12838_v10, %v17099_v42  ;;  %v21085_v11 = vld [vmem:[#allocation67_spill] sm:$0xff] }
 0x46b   : > { %21077 = vst [vmem:[#allocation58_spill] sm:$0xff] %v17220_v34  ;;  %21080 = vst [vmem:[#allocation125_spill] sm:$0xff] %v17227_v4  ;;  %v4441_v13 = vadd.f32 %v17199_v46, %v21083_v48  ;;  %v12842_v60 = vpop.eup %12841  ;;  %v4353_v36 = vmul.f32 2.0, %v17206_v3  ;;  %12855 = vrcp.f32 %v4479_v44  ;;  %v17243_v43 = vmul.f32 %v21061_v30, %v21085_v11  ;;  %v21088_v24 = vld [vmem:[#allocation140_spill] sm:$0xff]  ;;  %v21091_v46 = vld [vmem:[#allocation61_spill] sm:$0xff] }
 0x46c   : > { %21082 = vst [vmem:[#allocation137_spill] sm:$0xff] %v17231_v61  ;;  %21084 = vst [vmem:[#allocation66_spill] sm:$0xff] %v17238_v19  ;;  %v17245_v61 = vpop.f32.mrf.mxu1  ;;  %3828 = vmatmul.mubr.f32.gmra.mxu1 %v21088_v24  ;;  %v4481_v1 = vadd.f32 0.0001, %v4439_v59  ;;  %v21089_v38 = vld [vmem:[#allocation68_spill] sm:$0xff]  ;;  %v4442_v42 = vadd.f32 %v17220_v34, %v21091_v46  ;;  %v21092_v10 = vld [vmem:[#allocation126_spill] sm:$0xff]  ;;  %12857 = vrcp.f32 %v4480_v0 }
 0x46d   : > { %21086 = vst [vmem:[#allocation67_spill] sm:$0xff] %v17243_v43  ;;  %21087 = vst [vmem:[#allocation210_spill] sm:$0xff] %v17245_v61  ;;  %v17250_v63 = vmul.f32 %v21064_v14, %v21089_v38  ;;  %v17256_v3 = vmul.f32 %v21092_v10, %v21092_v10  ;;  %v13254_v44 = vld [vmem:[%s14442_s5 + $0x8] sm:$0xff]  ;;  %v17260_v30 = vadd.f32 0.0001, %v4352_v37  ;;  %v4354_v11 = vmul.f32 2.0, %v17227_v4 }
 0x46e   : > { %10808 = vmatprep.mubr.msk.f32.mxu1 %vm1466_vm0, %v13254_v44  ;;  %v4482_v59 = vadd.f32 0.0001, %v4440_v5  ;;  %v21094_v24 = vld [vmem:[#allocation127_spill] sm:$0xff]  ;;  %v17267_v38 = vpop.f32.mrf.mxu1  ;;  %v12844_v19 = vpop.eup %12843  ;;  %v17270_v61 = vmul.f32 %v12840_v51, %v17119_v26  ;;  %v21098_v34 = vld [vmem:[#allocation69_spill] sm:$0xff]  ;;  %v4483_v37 = vadd.f32 0.0001, %v4441_v13  ;;  %v17277_v4 = vmul.f32 %v12842_v60, %v17137_v55 }
 0x46f   : > { %21090 = vst [vmem:[#allocation140_spill] sm:$0xff] %v17250_v63  ;;  %21093 = vst [vmem:[#allocation68_spill] sm:$0xff] %v17256_v3  ;;  %v17265_v14 = vmul.f32 %v21094_v24, %v21094_v24  ;;  %v17274_v44 = vmul.f32 %v21067_v15, %v21098_v34  ;;  %v17279_v5 = vadd.f32 0.0001, %v4353_v36  ;;  %v4355_v46 = vmul.f32 2.0, %v17243_v43  ;;  %v21101_v48 = vld [vmem:[#allocation71_spill] sm:$0xff] }
 0x470   : > { %21096 = vst [vmem:[#allocation127_spill] sm:$0xff] %v17267_v38  ;;  %21097 = vst [vmem:[#allocation211_spill] sm:$0xff] %v17270_v61  ;;  %v17284_v38 = vmul.f32 %v21076_v49, %v21101_v48  ;;  %v17286_v26 = vpop.f32.mrf.mxu1  ;;  %v13255_v51 = vld [vmem:[%s14442_s5] sm:$0xff]  ;;  %v12846_v0 = vpop.eup %12845  ;;  %12859 = vrcp.f32 %v4481_v1  ;;  %v4356_v15 = vmul.f32 2.0, %v17250_v63  ;;  %v4484_v34 = vadd.f32 0.0001, %v4442_v42 }
 0x471   : > { %21095 = vst [vmem:[#allocation126_spill] sm:$0xff] %v17265_v14  ;;  %21099 = vst [vmem:[#allocation69_spill] sm:$0xff] %v17274_v44  ;;  %4893 = vmatmul.mubr.f32.vlgmr.msra.gmra.mxu1 %v13255_v51  ;;  %v21104_v13 = vld [vmem:[#allocation62_spill] sm:$0xff]  ;;  %v17294_v36 = vadd.f32 0.0001, %v4354_v11  ;;  %12861 = vrcp.f32 %v4482_v59  ;;  %v21105_v48 = vld [vmem:[#allocation96_spill] sm:$0xff]  ;;  %v12848_v42 = vpop.eup %12847  ;;  %v17314_v61 = vmul.f32 %v12844_v19, %v17146_v31 }
 0x472   : > { %21100 = vst [vmem:[#allocation212_spill] sm:$0xff] %v17277_v4  ;;  %21102 = vst [vmem:[#allocation71_spill] sm:$0xff] %v17284_v38  ;;  %v4443_v55 = vadd.f32 %v17256_v3, %v21104_v13  ;;  %v13256_v60 = vld [vmem:[%s14442_s5 + $0x18] sm:$0xff]  ;;  %v4444_v49 = vadd.f32 %v17265_v14, %v21105_v48  ;;  %v21106_v43 = vld [vmem:[#allocation128_spill] sm:$0xff]  ;;  %v17302_v1 = vpop.f32.mrf.mxu1  ;;  %v4357_v63 = vmul.f32 2.0, %v17274_v44  ;;  %12863 = vrcp.f32 %v4483_v37 }
 0x473   : > { %21103 = vst [vmem:[#allocation213_spill] sm:$0xff] %v17286_v26  ;;  %10809 = vmatprep.mubr.msk.f32.mxu1 %vm1466_vm0, %v13256_v60  ;;  %v17300_v51 = vmul.f32 %v21106_v43, %v21106_v43  ;;  %21108 = vst [vmem:[#allocation128_spill] sm:$0xff] %v17302_v1  ;;  %v21109_v4 = vld [vmem:[#allocation83_spill] sm:$0xff]  ;;  %v21111_v11 = vld [vmem:[#allocation84_spill] sm:$0xff]  ;;  %v17317_v26 = vmul.f32 %v12846_v0, %v17165_v58  ;;  %v17319_v1 = vadd.f32 0.0001, %v4355_v46  ;;  %12865 = vrcp.f32 %v4484_v34 }
 0x474   : > { %v17307_v60 = vmul.f32 %v21092_v10, %v21109_v4  ;;  %v17311_v59 = vmul.f32 %v21094_v24, %v21111_v11  ;;  %21113 = vst [vmem:[#allocation214_spill] sm:$0xff] %v17314_v61  ;;  %v4358_v44 = vmul.f32 2.0, %v17284_v38  ;;  %v17322_v14 = vpop.f32.mrf.mxu1  ;;  %v13257_v37 = vld [vmem:[%s14442_s5 + $0x10] sm:$0xff]  ;;  %v12850_v4 = vpop.eup %12849  ;;  %v17325_v10 = vadd.f32 0.0001, %v4356_v15  ;;  %v13258_v19 = vld [vmem:[%s14442_s5 + $0x28] sm:$0xff] }
 0x475   : > { %21107 = vst [vmem:[#allocation62_spill] sm:$0xff] %v17300_v51  ;;  %21114 = vst [vmem:[#allocation215_spill] sm:$0xff] %v17317_v26  ;;  %4898 = vmatmul.mubr.f32.gmra.mxu1 %v13257_v37  ;;  %v4485_v24 = vadd.f32 0.0001, %v4443_v55  ;;  %v21116_v11 = vld [vmem:[#allocation129_spill] sm:$0xff]  ;;  %v17334_v58 = vmul.f32 %v12848_v42, %v17175_v54  ;;  %v21121_v15 = vld [vmem:[#allocation63_spill] sm:$0xff] }
 0x476   : > { %21110 = vst [vmem:[#allocation83_spill] sm:$0xff] %v17307_v60  ;;  %21112 = vst [vmem:[#allocation84_spill] sm:$0xff] %v17311_v59  ;;  %v17329_v31 = vmul.f32 %v21116_v11, %v21116_v11  ;;  %10810 = vmatprep.mubr.msk.f32.mxu1 %vm1466_vm0, %v13258_v19  ;;  %v4486_v46 = vadd.f32 0.0001, %v4444_v49  ;;  %v21119_v0 = vld [vmem:[#allocation85_spill] sm:$0xff]  ;;  %v4445_v34 = vadd.f32 %v17300_v51, %v21121_v15  ;;  %v17342_v55 = vpop.f32.mrf.mxu1  ;;  %v12852_v38 = vpop.eup %12851  ;;  %v4359_v61 = vmul.f32 2.0, %v17307_v60 }
 0x477   : > { %21115 = vst [vmem:[#allocation216_spill] sm:$0xff] %v17322_v14  ;;  %21118 = vst [vmem:[#allocation217_spill] sm:$0xff] %v17334_v58  ;;  %v17338_v37 = vmul.f32 %v21106_v43, %v21119_v0  ;;  %v17344_v26 = vadd.f32 0.0001, %v4357_v63  ;;  %v4360_v54 = vmul.f32 2.0, %v17311_v59  ;;  %v21123_v42 = vld [vmem:[#allocation130_spill] sm:$0xff]  ;;  %v12854_v19 = vpop.eup %12853  ;;  %v17353_v43 = vmul.f32 %v12850_v4, %v17214_v40 }
 0x478   : > { %21117 = vst [vmem:[#allocation129_spill] sm:$0xff] %v17329_v31  ;;  %21122 = vst [vmem:[#allocation218_spill] sm:$0xff] %v17342_v55  ;;  %v17350_v49 = vmul.f32 %v21123_v42, %v21123_v42  ;;  %v17355_v0 = vadd.f32 0.0001, %v4358_v44  ;;  %v21126_v58 = vld [vmem:[#allocation86_spill] sm:$0xff]  ;;  %v21128_v63 = vld [vmem:[#allocation131_spill] sm:$0xff]  ;;  %v17365_v14 = vpop.f32.mrf.mxu1  ;;  %v12856_v51 = vpop.eup %12855  ;;  %12867 = vrcp.f32 %v4485_v24 }
 0x479   : > { %21120 = vst [vmem:[#allocation85_spill] sm:$0xff] %v17338_v37  ;;  %21125 = vst [vmem:[#allocation219_spill] sm:$0xff] %v17353_v43  ;;  %v17359_v55 = vmul.f32 %v21116_v11, %v21126_v58  ;;  %v17363_v60 = vmul.f32 %v21128_v63, %v21128_v63  ;;  %v13259_v59 = vld [vmem:[%s14442_s5 + $0x20] sm:$0xff]  ;;  %v21131_v3 = vld [vmem:[#allocation64_spill] sm:$0xff]  ;;  %12869 = vrcp.f32 %v4486_v46  ;;  %v4487_v24 = vadd.f32 0.0001, %v4445_v34 }
 0x47a   : > { %21124 = vst [vmem:[#allocation130_spill] sm:$0xff] %v17350_v49  ;;  %21130 = vst [vmem:[#allocation220_spill] sm:$0xff] %v17365_v14  ;;  %4903 = vmatmul.mubr.f32.gmra.mxu1 %v13259_v59  ;;  %v4446_v40 = vadd.f32 %v17329_v31, %v21131_v3  ;;  %v21132_v4 = vld [vmem:[#allocation87_spill] sm:$0xff]  ;;  %v21134_v43 = vld [vmem:[#allocation132_spill] sm:$0xff]  ;;  %v17381_v14 = vmul.f32 %v12852_v38, %v17233_v29  ;;  %v4361_v59 = vmul.f32 2.0, %v17338_v37  ;;  %v17384_v31 = vpop.f32.mrf.mxu1  ;;  %v12858_v29 = vpop.eup %12857 }
 0x47b   : > { %21127 = vst [vmem:[#allocation86_spill] sm:$0xff] %v17359_v55  ;;  %21129 = vst [vmem:[#allocation131_spill] sm:$0xff] %v17363_v60  ;;  %v17372_v44 = vmul.f32 %v21123_v42, %v21132_v4  ;;  %v17376_v11 = vmul.f32 %v21134_v43, %v21134_v43  ;;  %v13260_v58 = vld [vmem:[%s14442_s5 + $0x38] sm:$0xff]  ;;  %v17386_v42 = vadd.f32 0.0001, %v4359_v61  ;;  %v21138_v3 = vld [vmem:[#allocation99_spill] sm:$0xff]  ;;  %v17397_v38 = vmul.f32 %v12854_v19, %v17260_v30 }
 0x47c   : > { %10811 = vmatprep.mubr.msk.f32.mxu1 %vm1466_vm0, %v13260_v58  ;;  %21136 = vst [vmem:[#allocation221_spill] sm:$0xff] %v17381_v14  ;;  %21137 = vst [vmem:[#allocation222_spill] sm:$0xff] %v17384_v31  ;;  %v17388_v4 = vadd.f32 0.0001, %v4360_v54  ;;  %v4447_v15 = vadd.f32 %v17350_v49, %v21138_v3  ;;  %v21139_v48 = vld [vmem:[#allocation72_spill] sm:$0xff]  ;;  %v4362_v46 = vmul.f32 2.0, %v17359_v55  ;;  %v17408_v31 = vmul.f32 %v12856_v51, %v17279_v5 }
 0x47d   : > { %21133 = vst [vmem:[#allocation87_spill] sm:$0xff] %v17372_v44  ;;  %21135 = vst [vmem:[#allocation132_spill] sm:$0xff] %v17376_v11  ;;  %v17394_v58 = vmul.f32 %v21128_v63, %v21139_v48  ;;  %v21142_v34 = vld [vmem:[#allocation169_spill] sm:$0xff]  ;;  %v21143_v61 = vld [vmem:[#allocation88_spill] sm:$0xff]  ;;  %v4488_v48 = vadd.f32 0.0001, %v4446_v40  ;;  %v12860_v55 = vpop.eup %12859  ;;  %12871 = vrcp.f32 %v4487_v24  ;;  %v17425_v40 = vpop.f32.mrf.mxu1 }
 0x47e   : > { %21141 = vst [vmem:[#allocation72_spill] sm:$0xff] %v17397_v38  ;;  %v4448_v37 = vadd.f32 %v17363_v60, %v21142_v34  ;;  %v17404_v54 = vmul.f32 %v21134_v43, %v21143_v61  ;;  %v13261_v14 = vld [vmem:[%s14442_s5 + $0x30] sm:$0xff]  ;;  %21145 = vst [vmem:[#allocation223_spill] sm:$0xff] %v17408_v31  ;;  %v4363_v63 = vmul.f32 2.0, %v17372_v44  ;;  %v21146_v49 = vld [vmem:[#allocation170_spill] sm:$0xff]  ;;  %v12862_v61 = vpop.eup %12861  ;;  %v17428_v44 = vmul.f32 %v12858_v29, %v17294_v36 }
 0x47f   : > { %21140 = vst [vmem:[#allocation99_spill] sm:$0xff] %v17394_v58  ;;  %4908 = vmatmul.mubr.f32.gmra.mxu1 %v13261_v14  ;;  %v4449_v30 = vadd.f32 %v17376_v11, %v21146_v49  ;;  %v13262_v19 = vld [vmem:[%s14442_s5 + $0x48] sm:$0xff]  ;;  %v17415_v38 = vadd.f32 0.0001, %v4361_v59  ;;  %v21147_v43 = vld [vmem:[#allocation133_spill] sm:$0xff]  ;;  %21151 = vst [vmem:[#allocation224_spill] sm:$0xff] %v17425_v40  ;;  %v12864_v60 = vpop.eup %12863  ;;  %v17444_v36 = vmul.f32 %v12860_v55, %v17319_v1  ;;  %12873 = vrcp.f32 %v4488_v48  ;;  %v17460_v55 = vpop.f32.mrf.mxu1 }
 0x480   : > { %21144 = vst [vmem:[#allocation88_spill] sm:$0xff] %v17404_v54  ;;  %10812 = vmatprep.mubr.msk.f32.mxu1 %vm1466_vm0, %v13262_v19  ;;  %v17419_v14 = vmul.f32 %v21147_v43, %v21147_v43  ;;  %v21149_v5 = vld [vmem:[#allocation73_spill] sm:$0xff]  ;;  %21152 = vst [vmem:[#allocation225_spill] sm:$0xff] %v17428_v44  ;;  %v4489_v19 = vadd.f32 0.0001, %v4447_v15  ;;  %v4364_v59 = vmul.f32 2.0, %v17394_v58  ;;  %v17463_v48 = vmul.f32 %v12864_v60, %v17344_v26 }
 0x481   : > { %v17423_v51 = vmul.f32 %v21147_v43, %v21149_v5  ;;  %v21153_v31 = vld [vmem:[#allocation75_spill] sm:$0xff]  ;;  %v21154_v24 = vld [vmem:[#allocation134_spill] sm:$0xff]  ;;  %v17435_v49 = vadd.f32 0.0001, %v4362_v46  ;;  %v4490_v34 = vadd.f32 0.0001, %v4448_v37  ;;  %v12866_v37 = vpop.eup %12865  ;;  %v17451_v46 = vmul.f32 %v12862_v61, %v17325_v10 }
 0x482   : > { %21148 = vst [vmem:[#allocation133_spill] sm:$0xff] %v17419_v14  ;;  %v17433_v11 = vmul.f32 %v21154_v24, %v21153_v31  ;;  %v4365_v43 = vmul.f32 2.0, %v17404_v54  ;;  %v17440_v5 = vmul.f32 %v21154_v24, %v21154_v24  ;;  %v13263_v40 = vld [vmem:[%s14442_s5 + $0x40] sm:$0xff]  ;;  %21157 = vst [vmem:[#allocation226_spill] sm:$0xff] %v17444_v36  ;;  %v17446_v15 = vadd.f32 0.0001, %v4363_v63  ;;  %v3518_v36 = vpop.f32.mrf.mxu1 }
 0x483   : > { %21150 = vst [vmem:[#allocation73_spill] sm:$0xff] %v17423_v51  ;;  %4913 = vmatmul.mubr.f32.gmra.mxu1 %v13263_v40  ;;  %v4491_v31 = vadd.f32 0.0001, %v4449_v30  ;;  %v13264_v29 = vld [vmem:[%s14442_s5 + $0x58] sm:$0xff]  ;;  %21158 = vst [vmem:[#allocation227_spill] sm:$0xff] %v17451_v46  ;;  %v4366_v24 = vmul.f32 2.0, %v17423_v51  ;;  %12875 = vrcp.f32 %v4489_v19  ;;  %v17478_v26 = vmul.f32 %v12866_v37, %v17355_v0 }
 0x484   : > { %21155 = vst [vmem:[#allocation75_spill] sm:$0xff] %v17433_v11  ;;  %21156 = vst [vmem:[#allocation134_spill] sm:$0xff] %v17440_v5  ;;  %10813 = vmatprep.mubr.msk.f32.mxu1 %vm1466_vm0, %v13264_v29  ;;  %v21159_v54 = vld [vmem:[#allocation171_spill] sm:$0xff]  ;;  %v17465_v63 = vadd.f32 0.0001, %v4364_v59  ;;  %v4367_v10 = vmul.f32 2.0, %v17433_v11  ;;  %12877 = vrcp.f32 %v4490_v34 }
 0x485   : > { %v4450_v40 = vadd.f32 %v17419_v14, %v21159_v54  ;;  %v21160_v58 = vld [vmem:[#allocation135_spill] sm:$0xff]  ;;  %21163 = vst [vmem:[#allocation228_spill] sm:$0xff] %v17463_v48  ;;  %v17468_v30 = vadd.f32 0.0001, %v4365_v43  ;;  %v21164_v61 = vld [vmem:[#allocation173_spill] sm:$0xff]  ;;  %v21165_v51 = vld [vmem:[#allocation74_spill] sm:$0xff]  ;;  %12879 = vrcp.f32 %v4491_v31  ;;  %v12868_v48 = vpop.eup %12867  ;;  %v3520_v31 = vpop.f32.mrf.mxu1 }
 0x486   : > { %v17458_v1 = vmul.f32 %v21160_v58, %v21160_v58  ;;  %21162 = vst [vmem:[#allocation135_spill] sm:$0xff] %v17460_v55  ;;  %v4451_v29 = vadd.f32 %v17440_v5, %v21164_v61  ;;  %v17474_v46 = vmul.f32 %v21160_v58, %v21165_v51  ;;  %v13265_v44 = vld [vmem:[%s14442_s5 + $0x50] sm:$0xff]  ;;  %21167 = vst [vmem:[#allocation229_spill] sm:$0xff] %v17478_v26  ;;  %v21168_v60 = vld [vmem:[#allocation70_spill] sm:$0xff]  ;;  %v17485_v55 = vadd.f32 0.0001, %v4366_v24  ;;  %v12870_v37 = vpop.eup %12869 }
 0x487   : > { %4918 = vmatmul.mubr.f32.gmra.mxu1 %v13265_v44  ;;  %v21169_v19 = vld [vmem:[#allocation150_spill] sm:$0xff]  ;;  %v21170_v34 = vld [vmem:[#allocation53_spill] sm:$0xff]  ;;  %v13266_v11 = vld [vmem:[%s14442_s5 + $0x68] sm:$0xff]  ;;  %v4492_v58 = vadd.f32 0.0001, %v4450_v40 }
 0x488   : > { %21161 = vst [vmem:[#allocation171_spill] sm:$0xff] %v17458_v1  ;;  %21166 = vst [vmem:[#allocation74_spill] sm:$0xff] %v17474_v46  ;;  %v3960_v59 = vsub.f32 %v21169_v19, %v21168_v60  ;;  %v4002_v43 = vsub.f32 %v3518_v36, %v21170_v34  ;;  %10814 = vmatprep.mubr.msk.f32.mxu1 %vm1466_vm0, %v13266_v11  ;;  %v4452_v44 = vadd.f32 %v17458_v1, %v16908_v52  ;;  %v21172_v51 = vld [vmem:[#allocation138_spill] sm:$0xff]  ;;  %v21176_v19 = vld [vmem:[#allocation95_spill] sm:$0xff] }
 0x489   : > { %21171 = vst [vmem:[#allocation70_spill] sm:$0xff] %v17485_v55  ;;  %v17491_v0 = vmul.f32 %v21172_v51, %v21172_v51  ;;  %v17493_v60 = vadd.f32 0.0001, %v4367_v10  ;;  %v21175_v36 = vld [vmem:[#allocation114_spill] sm:$0xff]  ;;  %v21177_v24 = vld [vmem:[#allocation57_spill] sm:$0xff]  ;;  %v4368_v55 = vmul.f32 2.0, %v17474_v46  ;;  %v3524_v10 = vpop.f32.mrf.mxu1  ;;  %12881 = vrcp.f32 %v4492_v58 }
 0x48a   : > { %v3961_v11 = vsub.f32 %v21176_v19, %v21175_v36  ;;  %v17497_v34 = vadd.f32 %v4002_v43, %v3960_v59  ;;  %v4003_v26 = vsub.f32 %v3520_v31, %v21177_v24  ;;  %v4493_v40 = vadd.f32 0.0001, %v4451_v29  ;;  %v21178_v1 = vld [vmem:[#allocation89_spill] sm:$0xff]  ;;  %v21180_v14 = vld [vmem:[#allocation139_spill] sm:$0xff]  ;;  %v21185_v19 = vld [vmem:[#allocation60_spill] sm:$0xff] }
 0x48b   : > { %21173 = vst [vmem:[#allocation150_spill] sm:$0xff] %v17491_v0  ;;  %21174 = vst [vmem:[#allocation53_spill] sm:$0xff] %v17493_v60  ;;  %v17503_v5 = vmul.f32 %v21172_v51, %v21178_v1  ;;  %v17507_v52 = vmul.f32 %v21180_v14, %v21180_v14  ;;  %v13267_v60 = vld [vmem:[%s14442_s5 + $0x60] sm:$0xff]  ;;  %v17511_v36 = vmul.f32 %v12868_v48, %v17386_v42  ;;  %v13268_v46 = vld [vmem:[%s14442_s5 + $0x78] sm:$0xff]  ;;  %v4494_v51 = vadd.f32 0.0001, %v4452_v44  ;;  %v3526_v48 = vpop.f32.mrf.mxu1 }
 0x48c   : > { %4923 = vmatmul.mubr.f32.gmra.mxu1 %v13267_v60  ;;  %v21183_v59 = vld [vmem:[#allocation51_spill] sm:$0xff]  ;;  %v17515_v29 = vadd.f32 %v4003_v26, %v3961_v11  ;;  %v4004_v24 = vsub.f32 %v3524_v10, %v21185_v19  ;;  %v17521_v1 = vmul.f32 %v12870_v37, %v17388_v4  ;;  %v21188_v61 = vld [vmem:[#allocation90_spill] sm:$0xff]  ;;  %v21190_v11 = vld [vmem:[#allocation97_spill] sm:$0xff]  ;;  %12883 = vrcp.f32 %v4493_v40 }
 0x48d   : > { %21179 = vst [vmem:[#allocation138_spill] sm:$0xff] %v17503_v5  ;;  %21181 = vst [vmem:[#allocation114_spill] sm:$0xff] %v17507_v52  ;;  %v21184_v43 = vld [vmem:[#allocation151_spill] sm:$0xff]  ;;  %10815 = vmatprep.mubr.msk.f32.mxu1 %vm1466_vm0, %v13268_v46  ;;  %v17527_v26 = vmul.f32 %v21180_v14, %v21188_v61  ;;  %v3963_v10 = vsub.f32 %v21190_v11, %v16754_v12  ;;  %v17534_v58 = vadd.f32 0.0001, %v4368_v55  ;;  %v4369_v44 = vmul.f32 2.0, %v17503_v5  ;;  %v3530_v19 = vpop.f32.mrf.mxu1 }
 0x48e   : > { %21182 = vst [vmem:[#allocation95_spill] sm:$0xff] %v17511_v36  ;;  %v3962_v31 = vsub.f32 %v21184_v43, %v21183_v59  ;;  %21186 = vst [vmem:[#allocation57_spill] sm:$0xff] %v17521_v1  ;;  %v21187_v60 = vld [vmem:[#allocation175_spill] sm:$0xff]  ;;  %v12872_v36 = vpop.eup %12871  ;;  %v21191_v59 = vld [vmem:[#allocation82_spill] sm:$0xff]  ;;  %v4006_v55 = vsub.f32 %v3530_v19, %v16926_v45  ;;  %12885 = vrcp.f32 %v4494_v51 }
 0x48f   : > { %v4453_v42 = vadd.f32 %v17491_v0, %v21187_v60  ;;  %21189 = vst [vmem:[#allocation89_spill] sm:$0xff] %v17527_v26  ;;  %v4005_v4 = vsub.f32 %v3526_v48, %v21191_v59  ;;  %21192 = vst [vmem:[#allocation139_spill] sm:$0xff] %v17534_v58  ;;  %v21193_v37 = vld [vmem:[#allocation176_spill] sm:$0xff]  ;;  %v21194_v14 = vld [vmem:[#allocation91_spill] sm:$0xff]  ;;  %v12874_v48 = vpop.eup %12873  ;;  %v17552_v11 = vmul.f32 %v12872_v36, %v17415_v38  ;;  %v17564_v38 = vadd.f32 0.0001, %v4369_v44 }
 0x490   : > { %v17531_v46 = vadd.f32 %v4004_v24, %v3962_v31  ;;  %v4454_v43 = vadd.f32 %v17507_v52, %v21193_v37  ;;  %v13269_v1 = vld [vmem:[%s14442_s5 + $0x70] sm:$0xff]  ;;  %v21197_v12 = vld [vmem:[#allocation98_spill] sm:$0xff]  ;;  %v13270_v40 = vld [vmem:[%s14442_s5 + $0x88] sm:$0xff] }
 0x491   : > { %4928 = vmatmul.mubr.f32.gmra.mxu1 %v13269_v1  ;;  %v21195_v61 = vld [vmem:[#allocation141_spill] sm:$0xff]  ;;  %v3964_v31 = vsub.f32 %v21197_v12, %v16758_v20  ;;  %v17546_v24 = vadd.f32 %v4005_v4, %v3963_v10  ;;  %21198 = vst [vmem:[#allocation151_spill] sm:$0xff] %v17552_v11  ;;  %v4495_v1 = vadd.f32 0.0001, %v4453_v42  ;;  %v4370_v20 = vmul.f32 2.0, %v17527_v26  ;;  %v12876_v12 = vpop.eup %12875  ;;  %21201 = vst [vmem:[#allocation175_spill] sm:$0xff] %v17564_v38 }
 0x492   : > { %v17542_v0 = vmul.f32 %v21195_v61, %v21194_v14  ;;  %10816 = vmatprep.mubr.msk.f32.mxu1 %vm1466_vm0, %v13270_v40  ;;  %v17556_v59 = vmul.f32 %v21195_v61, %v21195_v61  ;;  %v3532_v14 = vpop.f32.mrf.mxu1  ;;  %v21200_v10 = vld [vmem:[#allocation101_spill] sm:$0xff]  ;;  %v4496_v36 = vadd.f32 0.0001, %v4454_v43  ;;  %v21202_v51 = vld [vmem:[#allocation142_spill] sm:$0xff]  ;;  %v21226_v58 = vld [vmem:[#allocation76_spill] sm:$0xff] }
 0x493   : > { %v3965_v45 = vsub.f32 %v21200_v10, %v16765_v6  ;;  %v17561_v4 = vadd.f32 %v4006_v55, %v3964_v31  ;;  %v4007_v19 = vsub.f32 %v3532_v14, %v16939_v39  ;;  %v17568_v42 = vmul.f32 %v21202_v51, %v21202_v51  ;;  %v21204_v61 = vld [vmem:[#allocation77_spill] sm:$0xff]  ;;  %v13271_v5 = vld [vmem:[%s14442_s5 + $0x80] sm:$0xff]  ;;  %v17575_v6 = vpop.eup %12877 }
 0x494   : > { %21196 = vst [vmem:[#allocation51_spill] sm:$0xff] %v17542_v0  ;;  %21199 = vst [vmem:[#allocation60_spill] sm:$0xff] %v17556_v59  ;;  %v17572_v40 = vmul.f32 %v21202_v51, %v21204_v61  ;;  %v3536_v26 = vpop.f32.mrf.mxu1  ;;  %v4371_v31 = vmul.f32 2.0, %v17542_v0  ;;  %v21206_v39 = vld [vmem:[#allocation154_spill] sm:$0xff]  ;;  %v17585_v10 = vpop.eup %12879  ;;  %v17588_v51 = vmul.f32 %v12874_v48, %v17435_v49  ;;  %12887 = vrcp.f32 %v4495_v1  ;;  %v21209_v0 = vld [vmem:[#allocation143_spill] sm:$0xff] }
 0x495   : > { %21203 = vst [vmem:[#allocation90_spill] sm:$0xff] %v17568_v42  ;;  %4933 = vmatmul.mubr.f32.gmra.mxu1 %v13271_v5  ;;  %v3966_v44 = vsub.f32 %v21206_v39, %v16769_v23  ;;  %v17580_v55 = vadd.f32 %v4007_v19, %v3965_v45  ;;  %v4008_v43 = vsub.f32 %v3536_v26, %v16981_v17  ;;  %v13272_v14 = vld [vmem:[%s14442_s5 + $0x98] sm:$0xff]  ;;  %v17596_v17 = vadd.f32 0.0001, %v4370_v20  ;;  %v13273_v20 = vld [vmem:[%s14442_s5 + $0x90] sm:$0xff] }
 0x496   : > { %21205 = vst [vmem:[#allocation97_spill] sm:$0xff] %v17572_v40  ;;  %10817 = vmatprep.mubr.msk.f32.mxu1 %vm1466_vm0, %v13272_v14  ;;  %21207 = vst [vmem:[#allocation82_spill] sm:$0xff] %v17588_v51  ;;  %v21208_v5 = vld [vmem:[#allocation177_spill] sm:$0xff]  ;;  %v17594_v23 = vmul.f32 %v21209_v0, %v21209_v0  ;;  %v3538_v45 = vpop.f32.mrf.mxu1  ;;  %12889 = vrcp.f32 %v4496_v36  ;;  %v4372_v48 = vmul.f32 2.0, %v17572_v40  ;;  %v21213_v1 = vld [vmem:[#allocation178_spill] sm:$0xff] }
 0x497   : > { %v4455_v61 = vadd.f32 %v17556_v59, %v21208_v5  ;;  %21211 = vst [vmem:[#allocation91_spill] sm:$0xff] %v17596_v17  ;;  %v21212_v26 = vld [vmem:[#allocation157_spill] sm:$0xff]  ;;  %v17600_v39 = vadd.f32 %v4008_v43, %v3966_v44  ;;  %v4009_v49 = vsub.f32 %v3538_v45, %v16990_v28  ;;  %v4456_v14 = vadd.f32 %v17568_v42, %v21213_v1  ;;  %v21214_v51 = vld [vmem:[#allocation144_spill] sm:$0xff]  ;;  %v21218_v40 = vld [vmem:[#allocation103_spill] sm:$0xff] }
 0x498   : > { %21210 = vst [vmem:[#allocation176_spill] sm:$0xff] %v17594_v23  ;;  %v3967_v19 = vsub.f32 %v21212_v26, %v16773_v25  ;;  %v17608_v11 = vmul.f32 %v21214_v51, %v21214_v51  ;;  %v3542_v38 = vpop.f32.mrf.mxu1  ;;  %v17611_v17 = vadd.f32 0.0001, %v4371_v31  ;;  %v21216_v25 = vld [vmem:[#allocation158_spill] sm:$0xff]  ;;  %v13274_v36 = vld [vmem:[%s14442_s5 + $0xa8] sm:$0xff]  ;;  %v17622_v26 = vmul.f32 %v21209_v0, %v21005_v50 }
 0x499   : > { %4938 = vmatmul.mubr.f32.gmra.mxu1 %v13273_v20  ;;  %v3968_v44 = vsub.f32 %v21216_v25, %v16784_v41  ;;  %v4010_v28 = vsub.f32 %v3542_v38, %v17013_v8  ;;  %v4497_v45 = vadd.f32 0.0001, %v4455_v61  ;;  %v4457_v31 = vadd.f32 %v17594_v23, %v21218_v40  ;;  %v21219_v20 = vld [vmem:[#allocation145_spill] sm:$0xff]  ;;  %v21222_v8 = vld [vmem:[#allocation146_spill] sm:$0xff] }
 0x49a   : > { %21215 = vst [vmem:[#allocation141_spill] sm:$0xff] %v17611_v17  ;;  %v17615_v43 = vadd.f32 %v4009_v49, %v3967_v19  ;;  %10818 = vmatprep.mubr.msk.f32.mxu1 %vm1466_vm0, %v13274_v36  ;;  %21217 = vst [vmem:[#allocation98_spill] sm:$0xff] %v17622_v26  ;;  %v17628_v17 = vmul.f32 %v21219_v20, %v21219_v20  ;;  %v3544_v41 = vpop.f32.mrf.mxu1  ;;  %v17630_v19 = vpop.eup %12881  ;;  %v17634_v38 = vmul.f32 %v21222_v8, %v21222_v8  ;;  %v21224_v61 = vld [vmem:[#allocation110_spill] sm:$0xff] }
 0x49b   : > { %21221 = vst [vmem:[#allocation142_spill] sm:$0xff] %v17630_v19  ;;  %v3969_v49 = vsub.f32 %v21224_v61, %v16788_v53  ;;  %v17638_v50 = vadd.f32 %v4010_v28, %v3968_v44  ;;  %v4011_v0 = vsub.f32 %v3544_v41, %v17036_v62  ;;  %v17642_v25 = vmul.f32 %v12876_v12, %v17446_v15  ;;  %v21227_v19 = vld [vmem:[#allocation147_spill] sm:$0xff]  ;;  %v17651_v52 = vpop.eup %12883  ;;  %v21230_v53 = vld [vmem:[#allocation148_spill] sm:$0xff]  ;;  %v13276_v28 = vld [vmem:[%s14442_s5 + $0xb8] sm:$0xff] }
 0x49c   : > { %21220 = vst [vmem:[#allocation101_spill] sm:$0xff] %v17628_v17  ;;  %21223 = vst [vmem:[#allocation77_spill] sm:$0xff] %v17634_v38  ;;  %v4498_v36 = vadd.f32 0.0001, %v4456_v14  ;;  %v4458_v23 = vadd.f32 %v17608_v11, %v21226_v58  ;;  %v17648_v40 = vmul.f32 %v21227_v19, %v21227_v19  ;;  %v3548_v42 = vpop.f32.mrf.mxu1  ;;  %v13275_v59 = vld [vmem:[%s14442_s5 + $0xa0] sm:$0xff]  ;;  %v17655_v44 = vmul.f32 %v21230_v53, %v21230_v53  ;;  %v21233_v61 = vld [vmem:[#allocation149_spill] sm:$0xff]  ;;  %v17670_v53 = vpop.eup %12885 }
 0x49d   : > { %21225 = vst [vmem:[#allocation154_spill] sm:$0xff] %v17642_v25  ;;  %4943 = vmatmul.mubr.f32.gmra.mxu1 %v13275_v59  ;;  %21229 = vst [vmem:[#allocation143_spill] sm:$0xff] %v17651_v52  ;;  %v21232_v62 = vld [vmem:[#allocation167_spill] sm:$0xff]  ;;  %v17659_v12 = vadd.f32 %v4011_v0, %v3969_v49  ;;  %v4012_v14 = vsub.f32 %v3548_v42, %v17053_v2  ;;  %12891 = vrcp.f32 %v4497_v45  ;;  %v4499_v41 = vadd.f32 0.0001, %v4457_v31  ;;  %v21237_v42 = vld [vmem:[#allocation52_spill] sm:$0xff] }
 0x49e   : > { %21228 = vst [vmem:[#allocation177_spill] sm:$0xff] %v17648_v40  ;;  %21231 = vst [vmem:[#allocation157_spill] sm:$0xff] %v17655_v44  ;;  %v3970_v15 = vsub.f32 %v21232_v62, %v16792_v27  ;;  %10819 = vmatprep.mubr.msk.f32.mxu1 %vm1466_vm0, %v13276_v28  ;;  %v4459_v59 = vadd.f32 %v17628_v17, %v16963_v32  ;;  %v17668_v25 = vmul.f32 %v21233_v61, %v21233_v61  ;;  %v3550_v52 = vpop.f32.mrf.mxu1  ;;  %v21236_v27 = vld [vmem:[#allocation184_spill] sm:$0xff]  ;;  %v21238_v45 = vld [vmem:[#allocation115_spill] sm:$0xff] }
 0x49f   : > { %21235 = vst [vmem:[#allocation144_spill] sm:$0xff] %v17670_v53  ;;  %v4460_v2 = vadd.f32 %v17634_v38, %v21236_v27  ;;  %v3971_v49 = vsub.f32 %v21237_v42, %v16804_v9  ;;  %v4013_v31 = vsub.f32 %v3550_v52, %v21238_v45  ;;  %v17679_v62 = vadd.f32 0.0001, %v4372_v48  ;;  %v21240_v61 = vld [vmem:[#allocation107_spill] sm:$0xff]  ;;  %v13277_v53 = vld [vmem:[%s14442_s5 + $0xb0] sm:$0xff] }
 0x4a0   : > { %21234 = vst [vmem:[#allocation178_spill] sm:$0xff] %v17668_v25  ;;  %v17676_v0 = vadd.f32 %v4012_v14, %v3970_v15  ;;  %12893 = vrcp.f32 %v4498_v36  ;;  %v4500_v28 = vadd.f32 0.0001, %v4458_v23  ;;  %v4461_v19 = vadd.f32 %v17648_v40, %v21240_v61  ;;  %v3554_v17 = vpop.f32.mrf.mxu1  ;;  %v21241_v32 = vld [vmem:[#allocation108_spill] sm:$0xff]  ;;  %v21242_v27 = vld [vmem:[#allocation55_spill] sm:$0xff]  ;;  %v21351_v40 = vld [vmem:[#allocation54_spill] sm:$0xff] }
 0x4a1   : > { %21239 = vst [vmem:[#allocation158_spill] sm:$0xff] %v17679_v62  ;;  %4948 = vmatmul.mubr.f32.gmra.mxu1 %v13277_v53  ;;  %v4462_v38 = vadd.f32 %v17655_v44, %v21241_v32  ;;  %v3972_v9 = vsub.f32 %v21242_v27, %v16808_v22  ;;  %v17688_v15 = vadd.f32 %v4013_v31, %v3971_v49  ;;  %v13278_v48 = vld [vmem:[%s14442_s5 + $0xc8] sm:$0xff]  ;;  %v4373_v23 = vmul.f32 2.0, %v17622_v26  ;;  %v17696_v45 = vpop.eup %12887  ;;  %v13291_v44 = vld [vmem:[%s14442_s5 + $0x120] sm:$0xff] }
 0x4a2   : > { %v4014_v52 = vsub.f32 %v3554_v17, %v17094_v56  ;;  %10820 = vmatprep.mubr.msk.f32.mxu1 %vm1466_vm0, %v13278_v48  ;;  %12895 = vrcp.f32 %v4499_v41  ;;  %v4501_v36 = vadd.f32 0.0001, %v4459_v59  ;;  %v21243_v14 = vld [vmem:[#allocation195_spill] sm:$0xff]  ;;  %v3556_v42 = vpop.f32.mrf.mxu1  ;;  %21244 = vst [vmem:[#allocation145_spill] sm:$0xff] %v17696_v45  ;;  %v4502_v62 = vadd.f32 0.0001, %v4460_v2 }
 0x4a3   : > { %v4463_v53 = vadd.f32 %v17668_v25, %v21243_v14  ;;  %v21245_v22 = vld [vmem:[#allocation80_spill] sm:$0xff]  ;;  %v4015_v17 = vsub.f32 %v3556_v42, %v17113_v18  ;;  %12897 = vrcp.f32 %v4500_v28  ;;  %v21248_v41 = vld [vmem:[#allocation93_spill] sm:$0xff]  ;;  %v4503_v48 = vadd.f32 0.0001, %v4461_v19  ;;  %v13279_v2 = vld [vmem:[%s14442_s5 + $0xc0] sm:$0xff]  ;;  %v17712_v45 = vpop.eup %12889 }
 0x4a4   : > { %v3973_v27 = vsub.f32 %v21245_v22, %v16818_v16  ;;  %v17700_v56 = vadd.f32 %v4014_v52, %v3972_v9  ;;  %v21246_v49 = vld [vmem:[#allocation92_spill] sm:$0xff]  ;;  %v17709_v59 = vmul.f32 %v21219_v20, %v21248_v41  ;;  %v3560_v26 = vpop.f32.mrf.mxu1  ;;  %21250 = vst [vmem:[#allocation76_spill] sm:$0xff] %v17712_v45  ;;  %v4504_v16 = vadd.f32 0.0001, %v4462_v38  ;;  %v21251_v9 = vld [vmem:[#allocation118_spill] sm:$0xff]  ;;  %v21262_v41 = vld [vmem:[#allocation181_spill] sm:$0xff] }
 0x4a5   : > { %v17705_v31 = vmul.f32 %v21214_v51, %v21246_v49  ;;  %4953 = vmatmul.mubr.f32.gmra.mxu1 %v13279_v2  ;;  %v3974_v52 = vsub.f32 %v21251_v9, %v16822_v35  ;;  %v4016_v51 = vsub.f32 %v3560_v26, %v17123_v33  ;;  %v13280_v42 = vld [vmem:[%s14442_s5 + $0xd8] sm:$0xff]  ;;  %v17723_v20 = vmul.f32 %v17575_v6, %v17465_v63  ;;  %v21254_v35 = vld [vmem:[#allocation172_spill] sm:$0xff]  ;;  %v21264_v9 = vld [vmem:[#allocation59_spill] sm:$0xff] }
 0x4a6   : > { %21249 = vst [vmem:[#allocation110_spill] sm:$0xff] %v17709_v59  ;;  %v17716_v18 = vadd.f32 %v4015_v17, %v3973_v27  ;;  %10821 = vmatprep.mubr.msk.f32.mxu1 %vm1466_vm0, %v13280_v42  ;;  %v17727_v19 = vmul.f32 %v17585_v10, %v17468_v30  ;;  %12899 = vrcp.f32 %v4501_v36  ;;  %v4505_v38 = vadd.f32 0.0001, %v4463_v53  ;;  %v3562_v28 = vpop.f32.mrf.mxu1  ;;  %v13281_v10 = vld [vmem:[%s14442_s5 + $0xd0] sm:$0xff]  ;;  %v21260_v17 = vld [vmem:[#allocation79_spill] sm:$0xff]  ;;  %v13288_v45 = vld [vmem:[%s14442_s5 + $0x118] sm:$0xff] }
 0x4a7   : > { %21247 = vst [vmem:[#allocation146_spill] sm:$0xff] %v17705_v31  ;;  %21252 = vst [vmem:[#allocation167_spill] sm:$0xff] %v17723_v20  ;;  %12901 = vrcp.f32 %v4502_v62  ;;  %v3975_v33 = vsub.f32 %v21254_v35, %v16826_v7  ;;  %v17731_v26 = vadd.f32 %v4016_v51, %v3974_v52  ;;  %v4017_v22 = vsub.f32 %v3562_v28, %v17130_v47  ;;  %v21258_v62 = vld [vmem:[#allocation100_spill] sm:$0xff]  ;;  %v21259_v53 = vld [vmem:[#allocation121_spill] sm:$0xff] }
 0x4a8   : > { %21253 = vst [vmem:[#allocation52_spill] sm:$0xff] %v17727_v19  ;;  %v17734_v27 = vadd.f32 0.0001, %v4373_v23  ;;  %v17737_v63 = vmul.f32 2.0, %v17705_v31  ;;  %v17740_v30 = vmul.f32 2.0, %v17709_v59  ;;  %12903 = vrcp.f32 %v4503_v48  ;;  %v3566_v6 = vpop.f32.mrf.mxu1  ;;  %v13282_v23 = vld [vmem:[%s14442_s5 + $0xe8] sm:$0xff] }
 0x4a9   : > { %4958 = vmatmul.mubr.f32.gmra.mxu1 %v13281_v10  ;;  %12905 = vrcp.f32 %v4504_v16  ;;  %v3976_v7 = vsub.f32 %v21258_v62, %v16830_v21  ;;  %v17745_v36 = vadd.f32 %v4017_v22, %v3975_v33  ;;  %v4018_v47 = vsub.f32 %v3566_v6, %v21259_v53  ;;  %v21265_v52 = vld [vmem:[#allocation104_spill] sm:$0xff]  ;;  %v21266_v35 = vld [vmem:[#allocation122_spill] sm:$0xff]  ;;  %v21267_v33 = vld [vmem:[#allocation117_spill] sm:$0xff] }
 0x4aa   : > { %21255 = vst [vmem:[#allocation115_spill] sm:$0xff] %v17734_v27  ;;  %21256 = vst [vmem:[#allocation55_spill] sm:$0xff] %v17737_v63  ;;  %10822 = vmatprep.mubr.msk.f32.mxu1 %vm1466_vm0, %v13282_v23  ;;  %v17752_v49 = vmul.f32 %v21222_v8, %v21260_v17  ;;  %12907 = vrcp.f32 %v4505_v38  ;;  %v3977_v48 = vsub.f32 %v21262_v41, %v21075_v57  ;;  %v4212_v2 = vadd.f32 0.0009, %v17497_v34  ;;  %v3568_v16 = vpop.f32.mrf.mxu1  ;;  %v17757_v21 = vpop.eup %12891  ;;  %v21268_v38 = vld [vmem:[#allocation187_spill] sm:$0xff]  ;;  %v21269_v6 = vld [vmem:[#allocation61_spill] sm:$0xff] }
 0x4ab   : > { %21257 = vst [vmem:[#allocation80_spill] sm:$0xff] %v17740_v30  ;;  %21263 = vst [vmem:[#allocation93_spill] sm:$0xff] %v17757_v21  ;;  %v3978_v51 = vsub.f32 %v21265_v52, %v21264_v9  ;;  %v4213_v42 = vadd.f32 0.0009, %v17515_v29  ;;  %v17762_v28 = vadd.f32 %v4018_v47, %v3976_v7  ;;  %v4019_v8 = vsub.f32 %v3568_v16, %v21266_v35  ;;  %v21270_v57 = vld [vmem:[#allocation189_spill] sm:$0xff]  ;;  %v21271_v34 = vld [vmem:[#allocation111_spill] sm:$0xff] }
 0x4ac   : > { %21261 = vst [vmem:[#allocation92_spill] sm:$0xff] %v17752_v49  ;;  %v3979_v22 = vsub.f32 %v21268_v38, %v21267_v33  ;;  %v3980_v10 = vsub.f32 %v21270_v57, %v21269_v6  ;;  %v3981_v62 = vsub.f32 %v21271_v34, %v21104_v13  ;;  %v4214_v53 = vadd.f32 0.0009, %v17531_v46  ;;  %v3572_v23 = vpop.f32.mrf.mxu1  ;;  %v13283_v17 = vld [vmem:[%s14442_s5 + $0xe0] sm:$0xff]  ;;  %v21273_v7 = vld [vmem:[#allocation152_spill] sm:$0xff]  ;;  %v13284_v38 = vld [vmem:[%s14442_s5 + $0xf8] sm:$0xff] }
 0x4ad   : > { %4963 = vmatmul.mubr.f32.gmra.mxu1 %v13283_v17  ;;  %v17773_v29 = vpop.eup %12893  ;;  %v21274_v47 = vand.u32 2147483647, %v21273_v7  ;;  %v21277_v16 = vld [vmem:[#allocation96_spill] sm:$0xff]  ;;  %v4215_v35 = vadd.f32 0.0009, %v17546_v24  ;;  %v17784_v33 = vadd.f32 %v4019_v8, %v3977_v48  ;;  %v21279_v13 = vld [vmem:[#allocation123_spill] sm:$0xff]  ;;  %12909 = vrcp.f32 %v4212_v2 }
 0x4ae   : > { %21272 = vst [vmem:[#allocation118_spill] sm:$0xff] %v17773_v29  ;;  %v21278_v9 = vld [vmem:[#allocation112_spill] sm:$0xff]  ;;  %v4020_v46 = vsub.f32 %v3572_v23, %v21279_v13  ;;  %10823 = vmatprep.mubr.msk.f32.mxu1 %vm1466_vm0, %v13284_v38  ;;  %v21280_v6 = vld [vmem:[#allocation102_spill] sm:$0xff]  ;;  %v21284_v17 = vld [vmem:[#allocation63_spill] sm:$0xff]  ;;  %v4216_v48 = vadd.f32 0.0009, %v17561_v4  ;;  %v3574_v8 = vpop.f32.mrf.mxu1  ;;  %12911 = vrcp.f32 %v4213_v42 }
 0x4af   : > { %vm17777_vm5 = vcmp.lt.f32.partialorder %v21274_v47, 1.0  ;;  %v21281_v57 = vand.u32 2147483647, %v21280_v6  ;;  %v21285_v7 = vld [vmem:[#allocation194_spill] sm:$0xff]  ;;  %v21286_v52 = vld [vmem:[#allocation64_spill] sm:$0xff]  ;;  %v17800_v23 = vpop.eup %12895  ;;  %v21291_v19 = vld [vmem:[#allocation169_spill] sm:$0xff]  ;;  %12913 = vrcp.f32 %v4214_v53 }
 0x4b0   : > { %v21287_v59 = vld [vmem:[#allocation116_spill] sm:$0xff]  ;;  %21288 = vst [vmem:[#allocation172_spill] sm:$0xff] %v17800_v23  ;;  %v4217_v13 = vadd.f32 0.0009, %v17580_v55  ;;  %v17803_v38 = vadd.f32 %v4020_v46, %v3978_v51  ;;  %v21290_v31 = vld [vmem:[#allocation198_spill] sm:$0xff]  ;;  %v21292_v20 = vld [vmem:[#allocation119_spill] sm:$0xff]  ;;  %v3578_v2 = vpop.f32.mrf.mxu1  ;;  %v17812_v42 = vpop.eup %12897  ;;  %12915 = vrcp.f32 %v4215_v35 }
 0x4b1   : > { %vm17791_vm6 = vcmp.lt.f32.partialorder %v21281_v57, 1.0  ;;  %v21289_v6 = vld [vmem:[#allocation124_spill] sm:$0xff]  ;;  %v4218_v4 = vadd.f32 0.0009, %v17600_v39  ;;  %21293 = vst [vmem:[#allocation100_spill] sm:$0xff] %v17812_v42  ;;  %v21294_v46 = vld [vmem:[#allocation58_spill] sm:$0xff]  ;;  %12917 = vrcp.f32 %v4216_v48  ;;  %v21338_v34 = vsub.f32 %v21287_v59, %v21286_v52 }
 0x4b2   : > { %v4021_v57 = vsub.f32 %v3574_v8, %v21289_v6  ;;  %v13285_v27 = vld [vmem:[%s14442_s5 + $0xf0] sm:$0xff]  ;;  %v4219_v55 = vadd.f32 0.0009, %v17615_v43  ;;  %v4022_v8 = vsub.f32 %v3578_v2, %v21294_v46  ;;  %v13286_v6 = vld [vmem:[%s14442_s5 + $0x108] sm:$0xff]  ;;  %v21295_v47 = vld [vmem:[#allocation170_spill] sm:$0xff]  ;;  %v3580_v35 = vpop.f32.mrf.mxu1  ;;  %12919 = vrcp.f32 %v4217_v13 }
 0x4b3   : > { %4968 = vmatmul.mubr.f32.gmra.mxu1 %v13285_v27  ;;  %v21296_v24 = vld [vmem:[#allocation201_spill] sm:$0xff]  ;;  %v21297_v39 = vld [vmem:[#allocation204_spill] sm:$0xff]  ;;  %v4220_v27 = vadd.f32 0.0009, %v17638_v50  ;;  %v17825_v42 = vpop.eup %12899  ;;  %v4221_v43 = vadd.f32 0.0009, %v17659_v12  ;;  %12921 = vrcp.f32 %v4218_v4 }
 0x4b4   : > { %v17815_v51 = vadd.f32 %v4021_v57, %v3979_v22  ;;  %10824 = vmatprep.mubr.msk.f32.mxu1 %vm1466_vm0, %v13286_v6  ;;  %21298 = vst [vmem:[#allocation121_spill] sm:$0xff] %v17825_v42  ;;  %v17828_v22 = vadd.f32 %v4022_v8, %v3980_v10  ;;  %v21299_v57 = vld [vmem:[#allocation68_spill] sm:$0xff]  ;;  %v17831_v46 = vpop.eup %12901  ;;  %v21301_v6 = vld [vmem:[#allocation173_spill] sm:$0xff]  ;;  %v21302_v53 = vld [vmem:[#allocation207_spill] sm:$0xff]  ;;  %v4222_v48 = vadd.f32 0.0009, %v17676_v0  ;;  %v3584_v50 = vpop.f32.mrf.mxu1  ;;  %12923 = vrcp.f32 %v4219_v55 }
 0x4b5   : > { %v4023_v2 = vsub.f32 %v3580_v35, %v21299_v57  ;;  %21300 = vst [vmem:[#allocation79_spill] sm:$0xff] %v17831_v46  ;;  %v13287_v23 = vld [vmem:[%s14442_s5 + $0x100] sm:$0xff]  ;;  %v21305_v12 = vld [vmem:[#allocation156_spill] sm:$0xff]  ;;  %v17843_v8 = vpop.eup %12903  ;;  %v21309_v57 = vld [vmem:[#allocation209_spill] sm:$0xff]  ;;  %12925 = vrcp.f32 %v4220_v27 }
 0x4b6   : > { %v21304_v13 = vld [vmem:[#allocation155_spill] sm:$0xff]  ;;  %21307 = vst [vmem:[#allocation181_spill] sm:$0xff] %v17843_v8  ;;  %v21308_v35 = vld [vmem:[#allocation174_spill] sm:$0xff]  ;;  %v21313_v42 = vld [vmem:[#allocation137_spill] sm:$0xff]  ;;  %12927 = vrcp.f32 %v4221_v43 }
 0x4b7   : > { %4973 = vmatmul.mubr.f32.gmra.mxu1 %v13287_v23  ;;  %v21306_v21 = vsel %vm16662_vm4, %v21304_v13, %v21305_v12  ;;  %v17847_v29 = vadd.f32 %v4023_v2, %v3981_v62  ;;  %v21311_v4 = vld [vmem:[#allocation126_spill] sm:$0xff]  ;;  %v17852_v23 = vpop.eup %12905  ;;  %v21315_v8 = vld [vmem:[#allocation127_spill] sm:$0xff]  ;;  %v3586_v62 = vpop.f32.mrf.mxu1  ;;  %v21320_v13 = vld [vmem:[#allocation109_spill] sm:$0xff]  ;;  %12929 = vrcp.f32 %v4222_v48  ;;  %vm5440_vm4 = vcmask 719872  }
 0x4b8   : > { %v1515_v10 = vsel %vm1466_vm0, %v21306_v21, 0.0  ;;  %v4024_v0 = vsub.f32 %v3584_v50, %v21311_v4  ;;  %10825 = vmatprep.mubr.msk.f32.mxu1 %vm1466_vm0, %v13288_v45  ;;  %21312 = vst [vmem:[#allocation104_spill] sm:$0xff] %v17852_v23  ;;  %v21314_v21 = vld [vmem:[#allocation210_spill] sm:$0xff]  ;;  %v17860_v55 = vpop.eup %12907  ;;  %v21317_v45 = vsub.f32 %v21278_v9, %v21277_v16  ;;  %v21321_v12 = vld [vmem:[#allocation213_spill] sm:$0xff]  ;;  %v17878_v9 = vadd.f32 0.0009, %v17688_v15 }
 0x4b9   : > { %21310 = vst [vmem:[#allocation59_spill] sm:$0xff] %v17847_v29  ;;  %21316 = vst [vmem:[#allocation122_spill] sm:$0xff] %v17860_v55  ;;  %v21319_v50 = vld [vmem:[#allocation62_spill] sm:$0xff]  ;;  %v1516_v23 = vadd.f32 %v1515_v10, %v21320_v13  ;;  %v3590_v46 = vpop.f32.mrf.mxu1  ;;  %v13289_v27 = vld [vmem:[%s14442_s5 + $0x110] sm:$0xff]  ;;  %v21325_v10 = vsub.f32 %v21285_v7, %v21284_v17  ;;  %v17893_v15 = vadd.f32 0.0009, %v17700_v56 }
 0x4ba   : > { %v17865_v2 = vadd.f32 %v4024_v0, %v21317_v45  ;;  %v4025_v4 = vsub.f32 %v3586_v62, %v21319_v50  ;;  %v21322_v49 = vld [vmem:[#allocation165_spill] sm:$0xff]  ;;  %v21323_v55 = vld [vmem:[#allocation163_spill] sm:$0xff]  ;;  %v21328_v45 = vld [vmem:[#allocation160_spill] sm:$0xff]  ;;  %12931 = vrcp.f32 %v17878_v9 }
 0x4bb   : > { %4978 = vmatmul.mubr.f32.gmra.mxu1 %v13289_v27  ;;  %v1240_v25 = vand.u32 2147483647, %v21322_v49  ;;  %v21324_v43 = vld [vmem:[#allocation161_spill] sm:$0xff]  ;;  %v13290_v62 = vld [vmem:[%s14442_s5 + $0x128] sm:$0xff]  ;;  %v21340_v56 = vld [vmem:[#allocation130_spill] sm:$0xff]  ;;  %12933 = vrcp.f32 %v17893_v15 }
 0x4bc   : > { %21318 = vst [vmem:[#allocation117_spill] sm:$0xff] %v17865_v2  ;;  %v1456_v16 = vsel %vm17777_vm5, %v21324_v43, %v21323_v55  ;;  %v17883_v0 = vadd.f32 %v4025_v4, %v21325_v10  ;;  %v21327_v13 = vld [vmem:[#allocation129_spill] sm:$0xff]  ;;  %10826 = vmatprep.mubr.msk.f32.mxu1 %vm1466_vm0, %v13290_v62  ;;  %v21329_v50 = vld [vmem:[#allocation159_spill] sm:$0xff]  ;;  %v3592_v55 = vpop.f32.mrf.mxu1  ;;  %v17904_v62 = vpop.eup %12909  ;;  %v4228_v15 = vadd.f32 0.0009, %v17762_v28  ;;  %vm6759_vm5 = vcmask 635904  }
 0x4bd   : > { %v4026_v48 = vsub.f32 %v3590_v46, %v21327_v13  ;;  %v1457_v41 = vsel %vm17791_vm6, %v21329_v50, %v21328_v45  ;;  %v21330_v17 = vld [vmem:[#allocation105_spill] sm:$0xff]  ;;  %v21334_v46 = vld [vmem:[#allocation162_spill] sm:$0xff]  ;;  %21337 = vst [vmem:[#allocation61_spill] sm:$0xff] %v17904_v62  ;;  %v4027_v50 = vsub.f32 %v3592_v55, %v21340_v56  ;;  %v17913_v30 = vpop.eup %12911  ;;  %vm17929_vm9 = vcmp.lt.f32.partialorder %v1240_v25, 1.0 }
 0x4be   : > { %21326 = vst [vmem:[#allocation187_spill] sm:$0xff] %v17883_v0  ;;  %v21331_v7 = vand.u32 2147483647, %v21330_v17  ;;  %v1329_v27 = vmul.f32 0.5, %v21334_v46  ;;  %v21335_v43 = vld [vmem:[#allocation153_spill] sm:$0xff]  ;;  %21341 = vst [vmem:[#allocation111_spill] sm:$0xff] %v17913_v30  ;;  %v3596_v14 = vpop.f32.mrf.mxu1  ;;  %v17934_v55 = vpop.eup %12913 }
 0x4bf   : > { %v21336_v10 = vand.u32 2147483647, %v21335_v43  ;;  %v17909_v45 = vadd.f32 %v4026_v48, %v21338_v34  ;;  %v1241_v17 = vand.u32 2147483647, %v21334_v46  ;;  %4983 = vmatmul.mubr.f32.gmra.mxu1 %v13291_v44  ;;  %v13293_v62 = vld [vmem:[%s14450_s26 + $0x150] sm:$0xff]  ;;  %21347 = vst [vmem:[#allocation152_spill] sm:$0xff] %v17934_v55  ;;  %v21348_v44 = vsub.f32 %v21290_v31, %v21138_v3  ;;  %v17952_v55 = vpop.eup %12915 }
 0x4c0   : > { %vm17897_vm7 = vcmp.lt.f32.partialorder %v21331_v7, 1.0  ;;  %v1517_v7 = vadd.f32 %v1516_v23, %v1456_v16  ;;  %v21342_v52 = vand.u32 2147483647, %v21335_v43  ;;  %v1518_v16 = vsel %vm1466_vm0, %v1457_v41, 0.0  ;;  %v13294_v43 = vld [vmem:[%s14442_s5 + $0x138] sm:$0xff]  ;;  %21352 = vst [vmem:[#allocation112_spill] sm:$0xff] %v17952_v55  ;;  %v3598_v61 = vpop.f32.mrf.mxu1 }
 0x4c1   : > { %v10586_v13 = vadd.f32 -0.5, %v21336_v10  ;;  %21339 = vst [vmem:[#allocation189_spill] sm:$0xff] %v17909_v45  ;;  %v17917_v10 = vld [vmem:[%s14442_s5 + $0x150] sm:$0xff]  ;;  %v17939_v34 = vadd.f32 %v4027_v50, %v21348_v44  ;;  %10827 = vmatprep.mubr.msk.f32.mxu1 %vm1466_vm0, %v13294_v43  ;;  %v13296_v30 = vld [vmem:[%s14450_s26 + $0x158] sm:$0xff]  ;;  %v17950_v41 = vmul.f32 %v21351_v40, %v21322_v49  ;;  %v17957_v43 = vpop.eup %12917  ;;  %vm17965_vm10 = vcmp.lt.f32.partialorder %v1241_v17, 1.0  ;;  %v13298_v0 = vld [vmem:[%s14442_s5 + $0x148] sm:$0xff] }
 0x4c2   : > { %v17921_v59 = vsub.f32 %v17917_v10, %v13293_v62  ;;  %vm17925_vm8 = vcmp.lt.f32.partialorder %v21342_v52, 1.0  ;;  %v21350_v62 = vld [vmem:[#allocation131_spill] sm:$0xff]  ;;  %v13295_v52 = vld [vmem:[%s14442_s5 + $0x158] sm:$0xff]  ;;  %v21353_v3 = vld [vmem:[#allocation168_spill] sm:$0xff]  ;;  %21355 = vst [vmem:[#allocation123_spill] sm:$0xff] %v17957_v43  ;;  %v17970_v45 = vpop.eup %12919  ;;  %vm7239_vm6 = vcmask 1043456  }
 0x4c3   : > { %21349 = vst [vmem:[#allocation96_spill] sm:$0xff] %v17939_v34  ;;  %v4028_v56 = vsub.f32 %v3596_v14, %v21350_v62  ;;  %v17946_v32 = vsub.f32 %v13295_v52, %v13296_v30  ;;  %v1242_v31 = vand.u32 2147483647, %v21353_v3  ;;  %v21354_v50 = vld [vmem:[#allocation166_spill] sm:$0xff]  ;;  %v1373_v14 = vmul.f32 %v1329_v27, %v21334_v46  ;;  %v21358_v40 = vld [vmem:[#allocation132_spill] sm:$0xff]  ;;  %21361 = vst [vmem:[#allocation63_spill] sm:$0xff] %v17970_v45  ;;  %v3602_v46 = vpop.f32.mrf.mxu1 }
 0x4c4   : > { %v1243_v44 = vand.u32 2147483647, %v21354_v50  ;;  %v10587_v62 = vadd.f32 -0.5, %v1240_v25  ;;  %v21356_v30 = vsub.f32 %v21292_v20, %v21291_v19  ;;  %v4029_v49 = vsub.f32 %v3598_v61, %v21358_v40  ;;  %v13297_v25 = vld [vmem:[%s14442_s5 + $0x130] sm:$0xff]  ;;  %v13299_v29 = vld [vmem:[%s14442_s5 + $0x140] sm:$0xff] }
 0x4c5   : > { %v1330_v63 = vmul.f32 0.5, %v21353_v3  ;;  %4988 = vmatmul.mubr.f32.gmra.mxu1 %v13297_v25  ;;  %v1244_v27 = vand.u32 2147483647, %v17921_v59  ;;  %v1331_v20 = vmul.f32 0.5, %v21354_v50  ;;  %v10588_v19 = vadd.f32 -0.5, %v1241_v17  ;;  %v21366_v45 = vld [vmem:[#allocation133_spill] sm:$0xff] }
 0x4c6   : > { %v17962_v34 = vadd.f32 %v4028_v56, %v21356_v30  ;;  %v21362_v56 = vld [vmem:[#allocation164_spill] sm:$0xff]  ;;  %v17978_v30 = vpop.eup %12921  ;;  %v21364_v40 = vsub.f32 %v21296_v24, %v21295_v47  ;;  %10828 = vmatprep.mubr.msk.f32.mxu1 %vm1466_vm0, %v13298_v0  ;;  %v1245_v25 = vand.u32 2147483647, %v17946_v32  ;;  %v21368_v2 = vld [vmem:[#allocation113_spill] sm:$0xff]  ;;  %vm17995_vm11 = vcmp.lt.f32.partialorder %v1243_v44, 1.0  ;;  %v21382_v23 = vld [vmem:[#allocation150_spill] sm:$0xff] }
 0x4c7   : > { %v1459_v61 = vsel %vm17925_vm8, %v21362_v56, %v10586_v13  ;;  %21363 = vst [vmem:[#allocation194_spill] sm:$0xff] %v17978_v30  ;;  %v21367_v17 = vld [vmem:[#allocation56_spill] sm:$0xff]  ;;  %v17993_v48 = vpop.eup %12923  ;;  %v3604_v56 = vpop.f32.mrf.mxu1  ;;  %v1332_v24 = vmul.f32 0.5, %v17921_v59  ;;  %v1519_v0 = vadd.f32 %v1518_v16, %v1517_v7  ;;  %v1375_v7 = vmul.f32 %v1331_v20, %v21354_v50 }
 0x4c8   : > { %21357 = vst [vmem:[#allocation102_spill] sm:$0xff] %v17962_v34  ;;  %v17983_v43 = vadd.f32 %v4029_v49, %v21364_v40  ;;  %v4030_v34 = vsub.f32 %v3602_v46, %v21366_v45  ;;  %v1458_v13 = vsel %vm17897_vm7, %v21368_v2, %v21367_v17  ;;  %21369 = vst [vmem:[#allocation116_spill] sm:$0xff] %v17993_v48  ;;  %v1333_v45 = vmul.f32 0.5, %v17946_v32  ;;  %v18001_v49 = vpop.eup %12925  ;;  %v21374_v2 = vld [vmem:[#allocation134_spill] sm:$0xff] }
 0x4c9   : > { %21372 = vst [vmem:[#allocation124_spill] sm:$0xff] %v18001_v49  ;;  %v21373_v46 = vsub.f32 %v21297_v39, %v21159_v54  ;;  %v4031_v4 = vsub.f32 %v3604_v56, %v21374_v2  ;;  %v1374_v17 = vmul.f32 %v1330_v63, %v21353_v3  ;;  %v1521_v48 = vsel %vm1466_vm0, %v1459_v61, 0.0  ;;  %v18011_v30 = vpop.eup %12927  ;;  %4993 = vmatmul.mubr.f32.gmra.mxu1 %v13299_v29  ;;  %v21376_v3 = vld [vmem:[#allocation171_spill] sm:$0xff] }
 0x4ca   : > { %21365 = vst [vmem:[#allocation64_spill] sm:$0xff] %v17983_v43  ;;  %v3608_v43 = vpop.f32.mrf.mxu1  ;;  %v10590_v16 = vadd.f32 -0.5, %v1243_v44  ;;  %v1461_v49 = vsel %vm17965_vm10, %v1373_v14, %v10588_v19  ;;  %v1520_v54 = vadd.f32 %v1519_v0, %v1458_v13  ;;  %v18017_v39 = vpop.eup %12929  ;;  %10829 = vmatprep.mubr.msk.f32.mxu1 %vm1466_vm0, %v13295_v52  ;;  %v10589_v56 = vadd.f32 -0.5, %v1242_v31  ;;  %v13301_v2 = vld [vmem:[%s14450_s26] sm:$0xff] }
 0x4cb   : > { %v18006_v40 = vadd.f32 %v4030_v34, %v21373_v46  ;;  %v21375_v34 = vsub.f32 %v21302_v53, %v21301_v6  ;;  %v4032_v61 = vsub.f32 %v3608_v43, %v21376_v3  ;;  %v1460_v29 = vsel %vm17929_vm9, %v17950_v41, %v10587_v62  ;;  %v21392_v3 = vld [vmem:[#allocation128_spill] sm:$0xff] }
 0x4cc   : > { %v4225_v55 = vadd.f32 0.0009, %v17716_v18  ;;  %v3610_v50 = vpop.f32.mrf.mxu1  ;;  %vm18030_vm12 = vcmp.lt.f32.partialorder %v1242_v31, 1.0  ;;  %vm18034_vm13 = vcmp.lt.f32.partialorder %v1245_v25, 1.0  ;;  %v1522_v6 = vadd.f32 %v1521_v48, %v1520_v54  ;;  %v21384_v48 = vld [vmem:[#allocation114_spill] sm:$0xff] }
 0x4cd   : > { %v18022_v63 = vadd.f32 %v4031_v4, %v21375_v34  ;;  %v21381_v52 = vsub.f32 %v21309_v57, %v21308_v35  ;;  %v4033_v41 = vsub.f32 %v3610_v50, %v21382_v23  ;;  %v1376_v18 = vmul.f32 %v1332_v24, %v17921_v59  ;;  %4998 = vmatmul.mubr.f32.gmra.mxu1 %v17917_v10  ;;  %v13300_v59 = vld [vmem:[%s14450_s26 + $0x8] sm:$0xff]  ;;  %v13302_v54 = vld [vmem:[%s14450_s26 + $0x18] sm:$0xff] }
 0x4ce   : > { %v1524_v62 = vsel %vm1466_vm0, %v1461_v49, 0.0  ;;  %v3614_v31 = vpop.f32.mrf.mxu1  ;;  %v1377_v43 = vmul.f32 %v1333_v45, %v17946_v32  ;;  %v10592_v20 = vadd.f32 -0.5, %v1245_v25  ;;  %v1463_v19 = vsel %vm17995_vm11, %v1375_v7, %v10590_v16  ;;  %10830 = vmatprep.mubr.msk.f32.mxu1 %vm1466_vm0, %v13300_v59  ;;  %v21388_v49 = vld [vmem:[#allocation60_spill] sm:$0xff]  ;;  %v21390_v7 = vld [vmem:[#allocation90_spill] sm:$0xff]  ;;  %v21391_v34 = vld [vmem:[#allocation103_spill] sm:$0xff] }
 0x4cf   : > { %v18041_v14 = vadd.f32 %v4032_v61, %v21381_v52  ;;  %v1523_v13 = vadd.f32 %v1522_v6, %v1460_v29  ;;  %v21383_v35 = vsub.f32 %v21313_v42, %v21187_v60  ;;  %v4034_v0 = vsub.f32 %v3614_v31, %v21384_v48  ;;  %v21394_v50 = vld [vmem:[#allocation176_spill] sm:$0xff]  ;;  %v21396_v31 = vld [vmem:[#allocation182_spill] sm:$0xff] }
 0x4d0   : > { %v10591_v24 = vadd.f32 -0.5, %v1244_v27  ;;  %v1462_v32 = vsel %vm18030_vm12, %v1374_v17, %v10589_v56  ;;  %v4226_v10 = vadd.f32 0.0009, %v17731_v26  ;;  %v3616_v25 = vpop.f32.mrf.mxu1  ;;  %vm18062_vm14 = vcmp.lt.f32.partialorder %v1244_v27, 1.0  ;;  %v21395_v6 = vld [vmem:[#allocation216_spill] sm:$0xff]  ;;  %v21401_v59 = vld [vmem:[#allocation70_spill] sm:$0xff] }
 0x4d1   : > { %v18053_v57 = vadd.f32 %v4033_v41, %v21383_v35  ;;  %v1525_v60 = vadd.f32 %v1524_v62, %v1523_v13  ;;  %v21387_v42 = vsub.f32 %v21314_v21, %v21193_v37  ;;  %v4035_v46 = vsub.f32 %v3616_v25, %v21388_v49  ;;  %5003 = vmatmul.mubr.f32.gmra.mxu1 %v13301_v2  ;;  %v13303_v41 = vld [vmem:[%s14450_s26 + $0x10] sm:$0xff]  ;;  %v13304_v62 = vld [vmem:[%s14450_s26 + $0x28] sm:$0xff] }
 0x4d2   : > { %v1527_v9 = vsel %vm1466_vm0, %v1463_v19, 0.0  ;;  %12935 = vrcp.f32 %v4225_v55  ;;  %v4227_v26 = vadd.f32 0.0009, %v17745_v36  ;;  %v3620_v27 = vpop.f32.mrf.mxu1  ;;  %v1465_v4 = vsel %vm18034_vm13, %v1377_v43, %v10592_v20  ;;  %10831 = vmatprep.mubr.msk.f32.mxu1 %vm1466_vm0, %v13302_v54  ;;  %v21399_v35 = vld [vmem:[#allocation117_spill] sm:$0xff]  ;;  %v21404_v25 = vld [vmem:[#allocation220_spill] sm:$0xff] }
 0x4d3   : > { %v18070_v45 = vadd.f32 %v4034_v0, %v21387_v42  ;;  %v1526_v17 = vadd.f32 %v1525_v60, %v1462_v32  ;;  %v21389_v37 = vsub.f32 %v21315_v8, %v21208_v5  ;;  %v4036_v16 = vsub.f32 %v3620_v27, %v21390_v7  ;;  %v21400_v0 = vld [vmem:[#allocation101_spill] sm:$0xff]  ;;  %v21405_v60 = vld [vmem:[#allocation187_spill] sm:$0xff] }
 0x4d4   : > { %v1464_v36 = vsel %vm18062_vm14, %v1376_v18, %v10591_v24  ;;  %v3995_v61 = vsub.f32 %v21392_v3, %v21391_v34  ;;  %12937 = vrcp.f32 %v4226_v10  ;;  %v4229_v28 = vadd.f32 0.0009, %v17784_v33  ;;  %v3622_v56 = vpop.f32.mrf.mxu1  ;;  %v21402_v24 = vld [vmem:[#allocation142_spill] sm:$0xff]  ;;  %v21403_v10 = vld [vmem:[#allocation184_spill] sm:$0xff]  ;;  %v21407_v2 = vld [vmem:[#allocation77_spill] sm:$0xff] }
 0x4d5   : > { %v18082_v21 = vadd.f32 %v4035_v46, %v21389_v37  ;;  %v1528_v29 = vadd.f32 %v1527_v9, %v1526_v17  ;;  %v4230_v5 = vadd.f32 0.0009, %v17803_v38  ;;  %v21393_v8 = vsub.f32 %v21321_v12, %v21213_v1  ;;  %5008 = vmatmul.mubr.f32.gmra.mxu1 %v13303_v41  ;;  %v13305_v46 = vld [vmem:[%s14450_s26 + $0x20] sm:$0xff]  ;;  %v21406_v9 = vld [vmem:[#allocation189_spill] sm:$0xff]  ;;  %v21419_v41 = vld [vmem:[#allocation64_spill] sm:$0xff] }
 0x4d6   : > { %v4037_v44 = vsub.f32 %v3622_v56, %v21394_v50  ;;  %v1530_v53 = vsel %vm1466_vm0, %v1465_v4, 0.0  ;;  %v3996_v52 = vsub.f32 %v21395_v6, %v21226_v58  ;;  %12939 = vrcp.f32 %v4227_v26  ;;  %v3626_v23 = vpop.f32.mrf.mxu1  ;;  %10832 = vmatprep.mubr.msk.f32.mxu1 %vm1466_vm0, %v13304_v62  ;;  %v21397_v58 = vld [vmem:[#allocation218_spill] sm:$0xff]  ;;  %v21409_v7 = vld [vmem:[#allocation107_spill] sm:$0xff] }
 0x4d7   : > { %v18096_v55 = vadd.f32 %v4036_v16, %v21393_v8  ;;  %v4231_v33 = vadd.f32 0.0009, %v17815_v51  ;;  %v1529_v18 = vadd.f32 %v1528_v29, %v1464_v36  ;;  %12941 = vrcp.f32 %v4228_v15  ;;  %v21398_v51 = vld [vmem:[#allocation59_spill] sm:$0xff]  ;;  %v13306_v17 = vld [vmem:[%s14450_s26 + $0x38] sm:$0xff]  ;;  %v21411_v36 = vld [vmem:[#allocation96_spill] sm:$0xff] }
 0x4d8   : > { %v4232_v38 = vadd.f32 0.0009, %v17828_v22  ;;  %v18105_v1 = vadd.f32 %v4037_v44, %v3995_v61  ;;  %v4038_v12 = vsub.f32 %v3626_v23, %v17608_v11  ;;  %v3997_v43 = vsub.f32 %v21397_v58, %v21396_v31  ;;  %v3628_v19 = vpop.f32.mrf.mxu1  ;;  %v21408_v15 = vld [vmem:[#allocation55_spill] sm:$0xff]  ;;  %v21410_v16 = vld [vmem:[#allocation222_spill] sm:$0xff]  ;;  %v18137_v61 = vpop.eup %12931 }
 0x4d9   : > { %12943 = vrcp.f32 %v4229_v28  ;;  %v4233_v20 = vadd.f32 0.0009, %v21398_v51  ;;  %v1531_v13 = vadd.f32 %v1530_v53, %v1529_v18  ;;  %v4234_v22 = vadd.f32 0.0009, %v21399_v35  ;;  %5013 = vmatmul.mubr.f32.gmra.mxu1 %v13305_v46  ;;  %v21412_v28 = vld [vmem:[#allocation102_spill] sm:$0xff]  ;;  %v18143_v50 = vpop.eup %12933  ;;  %v21415_v53 = vld [vmem:[#allocation147_spill] sm:$0xff] }
 0x4da   : > { %12945 = vrcp.f32 %v4230_v5  ;;  %v18114_v48 = vadd.f32 %v4038_v12, %v3996_v52  ;;  %v4039_v11 = vsub.f32 %v3628_v19, %v21400_v0  ;;  %v18119_v32 = vmul.f32 %v21402_v24, %v21401_v59  ;;  %v3632_v49 = vpop.f32.mrf.mxu1  ;;  %10833 = vmatprep.mubr.msk.f32.mxu1 %vm1466_vm0, %v13306_v17  ;;  %v21413_v5 = vld [vmem:[#allocation177_spill] sm:$0xff]  ;;  %v21414_v44 = vld [vmem:[#allocation78_spill] sm:$0xff]  ;;  %v21417_v52 = vld [vmem:[#allocation108_spill] sm:$0xff] }
 0x4db   : > { %v3998_v47 = vsub.f32 %v21404_v25, %v21403_v10  ;;  %12947 = vrcp.f32 %v4231_v33  ;;  %v4235_v42 = vadd.f32 0.0009, %v21405_v60  ;;  %1532 = vadd.xlane.f32.xlu0 %v1531_v13  ;;  %v4236_v26 = vadd.f32 0.0009, %v21406_v9  ;;  %v21418_v33 = vld [vmem:[#allocation224_spill] sm:$0xff]  ;;  %v21421_v19 = vld [vmem:[#allocation94_spill] sm:$0xff] }
 0x4dc   : > { %12949 = vrcp.f32 %v4232_v38  ;;  %v18126_v27 = vadd.f32 %v4039_v11, %v3997_v43  ;;  %v4040_v4 = vsub.f32 %v3632_v49, %v21407_v2  ;;  %v18132_v37 = vadd.f32 0.0001, %v21408_v15  ;;  %v3634_v3 = vpop.f32.mrf.mxu1  ;;  %v13307_v12 = vld [vmem:[%s14450_s26 + $0x30] sm:$0xff]  ;;  %v21425_v0 = vld [vmem:[#allocation135_spill] sm:$0xff] }
 0x4dd   : > { %v3999_v54 = vsub.f32 %v21410_v16, %v21409_v7  ;;  %12951 = vrcp.f32 %v4233_v20  ;;  %v4237_v34 = vadd.f32 0.0009, %v21411_v36  ;;  %v4238_v56 = vadd.f32 0.0009, %v21412_v28  ;;  %5018 = vmatmul.mubr.f32.gmra.mxu1 %v13307_v12  ;;  %v21420_v43 = vld [vmem:[#allocation157_spill] sm:$0xff]  ;;  %v13308_v20 = vld [vmem:[%s14450_s26 + $0x48] sm:$0xff] }
 0x4de   : > { %12953 = vrcp.f32 %v4234_v22  ;;  %v18140_v29 = vadd.f32 %v4040_v4, %v3998_v47  ;;  %v4041_v8 = vsub.f32 %v3634_v3, %v21413_v5  ;;  %v18147_v6 = vmul.f32 %v21415_v53, %v21414_v44  ;;  %v3638_v38 = vpop.f32.mrf.mxu1  ;;  %10834 = vmatprep.mubr.msk.f32.mxu1 %vm1466_vm0, %v13308_v20  ;;  %v21422_v13 = vld [vmem:[#allocation148_spill] sm:$0xff]  ;;  %v21424_v22 = vld [vmem:[#allocation195_spill] sm:$0xff]  ;;  %v21426_v47 = vld [vmem:[#allocation178_spill] sm:$0xff] }
 0x4df   : > { %v4000_v23 = vsub.f32 %v21418_v33, %v21417_v52  ;;  %12955 = vrcp.f32 %v4235_v42  ;;  %v4239_v18 = vadd.f32 0.0009, %v21419_v41  ;;  %v18153_v62 = vpop.eup %12935  ;;  %v4240_v31 = vadd.f32 0.0009, %v18006_v40  ;;  %v21427_v42 = vld [vmem:[#allocation92_spill] sm:$0xff]  ;;  %v21428_v46 = vld [vmem:[#allocation81_spill] sm:$0xff] }
 0x4e0   : > { %21416 = vst [vmem:[#allocation198_spill] sm:$0xff] %v18147_v6  ;;  %12957 = vrcp.f32 %v4236_v26  ;;  %v18156_v58 = vadd.f32 %v4041_v8, %v3999_v54  ;;  %v4042_v51 = vsub.f32 %v3638_v38, %v21420_v43  ;;  %v18163_v35 = vmul.f32 %v21422_v13, %v21421_v19  ;;  %v3640_v24 = vpop.f32.mrf.mxu1  ;;  %v21429_v9 = vld [vmem:[#allocation149_spill] sm:$0xff]  ;;  %v13309_v2 = vld [vmem:[%s14450_s26 + $0x40] sm:$0xff]  ;;  %v13312_v19 = vld [vmem:[%s14450_s26 + $0x68] sm:$0xff] }
 0x4e1   : > { %v4001_v11 = vsub.f32 %v21425_v0, %v21424_v22  ;;  %12959 = vrcp.f32 %v4237_v34  ;;  %v4241_v59 = vadd.f32 0.0009, %v18022_v63  ;;  %v18168_v40 = vpop.eup %12937  ;;  %v4242_v10 = vadd.f32 0.0009, %v18041_v14  ;;  %5023 = vmatmul.mubr.f32.gmra.mxu1 %v13309_v2  ;;  %v21431_v17 = vld [vmem:[#allocation53_spill] sm:$0xff]  ;;  %v21432_v15 = vld [vmem:[#allocation143_spill] sm:$0xff] }
 0x4e2   : > { %21423 = vst [vmem:[#allocation169_spill] sm:$0xff] %v18163_v35  ;;  %12961 = vrcp.f32 %v4238_v56  ;;  %v18171_v25 = vadd.f32 %v4042_v51, %v4000_v23  ;;  %v4043_v60 = vsub.f32 %v3640_v24, %v21426_v47  ;;  %v4376_v49 = vmul.f32 2.0, %v21427_v42  ;;  %v13310_v54 = vld [vmem:[%s14450_s26 + $0x58] sm:$0xff]  ;;  %v21433_v34 = vld [vmem:[#allocation80_spill] sm:$0xff]  ;;  %v21434_v5 = vld [vmem:[#allocation139_spill] sm:$0xff]  ;;  %v3709_v41 = vpop.f32.mrf.mxu1 }
 0x4e3   : > { %v18177_v26 = vmul.f32 %v21429_v9, %v21428_v46  ;;  %12963 = vrcp.f32 %v4239_v18  ;;  %v4243_v63 = vadd.f32 0.0009, %v18053_v57  ;;  %v18181_v4 = vpop.eup %12939  ;;  %v18185_v14 = vmul.f32 %v21432_v15, %v21431_v17  ;;  %10835 = vmatprep.mubr.msk.f32.mxu1 %vm1466_vm0, %v13310_v54  ;;  %v13311_v18 = vld [vmem:[%s14450_s26 + $0x50] sm:$0xff]  ;;  %v21436_v12 = vld [vmem:[#allocation175_spill] sm:$0xff] }
 0x4e4   : > { %12965 = vrcp.f32 %v4240_v31  ;;  %v4244_v7 = vadd.f32 0.0009, %v18070_v45  ;;  %v18188_v16 = vadd.f32 %v4043_v60, %v4001_v11  ;;  %v18192_v36 = vpop.eup %12941  ;;  %v18195_v57 = vadd.f32 0.0001, %v21433_v34  ;;  %v21435_v45 = vld [vmem:[#allocation144_spill] sm:$0xff]  ;;  %v21437_v31 = vld [vmem:[#allocation145_spill] sm:$0xff]  ;;  %v3711_v24 = vpop.f32.mrf.mxu1 }
 0x4e5   : > { %21430 = vst [vmem:[#allocation119_spill] sm:$0xff] %v18177_v26  ;;  %v4377_v3 = vmul.f32 2.0, %v18147_v6  ;;  %12967 = vrcp.f32 %v4241_v59  ;;  %v4245_v28 = vadd.f32 0.0009, %v18082_v21  ;;  %v18203_v8 = vmul.f32 %v21435_v45, %v21434_v5  ;;  %5028 = vmatmul.mubr.f32.gmra.mxu1 %v13311_v18  ;;  %v21438_v51 = vld [vmem:[#allocation179_spill] sm:$0xff]  ;;  %v21440_v22 = vld [vmem:[#allocation76_spill] sm:$0xff] }
 0x4e6   : > { %v18199_v56 = vpop.eup %12943  ;;  %v4378_v44 = vmul.f32 2.0, %v18163_v35  ;;  %12969 = vrcp.f32 %v4242_v10  ;;  %v4246_v53 = vadd.f32 0.0009, %v18096_v55  ;;  %v18209_v33 = vadd.f32 0.0001, %v4376_v49  ;;  %10836 = vmatprep.mubr.msk.f32.mxu1 %vm1466_vm0, %v13312_v19  ;;  %v21443_v60 = vld [vmem:[#allocation180_spill] sm:$0xff]  ;;  %v3715_v15 = vpop.f32.mrf.mxu1 }
 0x4e7   : > { %v18207_v52 = vpop.eup %12945  ;;  %v4379_v23 = vmul.f32 2.0, %v18177_v26  ;;  %12971 = vrcp.f32 %v4243_v63  ;;  %v4247_v21 = vadd.f32 0.0009, %v18105_v1  ;;  %v18218_v43 = vmul.f32 %v21437_v31, %v21436_v12  ;;  %v21439_v1 = vld [vmem:[#allocation91_spill] sm:$0xff]  ;;  %v21444_v9 = vld [vmem:[#allocation141_spill] sm:$0xff] }
 0x4e8   : > { %v18214_v38 = vpop.eup %12947  ;;  %12973 = vrcp.f32 %v4244_v7  ;;  %v4248_v55 = vadd.f32 0.0009, %v18114_v48  ;;  %v4044_v20 = vsub.f32 %v3709_v41, %v21438_v51  ;;  %v18228_v0 = vmul.f32 %v21440_v22, %v21439_v1  ;;  %v21445_v63 = vld [vmem:[#allocation93_spill] sm:$0xff]  ;;  %v13313_v7 = vld [vmem:[%s14450_s26 + $0x60] sm:$0xff]  ;;  %v21451_v41 = vld [vmem:[#allocation172_spill] sm:$0xff]  ;;  %v3717_v31 = vpop.f32.mrf.mxu1 }
 0x4e9   : > { %v18224_v13 = vpop.eup %12949  ;;  %v18230_v11 = vadd.f32 0.0001, %v4377_v3  ;;  %12975 = vrcp.f32 %v4245_v28  ;;  %v4249_v59 = vadd.f32 0.0009, %v18126_v27  ;;  %v18235_v48 = vadd.f32 0.0001, %v4378_v44  ;;  %5033 = vmatmul.mubr.f32.gmra.mxu1 %v13313_v7 }
 0x4ea   : > { %v18233_v10 = vpop.eup %12951  ;;  %12977 = vrcp.f32 %v4246_v53  ;;  %v4086_v47 = vmul.f32 2.0, %v4044_v20  ;;  %v4045_v49 = vsub.f32 %v3711_v24, %v21443_v60  ;;  %v18242_v2 = vmul.f32 %v21445_v63, %v21444_v9  ;;  %v21447_v28 = vld [vmem:[#allocation183_spill] sm:$0xff]  ;;  %v13314_v45 = vld [vmem:[%s14450_s26 + $0x78] sm:$0xff]  ;;  %v21454_v60 = vld [vmem:[#allocation100_spill] sm:$0xff] }
 0x4eb   : > { %21441 = vst [vmem:[#allocation58_spill] sm:$0xff] %v18230_v11  ;;  %21442 = vst [vmem:[#allocation170_spill] sm:$0xff] %v18235_v48  ;;  %v18238_v46 = vpop.eup %12953  ;;  %v18244_v17 = vadd.f32 0.0001, %v4379_v23  ;;  %12979 = vrcp.f32 %v4247_v21  ;;  %v4250_v27 = vadd.f32 0.0009, %v18140_v29  ;;  %v4046_v5 = vsub.f32 %v3715_v15, %v21447_v28  ;;  %10837 = vmatprep.mubr.msk.f32.mxu1 %vm1466_vm0, %v13314_v45 }
 0x4ec   : > { %v18248_v54 = vpop.eup %12955  ;;  %12981 = vrcp.f32 %v4248_v55  ;;  %v4128_v34 = vadd.f32 0.0009, %v4086_v47  ;;  %v4087_v3 = vmul.f32 2.0, %v4045_v49  ;;  %v21448_v53 = vld [vmem:[#allocation158_spill] sm:$0xff]  ;;  %v21450_v29 = vld [vmem:[#allocation115_spill] sm:$0xff]  ;;  %v21452_v51 = vld [vmem:[#allocation61_spill] sm:$0xff]  ;;  %v18272_v49 = vmul.f32 %v21454_v60, %v18132_v37 }
 0x4ed   : > { %21446 = vst [vmem:[#allocation201_spill] sm:$0xff] %v18244_v17  ;;  %v18253_v44 = vpop.eup %12957  ;;  %v21449_v23 = vld [vmem:[#allocation118_spill] sm:$0xff]  ;;  %v18261_v18 = vmul.f32 %v21451_v41, %v21450_v29  ;;  %12983 = vrcp.f32 %v4249_v59  ;;  %v4251_v12 = vadd.f32 0.0009, %v18156_v58  ;;  %v4088_v1 = vmul.f32 2.0, %v4046_v5  ;;  %v21453_v22 = vld [vmem:[#allocation185_spill] sm:$0xff]  ;;  %v3721_v58 = vpop.f32.mrf.mxu1 }
 0x4ee   : > { %v18257_v21 = vmul.f32 %v21449_v23, %v21448_v53  ;;  %v18264_v55 = vpop.eup %12959  ;;  %v4255_v20 = vmul.f32 %v21452_v51, %v4128_v34  ;;  %v4129_v19 = vadd.f32 0.0009, %v4087_v3  ;;  %v4047_v24 = vsub.f32 %v3717_v31, %v21453_v22  ;;  %21455 = vst [vmem:[#allocation204_spill] sm:$0xff] %v18272_v49  ;;  %v21456_v59 = vld [vmem:[#allocation121_spill] sm:$0xff]  ;;  %v21458_v7 = vld [vmem:[#allocation199_spill] sm:$0xff]  ;;  %v21462_v29 = vld [vmem:[#allocation186_spill] sm:$0xff] }
 0x4ef   : > { %v18268_v47 = vpop.eup %12961  ;;  %v18276_v9 = vmul.f32 %v21456_v59, %v18195_v57  ;;  %12985 = vrcp.f32 %v4250_v27  ;;  %v13315_v63 = vld [vmem:[%s14450_s26 + $0x70] sm:$0xff]  ;;  %v21459_v3 = vld [vmem:[#allocation111_spill] sm:$0xff]  ;;  %v4130_v5 = vadd.f32 0.0009, %v4088_v1  ;;  %v4252_v23 = vadd.f32 0.0009, %v18171_v25  ;;  %v3723_v31 = vpop.f32.mrf.mxu1 }
 0x4f0   : > { %5038 = vmatmul.mubr.f32.gmra.mxu1 %v13315_v63  ;;  %v18279_v15 = vpop.eup %12963  ;;  %v4590_v34 = vmul.f32 %v21458_v7, %v4255_v20  ;;  %v4257_v28 = vmul.f32 %v21459_v3, %v4129_v19  ;;  %v4089_v45 = vmul.f32 2.0, %v4047_v24  ;;  %v13316_v53 = vld [vmem:[%s14450_s26 + $0x88] sm:$0xff]  ;;  %12987 = vrcp.f32 %v4251_v12  ;;  %v13318_v48 = vld [vmem:[%s14450_s26 + $0x98] sm:$0xff] }
 0x4f1   : > { %21457 = vst [vmem:[#allocation68_spill] sm:$0xff] %v18276_v9  ;;  %10838 = vmatprep.mubr.msk.f32.mxu1 %vm1466_vm0, %v13316_v53  ;;  %v18285_v37 = vpop.eup %12965  ;;  %v21460_v57 = vld [vmem:[#allocation79_spill] sm:$0xff]  ;;  %v4048_v41 = vsub.f32 %v3721_v58, %v21462_v29  ;;  %v21463_v19 = vld [vmem:[#allocation120_spill] sm:$0xff]  ;;  %v3727_v3 = vpop.f32.mrf.mxu1  ;;  %v21466_v29 = vld [vmem:[#allocation202_spill] sm:$0xff]  ;;  %12989 = vrcp.f32 %v4252_v23  ;;  %vm7272_vm7 = vcmask 359424   ;;  %vm8170_vm8 = vcmask 277504  }
 0x4f2   : > { %v18289_v27 = vmul.f32 %v21460_v57, %v18209_v33  ;;  %v18293_v51 = vpop.eup %12967  ;;  %v4591_v1 = vmul.f32 %v21463_v19, %v4257_v28  ;;  %v4710_v22 = vsel %vm4632_vm15, %v4257_v28, 0.0  ;;  %v21464_v24 = vld [vmem:[#allocation152_spill] sm:$0xff]  ;;  %v4131_v59 = vadd.f32 0.0009, %v4089_v45  ;;  %v13317_v53 = vld [vmem:[%s14450_s26 + $0x80] sm:$0xff] }
 0x4f3   : > { %v4259_v60 = vmul.f32 %v21464_v24, %v4130_v5  ;;  %v18298_v63 = vpop.eup %12969  ;;  %v18301_v33 = vadd.f32 0.0009, %v18188_v16  ;;  %v4711_v12 = vadd.f32 %v4710_v22, %v4255_v20  ;;  %v4090_v25 = vmul.f32 2.0, %v4048_v41  ;;  %v21465_v7 = vld [vmem:[#allocation188_spill] sm:$0xff]  ;;  %v21468_v24 = vld [vmem:[#allocation190_spill] sm:$0xff]  ;;  %v21471_v11 = vld [vmem:[#allocation123_spill] sm:$0xff] }
 0x4f4   : > { %21461 = vst [vmem:[#allocation173_spill] sm:$0xff] %v18289_v27  ;;  %v4049_v58 = vsub.f32 %v3723_v31, %v21465_v7  ;;  %5043 = vmatmul.mubr.f32.gmra.mxu1 %v13317_v53  ;;  %v18305_v57 = vpop.eup %12971  ;;  %v4633_v28 = vsel %vm4632_vm15, %v4591_v1, 0.0  ;;  %v21467_v5 = vld [vmem:[#allocation112_spill] sm:$0xff]  ;;  %v4050_v17 = vsub.f32 %v3727_v3, %v21468_v24  ;;  %v3729_v7 = vpop.f32.mrf.mxu1  ;;  %v21469_v1 = vld [vmem:[#allocation205_spill] sm:$0xff]  ;;  %v21470_v3 = vld [vmem:[#allocation191_spill] sm:$0xff]  ;;  %vm8178_vm9 = vcmask 271360  }
 0x4f5   : > { %v4592_v19 = vmul.f32 %v21466_v29, %v4259_v60  ;;  %v4261_v45 = vmul.f32 %v21467_v5, %v4131_v59  ;;  %10839 = vmatprep.mubr.msk.f32.mxu1 %vm1466_vm0, %v13318_v48  ;;  %v18313_v16 = vpop.eup %12973  ;;  %v4634_v20 = vadd.f32 %v4633_v28, %v4590_v34  ;;  %v4712_v41 = vadd.f32 %v4711_v12, %v4259_v60  ;;  %v21472_v9 = vld [vmem:[#allocation192_spill] sm:$0xff] }
 0x4f6   : > { %v4132_v31 = vadd.f32 0.0009, %v4090_v25  ;;  %v4091_v22 = vmul.f32 2.0, %v4049_v58  ;;  %v18315_v53 = vpop.eup %12975  ;;  %v4092_v59 = vmul.f32 2.0, %v4050_v17  ;;  %v4051_v5 = vsub.f32 %v3729_v7, %v21470_v3  ;;  %v3733_v12 = vpop.f32.mrf.mxu1  ;;  %v13319_v25 = vld [vmem:[%s14450_s26 + $0x90] sm:$0xff]  ;;  %v13320_v35 = vld [vmem:[%s14450_s26 + $0xa8] sm:$0xff] }
 0x4f7   : > { %v4593_v27 = vmul.f32 %v21469_v1, %v4261_v45  ;;  %v4713_v29 = vsel %vm4632_vm15, %v4261_v45, 0.0  ;;  %v18320_v24 = vpop.eup %12977  ;;  %v4635_v48 = vadd.f32 %v4634_v20, %v4592_v19  ;;  %v4052_v17 = vsub.f32 %v3733_v12, %v21472_v9  ;;  %v21473_v19 = vld [vmem:[#allocation208_spill] sm:$0xff]  ;;  %v21477_v12 = vld [vmem:[#allocation193_spill] sm:$0xff] }
 0x4f8   : > { %v4263_v34 = vmul.f32 %v21471_v11, %v4132_v31  ;;  %v4714_v28 = vadd.f32 %v4713_v29, %v4712_v41  ;;  %v4133_v60 = vadd.f32 0.0009, %v4091_v22  ;;  %5048 = vmatmul.mubr.f32.gmra.mxu1 %v13319_v25  ;;  %v18324_v58 = vpop.eup %12979  ;;  %v4134_v26 = vadd.f32 0.0009, %v4092_v59  ;;  %v21474_v31 = vld [vmem:[#allocation63_spill] sm:$0xff]  ;;  %v3735_v29 = vpop.f32.mrf.mxu1  ;;  %v21478_v49 = vld [vmem:[#allocation136_spill] sm:$0xff] }
 0x4f9   : > { %v4636_v1 = vsel %vm4632_vm15, %v4593_v27, 0.0  ;;  %v4093_v45 = vmul.f32 2.0, %v4051_v5  ;;  %10840 = vmatprep.mubr.msk.f32.mxu1 %vm1466_vm0, %v13320_v35  ;;  %v18330_v7 = vpop.eup %12981  ;;  %v21476_v27 = vld [vmem:[#allocation194_spill] sm:$0xff]  ;;  %v4094_v9 = vmul.f32 2.0, %v4052_v17  ;;  %v4053_v25 = vsub.f32 %v3735_v29, %v21477_v12 }
 0x4fa   : > { %v4594_v11 = vmul.f32 %v21473_v19, %v4263_v34  ;;  %v4637_v20 = vadd.f32 %v4636_v1, %v4635_v48  ;;  %v4715_v41 = vadd.f32 %v4714_v28, %v4263_v34  ;;  %v4265_v22 = vmul.f32 %v21474_v31, %v4133_v60  ;;  %v18334_v3 = vpop.eup %12983  ;;  %v3739_v48 = vpop.f32.mrf.mxu1  ;;  %v13321_v34 = vld [vmem:[%s14450_s26 + $0xa0] sm:$0xff]  ;;  %v13322_v17 = vld [vmem:[%s14450_s26 + $0xb8] sm:$0xff] }
 0x4fb   : > { %21475 = vst [vmem:[#allocation207_spill] sm:$0xff] %v18334_v3  ;;  %v4267_v59 = vmul.f32 %v21476_v27, %v4134_v26  ;;  %v4135_v5 = vadd.f32 0.0009, %v4093_v45  ;;  %v21480_v60 = vld [vmem:[#allocation66_spill] sm:$0xff]  ;;  %v21481_v26 = vld [vmem:[#allocation116_spill] sm:$0xff]  ;;  %12991 = vrcp.f32 %v18301_v33  ;;  %v4095_v23 = vmul.f32 2.0, %v4053_v25 }
 0x4fc   : > { %v4638_v35 = vadd.f32 %v4637_v20, %v4594_v11  ;;  %v4595_v6 = vmul.f32 %v21478_v49, %v4265_v22  ;;  %v4716_v19 = vsel %vm4632_vm15, %v4265_v22, 0.0  ;;  %5053 = vmatmul.mubr.f32.gmra.mxu1 %v13321_v34  ;;  %v18341_v28 = vpop.eup %12985  ;;  %v4136_v45 = vadd.f32 0.0009, %v4094_v9  ;;  %v21482_v11 = vld [vmem:[#allocation196_spill] sm:$0xff]  ;;  %v3741_v22 = vpop.f32.mrf.mxu1  ;;  %v21486_v33 = vld [vmem:[#allocation197_spill] sm:$0xff] }
 0x4fd   : > { %21479 = vst [vmem:[#allocation106_spill] sm:$0xff] %v18341_v28  ;;  %v4596_v1 = vmul.f32 %v21480_v60, %v4267_v59  ;;  %v4717_v31 = vadd.f32 %v4716_v19, %v4715_v41  ;;  %v4269_v27 = vmul.f32 %v21481_v26, %v4135_v5  ;;  %10841 = vmatprep.mubr.msk.f32.mxu1 %vm1466_vm0, %v13322_v17  ;;  %v18350_v29 = vpop.eup %12987  ;;  %v21484_v19 = vld [vmem:[#allocation211_spill] sm:$0xff]  ;;  %v21485_v34 = vld [vmem:[#allocation124_spill] sm:$0xff]  ;;  %v4137_v26 = vadd.f32 0.0009, %v4095_v23 }
 0x4fe   : > { %v4639_v49 = vsel %vm4632_vm15, %v4595_v6, 0.0  ;;  %v4054_v20 = vsub.f32 %v3739_v48, %v21482_v11  ;;  %21483 = vst [vmem:[#allocation155_spill] sm:$0xff] %v18350_v29  ;;  %v4271_v60 = vmul.f32 %v21485_v34, %v4136_v45  ;;  %v4055_v28 = vsub.f32 %v3741_v22, %v21486_v33  ;;  %v3745_v6 = vpop.f32.mrf.mxu1  ;;  %v13323_v25 = vld [vmem:[%s14450_s26 + $0xb0] sm:$0xff] }
 0x4ff   : > { %v4640_v12 = vadd.f32 %v4639_v49, %v4638_v35  ;;  %v4718_v41 = vadd.f32 %v4717_v31, %v4267_v59  ;;  %v4597_v5 = vmul.f32 %v21484_v19, %v4269_v27  ;;  %v4719_v9 = vsel %vm4632_vm15, %v4269_v27, 0.0  ;;  %v21487_v3 = vld [vmem:[#allocation200_spill] sm:$0xff] }
 0x500   : > { %v4096_v17 = vmul.f32 2.0, %v4054_v20  ;;  %5058 = vmatmul.mubr.f32.gmra.mxu1 %v13323_v25  ;;  %v4056_v35 = vsub.f32 %v3745_v6, %v21487_v3  ;;  %v13324_v59 = vld [vmem:[%s14450_s26 + $0xc8] sm:$0xff]  ;;  %v4273_v45 = vmul.f32 %v18011_v30, %v4137_v26  ;;  %v4097_v23 = vmul.f32 2.0, %v4055_v28  ;;  %v3747_v20 = vpop.f32.mrf.mxu1  ;;  %v13325_v25 = vld [vmem:[%s14450_s26 + $0xc0] sm:$0xff] }
 0x501   : > { %v4641_v48 = vadd.f32 %v4640_v12, %v4596_v1  ;;  %v4642_v11 = vsel %vm4632_vm15, %v4597_v5, 0.0  ;;  %v4720_v29 = vadd.f32 %v4719_v9, %v4718_v41  ;;  %10842 = vmatprep.mubr.msk.f32.mxu1 %vm1466_vm0, %v13324_v59  ;;  %v21488_v31 = vld [vmem:[#allocation212_spill] sm:$0xff]  ;;  %v21489_v12 = vld [vmem:[#allocation203_spill] sm:$0xff]  ;;  %v21490_v41 = vld [vmem:[#allocation214_spill] sm:$0xff]  ;;  %vm8587_vm10 = vcmask 179200  }
 0x502   : > { %v4598_v27 = vmul.f32 %v21488_v31, %v4271_v60  ;;  %v4138_v49 = vadd.f32 0.0009, %v4096_v17  ;;  %v4098_v1 = vmul.f32 2.0, %v4056_v35  ;;  %v4057_v5 = vsub.f32 %v3747_v20, %v21489_v12  ;;  %v3751_v6 = vpop.f32.mrf.mxu1  ;;  %v13326_v59 = vld [vmem:[%s14450_s26 + $0xd8] sm:$0xff] }
 0x503   : > { %v4643_v22 = vadd.f32 %v4642_v11, %v4641_v48  ;;  %v4721_v19 = vadd.f32 %v4720_v29, %v4271_v60  ;;  %v4599_v9 = vmul.f32 %v21490_v41, %v4273_v45  ;;  %v4722_v3 = vsel %vm4632_vm15, %v4273_v45, 0.0  ;;  %v21491_v60 = vld [vmem:[#allocation215_spill] sm:$0xff]  ;;  %v21492_v35 = vld [vmem:[#allocation206_spill] sm:$0xff]  ;;  %v21493_v20 = vld [vmem:[#allocation217_spill] sm:$0xff] }
 0x504   : > { %v4275_v34 = vmul.f32 %v18017_v39, %v4138_v49  ;;  %v4139_v33 = vadd.f32 0.0009, %v4097_v23  ;;  %5063 = vmatmul.mubr.f32.gmra.mxu1 %v13325_v25  ;;  %v4140_v28 = vadd.f32 0.0009, %v4098_v1  ;;  %v4099_v17 = vmul.f32 2.0, %v4057_v5  ;;  %v3753_v31 = vpop.f32.mrf.mxu1  ;;  %v21494_v12 = vld [vmem:[#allocation65_spill] sm:$0xff] }
 0x505   : > { %v4644_v30 = vadd.f32 %v4643_v22, %v4598_v27  ;;  %v4723_v26 = vadd.f32 %v4722_v3, %v4721_v19  ;;  %10843 = vmatprep.mubr.msk.f32.mxu1 %vm1466_vm0, %v13326_v59  ;;  %v4645_v29 = vsel %vm4632_vm15, %v4599_v9, 0.0  ;;  %v4058_v39 = vsub.f32 %v3751_v6, %v21492_v35  ;;  %v13327_v9 = vld [vmem:[%s14450_s26 + $0xd0] sm:$0xff] }
 0x506   : > { %v4600_v48 = vmul.f32 %v21491_v60, %v4275_v34  ;;  %v4277_v11 = vmul.f32 %v18137_v61, %v4139_v33  ;;  %v4279_v27 = vmul.f32 %v18143_v50, %v4140_v28  ;;  %v4141_v23 = vadd.f32 0.0009, %v4099_v17  ;;  %v3757_v41 = vpop.f32.mrf.mxu1  ;;  %v18379_v61 = vpop.eup %12989  ;;  %v21495_v33 = vld [vmem:[#allocation219_spill] sm:$0xff]  ;;  %v21496_v17 = vld [vmem:[#allocation125_spill] sm:$0xff] }
 0x507   : > { %v4646_v45 = vadd.f32 %v4645_v29, %v4644_v30  ;;  %v4724_v49 = vadd.f32 %v4723_v26, %v4275_v34  ;;  %v4100_v1 = vmul.f32 2.0, %v4058_v39  ;;  %v4059_v5 = vsub.f32 %v3753_v31, %v21494_v12  ;;  %v13328_v50 = vld [vmem:[%s14450_s26 + $0xe8] sm:$0xff]  ;;  %v21497_v35 = vld [vmem:[#allocation221_spill] sm:$0xff] }
 0x508   : > { %v4601_v22 = vmul.f32 %v21493_v20, %v4277_v11  ;;  %v4725_v19 = vsel %vm4632_vm15, %v4277_v11, 0.0  ;;  %5068 = vmatmul.mubr.f32.gmra.mxu1 %v13327_v9  ;;  %v4602_v6 = vmul.f32 %v21495_v33, %v4279_v27  ;;  %v4281_v34 = vmul.f32 %v18153_v62, %v4141_v23  ;;  %v3759_v29 = vpop.f32.mrf.mxu1  ;;  %v18387_v60 = vpop.eup %12991  ;;  %v21498_v23 = vld [vmem:[#allocation67_spill] sm:$0xff] }
 0x509   : > { %v4647_v3 = vadd.f32 %v4646_v45, %v4600_v48  ;;  %v4726_v25 = vadd.f32 %v4725_v19, %v4724_v49  ;;  %10844 = vmatprep.mubr.msk.f32.mxu1 %vm1466_vm0, %v13328_v50  ;;  %v4142_v26 = vadd.f32 0.0009, %v4100_v1  ;;  %v4101_v28 = vmul.f32 2.0, %v4059_v5  ;;  %v13329_v19 = vld [vmem:[%s14450_s26 + $0xe0] sm:$0xff] }
 0x50a   : > { %v4648_v30 = vsel %vm4632_vm15, %v4601_v22, 0.0  ;;  %v4060_v59 = vsub.f32 %v3757_v41, %v21496_v17  ;;  %v4603_v39 = vmul.f32 %v21497_v35, %v4281_v34  ;;  %v4728_v62 = vsel %vm4632_vm15, %v4281_v34, 0.0  ;;  %v3763_v22 = vpop.f32.mrf.mxu1  ;;  %v21499_v41 = vld [vmem:[#allocation140_spill] sm:$0xff] }
 0x50b   : > { %v4649_v48 = vadd.f32 %v4648_v30, %v4647_v3  ;;  %v4727_v11 = vadd.f32 %v4726_v25, %v4279_v27  ;;  %v4283_v31 = vmul.f32 %v18168_v40, %v4142_v26  ;;  %v4143_v45 = vadd.f32 0.0009, %v4101_v28  ;;  %v13330_v27 = vld [vmem:[%s14450_s26 + $0xf8] sm:$0xff]  ;;  %v21500_v3 = vld [vmem:[#allocation72_spill] sm:$0xff] }
 0x50c   : > { %v4102_v49 = vmul.f32 2.0, %v4060_v59  ;;  %v4061_v20 = vsub.f32 %v3759_v29, %v21498_v23  ;;  %5073 = vmatmul.mubr.f32.gmra.mxu1 %v13329_v19  ;;  %v4651_v12 = vsel %vm4632_vm15, %v4603_v39, 0.0  ;;  %v4062_v9 = vsub.f32 %v3763_v22, %v21499_v41  ;;  %v3765_v50 = vpop.f32.mrf.mxu1  ;;  %v21501_v28 = vld [vmem:[#allocation69_spill] sm:$0xff]  ;;  %v21502_v59 = vld [vmem:[#allocation223_spill] sm:$0xff] }
 0x50d   : > { %v4650_v1 = vadd.f32 %v4649_v48, %v4602_v6  ;;  %v4729_v5 = vadd.f32 %v4728_v62, %v4727_v11  ;;  %10845 = vmatprep.mubr.msk.f32.mxu1 %vm1466_vm0, %v13330_v27  ;;  %v4604_v33 = vmul.f32 %v21500_v3, %v4283_v31  ;;  %v4285_v40 = vmul.f32 %v18181_v4, %v4143_v45  ;;  %v13331_v62 = vld [vmem:[%s14450_s26 + $0xf0] sm:$0xff] }
 0x50e   : > { %v4144_v25 = vadd.f32 0.0009, %v4102_v49  ;;  %v4103_v34 = vmul.f32 2.0, %v4061_v20  ;;  %v4104_v6 = vmul.f32 2.0, %v4062_v9  ;;  %v4063_v17 = vsub.f32 %v3765_v50, %v21501_v28  ;;  %v3769_v39 = vpop.f32.mrf.mxu1  ;;  %v13332_v20 = vld [vmem:[%s14450_s26 + $0x108] sm:$0xff]  ;;  %v21503_v22 = vld [vmem:[#allocation225_spill] sm:$0xff] }
 0x50f   : > { %v4652_v30 = vadd.f32 %v4651_v12, %v4650_v1  ;;  %v4730_v26 = vadd.f32 %v4729_v5, %v4283_v31  ;;  %v4605_v29 = vmul.f32 %v21502_v59, %v4285_v40  ;;  %v4731_v48 = vsel %vm4632_vm15, %v4285_v40, 0.0  ;;  %v21504_v12 = vld [vmem:[#allocation71_spill] sm:$0xff] }
 0x510   : > { %v4287_v11 = vmul.f32 %v18192_v36, %v4144_v25  ;;  %v4145_v35 = vadd.f32 0.0009, %v4103_v34  ;;  %5078 = vmatmul.mubr.f32.gmra.mxu1 %v13331_v62  ;;  %v4146_v49 = vadd.f32 0.0009, %v4104_v6  ;;  %v4105_v23 = vmul.f32 2.0, %v4063_v17  ;;  %v3771_v5 = vpop.f32.mrf.mxu1  ;;  %v21506_v50 = vld [vmem:[#allocation83_spill] sm:$0xff] }
 0x511   : > { %v4653_v4 = vadd.f32 %v4652_v30, %v4604_v33  ;;  %v4732_v45 = vadd.f32 %v4731_v48, %v4730_v26  ;;  %10846 = vmatprep.mubr.msk.f32.mxu1 %vm1466_vm0, %v13332_v20  ;;  %v4654_v31 = vsel %vm4632_vm15, %v4605_v29, 0.0  ;;  %v4064_v36 = vsub.f32 %v3769_v39, %v21504_v12  ;;  %v21505_v33 = vld [vmem:[#allocation226_spill] sm:$0xff]  ;;  %v21507_v28 = vld [vmem:[#allocation227_spill] sm:$0xff]  ;;  %v21508_v39 = vld [vmem:[#allocation84_spill] sm:$0xff] }
 0x512   : > { %v4606_v19 = vmul.f32 %v21503_v22, %v4287_v11  ;;  %v4289_v1 = vmul.f32 %v18199_v56, %v4145_v35  ;;  %v4291_v27 = vmul.f32 %v18207_v52, %v4146_v49  ;;  %v4147_v3 = vadd.f32 0.0009, %v4105_v23  ;;  %v3775_v26 = vpop.f32.mrf.mxu1  ;;  %v13333_v6 = vld [vmem:[%s14450_s26 + $0x100] sm:$0xff]  ;;  %v13334_v48 = vld [vmem:[%s14450_s26 + $0x118] sm:$0xff]  ;;  %v21509_v23 = vld [vmem:[#allocation228_spill] sm:$0xff] }
 0x513   : > { %v4655_v41 = vadd.f32 %v4654_v31, %v4653_v4  ;;  %v4733_v9 = vadd.f32 %v4732_v45, %v4287_v11  ;;  %v4106_v34 = vmul.f32 2.0, %v4064_v36  ;;  %v4065_v30 = vsub.f32 %v3771_v5, %v21506_v50  ;;  %v13335_v5 = vld [vmem:[%s14450_s26 + $0x110] sm:$0xff] }
 0x514   : > { %v4607_v40 = vmul.f32 %v21505_v33, %v4289_v1  ;;  %v4734_v25 = vsel %vm4632_vm15, %v4289_v1, 0.0  ;;  %5083 = vmatmul.mubr.f32.gmra.mxu1 %v13333_v6  ;;  %v4608_v17 = vmul.f32 %v21507_v28, %v4291_v27  ;;  %v4293_v29 = vmul.f32 %v18214_v38, %v4147_v3  ;;  %v3777_v4 = vpop.f32.mrf.mxu1  ;;  %v21510_v1 = vld [vmem:[#allocation85_spill] sm:$0xff]  ;;  %v21511_v33 = vld [vmem:[#allocation86_spill] sm:$0xff] }
 0x515   : > { %v4656_v56 = vadd.f32 %v4655_v41, %v4606_v19  ;;  %v4735_v59 = vadd.f32 %v4734_v25, %v4733_v9  ;;  %10847 = vmatprep.mubr.msk.f32.mxu1 %vm1466_vm0, %v13334_v48  ;;  %v4148_v11 = vadd.f32 0.0009, %v4106_v34  ;;  %v4107_v35 = vmul.f32 2.0, %v4065_v30  ;;  %v21512_v25 = vld [vmem:[#allocation229_spill] sm:$0xff] }
 0x516   : > { %v4657_v52 = vsel %vm4632_vm15, %v4607_v40, 0.0  ;;  %v4066_v62 = vsub.f32 %v3775_v26, %v21508_v39  ;;  %v4609_v20 = vmul.f32 %v21509_v23, %v4293_v29  ;;  %v4737_v31 = vsel %vm4632_vm15, %v4293_v29, 0.0  ;;  %v3781_v36 = vpop.f32.mrf.mxu1  ;;  %v21514_v29 = vld [vmem:[#allocation95_spill] sm:$0xff]  ;;  %v13338_v23 = vld [vmem:[%s14450_s26 + $0x138] sm:$0xff] }
 0x517   : > { %v4658_v45 = vadd.f32 %v4657_v52, %v4656_v56  ;;  %v4736_v49 = vadd.f32 %v4735_v59, %v4291_v27  ;;  %v4295_v38 = vmul.f32 %v18224_v13, %v4148_v11  ;;  %v4149_v22 = vadd.f32 0.0009, %v4107_v35  ;;  %v13336_v27 = vld [vmem:[%s14450_s26 + $0x128] sm:$0xff] }
 0x518   : > { %v4108_v19 = vmul.f32 2.0, %v4066_v62  ;;  %v4067_v12 = vsub.f32 %v3777_v4, %v21510_v1  ;;  %5088 = vmatmul.mubr.f32.gmra.mxu1 %v13335_v5  ;;  %v4660_v9 = vsel %vm4632_vm15, %v4609_v20, 0.0  ;;  %v4068_v40 = vsub.f32 %v3781_v36, %v21511_v33  ;;  %v3783_v26 = vpop.f32.mrf.mxu1  ;;  %v13337_v62 = vld [vmem:[%s14450_s26 + $0x120] sm:$0xff] }
 0x519   : > { %v4659_v41 = vadd.f32 %v4658_v45, %v4608_v17  ;;  %v4738_v3 = vadd.f32 %v4737_v31, %v4736_v49  ;;  %10848 = vmatprep.mubr.msk.f32.mxu1 %vm1466_vm0, %v13336_v27  ;;  %v4610_v34 = vmul.f32 %v21512_v25, %v4295_v38  ;;  %v4297_v13 = vmul.f32 %v18233_v10, %v4149_v22  ;;  %v21513_v17 = vld [vmem:[#allocation87_spill] sm:$0xff]  ;;  %v21515_v31 = vld [vmem:[#allocation57_spill] sm:$0xff]  ;;  %v21518_v27 = vld [vmem:[#allocation88_spill] sm:$0xff] }
 0x51a   : > { %v4150_v50 = vadd.f32 0.0009, %v4108_v19  ;;  %v4109_v30 = vmul.f32 2.0, %v4067_v12  ;;  %v4110_v28 = vmul.f32 2.0, %v4068_v40  ;;  %v4069_v59 = vsub.f32 %v3783_v26, %v21513_v17  ;;  %v3787_v39 = vpop.f32.mrf.mxu1  ;;  %v21516_v19 = vld [vmem:[#allocation99_spill] sm:$0xff] }
 0x51b   : > { %v4661_v6 = vadd.f32 %v4660_v9, %v4659_v41  ;;  %v4739_v56 = vadd.f32 %v4738_v3, %v4295_v38  ;;  %v4611_v48 = vmul.f32 %v21514_v29, %v4297_v13  ;;  %v4740_v52 = vsel %vm4632_vm15, %v4297_v13, 0.0  ;;  %v21517_v9 = vld [vmem:[#allocation151_spill] sm:$0xff]  ;;  %v13339_v13 = vld [vmem:[%s14450_s26 + $0x130] sm:$0xff] }
 0x51c   : > { %v4299_v11 = vmul.f32 %v18238_v46, %v4150_v50  ;;  %v4151_v35 = vadd.f32 0.0009, %v4109_v30  ;;  %5093 = vmatmul.mubr.f32.gmra.mxu1 %v13337_v62  ;;  %v4152_v45 = vadd.f32 0.0009, %v4110_v28  ;;  %v4111_v49 = vmul.f32 2.0, %v4069_v59  ;;  %v3789_v1 = vpop.f32.mrf.mxu1  ;;  %v21519_v50 = vld [vmem:[#allocation82_spill] sm:$0xff] }
 0x51d   : > { %v4662_v10 = vadd.f32 %v4661_v6, %v4610_v34  ;;  %v4741_v4 = vadd.f32 %v4740_v52, %v4739_v56  ;;  %10849 = vmatprep.mubr.msk.f32.mxu1 %vm1466_vm0, %v13338_v23  ;;  %v4663_v20 = vsel %vm4632_vm15, %v4611_v48, 0.0  ;;  %v4070_v46 = vsub.f32 %v3787_v39, %v21516_v19  ;;  %v13340_v56 = vld [vmem:[%s14450_s26 + $0x148] sm:$0xff]  ;;  %v21520_v59 = vld [vmem:[#allocation73_spill] sm:$0xff] }
 0x51e   : > { %v4612_v38 = vmul.f32 %v21515_v31, %v4299_v11  ;;  %v4301_v22 = vmul.f32 %v18248_v54, %v4151_v35  ;;  %v4303_v5 = vmul.f32 %v18253_v44, %v4152_v45  ;;  %v4153_v41 = vadd.f32 0.0009, %v4111_v49  ;;  %v3793_v34 = vpop.f32.mrf.mxu1  ;;  %v21521_v35 = vld [vmem:[#allocation154_spill] sm:$0xff]  ;;  %v21522_v45 = vld [vmem:[#allocation75_spill] sm:$0xff]  ;;  %v18460_v31 = vld [vmem:[#allocation21 + $0x8] sm:$0xff] }
 0x51f   : > { %v4664_v12 = vadd.f32 %v4663_v20, %v4662_v10  ;;  %v4742_v36 = vadd.f32 %v4741_v4, %v4299_v11  ;;  %v4112_v40 = vmul.f32 2.0, %v4070_v46  ;;  %v4071_v25 = vsub.f32 %v3789_v1, %v21518_v27  ;;  %v13341_v20 = vld [vmem:[%s14450_s26 + $0x140] sm:$0xff]  ;;  %10852 = vmatprep.mubr.msk.f32.mxu0 %vm1466_vm0, %v18460_v31 }
 0x520   : > { %v4613_v3 = vmul.f32 %v21517_v9, %v4301_v22  ;;  %v4743_v33 = vsel %vm4632_vm15, %v4301_v22, 0.0  ;;  %5098 = vmatmul.mubr.f32.gmra.mxu1 %v13339_v13  ;;  %v4614_v30 = vmul.f32 %v21519_v50, %v4303_v5  ;;  %v4305_v6 = vmul.f32 %v18264_v55, %v4153_v41  ;;  %v3795_v48 = vpop.f32.mrf.mxu1  ;;  %v21523_v46 = vld [vmem:[#allocation74_spill] sm:$0xff]  ;;  %v21526_v13 = vld [vmem:[#allocation52_spill] sm:$0xff] }
 0x521   : > { %v4665_v54 = vadd.f32 %v4664_v12, %v4612_v38  ;;  %v4744_v26 = vadd.f32 %v4743_v33, %v4742_v36  ;;  %10850 = vmatprep.mubr.msk.f32.mxu1 %vm1466_vm0, %v13340_v56  ;;  %v4154_v28 = vadd.f32 0.0009, %v4112_v40  ;;  %v4113_v17 = vmul.f32 2.0, %v4071_v25  ;;  %v13342_v12 = vld [vmem:[%s14450_s26 + $0x158] sm:$0xff]  ;;  %v13343_v56 = vld [vmem:[%s14450_s26 + $0x150] sm:$0xff] }
 0x522   : > { %v4666_v44 = vsel %vm4632_vm15, %v4613_v3, 0.0  ;;  %v4072_v29 = vsub.f32 %v3793_v34, %v21520_v59  ;;  %v4615_v39 = vmul.f32 %v21521_v35, %v4305_v6  ;;  %v4746_v62 = vsel %vm4632_vm15, %v4305_v6, 0.0  ;;  %v3799_v23 = vpop.f32.mrf.mxu1  ;;  %v21525_v25 = vld [vmem:[#allocation138_spill] sm:$0xff] }
 0x523   : > { %v4667_v52 = vadd.f32 %v4666_v44, %v4665_v54  ;;  %v4745_v11 = vadd.f32 %v4744_v26, %v4303_v5  ;;  %v4307_v55 = vmul.f32 %v18268_v47, %v4154_v28  ;;  %v4155_v10 = vadd.f32 0.0009, %v4113_v17  ;;  %v21524_v47 = vld [vmem:[#allocation167_spill] sm:$0xff] }
 0x524   : > { %v4114_v4 = vmul.f32 2.0, %v4072_v29  ;;  %v4073_v49 = vsub.f32 %v3795_v48, %v21522_v45  ;;  %5103 = vmatmul.mubr.f32.gmra.mxu1 %v13341_v20  ;;  %v4669_v22 = vsel %vm4632_vm15, %v4615_v39, 0.0  ;;  %v4074_v1 = vsub.f32 %v3799_v23, %v21523_v46  ;;  %v3801_v3 = vpop.f32.mrf.mxu1 }
 0x525   : > { %v4668_v38 = vadd.f32 %v4667_v52, %v4614_v30  ;;  %v4747_v19 = vadd.f32 %v4746_v62, %v4745_v11  ;;  %10851 = vmatprep.mubr.msk.f32.mxu1 %vm1466_vm0, %v13342_v12  ;;  %v4616_v36 = vmul.f32 %v21524_v47, %v4307_v55  ;;  %v4309_v5 = vmul.f32 %v18279_v15, %v4155_v10  ;;  %v21527_v52 = vld [vmem:[#allocation89_spill] sm:$0xff] }
 0x526   : > { %v4156_v41 = vadd.f32 0.0009, %v4114_v4  ;;  %v4115_v9 = vmul.f32 2.0, %v4073_v49  ;;  %v4116_v27 = vmul.f32 2.0, %v4074_v1  ;;  %v4075_v34 = vsub.f32 %v3801_v3, %v21525_v25  ;;  %v3805_v6 = vpop.f32.mrf.mxu1  ;;  %v21528_v49 = vld [vmem:[#allocation51_spill] sm:$0xff] }
 0x527   : > { %v4670_v33 = vadd.f32 %v4669_v22, %v4668_v38  ;;  %v4748_v40 = vadd.f32 %v4747_v19, %v4307_v55  ;;  %v4617_v54 = vmul.f32 %v21526_v13, %v4309_v5  ;;  %v4749_v50 = vsel %vm4632_vm15, %v4309_v5, 0.0  ;;  %v21531_v13 = vld [vmem:[#allocation146_spill] sm:$0xff] }
 0x528   : > { %v4311_v30 = vmul.f32 %v18285_v37, %v4156_v41  ;;  %v4157_v26 = vadd.f32 0.0009, %v4115_v9  ;;  %5108 = vmatmul.mubr.f32.gmra.mxu1 %v13343_v56  ;;  %v4158_v28 = vadd.f32 0.0009, %v4116_v27  ;;  %v4117_v17 = vmul.f32 2.0, %v4075_v34  ;;  %v3807_v35 = vpop.f32.mrf.mxu1 }
 0x529   : > { %v4671_v44 = vadd.f32 %v4670_v33, %v4616_v36  ;;  %v4750_v15 = vadd.f32 %v4749_v50, %v4748_v40  ;;  %v4672_v59 = vsel %vm4632_vm15, %v4617_v54, 0.0  ;;  %v4076_v11 = vsub.f32 %v3805_v6, %v21527_v52  ;;  %v21530_v33 = vld [vmem:[#allocation98_spill] sm:$0xff] }
 0x52a   : > { %v4618_v29 = vmul.f32 %v18119_v32, %v4311_v30  ;;  %v4313_v48 = vmul.f32 %v18293_v51, %v4157_v26  ;;  %v4315_v37 = vmul.f32 %v18298_v63, %v4158_v28  ;;  %v4159_v55 = vadd.f32 0.0009, %v4117_v17  ;;  %v3811_v20 = vpop.f32.mrf.mxu1  ;;  %v21529_v63 = vld [vmem:[#allocation97_spill] sm:$0xff] }
 0x52b   : > { %v4673_v39 = vadd.f32 %v4672_v59, %v4671_v44  ;;  %v4751_v62 = vadd.f32 %v4750_v15, %v4311_v30  ;;  %v4118_v45 = vmul.f32 2.0, %v4076_v11  ;;  %v4077_v23 = vsub.f32 %v3807_v35, %v21528_v49  ;;  %v21532_v15 = vld [vmem:[#allocation110_spill] sm:$0xff] }
 0x52c   : > { %v4619_v10 = vmul.f32 %v18185_v14, %v4313_v48  ;;  %v4752_v4 = vsel %vm4632_vm15, %v4313_v48, 0.0  ;;  %v4620_v32 = vmul.f32 %v18203_v8, %v4315_v37  ;;  %v4317_v22 = vmul.f32 %v18305_v57, %v4159_v55  ;;  %v3813_v47 = vpop.f32.mrf.mxu1 }
 0x52d   : > { %v4674_v38 = vadd.f32 %v4673_v39, %v4618_v29  ;;  %v4753_v51 = vadd.f32 %v4752_v4, %v4751_v62  ;;  %v4160_v46 = vadd.f32 0.0009, %v4118_v45  ;;  %v4119_v1 = vmul.f32 2.0, %v4077_v23 }
 0x52e   : > { %v4675_v19 = vsel %vm4632_vm15, %v4619_v10, 0.0  ;;  %v4078_v12 = vsub.f32 %v3811_v20, %v21529_v63  ;;  %v4621_v5 = vmul.f32 %v18218_v43, %v4317_v22  ;;  %v4755_v41 = vsel %vm4632_vm15, %v4317_v22, 0.0  ;;  %v3817_v57 = vpop.f32.mrf.mxu1 }
 0x52f   : > { %v4676_v14 = vadd.f32 %v4675_v19, %v4674_v38  ;;  %v4754_v36 = vadd.f32 %v4753_v51, %v4315_v37  ;;  %v4319_v9 = vmul.f32 %v18313_v16, %v4160_v46  ;;  %v4161_v3 = vadd.f32 0.0009, %v4119_v1  ;;  %v21533_v38 = vld [vmem:[#allocation198_spill] sm:$0xff]  ;;  %v21535_v46 = vld [vmem:[#allocation207_spill] sm:$0xff] }
 0x530   : > { %v4120_v8 = vmul.f32 2.0, %v4078_v12  ;;  %v4079_v40 = vsub.f32 %v3813_v47, %v21530_v33  ;;  %v4678_v25 = vsel %vm4632_vm15, %v4621_v5, 0.0  ;;  %v4080_v54 = vsub.f32 %v3817_v57, %v21531_v13  ;;  %v3819_v6 = vpop.f32.mrf.mxu1  ;;  %v21537_v5 = vld [vmem:[#allocation68_spill] sm:$0xff]  ;;  %v21539_v57 = vld [vmem:[#allocation119_spill] sm:$0xff]  ;;  %v21541_v13 = vld [vmem:[#allocation181_spill] sm:$0xff] }
 0x531   : > { %v4677_v27 = vadd.f32 %v4676_v14, %v4620_v32  ;;  %v4756_v34 = vadd.f32 %v4755_v41, %v4754_v36  ;;  %v4622_v50 = vmul.f32 %v18228_v0, %v4319_v9  ;;  %v4321_v30 = vmul.f32 %v18315_v53, %v4161_v3  ;;  %v21538_v3 = vld [vmem:[#allocation106_spill] sm:$0xff] }
 0x532   : > { %v4162_v43 = vadd.f32 0.0009, %v4120_v8  ;;  %v4121_v26 = vmul.f32 2.0, %v4079_v40  ;;  %v4122_v44 = vmul.f32 2.0, %v4080_v54  ;;  %v4081_v28 = vsub.f32 %v3819_v6, %v21532_v15  ;;  %v3823_v52 = vpop.f32.mrf.mxu1 }
 0x533   : > { %v4679_v56 = vadd.f32 %v4678_v25, %v4677_v27  ;;  %v4757_v16 = vadd.f32 %v4756_v34, %v4319_v9  ;;  %v4623_v17 = vmul.f32 %v18242_v2, %v4321_v30  ;;  %v4758_v59 = vsel %vm4632_vm15, %v4321_v30, 0.0  ;;  %v21540_v34 = vld [vmem:[#allocation58_spill] sm:$0xff] }
 0x534   : > { %v4323_v29 = vmul.f32 %v18320_v24, %v4162_v43  ;;  %v4163_v48 = vadd.f32 0.0009, %v4121_v26  ;;  %v4164_v35 = vadd.f32 0.0009, %v4122_v44  ;;  %v4123_v53 = vmul.f32 2.0, %v4081_v28  ;;  %v3825_v10 = vpop.f32.mrf.mxu1  ;;  %v21542_v26 = vld [vmem:[#allocation173_spill] sm:$0xff] }
 0x535   : > { %v4680_v11 = vadd.f32 %v4679_v56, %v4622_v50  ;;  %v4759_v0 = vadd.f32 %v4758_v59, %v4757_v16  ;;  %v4681_v39 = vsel %vm4632_vm15, %v4623_v17, 0.0  ;;  %v4082_v55 = vsub.f32 %v3823_v52, %v21427_v42  ;;  %v21543_v56 = vld [vmem:[#allocation155_spill] sm:$0xff]  ;;  %v21544_v17 = vld [vmem:[#allocation170_spill] sm:$0xff]  ;;  %v21545_v59 = vld [vmem:[#allocation104_spill] sm:$0xff] }
 0x536   : > { %v4624_v62 = vmul.f32 %v18257_v21, %v4323_v29  ;;  %v4325_v37 = vmul.f32 %v18324_v58, %v4163_v48  ;;  %v4327_v45 = vmul.f32 %v18330_v7, %v4164_v35  ;;  %v4165_v24 = vadd.f32 0.0009, %v4123_v53  ;;  %v3829_v51 = vpop.f32.mrf.mxu1  ;;  %v21534_v21 = vld [vmem:[#allocation204_spill] sm:$0xff]  ;;  %v21536_v7 = vld [vmem:[#allocation169_spill] sm:$0xff] }
 0x537   : > { %v4682_v2 = vadd.f32 %v4681_v39, %v4680_v11  ;;  %v4760_v4 = vadd.f32 %v4759_v0, %v4323_v29  ;;  %v4124_v20 = vmul.f32 2.0, %v4082_v55  ;;  %v4083_v32 = vsub.f32 %v3825_v10, %v21533_v38  ;;  %v21547_v55 = vld [vmem:[#allocation122_spill] sm:$0xff] }
 0x538   : > { %v4625_v49 = vmul.f32 %v18261_v18, %v4325_v37  ;;  %v4761_v23 = vsel %vm4632_vm15, %v4325_v37, 0.0  ;;  %v4626_v19 = vmul.f32 %v21534_v21, %v4327_v45  ;;  %v4329_v42 = vmul.f32 %v21535_v46, %v4165_v24  ;;  %v3831_v14 = vpop.f32.mrf.mxu1  ;;  %v21546_v37 = vld [vmem:[#allocation201_spill] sm:$0xff] }
 0x539   : > { %v4683_v22 = vadd.f32 %v4682_v2, %v4624_v62  ;;  %v4762_v58 = vadd.f32 %v4761_v23, %v4760_v4  ;;  %v4166_v63 = vadd.f32 0.0009, %v4124_v20  ;;  %v4125_v12 = vmul.f32 2.0, %v4083_v32 }
 0x53a   : > { %v4684_v1 = vsel %vm4632_vm15, %v4625_v49, 0.0  ;;  %v4084_v47 = vsub.f32 %v3829_v51, %v21536_v7  ;;  %v4627_v41 = vmul.f32 %v21537_v5, %v4329_v42  ;;  %v4764_v9 = vsel %vm4632_vm15, %v4329_v42, 0.0  ;;  %v18515_v25 = vpop.f32.mrf.mxu1 }
 0x53b   : > { %v4685_v18 = vadd.f32 %v4684_v1, %v4683_v22  ;;  %v4763_v36 = vadd.f32 %v4762_v58, %v4327_v45  ;;  %v4331_v8 = vmul.f32 %v21538_v3, %v4166_v63  ;;  %v4167_v33 = vadd.f32 0.0009, %v4125_v12 }
 0x53c   : > { %v4126_v40 = vmul.f32 2.0, %v4084_v47  ;;  %v4085_v27 = vsub.f32 %v3831_v14, %v21539_v57  ;;  %v4585_v54 = vmul.f32 %v21541_v13, %v21540_v34  ;;  %v4687_v30 = vsel %vm4632_vm15, %v4627_v41, 0.0  ;;  %v4896_v28 = vpop.f32.mrf.mxu1 }
 0x53d   : > { %v4686_v50 = vadd.f32 %v4685_v18, %v4626_v19  ;;  %v4765_v43 = vadd.f32 %v4764_v9, %v4763_v36  ;;  %v4628_v6 = vmul.f32 %v21542_v26, %v4331_v8  ;;  %v4333_v16 = vmul.f32 %v21543_v56, %v4167_v33 }
 0x53e   : > { %v4168_v44 = vadd.f32 0.0009, %v4126_v40  ;;  %v4127_v15 = vmul.f32 2.0, %v4085_v27  ;;  %v4587_v29 = vmul.f32 %v21545_v59, %v21544_v17  ;;  %v18525_v53 = vpop.f32.mrf.mxu1  ;;  %v4589_v10 = vmul.f32 %v21547_v55, %v21546_v37 }
 0x53f   : > { %v4766_v48 = vadd.f32 %v4765_v43, %v4331_v8  ;;  %v4688_v52 = vadd.f32 %v4687_v30, %v4686_v50  ;;  %v4629_v11 = vmul.f32 %v4585_v54, %v4333_v16  ;;  %v4767_v39 = vsel %vm4632_vm15, %v4333_v16, 0.0 }
 0x540   : > { %v4335_v0 = vmul.f32 %v18379_v61, %v4168_v44  ;;  %v4169_v35 = vadd.f32 0.0009, %v4127_v15  ;;  %v4901_v45 = vpop.f32.mrf.mxu1  ;;  %vm8577_vm11 = vcmask 1041408   ;;  %vm9228_vm12 = vcmask 93184  }
 0x541   : > { %v4768_v62 = vadd.f32 %v4767_v39, %v4766_v48  ;;  %v4689_v2 = vadd.f32 %v4688_v52, %v4628_v6  ;;  %v4690_v23 = vsel %vm4632_vm15, %v4629_v11, 0.0  ;;  %vm9226_vm13 = vcmask 97280  }
 0x542   : > { %v4630_v4 = vmul.f32 %v4587_v29, %v4335_v0  ;;  %v4337_v24 = vmul.f32 %v18387_v60, %v4169_v35  ;;  %v4769_v49 = vsel %vm4692_vm1, %v4335_v0, 0.0  ;;  %v18533_v38 = vpop.f32.mrf.mxu1  ;;  %v21548_v29 = vmov 0.0  }
 0x543   : > { %v4770_v61 = vadd.f32 %v4769_v49, %v4768_v62  ;;  %v4691_v20 = vadd.f32 %v4690_v23, %v4689_v2  ;;  %vm9546_vm14 = vcmask 1042432   ;;  %vm9577_vm15 = vcmask 89088  }
 0x544   : > { %v4771_v32 = vsel %vm4695_vm2, %v4337_v24, 0.0  ;;  %v4631_v51 = vmul.f32 %v4589_v10, %v4337_v24  ;;  %v4693_v22 = vsel %vm4692_vm1, %v4630_v4, 0.0  ;;  %v4906_v58 = vpop.f32.mrf.mxu1 }
 0x545   : > { %v4772_v21 = vadd.f32 %v4771_v32, %v4770_v61  ;;  %v4694_v19 = vadd.f32 %v4693_v22, %v4691_v20  ;;  %v18583_v20 = vld [vmem:[#allocation21] sm:$0xff]  ;;  %v18586_v32 = vld [vmem:[#allocation21 + $0x18] sm:$0xff]  ;;  %v18601_v58 = vld [vmem:[#allocation21 + $0x28] sm:$0xff] }
 0x546   : > { %v4696_v46 = vsel %vm4695_vm2, %v4631_v51, 0.0  ;;  %v18538_v42 = vpop.f32.mrf.mxu1  ;;  %vm9561_vm2 = vcmask 1040384  }
 0x547   : > { %4773 = vadd.xlane.f32.xlu1 %v4772_v21  ;;  %v4697_v60 = vadd.f32 %v4696_v46, %v4694_v19  ;;  %v18599_v21 = vld [vmem:[#allocation21 + $0x10] sm:$0xff] }
 0x548   : > { %v4911_v1 = vpop.f32.mrf.mxu1 }
 0x549   : > { %4698 = vadd.xlane.f32.xlu0 %v4697_v60  ;;  %v18608_v60 = vld [vmem:[#allocation21 + $0x20] sm:$0xff]  ;;  %v18610_v1 = vld [vmem:[#allocation21 + $0x38] sm:$0xff] }
 0x54a   : > { %v18540_v63 = vpop.f32.mrf.mxu1 }
 0x54c   : > { %v4916_v12 = vpop.f32.mrf.mxu1 }
 0x54d   : > { %v18617_v12 = vld [vmem:[#allocation21 + $0x30] sm:$0xff] }
 0x54e   : > { %v4919_v7 = vpop.f32.mrf.mxu1 }
 0x550   : > { %v4921_v47 = vpop.f32.mrf.mxu1 }
 0x551   : > { %v18619_v47 = vld [vmem:[#allocation21 + $0x48] sm:$0xff] }
 0x552   : > { %v4924_v14 = vpop.f32.mrf.mxu1 }
 0x554   : > { %v4926_v18 = vpop.f32.mrf.mxu1 }
 0x555   : > { %v18626_v18 = vld [vmem:[#allocation21 + $0x40] sm:$0xff] }
 0x556   : > { %v4929_v36 = vpop.f32.mrf.mxu1 }
 0x558   : > { %v4931_v5 = vpop.f32.mrf.mxu1 }
 0x559   : > { %v18628_v5 = vld [vmem:[#allocation21 + $0x58] sm:$0xff] }
 0x55a   : > { %v4934_v41 = vpop.f32.mrf.mxu1 }
 0x55c   : > { %v4936_v9 = vpop.f32.mrf.mxu1 }
 0x55d   : > { %v18635_v9 = vld [vmem:[#allocation21 + $0x50] sm:$0xff] }
 0x55e   : > { %v4939_v3 = vpop.f32.mrf.mxu1 }
 0x560   : > { %v4941_v8 = vpop.f32.mrf.mxu1 }
 0x561   : > { %v18637_v8 = vld [vmem:[#allocation21 + $0x68] sm:$0xff] }
 0x562   : > { %v4944_v33 = vpop.f32.mrf.mxu1 }
 0x564   : > { %v1533_v40 = vpop.xlane.xlu0 %1532  ;;  %v4946_v57 = vpop.f32.mrf.mxu1 }
 0x565   : > { %v1534_v27 = vrot.slane %v1533_v40, 4 }
 0x566   : > { %v4949_v34 = vpop.f32.mrf.mxu1 }
 0x567   : > { %v1535_v13 = vadd.f32 %v1534_v27, %v1533_v40  ;;  %v18644_v40 = vld [vmem:[#allocation21 + $0x60] sm:$0xff]  ;;  %v18646_v27 = vld [vmem:[#allocation21 + $0x78] sm:$0xff] }
 0x568   : > { %v4951_v54 = vpop.f32.mrf.mxu1 }
 0x569   : > { %v1536_v50 = vrot.slane %v1535_v13, 2 }
 0x56a   : > { %v4954_v30 = vpop.f32.mrf.mxu1 }
 0x56b   : > { %v1537_v43 = vadd.f32 %v1536_v50, %v1535_v13  ;;  %v18651_v13 = vld [vmem:[#allocation21 + $0x70] sm:$0xff]  ;;  %v18653_v50 = vld [vmem:[#allocation21 + $0x88] sm:$0xff] }
 0x56c   : > { %v4956_v26 = vpop.f32.mrf.mxu1 }
 0x56d   : > { %v1538_v6 = vrot.slane %v1537_v43, 1 }
 0x56e   : > { %v4959_v56 = vpop.f32.mrf.mxu1 }
 0x56f   : > { %v1539_v16 = vadd.f32 %v1538_v6, %v1537_v43  ;;  %v18658_v43 = vld [vmem:[#allocation21 + $0x80] sm:$0xff]  ;;  %v18660_v6 = vld [vmem:[#allocation21 + $0x98] sm:$0xff] }
 0x570   : > { %v4961_v44 = vpop.f32.mrf.mxu1 }
 0x571   : > { %12540 = vpush %v1539_v16  ;;  %v18665_v16 = vld [vmem:[#allocation21 + $0x90] sm:$0xff] }
 0x572   : > { %v4964_v15 = vpop.f32.mrf.mxu1 }
 0x574   : > { %v4966_v28 = vpop.f32.mrf.mxu1 }
 0x576   : > { %v4969_v17 = vpop.f32.mrf.mxu1 }
 0x577   : > { %5147 = vmatpush1.msra.mxu0 %v4969_v17  ;;  %v18672_v17 = vld [vmem:[#allocation21 + $0xa0] sm:$0xff] }
 0x578   : > { %v4971_v59 = vpop.f32.mrf.mxu1  ;;  %5148 = vmatprep.subr.mxu0 %v21548_v29 }
 0x579   : > { %5149 = vmatpush1.msra.mxu0 %v4964_v15  ;;  %v18667_v15 = vld [vmem:[#allocation21 + $0xa8] sm:$0xff] }
 0x57a   : > { %v18543_v48 = vpop.f32.mrf.mxu1  ;;  %5150 = vmatprep.subr.mxu0 %v21548_v29 }
 0x57b   : > { %5151 = vmatpush1.msra.mxu0 %v4959_v56 }
 0x57c   : > { %v4976_v52 = vpop.f32.mrf.mxu1  ;;  %5152 = vmatprep.subr.mxu0 %v21548_v29 }
 0x57d   : > { %5153 = vmatpush1.msra.mxu0 %v4954_v30 }
 0x57e   : > { %v4979_v11 = vpop.f32.mrf.mxu1  ;;  %5154 = vmatprep.subr.mxu0 %v21548_v29 }
 0x57f   : > { %5155 = vmatpush1.msra.mxu0 %v4949_v34 }
 0x580   : > { %v4981_v0 = vpop.f32.mrf.mxu1  ;;  %5156 = vmatprep.subr.mxu0 %v21548_v29 }
 0x581   : > { %5157 = vmatpush1.msra.mxu0 %v4944_v33 }
 0x582   : > { %v4984_v35 = vpop.f32.mrf.mxu1  ;;  %5158 = vmatprep.subr.mxu0 %v21548_v29 }
 0x583   : > { %5159 = vmatpush1.msra.mxu0 %v4939_v3 }
 0x584   : > { %v4986_v39 = vpop.f32.mrf.mxu1  ;;  %5160 = vmatprep.subr.mxu0 %v21548_v29 }
 0x585   : > { %5161 = vmatpush1.msra.mxu0 %v4934_v41 }
 0x586   : > { %v4989_v62 = vpop.f32.mrf.mxu1  ;;  %5162 = vmatprep.subr.mxu0 %v21548_v29 }
 0x587   : > { %5163 = vmatpush1.msra.mxu0 %v4929_v36 }
 0x588   : > { %v4991_v37 = vpop.f32.mrf.mxu1  ;;  %5164 = vmatprep.subr.mxu0 %v21548_v29 }
 0x589   : > { %5165 = vmatpush1.msra.mxu0 %v4924_v14 }
 0x58a   : > { %v4994_v55 = vpop.f32.mrf.mxu1  ;;  %5166 = vmatprep.subr.mxu0 %v21548_v29 }
 0x58b   : > { %5167 = vmatpush1.msra.mxu0 %v4919_v7 }
 0x58c   : > { %v4996_v10 = vpop.f32.mrf.mxu1  ;;  %5168 = vmatprep.subr.mxu0 %v21548_v29 }
 0x58d   : > { %5169 = vmatpush1.msra.mxu0 %v18540_v63 }
 0x58e   : > { %v4999_v2 = vpop.f32.mrf.mxu1  ;;  %5170 = vmatprep.subr.mxu0 %v21548_v29 }
 0x58f   : > { %5171 = vmatpush1.msra.mxu0 %v18538_v42 }
 0x590   : > { %v5001_v4 = vpop.f32.mrf.mxu1  ;;  %5172 = vmatprep.subr.mxu0 %v21548_v29 }
 0x591   : > { %5173 = vmatpush1.msra.mxu0 %v18533_v38 }
 0x592   : > { %v18561_v45 = vpop.f32.mrf.mxu1  ;;  %5174 = vmatprep.subr.mxu0 %v21548_v29 }
 0x593   : > { %5175 = vmatpush1.msra.mxu0 %v18525_v53 }
 0x594   : > { %v5006_v24 = vpop.f32.mrf.mxu1  ;;  %5176 = vmatprep.subr.mxu0 %v21548_v29 }
 0x595   : > { %5177 = vmatpush1.msra.mxu0 %v18515_v25 }
 0x596   : > { %v18569_v49 = vpop.f32.mrf.mxu1  ;;  %5198 = vmatprep.subr.mxu0 %v21548_v29 }
 0x597   : > { %5199 = vmatpush2.msra.mxu0 %v4999_v2 }
 0x598   : > { %v5011_v23 = vpop.f32.mrf.mxu1  ;;  %5200 = vmatprep.subr.mxu0 %v21548_v29 }
 0x599   : > { %5201 = vmatpush2.msra.mxu0 %v4994_v55 }
 0x59a   : > { %v18574_v61 = vpop.f32.mrf.mxu1  ;;  %5202 = vmatprep.subr.mxu0 %v21548_v29 }
 0x59b   : > { %5203 = vmatpush2.msra.mxu0 %v4989_v62 }
 0x59c   : > { %v5016_v53 = vpop.f32.mrf.mxu1  ;;  %5204 = vmatprep.subr.mxu0 %v21548_v29 }
 0x59d   : > { %5205 = vmatpush2.msra.mxu0 %v4984_v35 }
 0x59e   : > { %v18580_v25 = vpop.f32.mrf.mxu1  ;;  %5206 = vmatprep.subr.mxu0 %v21548_v29 }
 0x59f   : > { %5207 = vmatpush2.msra.mxu0 %v4979_v11 }
 0x5a0   : > { %v5021_v38 = vpop.f32.mrf.mxu1  ;;  %5208 = vmatprep.subr.mxu0 %v21548_v29 }
 0x5a1   : > { %5209 = vmatpush2.msra.mxu0 %v18543_v48 }
 0x5a2   : > { %s12541_s11 = spop %12540  ;;  %v18593_v51 = vpop.f32.mrf.mxu1  ;;  %5211 = vmatmul.mubr.f32.vlgmr.msra.gmra.mxu0 %v18583_v20  ;;  %5266 = vmatprep.subr.mxu0 %v21548_v29 }
 0x5a3   : > { %v1541_v22 = vstv %s12541_s11  ;;  %10853 = vmatprep.mubr.msk.f32.mxu0 %vm1466_vm0, %v18586_v32 }
 0x5a4   : > { %1542 = vst [vmem:[%s1069_s8] sm:$0x1] %v1541_v22  ;;  %v5026_v19 = vpop.f32.mrf.mxu1 }
 0x5a6   : > { %v18603_v46 = vpop.f32.mrf.mxu1  ;;  %5216 = vmatmul.mubr.f32.gmra.mxu0 %v18599_v21 }
 0x5a7   : > { %10854 = vmatprep.mubr.msk.f32.mxu0 %vm1466_vm0, %v18601_v58 }
 0x5a8   : > { %v5031_v42 = vpop.f32.mrf.mxu1 }
 0x5aa   : > { %v18612_v63 = vpop.f32.mrf.mxu1  ;;  %5221 = vmatmul.mubr.f32.gmra.mxu0 %v18608_v60 }
 0x5ab   : > { %10855 = vmatprep.mubr.msk.f32.mxu0 %vm1466_vm0, %v18610_v1 }
 0x5ac   : > { %v5036_v7 = vpop.f32.mrf.mxu1 }
 0x5ae   : > { %5226 = vmatmul.mubr.f32.gmra.mxu0 %v18617_v12 }
 0x5af   : > { %10856 = vmatprep.mubr.msk.f32.mxu0 %vm1466_vm0, %v18619_v47 }
 0x5b0   : > { %v18621_v14 = vpop.f32.mrf.mxu1 }
 0x5b2   : > { %v5041_v36 = vpop.f32.mrf.mxu1  ;;  %5231 = vmatmul.mubr.f32.gmra.mxu0 %v18626_v18 }
 0x5b3   : > { %10857 = vmatprep.mubr.msk.f32.mxu0 %vm1466_vm0, %v18628_v5 }
 0x5b4   : > { %v18630_v41 = vpop.f32.mrf.mxu1 }
 0x5b6   : > { %v5046_v3 = vpop.f32.mrf.mxu1  ;;  %5236 = vmatmul.mubr.f32.gmra.mxu0 %v18635_v9 }
 0x5b7   : > { %10858 = vmatprep.mubr.msk.f32.mxu0 %vm1466_vm0, %v18637_v8 }
 0x5b8   : > { %v18639_v33 = vpop.f32.mrf.mxu1 }
 0x5ba   : > { %v5051_v57 = vpop.f32.mrf.mxu1  ;;  %5241 = vmatmul.mubr.f32.gmra.mxu0 %v18644_v40 }
 0x5bb   : > { %10859 = vmatprep.mubr.msk.f32.mxu0 %vm1466_vm0, %v18646_v27 }
 0x5bc   : > { %v5054_v34 = vpop.f32.mrf.mxu1 }
 0x5be   : > { %v5056_v54 = vpop.f32.mrf.mxu1  ;;  %5246 = vmatmul.mubr.f32.gmra.mxu0 %v18651_v13 }
 0x5bf   : > { %10860 = vmatprep.mubr.msk.f32.mxu0 %vm1466_vm0, %v18653_v50 }
 0x5c0   : > { %v5059_v30 = vpop.f32.mrf.mxu1 }
 0x5c2   : > { %v5061_v26 = vpop.f32.mrf.mxu1  ;;  %5251 = vmatmul.mubr.f32.gmra.mxu0 %v18658_v43 }
 0x5c3   : > { %10861 = vmatprep.mubr.msk.f32.mxu0 %vm1466_vm0, %v18660_v6 }
 0x5c4   : > { %v5064_v56 = vpop.f32.mrf.mxu1 }
 0x5c6   : > { %v5066_v44 = vpop.f32.mrf.mxu1  ;;  %5256 = vmatmul.mubr.f32.gmra.mxu0 %v18665_v16 }
 0x5c7   : > { %10862 = vmatprep.mubr.msk.f32.mxu0 %vm1466_vm0, %v18667_v15 }
 0x5c8   : > { %v5069_v28 = vpop.f32.mrf.mxu1 }
 0x5ca   : > { %v5071_v59 = vpop.f32.mrf.mxu1  ;;  %5261 = vmatmul.mubr.f32.gmra.mxu0 %v18672_v17 }
 0x5cb   : > { %10863 = vmatprep.mubr.msk.f32.mxu0 %vm1466_vm0, %v18460_v31 }
 0x5cc   : > { %v5074_v48 = vpop.f32.mrf.mxu1 }
 0x5ce   : > { %v5076_v52 = vpop.f32.mrf.mxu1 }
 0x5d0   : > { %v4774_v11 = vpop.xlane.xlu1 %4773  ;;  %v5079_v0 = vpop.f32.mrf.mxu1 }
 0x5d1   : > { %v4775_v35 = vrot.slane %v4774_v11, 4  ;;  %5267 = vmatpush1.msra.mxu0 %v5079_v0 }
 0x5d2   : > { %v4699_v39 = vpop.xlane.xlu0 %4698  ;;  %5268 = vmatprep.subr.mxu0 %v21548_v29  ;;  %v5081_v62 = vpop.f32.mrf.mxu1 }
 0x5d3   : > { %v4776_v37 = vadd.f32 %v4775_v35, %v4774_v11  ;;  %v4700_v55 = vrot.slane %v4699_v39, 4  ;;  %5269 = vmatpush1.msra.mxu0 %v5074_v48 }
 0x5d4   : > { %5270 = vmatprep.subr.mxu0 %v21548_v29  ;;  %v5084_v10 = vpop.f32.mrf.mxu1 }
 0x5d5   : > { %v4777_v2 = vrot.slane %v4776_v37, 2  ;;  %v4701_v4 = vadd.f32 %v4700_v55, %v4699_v39  ;;  %5271 = vmatpush1.msra.mxu0 %v5069_v28 }
 0x5d6   : > { %5272 = vmatprep.subr.mxu0 %v21548_v29  ;;  %v5086_v31 = vpop.f32.mrf.mxu1 }
 0x5d7   : > { %v4702_v24 = vrot.slane %v4701_v4, 2  ;;  %5273 = vmatpush1.msra.mxu0 %v5064_v56  ;;  %v4778_v23 = vadd.f32 %v4777_v2, %v4776_v37 }
 0x5d8   : > { %5274 = vmatprep.subr.mxu0 %v21548_v29  ;;  %v5089_v53 = vpop.f32.mrf.mxu1 }
 0x5d9   : > { %5275 = vmatpush1.msra.mxu0 %v5059_v30  ;;  %v4703_v38 = vadd.f32 %v4702_v24, %v4701_v4  ;;  %v4779_v22 = vrot.slane %v4778_v23, 1 }
 0x5da   : > { %5276 = vmatprep.subr.mxu0 %v21548_v29  ;;  %v5091_v19 = vpop.f32.mrf.mxu1 }
 0x5db   : > { %5277 = vmatpush1.msra.mxu0 %v5054_v34  ;;  %v4704_v42 = vrot.slane %v4703_v38, 1  ;;  %v4780_v3 = vadd.f32 %v4779_v22, %v4778_v23 }
 0x5dc   : > { %5278 = vmatprep.subr.mxu0 %v21548_v29  ;;  %v5094_v7 = vpop.f32.mrf.mxu1 }
 0x5dd   : > { %5279 = vmatpush1.msra.mxu0 %v18639_v33  ;;  %v4705_v36 = vadd.f32 %v4704_v42, %v4703_v38 }
 0x5de   : > { %5280 = vmatprep.subr.mxu0 %v21548_v29  ;;  %v5096_v57 = vpop.f32.mrf.mxu1 }
 0x5df   : > { %12542 = vpush %v4705_v36  ;;  %5281 = vmatpush1.msra.mxu0 %v18630_v41 }
 0x5e0   : > { %12544 = vpush %v4780_v3  ;;  %5282 = vmatprep.subr.mxu0 %v21548_v29  ;;  %v5099_v54 = vpop.f32.mrf.mxu1 }
 0x5e1   : > { %5283 = vmatpush1.msra.mxu0 %v18621_v14 }
 0x5e2   : > { %5284 = vmatprep.subr.mxu0 %v21548_v29  ;;  %v5101_v34 = vpop.f32.mrf.mxu1 }
 0x5e3   : > { %5285 = vmatpush1.msra.mxu0 %v18612_v63 }
 0x5e4   : > { %5286 = vmatprep.subr.mxu0 %v21548_v29  ;;  %v5104_v33 = vpop.f32.mrf.mxu1 }
 0x5e5   : > { %5287 = vmatpush1.msra.mxu0 %v18603_v46  ;;  %v5397_v46 = vld [vmem:[#allocation10 + $0x8] sm:$0xff] }
 0x5e6   : > { %5288 = vmatprep.subr.mxu0 %v21548_v29  ;;  %v5106_v30 = vpop.f32.mrf.mxu1 }
 0x5e7   : > { %5289 = vmatpush1.msra.mxu0 %v18593_v51  ;;  %v5400_v51 = vld [vmem:[#allocation10 + $0x20] sm:$0xff] }
 0x5e8   : > { %5290 = vmatprep.subr.mxu0 %v21548_v29  ;;  %v5109_v41 = vpop.f32.mrf.mxu1 }
 0x5e9   : > { %5291 = vmatpush1.msra.mxu0 %v18580_v25  ;;  %v5403_v25 = vld [vmem:[#allocation10 + $0x38] sm:$0xff] }
 0x5ea   : > { %5292 = vmatprep.subr.mxu0 %v21548_v29  ;;  %v5111_v14 = vpop.f32.mrf.mxu1 }
 0x5eb   : > { %5293 = vmatpush1.msra.mxu0 %v18574_v61  ;;  %v5404_v61 = vld [vmem:[#allocation10 + $0x40] sm:$0xff] }
 0x5ec   : > { %5294 = vmatprep.subr.mxu0 %v21548_v29 }
 0x5ed   : > { %5295 = vmatpush1.msra.mxu0 %v18569_v49  ;;  %v5406_v49 = vld [vmem:[#allocation10 + $0x50] sm:$0xff] }
 0x5ee   : > { %5296 = vmatprep.subr.mxu0 %v21548_v29 }
 0x5ef   : > { %5297 = vmatpush1.msra.mxu0 %v18561_v45  ;;  %v5405_v45 = vld [vmem:[#allocation10 + $0x48] sm:$0xff] }
 0x5f0   : > { %5318 = vmatprep.subr.mxu0 %v21548_v29 }
 0x5f1   : > { %5319 = vmatpush2.msra.mxu0 %v5109_v41 }
 0x5f2   : > { %5320 = vmatprep.subr.mxu0 %v21548_v29 }
 0x5f3   : > { %5321 = vmatpush2.msra.mxu0 %v5104_v33 }
 0x5f4   : > { %5322 = vmatprep.subr.mxu0 %v21548_v29 }
 0x5f5   : > { %5323 = vmatpush2.msra.mxu0 %v5099_v54 }
 0x5f6   : > { %5324 = vmatprep.subr.mxu0 %v21548_v29 }
 0x5f7   : > { %5325 = vmatpush2.msra.mxu0 %v5094_v7 }
 0x5f8   : > { %5326 = vmatprep.subr.mxu0 %v21548_v29 }
 0x5f9   : > { %5327 = vmatpush2.msra.mxu0 %v5089_v53 }
 0x5fa   : > { %5328 = vmatprep.subr.mxu0 %v21548_v29 }
 0x5fb   : > { %5329 = vmatpush2.msra.mxu0 %v5084_v10 }
 0x5fc   : > { %5331 = vmatmul.mubr.f32.vlgmr.msra.gmra.mxu0 %v18583_v20  ;;  %11602 = vmatprep.subr.mxu0 %v21548_v29  ;;  %v5402_v20 = vld [vmem:[#allocation10 + $0x30] sm:$0xff] }
 0x5fd   : > { %10864 = vmatprep.mubr.msk.f32.mxu0 %vm1466_vm0, %v18586_v32  ;;  %11603 = vmatpush3.msra.mxu0 %v5406_v49  ;;  %v5401_v32 = vld [vmem:[#allocation10 + $0x28] sm:$0xff] }
 0x5fe   : > { %11604 = vmatprep.subr.mxu0 %v21548_v29 }
 0x5ff   : > { %11605 = vmatpush3.msra.mxu0 %v5405_v45 }
 0x600   : > { %5336 = vmatmul.mubr.f32.gmra.mxu0 %v18599_v21  ;;  %11606 = vmatprep.subr.mxu0 %v21548_v29  ;;  %v5399_v21 = vld [vmem:[#allocation10 + $0x18] sm:$0xff] }
 0x601   : > { %10865 = vmatprep.mubr.msk.f32.mxu0 %vm1466_vm0, %v18601_v58  ;;  %11607 = vmatpush3.msra.mxu0 %v5404_v61  ;;  %v5398_v58 = vld [vmem:[#allocation10 + $0x10] sm:$0xff] }
 0x602   : > { %11608 = vmatprep.subr.mxu0 %v21548_v29 }
 0x603   : > { %11609 = vmatpush3.msra.mxu0 %v5403_v25 }
 0x604   : > { %5341 = vmatmul.mubr.f32.gmra.mxu0 %v18608_v60  ;;  %11610 = vmatprep.subr.mxu0 %v21548_v29  ;;  %v5396_v60 = vld [vmem:[#allocation10] sm:$0xff] }
 0x605   : > { %10866 = vmatprep.mubr.msk.f32.mxu0 %vm1466_vm0, %v18610_v1  ;;  %11611 = vmatpush3.msra.mxu0 %v5402_v20 }
 0x606   : > { %11612 = vmatprep.subr.mxu0 %v21548_v29 }
 0x607   : > { %11613 = vmatpush3.msra.mxu0 %v5401_v32 }
 0x608   : > { %5346 = vmatmul.mubr.f32.gmra.mxu0 %v18617_v12  ;;  %11614 = vmatprep.subr.mxu0 %v21548_v29 }
 0x609   : > { %10867 = vmatprep.mubr.msk.f32.mxu0 %vm1466_vm0, %v18619_v47  ;;  %11615 = vmatpush3.msra.mxu0 %v5400_v51 }
 0x60a   : > { %11616 = vmatprep.subr.mxu0 %v21548_v29 }
 0x60b   : > { %11617 = vmatpush3.msra.mxu0 %v5399_v21 }
 0x60c   : > { %5351 = vmatmul.mubr.f32.gmra.mxu0 %v18626_v18  ;;  %11618 = vmatprep.subr.mxu0 %v21548_v29 }
 0x60d   : > { %10868 = vmatprep.mubr.msk.f32.mxu0 %vm1466_vm0, %v18628_v5  ;;  %11619 = vmatpush3.msra.mxu0 %v5398_v58 }
 0x60e   : > { %11620 = vmatprep.subr.mxu0 %v21548_v29 }
 0x60f   : > { %11621 = vmatpush3.msra.mxu0 %v5397_v46 }
 0x610   : > { %5356 = vmatmul.mubr.f32.gmra.mxu0 %v18635_v9  ;;  %11622 = vmatprep.subr.mxu0 %v21548_v29  ;;  %s12543_s9 = spop %12542 }
 0x611   : > { %10869 = vmatprep.mubr.msk.f32.mxu0 %vm1466_vm0, %v18637_v8  ;;  %11623 = vmatpush3.msra.mxu0 %v5396_v60  ;;  %s12545_s22 = spop %12544 }
 0x614   : > { %5361 = vmatmul.mubr.f32.gmra.mxu0 %v18644_v40 }
 0x615   : > { %10870 = vmatprep.mubr.msk.f32.mxu0 %vm1466_vm0, %v18646_v27 }
 0x618   : > { %5366 = vmatmul.mubr.f32.gmra.mxu0 %v18651_v13 }
 0x619   : > { %10871 = vmatprep.mubr.msk.f32.mxu0 %vm1466_vm0, %v18653_v50 }
 0x61c   : > { %5371 = vmatmul.mubr.f32.gmra.mxu0 %v18658_v43 }
 0x61d   : > { %10872 = vmatprep.mubr.msk.f32.mxu0 %vm1466_vm0, %v18660_v6 }
 0x620   : > { %5376 = vmatmul.mubr.f32.gmra.mxu0 %v18665_v16 }
 0x621   : > { %10873 = vmatprep.mubr.msk.f32.mxu0 %vm1466_vm0, %v18667_v15  ;;  %vm6741_vm0 = vcmask 637952  }
 0x624   : > { %5381 = vmatmul.mubr.f32.gmra.mxu0 %v18672_v17 }
 0x625   : > { %11624 = vmatprep.mubr.msk.f32.mxu0 %vm14005_vm3, %v21548_v29 }
 0x662   : > { %v18752_v1 = vpop.f32.mrf.mxu0 }
 0x663   : > { %11625 = vmatmul.mubr.msk.f32.vlgmr.msra.gmra.mxu0 %vm5440_vm4, %v18752_v1  ;;  %v5407_v3 = vmul.f32 %v18752_v1, %v18752_v1 }
 0x664   : > { %v5214_v63 = vpop.f32.mrf.mxu0  ;;  %11627 = vmatprep.mubr.msk.f32.mxu0 %vm14005_vm3, %v21548_v29 }
 0x665   : > { %v18968_v63 = vld [vmem:[#allocation9] sm:$0xff] }
 0x666   : > { %v18758_v12 = vpop.f32.mrf.mxu0  ;;  %11811 = vmatprep.mubr.msk.f32.mxu1 %vm5440_vm4, %v18968_v63 }
 0x667   : > { %11628 = vmatmul.mubr.msk.f32.gmra.mxu0 %vm5440_vm4, %v18758_v12  ;;  %v5408_v57 = vmul.f32 %v18758_v12, %v18758_v12 }
 0x668   : > { %v5219_v47 = vpop.f32.mrf.mxu0  ;;  %11630 = vmatprep.mubr.msk.f32.mxu0 %vm14005_vm3, %v21548_v29 }
 0x66a   : > { %v18764_v18 = vpop.f32.mrf.mxu0 }
 0x66b   : > { %11631 = vmatmul.mubr.msk.f32.gmra.mxu0 %vm5440_vm4, %v18764_v18  ;;  %v5409_v54 = vmul.f32 %v18764_v18, %v18764_v18 }
 0x66c   : > { %v5224_v5 = vpop.f32.mrf.mxu0  ;;  %11633 = vmatprep.mubr.msk.f32.mxu0 %vm14005_vm3, %v21548_v29 }
 0x66e   : > { %v18770_v9 = vpop.f32.mrf.mxu0 }
 0x66f   : > { %11634 = vmatmul.mubr.msk.f32.gmra.mxu0 %vm5440_vm4, %v18770_v9  ;;  %v5410_v34 = vmul.f32 %v18770_v9, %v18770_v9 }
 0x670   : > { %v5229_v8 = vpop.f32.mrf.mxu0  ;;  %11636 = vmatprep.mubr.msk.f32.mxu0 %vm14005_vm3, %v21548_v29 }
 0x672   : > { %v18776_v40 = vpop.f32.mrf.mxu0 }
 0x673   : > { %11637 = vmatmul.mubr.msk.f32.gmra.mxu0 %vm5440_vm4, %v18776_v40  ;;  %v5411_v33 = vmul.f32 %v18776_v40, %v18776_v40 }
 0x674   : > { %v5234_v27 = vpop.f32.mrf.mxu0  ;;  %11639 = vmatprep.mubr.msk.f32.mxu0 %vm14005_vm3, %v21548_v29 }
 0x676   : > { %v18782_v13 = vpop.f32.mrf.mxu0 }
 0x677   : > { %11640 = vmatmul.mubr.msk.f32.gmra.mxu0 %vm5440_vm4, %v18782_v13  ;;  %v5412_v30 = vmul.f32 %v18782_v13, %v18782_v13 }
 0x678   : > { %v5239_v50 = vpop.f32.mrf.mxu0  ;;  %11642 = vmatprep.mubr.msk.f32.mxu0 %vm14005_vm3, %v21548_v29 }
 0x67a   : > { %v18788_v43 = vpop.f32.mrf.mxu0 }
 0x67b   : > { %11643 = vmatmul.mubr.msk.f32.gmra.mxu0 %vm5440_vm4, %v18788_v43  ;;  %v5413_v41 = vmul.f32 %v18788_v43, %v18788_v43 }
 0x67c   : > { %v5244_v26 = vpop.f32.mrf.mxu0  ;;  %11645 = vmatprep.mubr.msk.f32.mxu0 %vm14005_vm3, %v21548_v29 }
 0x67e   : > { %v18794_v6 = vpop.f32.mrf.mxu0 }
 0x67f   : > { %11646 = vmatmul.mubr.msk.f32.gmra.mxu0 %vm5440_vm4, %v18794_v6  ;;  %v5414_v14 = vmul.f32 %v18794_v6, %v18794_v6 }
 0x680   : > { %v5249_v56 = vpop.f32.mrf.mxu0  ;;  %11648 = vmatprep.mubr.msk.f32.mxu0 %vm14005_vm3, %v21548_v29 }
 0x682   : > { %v18800_v16 = vpop.f32.mrf.mxu0 }
 0x683   : > { %11649 = vmatmul.mubr.msk.f32.gmra.mxu0 %vm5440_vm4, %v18800_v16  ;;  %v5415_v49 = vmul.f32 %v18800_v16, %v18800_v16 }
 0x684   : > { %v5254_v44 = vpop.f32.mrf.mxu0  ;;  %11651 = vmatprep.mubr.msk.f32.mxu0 %vm14005_vm3, %v21548_v29 }
 0x686   : > { %v18806_v15 = vpop.f32.mrf.mxu0 }
 0x687   : > { %11652 = vmatmul.mubr.msk.f32.gmra.mxu0 %vm5440_vm4, %v18806_v15  ;;  %v5416_v45 = vmul.f32 %v18806_v15, %v18806_v15 }
 0x688   : > { %v5259_v28 = vpop.f32.mrf.mxu0  ;;  %11654 = vmatprep.mubr.msk.f32.mxu0 %vm14005_vm3, %v21548_v29 }
 0x68a   : > { %v18812_v17 = vpop.f32.mrf.mxu0 }
 0x68b   : > { %11655 = vmatmul.mubr.msk.f32.gmra.mxu0 %vm5440_vm4, %v18812_v17  ;;  %v5417_v61 = vmul.f32 %v18812_v17, %v18812_v17 }
 0x68c   : > { %v5264_v59 = vpop.f32.mrf.mxu0  ;;  %11657 = vmatprep.mubr.msk.f32.mxu0 %vm14005_vm3, %v21548_v29 }
 0x6bc   : > { %v18818_v48 = vpop.f32.mrf.mxu0 }
 0x6bd   : > { %11658 = vmatmul.mubr.msk.f32.gmra.mxu0 %vm5440_vm4, %v18818_v48  ;;  %v5418_v25 = vmul.f32 %v18818_v48, %v18818_v48 }
 0x6be   : > { %v5334_v52 = vpop.f32.mrf.mxu0  ;;  %11660 = vmatprep.mubr.msk.f32.mxu0 %vm14005_vm3, %v21548_v29 }
 0x6c0   : > { %v18824_v11 = vpop.f32.mrf.mxu0 }
 0x6c1   : > { %11661 = vmatmul.mubr.msk.f32.gmra.mxu0 %vm5440_vm4, %v18824_v11  ;;  %v5419_v20 = vmul.f32 %v18824_v11, %v18824_v11 }
 0x6c2   : > { %v5339_v0 = vpop.f32.mrf.mxu0  ;;  %11663 = vmatprep.mubr.msk.f32.mxu0 %vm14005_vm3, %v21548_v29 }
 0x6c4   : > { %v18830_v35 = vpop.f32.mrf.mxu0 }
 0x6c5   : > { %11664 = vmatmul.mubr.msk.f32.gmra.mxu0 %vm5440_vm4, %v18830_v35  ;;  %v5420_v32 = vmul.f32 %v18830_v35, %v18830_v35 }
 0x6c6   : > { %v5344_v39 = vpop.f32.mrf.mxu0  ;;  %11666 = vmatprep.mubr.msk.f32.mxu0 %vm14005_vm3, %v21548_v29 }
 0x6c8   : > { %v18836_v62 = vpop.f32.mrf.mxu0 }
 0x6c9   : > { %11667 = vmatmul.mubr.msk.f32.gmra.mxu0 %vm5440_vm4, %v18836_v62  ;;  %v5421_v51 = vmul.f32 %v18836_v62, %v18836_v62 }
 0x6ca   : > { %v5349_v37 = vpop.f32.mrf.mxu0  ;;  %11669 = vmatprep.mubr.msk.f32.mxu0 %vm14005_vm3, %v21548_v29 }
 0x6cc   : > { %v18842_v55 = vpop.f32.mrf.mxu0 }
 0x6cd   : > { %11670 = vmatmul.mubr.msk.f32.gmra.mxu0 %vm5440_vm4, %v18842_v55  ;;  %v5422_v21 = vmul.f32 %v18842_v55, %v18842_v55 }
 0x6ce   : > { %v5354_v10 = vpop.f32.mrf.mxu0  ;;  %11672 = vmatprep.mubr.msk.f32.mxu0 %vm14005_vm3, %v21548_v29 }
 0x6d0   : > { %v18848_v2 = vpop.f32.mrf.mxu0 }
 0x6d1   : > { %11673 = vmatmul.mubr.msk.f32.gmra.mxu0 %vm5440_vm4, %v18848_v2  ;;  %v5423_v46 = vmul.f32 %v18848_v2, %v18848_v2 }
 0x6d2   : > { %v5359_v4 = vpop.f32.mrf.mxu0  ;;  %11675 = vmatprep.mubr.msk.f32.mxu0 %vm14005_vm3, %v21548_v29 }
 0x6d4   : > { %v18854_v31 = vpop.f32.mrf.mxu0 }
 0x6d5   : > { %11676 = vmatmul.mubr.msk.f32.gmra.mxu0 %vm5440_vm4, %v18854_v31  ;;  %v5424_v5 = vmul.f32 %v18854_v31, %v18854_v31 }
 0x6d6   : > { %v5364_v24 = vpop.f32.mrf.mxu0  ;;  %11678 = vmatprep.mubr.msk.f32.mxu0 %vm14005_vm3, %v21548_v29 }
 0x6d7   : > { %v5429_v24 = vmul.f32 %v18818_v48, %v18752_v1 }
 0x6d8   : > { %v18860_v23 = vpop.f32.mrf.mxu0 }
 0x6d9   : > { %11679 = vmatmul.mubr.msk.f32.gmra.mxu0 %vm5440_vm4, %v18860_v23  ;;  %v5425_v50 = vmul.f32 %v18860_v23, %v18860_v23 }
 0x6da   : > { %v5369_v53 = vpop.f32.mrf.mxu0  ;;  %11681 = vmatprep.mubr.msk.f32.mxu0 %vm14005_vm3, %v21548_v29 }
 0x6dc   : > { %v18866_v38 = vpop.f32.mrf.mxu0 }
 0x6dd   : > { %11682 = vmatmul.mubr.msk.f32.gmra.mxu0 %vm5440_vm4, %v18866_v38  ;;  %v5426_v44 = vmul.f32 %v18866_v38, %v18866_v38 }
 0x6de   : > { %v5374_v22 = vpop.f32.mrf.mxu0  ;;  %11684 = vmatprep.mubr.msk.f32.mxu0 %vm14005_vm3, %v21548_v29 }
 0x6e0   : > { %v18872_v19 = vpop.f32.mrf.mxu0 }
 0x6e1   : > { %11685 = vmatmul.mubr.msk.f32.gmra.mxu0 %vm5440_vm4, %v18872_v19  ;;  %v5427_v52 = vmul.f32 %v18872_v19, %v18872_v19 }
 0x6e2   : > { %v5379_v42 = vpop.f32.mrf.mxu0  ;;  %11687 = vmatprep.mubr.msk.f32.mxu0 %vm14005_vm3, %v21548_v29 }
 0x6e3   : > { %v5430_v42 = vmul.f32 %v18824_v11, %v18758_v12 }
 0x6e4   : > { %v18878_v7 = vpop.f32.mrf.mxu0 }
 0x6e5   : > { %11688 = vmatmul.mubr.msk.f32.gmra.mxu0 %vm5440_vm4, %v18878_v7  ;;  %v5428_v37 = vmul.f32 %v18878_v7, %v18878_v7 }
 0x6e6   : > { %11690 = vmatprep.mubr.msk.f32.mxu0 %vm14005_vm3, %v21548_v29  ;;  %v5384_v36 = vpop.f32.mrf.mxu0 }
 0x6e9   : > { %11691 = vmatmul.mubr.msk.f32.gmra.mxu0 %vm5440_vm4, %v5407_v3 }
 0x6ea   : > { %11693 = vmatprep.mubr.msk.f32.mxu0 %vm14005_vm3, %v21548_v29 }
 0x6ed   : > { %11694 = vmatmul.mubr.msk.f32.gmra.mxu0 %vm5440_vm4, %v5408_v57  ;;  %v5431_v57 = vmul.f32 %v18830_v35, %v18764_v18 }
 0x6ee   : > { %11696 = vmatprep.mubr.msk.f32.mxu0 %vm14005_vm3, %v21548_v29 }
 0x6f1   : > { %11697 = vmatmul.mubr.msk.f32.gmra.mxu0 %vm5440_vm4, %v5409_v54 }
 0x6f2   : > { %11699 = vmatprep.mubr.msk.f32.mxu0 %vm14005_vm3, %v21548_v29 }
 0x6f5   : > { %11700 = vmatmul.mubr.msk.f32.gmra.mxu0 %vm5440_vm4, %v5410_v34 }
 0x6f6   : > { %11702 = vmatprep.mubr.msk.f32.mxu0 %vm14005_vm3, %v21548_v29 }
 0x6f9   : > { %11703 = vmatmul.mubr.msk.f32.gmra.mxu0 %vm5440_vm4, %v5411_v33  ;;  %v5432_v33 = vmul.f32 %v18836_v62, %v18770_v9 }
 0x6fa   : > { %11705 = vmatprep.mubr.msk.f32.mxu0 %vm14005_vm3, %v21548_v29 }
 0x6fd   : > { %11706 = vmatmul.mubr.msk.f32.gmra.mxu0 %vm5440_vm4, %v5412_v30 }
 0x6fe   : > { %11708 = vmatprep.mubr.msk.f32.mxu0 %vm14005_vm3, %v21548_v29 }
 0x701   : > { %11709 = vmatmul.mubr.msk.f32.gmra.mxu0 %vm5440_vm4, %v5413_v41 }
 0x702   : > { %11711 = vmatprep.mubr.msk.f32.mxu0 %vm14005_vm3, %v21548_v29 }
 0x705   : > { %11712 = vmatmul.mubr.msk.f32.gmra.mxu0 %vm5440_vm4, %v5414_v14  ;;  %v5433_v14 = vmul.f32 %v18842_v55, %v18776_v40 }
 0x706   : > { %11714 = vmatprep.mubr.msk.f32.mxu0 %vm14005_vm3, %v21548_v29 }
 0x709   : > { %11715 = vmatmul.mubr.msk.f32.gmra.mxu0 %vm5440_vm4, %v5415_v49 }
 0x70a   : > { %11717 = vmatprep.mubr.msk.f32.mxu0 %vm14005_vm3, %v21548_v29 }
 0x70d   : > { %11718 = vmatmul.mubr.msk.f32.gmra.mxu0 %vm5440_vm4, %v5416_v45  ;;  %v5434_v45 = vmul.f32 %v18848_v2, %v18782_v13 }
 0x70e   : > { %11720 = vmatprep.mubr.msk.f32.mxu0 %vm14005_vm3, %v21548_v29 }
 0x711   : > { %11721 = vmatmul.mubr.msk.f32.gmra.mxu0 %vm5440_vm4, %v5417_v61  ;;  %v5435_v61 = vmul.f32 %v18854_v31, %v18788_v43 }
 0x712   : > { %11723 = vmatprep.mubr.msk.f32.mxu0 %vm14005_vm3, %v21548_v29 }
 0x715   : > { %11724 = vmatmul.mubr.msk.f32.gmra.mxu0 %vm5440_vm4, %v5418_v25  ;;  %v5436_v25 = vmul.f32 %v18860_v23, %v18794_v6 }
 0x716   : > { %11726 = vmatprep.mubr.msk.f32.mxu0 %vm14005_vm3, %v21548_v29 }
 0x719   : > { %11727 = vmatmul.mubr.msk.f32.gmra.mxu0 %vm5440_vm4, %v5419_v20  ;;  %v5437_v20 = vmul.f32 %v18866_v38, %v18800_v16 }
 0x71a   : > { %11729 = vmatprep.mubr.msk.f32.mxu0 %vm14005_vm3, %v21548_v29 }
 0x71d   : > { %11730 = vmatmul.mubr.msk.f32.gmra.mxu0 %vm5440_vm4, %v5420_v32  ;;  %v19055_v32 = vld [vmem:[#allocation9 + $0x8] sm:$0xff] }
 0x71e   : > { %11732 = vmatprep.mubr.msk.f32.mxu0 %vm14005_vm3, %v21548_v29 }
 0x721   : > { %11733 = vmatmul.mubr.msk.f32.gmra.mxu0 %vm5440_vm4, %v5421_v51  ;;  %v19060_v51 = vld [vmem:[#allocation9 + $0x10] sm:$0xff] }
 0x722   : > { %11735 = vmatprep.mubr.msk.f32.mxu0 %vm14005_vm3, %v21548_v29 }
 0x723   : > { %v18962_v58 = vpop.f32.mrf.mxu0 }
 0x725   : > { %11736 = vmatmul.mubr.msk.f32.gmra.mxu0 %vm5440_vm4, %v5422_v21  ;;  %v11626_v60 = vpop.f32.mrf.mxu0  ;;  %v5438_v21 = vmul.f32 %v18872_v19, %v18806_v15 }
 0x726   : > { %11738 = vmatprep.mubr.msk.f32.mxu0 %vm14005_vm3, %v21548_v29  ;;  %v19074_v60 = vld [vmem:[#allocation9 + $0x20] sm:$0xff] }
 0x727   : > { %v18973_v47 = vpop.f32.mrf.mxu0 }
 0x729   : > { %11739 = vmatmul.mubr.msk.f32.gmra.mxu0 %vm5440_vm4, %v5423_v46  ;;  %v11629_v8 = vpop.f32.mrf.mxu0  ;;  %v19070_v46 = vld [vmem:[#allocation9 + $0x18] sm:$0xff] }
 0x72a   : > { %11741 = vmatprep.mubr.msk.f32.mxu0 %vm14005_vm3, %v21548_v29  ;;  %v19091_v8 = vld [vmem:[#allocation9 + $0x38] sm:$0xff] }
 0x72b   : > { %v18980_v27 = vpop.f32.mrf.mxu0 }
 0x72d   : > { %11742 = vmatmul.mubr.msk.f32.gmra.mxu0 %vm5440_vm4, %v5424_v5  ;;  %v11632_v26 = vpop.f32.mrf.mxu0  ;;  %v19085_v5 = vld [vmem:[#allocation9 + $0x30] sm:$0xff] }
 0x72e   : > { %11744 = vmatprep.mubr.msk.f32.mxu0 %vm14005_vm3, %v21548_v29 }
 0x72f   : > { %v18987_v56 = vpop.f32.mrf.mxu0 }
 0x731   : > { %11745 = vmatmul.mubr.msk.f32.gmra.mxu0 %vm5440_vm4, %v5425_v50  ;;  %v11635_v28 = vpop.f32.mrf.mxu0  ;;  %v19099_v50 = vld [vmem:[#allocation9 + $0x48] sm:$0x3f] }
 0x732   : > { %11747 = vmatprep.mubr.msk.f32.mxu0 %vm14005_vm3, %v21548_v29 }
 0x733   : > { %v5692_v59 = vpop.f32.mrf.mxu0 }
 0x735   : > { %11748 = vmatmul.mubr.msk.f32.gmra.mxu0 %vm5440_vm4, %v5426_v44  ;;  %v11638_v0 = vpop.f32.mrf.mxu0 }
 0x736   : > { %11750 = vmatprep.mubr.msk.f32.mxu0 %vm14005_vm3, %v21548_v29 }
 0x737   : > { %v5697_v39 = vpop.f32.mrf.mxu0 }
 0x739   : > { %11751 = vmatmul.mubr.msk.f32.gmra.mxu0 %vm5440_vm4, %v5427_v52  ;;  %v11641_v10 = vpop.f32.mrf.mxu0 }
 0x73a   : > { %11753 = vmatprep.mubr.msk.f32.mxu0 %vm14005_vm3, %v21548_v29 }
 0x73b   : > { %v5702_v4 = vpop.f32.mrf.mxu0 }
 0x73d   : > { %11754 = vmatmul.mubr.msk.f32.gmra.mxu0 %vm5440_vm4, %v5428_v37  ;;  %v11644_v53 = vpop.f32.mrf.mxu0 }
 0x73e   : > { %11756 = vmatprep.mubr.msk.f32.mxu0 %vm14005_vm3, %v21548_v29 }
 0x73f   : > { %v5707_v22 = vpop.f32.mrf.mxu0 }
 0x741   : > { %11757 = vmatmul.mubr.msk.f32.gmra.mxu0 %vm5440_vm4, %v5429_v24  ;;  %v11647_v36 = vpop.f32.mrf.mxu0 }
 0x742   : > { %11759 = vmatprep.mubr.msk.f32.mxu0 %vm14005_vm3, %v21548_v29 }
 0x743   : > { %v5712_v3 = vpop.f32.mrf.mxu0 }
 0x745   : > { %11760 = vmatmul.mubr.msk.f32.gmra.mxu0 %vm5440_vm4, %v5430_v42  ;;  %v11650_v54 = vpop.f32.mrf.mxu0 }
 0x746   : > { %11762 = vmatprep.mubr.msk.f32.mxu0 %vm14005_vm3, %v21548_v29 }
 0x747   : > { %v5717_v34 = vpop.f32.mrf.mxu0 }
 0x749   : > { %11763 = vmatmul.mubr.msk.f32.gmra.mxu0 %vm5440_vm4, %v5431_v57  ;;  %v11653_v30 = vpop.f32.mrf.mxu0 }
 0x74a   : > { %11765 = vmatprep.mubr.msk.f32.mxu0 %vm14005_vm3, %v21548_v29 }
 0x74b   : > { %v5722_v41 = vpop.f32.mrf.mxu0 }
 0x74c   : > { %11789 = vmatprep.subr.mxu1 %v5722_v41 }
 0x74d   : > { %11766 = vmatmul.mubr.msk.f32.gmra.mxu0 %vm5440_vm4, %v5432_v33  ;;  %v11656_v49 = vpop.f32.mrf.mxu0  ;;  %11790 = vmatpush3.msra.mxu1 %v5722_v41 }
 0x74e   : > { %11768 = vmatprep.mubr.msk.f32.mxu0 %vm14005_vm3, %v21548_v29  ;;  %11791 = vmatprep.subr.mxu1 %v5717_v34 }
 0x74f   : > { %11792 = vmatpush3.msra.mxu1 %v5717_v34 }
 0x750   : > { %11793 = vmatprep.subr.mxu1 %v5712_v3 }
 0x751   : > { %11769 = vmatmul.mubr.msk.f32.gmra.mxu0 %vm5440_vm4, %v5433_v14  ;;  %11794 = vmatpush3.msra.mxu1 %v5712_v3 }
 0x752   : > { %11771 = vmatprep.mubr.msk.f32.mxu0 %vm14005_vm3, %v21548_v29  ;;  %11795 = vmatprep.subr.mxu1 %v5707_v22 }
 0x753   : > { %11796 = vmatpush3.msra.mxu1 %v5707_v22 }
 0x754   : > { %11797 = vmatprep.subr.mxu1 %v5702_v4 }
 0x755   : > { %11772 = vmatmul.mubr.msk.f32.gmra.mxu0 %vm5440_vm4, %v5434_v45  ;;  %11798 = vmatpush3.msra.mxu1 %v5702_v4 }
 0x756   : > { %11774 = vmatprep.mubr.msk.f32.mxu0 %vm14005_vm3, %v21548_v29  ;;  %11799 = vmatprep.subr.mxu1 %v5697_v39 }
 0x757   : > { %11800 = vmatpush3.msra.mxu1 %v5697_v39 }
 0x758   : > { %11801 = vmatprep.subr.mxu1 %v5692_v59 }
 0x759   : > { %11775 = vmatmul.mubr.msk.f32.gmra.mxu0 %vm5440_vm4, %v5435_v61  ;;  %11802 = vmatpush3.msra.mxu1 %v5692_v59 }
 0x75a   : > { %11777 = vmatprep.mubr.msk.f32.mxu0 %vm14005_vm3, %v21548_v29  ;;  %11803 = vmatprep.subr.mxu1 %v18987_v56 }
 0x75b   : > { %11804 = vmatpush3.msra.mxu1 %v18987_v56 }
 0x75c   : > { %11805 = vmatprep.subr.mxu1 %v18980_v27 }
 0x75d   : > { %11778 = vmatmul.mubr.msk.f32.gmra.mxu0 %vm5440_vm4, %v5436_v25  ;;  %11806 = vmatpush3.msra.mxu1 %v18980_v27  ;;  %v19093_v27 = vld [vmem:[#allocation9 + $0x40] sm:$0xff] }
 0x75e   : > { %11780 = vmatprep.mubr.msk.f32.mxu0 %vm14005_vm3, %v21548_v29  ;;  %11807 = vmatprep.subr.mxu1 %v18973_v47 }
 0x75f   : > { %11808 = vmatpush3.msra.mxu1 %v18973_v47  ;;  %v5439_v47 = vmul.f32 %v18878_v7, %v18812_v17 }
 0x760   : > { %11809 = vmatprep.subr.mxu1 %v18962_v58 }
 0x761   : > { %11781 = vmatmul.mubr.msk.f32.gmra.mxu0 %vm5440_vm4, %v5437_v20  ;;  %11810 = vmatpush3.msra.mxu1 %v18962_v58  ;;  %v19083_v58 = vld [vmem:[#allocation9 + $0x28] sm:$0xff] }
 0x762   : > { %11783 = vmatprep.mubr.msk.f32.mxu0 %vm14005_vm3, %v21548_v29  ;;  %11812 = vmatmul.mubr.msk.f32.vlgmr.msra.gmra.mxu1 %vm5440_vm4, %v19055_v32 }
 0x763   : > { %11814 = vmatprep.mubr.msk.f32.mxu1 %vm5440_vm4, %v19060_v51 }
 0x765   : > { %11784 = vmatmul.mubr.msk.f32.gmra.mxu0 %vm5440_vm4, %v5438_v21 }
 0x766   : > { %11786 = vmatprep.mubr.msk.f32.mxu0 %vm14005_vm3, %v21548_v29  ;;  %11815 = vmatmul.mubr.msk.f32.gmra.mxu1 %vm5440_vm4, %v19070_v46 }
 0x767   : > { %11817 = vmatprep.mubr.msk.f32.mxu1 %vm5440_vm4, %v19074_v60 }
 0x769   : > { %11787 = vmatmul.mubr.msk.f32.gmra.mxu0 %vm5440_vm4, %v5439_v47 }
 0x76a   : > { %11818 = vmatmul.mubr.msk.f32.gmra.mxu1 %vm5440_vm4, %v19083_v58 }
 0x76b   : > { %11820 = vmatprep.mubr.msk.f32.mxu1 %vm5440_vm4, %v19085_v5 }
 0x76e   : > { %11821 = vmatmul.mubr.msk.f32.gmra.mxu1 %vm5440_vm4, %v19091_v8 }
 0x76f   : > { %11823 = vmatprep.mubr.msk.f32.mxu1 %vm5440_vm4, %v19093_v27 }
 0x772   : > { %11824 = vmatmul.mubr.msk.f32.gmra.mxu1 %vm5440_vm4, %v19099_v50 }
 0x773   : > { %11848 = vmatprep.mubr.msk.f32.mxu1 %vm5440_vm4, %v18968_v63 }
 0x77d   : > { %v5727_v26 = vpop.f32.mrf.mxu0 }
 0x77f   : > { %v11659_v56 = vpop.f32.mrf.mxu0 }
 0x781   : > { %v5732_v44 = vpop.f32.mrf.mxu0 }
 0x783   : > { %v11662_v28 = vpop.f32.mrf.mxu0 }
 0x785   : > { %v5737_v59 = vpop.f32.mrf.mxu0 }
 0x787   : > { %v11665_v52 = vpop.f32.mrf.mxu0 }
 0x789   : > { %v5742_v0 = vpop.f32.mrf.mxu0 }
 0x78b   : > { %v11668_v39 = vpop.f32.mrf.mxu0 }
 0x78d   : > { %v5747_v37 = vpop.f32.mrf.mxu0 }
 0x78f   : > { %v11671_v10 = vpop.f32.mrf.mxu0 }
 0x791   : > { %v5752_v4 = vpop.f32.mrf.mxu0 }
 0x793   : > { %v11674_v24 = vpop.f32.mrf.mxu0 }
 0x795   : > { %v5757_v53 = vpop.f32.mrf.mxu0 }
 0x797   : > { %v11677_v22 = vpop.f32.mrf.mxu0 }
 0x799   : > { %v5762_v42 = vpop.f32.mrf.mxu0 }
 0x79b   : > { %v11680_v36 = vpop.f32.mrf.mxu0 }
 0x79d   : > { %v5767_v3 = vpop.f32.mrf.mxu0 }
 0x79f   : > { %v11683_v57 = vpop.f32.mrf.mxu0 }
 0x7a1   : > { %v5772_v54 = vpop.f32.mrf.mxu0 }
 0x7a3   : > { %v11686_v34 = vpop.f32.mrf.mxu0 }
 0x7a5   : > { %v5777_v33 = vpop.f32.mrf.mxu0 }
 0x7a6   : > { %11826 = vmatprep.subr.mxu1 %v5777_v33 }
 0x7a7   : > { %v11689_v30 = vpop.f32.mrf.mxu0  ;;  %11827 = vmatpush3.msra.mxu1 %v5777_v33 }
 0x7a8   : > { %11828 = vmatprep.subr.mxu1 %v5772_v54 }
 0x7a9   : > { %v19105_v41 = vpop.f32.mrf.mxu0  ;;  %11829 = vmatpush3.msra.mxu1 %v5772_v54 }
 0x7aa   : > { %11830 = vmatprep.subr.mxu1 %v5767_v3 }
 0x7ab   : > { %v11692_v14 = vpop.f32.mrf.mxu0  ;;  %11831 = vmatpush3.msra.mxu1 %v5767_v3 }
 0x7ac   : > { %11832 = vmatprep.subr.mxu1 %v5762_v42 }
 0x7ad   : > { %v19107_v49 = vpop.f32.mrf.mxu0  ;;  %11833 = vmatpush3.msra.mxu1 %v5762_v42 }
 0x7ae   : > { %11834 = vmatprep.subr.mxu1 %v5757_v53 }
 0x7af   : > { %v11695_v45 = vpop.f32.mrf.mxu0  ;;  %11835 = vmatpush3.msra.mxu1 %v5757_v53 }
 0x7b0   : > { %11836 = vmatprep.subr.mxu1 %v5752_v4 }
 0x7b1   : > { %v19109_v61 = vpop.f32.mrf.mxu0  ;;  %11837 = vmatpush3.msra.mxu1 %v5752_v4 }
 0x7b2   : > { %11838 = vmatprep.subr.mxu1 %v5747_v37 }
 0x7b3   : > { %v11698_v25 = vpop.f32.mrf.mxu0  ;;  %11839 = vmatpush3.msra.mxu1 %v5747_v37 }
 0x7b4   : > { %11840 = vmatprep.subr.mxu1 %v5742_v0 }
 0x7b5   : > { %v5797_v20 = vpop.f32.mrf.mxu0  ;;  %11841 = vmatpush3.msra.mxu1 %v5742_v0 }
 0x7b6   : > { %11842 = vmatprep.subr.mxu1 %v5737_v59 }
 0x7b7   : > { %v11701_v21 = vpop.f32.mrf.mxu0  ;;  %11843 = vmatpush3.msra.mxu1 %v5737_v59 }
 0x7b8   : > { %11844 = vmatprep.subr.mxu1 %v5732_v44 }
 0x7b9   : > { %v5802_v47 = vpop.f32.mrf.mxu0  ;;  %11845 = vmatpush3.msra.mxu1 %v5732_v44 }
 0x7ba   : > { %11846 = vmatprep.subr.mxu1 %v5727_v26 }
 0x7bb   : > { %v11704_v56 = vpop.f32.mrf.mxu0  ;;  %11847 = vmatpush3.msra.mxu1 %v5727_v26 }
 0x7bc   : > { %11849 = vmatmul.mubr.msk.f32.vlgmr.msra.gmra.mxu1 %vm5440_vm4, %v19055_v32 }
 0x7bd   : > { %v5807_v28 = vpop.f32.mrf.mxu0  ;;  %11851 = vmatprep.mubr.msk.f32.mxu1 %vm5440_vm4, %v19060_v51 }
 0x7bf   : > { %v11707_v52 = vpop.f32.mrf.mxu0 }
 0x7c0   : > { %11852 = vmatmul.mubr.msk.f32.gmra.mxu1 %vm5440_vm4, %v19070_v46 }
 0x7c1   : > { %v5812_v0 = vpop.f32.mrf.mxu0  ;;  %11854 = vmatprep.mubr.msk.f32.mxu1 %vm5440_vm4, %v19074_v60 }
 0x7c3   : > { %v11710_v59 = vpop.f32.mrf.mxu0 }
 0x7c4   : > { %11855 = vmatmul.mubr.msk.f32.gmra.mxu1 %vm5440_vm4, %v19083_v58 }
 0x7c5   : > { %v5817_v26 = vpop.f32.mrf.mxu0  ;;  %11857 = vmatprep.mubr.msk.f32.mxu1 %vm5440_vm4, %v19085_v5 }
 0x7c7   : > { %v11713_v44 = vpop.f32.mrf.mxu0 }
 0x7c8   : > { %11858 = vmatmul.mubr.msk.f32.gmra.mxu1 %vm5440_vm4, %v19091_v8 }
 0x7c9   : > { %v5822_v39 = vpop.f32.mrf.mxu0  ;;  %11860 = vmatprep.mubr.msk.f32.mxu1 %vm5440_vm4, %v19093_v27 }
 0x7cb   : > { %v11716_v37 = vpop.f32.mrf.mxu0 }
 0x7cc   : > { %11861 = vmatmul.mubr.msk.f32.gmra.mxu1 %vm5440_vm4, %v19099_v50 }
 0x7cd   : > { %v5827_v10 = vpop.f32.mrf.mxu0  ;;  %11885 = vmatprep.mubr.msk.f32.mxu1 %vm5440_vm4, %v18968_v63 }
 0x7cf   : > { %v11719_v4 = vpop.f32.mrf.mxu0 }
 0x7d1   : > { %v5832_v24 = vpop.f32.mrf.mxu0 }
 0x7d2   : > { %11863 = vmatprep.subr.mxu1 %v5832_v24 }
 0x7d3   : > { %v11722_v53 = vpop.f32.mrf.mxu0  ;;  %11864 = vmatpush3.msra.mxu1 %v5832_v24 }
 0x7d4   : > { %11865 = vmatprep.subr.mxu1 %v5827_v10 }
 0x7d5   : > { %v19131_v22 = vpop.f32.mrf.mxu0  ;;  %11866 = vmatpush3.msra.mxu1 %v5827_v10 }
 0x7d6   : > { %11867 = vmatprep.subr.mxu1 %v5822_v39 }
 0x7d7   : > { %v11725_v42 = vpop.f32.mrf.mxu0  ;;  %11868 = vmatpush3.msra.mxu1 %v5822_v39 }
 0x7d8   : > { %11869 = vmatprep.subr.mxu1 %v5817_v26 }
 0x7d9   : > { %v19133_v36 = vpop.f32.mrf.mxu0  ;;  %11870 = vmatpush3.msra.mxu1 %v5817_v26 }
 0x7da   : > { %11871 = vmatprep.subr.mxu1 %v5812_v0 }
 0x7db   : > { %v11728_v3 = vpop.f32.mrf.mxu0  ;;  %11872 = vmatpush3.msra.mxu1 %v5812_v0 }
 0x7dc   : > { %11873 = vmatprep.subr.mxu1 %v5807_v28 }
 0x7dd   : > { %v19135_v57 = vpop.f32.mrf.mxu0  ;;  %11874 = vmatpush3.msra.mxu1 %v5807_v28 }
 0x7de   : > { %11875 = vmatprep.subr.mxu1 %v5802_v47 }
 0x7df   : > { %v11731_v54 = vpop.f32.mrf.mxu0  ;;  %11876 = vmatpush3.msra.mxu1 %v5802_v47 }
 0x7e0   : > { %11877 = vmatprep.subr.mxu1 %v5797_v20 }
 0x7e1   : > { %v5852_v34 = vpop.f32.mrf.mxu0  ;;  %11878 = vmatpush3.msra.mxu1 %v5797_v20 }
 0x7e2   : > { %11879 = vmatprep.subr.mxu1 %v19109_v61 }
 0x7e3   : > { %v11734_v33 = vpop.f32.mrf.mxu0  ;;  %11880 = vmatpush3.msra.mxu1 %v19109_v61 }
 0x7e4   : > { %11881 = vmatprep.subr.mxu1 %v19107_v49 }
 0x7e5   : > { %v5857_v30 = vpop.f32.mrf.mxu0  ;;  %11882 = vmatpush3.msra.mxu1 %v19107_v49 }
 0x7e6   : > { %11883 = vmatprep.subr.mxu1 %v19105_v41 }
 0x7e7   : > { %v11737_v14 = vpop.f32.mrf.mxu0  ;;  %11884 = vmatpush3.msra.mxu1 %v19105_v41 }
 0x7e8   : > { %11886 = vmatmul.mubr.msk.f32.vlgmr.msra.gmra.mxu1 %vm5440_vm4, %v19055_v32 }
 0x7e9   : > { %v5862_v45 = vpop.f32.mrf.mxu0  ;;  %11888 = vmatprep.mubr.msk.f32.mxu1 %vm5440_vm4, %v19060_v51 }
 0x7eb   : > { %v11740_v25 = vpop.f32.mrf.mxu0 }
 0x7ec   : > { %11889 = vmatmul.mubr.msk.f32.gmra.mxu1 %vm5440_vm4, %v19070_v46 }
 0x7ed   : > { %v5867_v61 = vpop.f32.mrf.mxu0  ;;  %11891 = vmatprep.mubr.msk.f32.mxu1 %vm5440_vm4, %v19074_v60 }
 0x7ef   : > { %v11743_v49 = vpop.f32.mrf.mxu0 }
 0x7f0   : > { %11892 = vmatmul.mubr.msk.f32.gmra.mxu1 %vm5440_vm4, %v19083_v58  ;;  %v6819_v49 = vld [vmem:[#allocation25 + $0x48] sm:$0xff] }
 0x7f1   : > { %v5872_v41 = vpop.f32.mrf.mxu0  ;;  %11894 = vmatprep.mubr.msk.f32.mxu1 %vm5440_vm4, %v19085_v5 }
 0x7f3   : > { %v11746_v20 = vpop.f32.mrf.mxu0 }
 0x7f4   : > { %11895 = vmatmul.mubr.msk.f32.gmra.mxu1 %vm5440_vm4, %v19091_v8  ;;  %v6817_v20 = vld [vmem:[#allocation25 + $0x38] sm:$0xff] }
 0x7f5   : > { %v5877_v21 = vpop.f32.mrf.mxu0  ;;  %11897 = vmatprep.mubr.msk.f32.mxu1 %vm5440_vm4, %v19093_v27 }
 0x7f7   : > { %v11749_v47 = vpop.f32.mrf.mxu0 }
 0x7f8   : > { %11898 = vmatmul.mubr.msk.f32.gmra.mxu1 %vm5440_vm4, %v19099_v50 }
 0x7f9   : > { %v5882_v56 = vpop.f32.mrf.mxu0  ;;  %11922 = vmatprep.mubr.msk.f32.mxu1 %vm5440_vm4, %v18968_v63 }
 0x7fb   : > { %v11752_v28 = vpop.f32.mrf.mxu0 }
 0x7fc   : > { %v6804_v28 = vld [vmem:[#allocation24] sm:$0xff] }
 0x7fd   : > { %v5887_v52 = vpop.f32.mrf.mxu0  ;;  %12051 = vmatprep.mubr.msk.f32.mxu0 %vm5440_vm4, %v6804_v28 }
 0x7fe   : > { %11900 = vmatprep.subr.mxu1 %v5887_v52 }
 0x7ff   : > { %v11755_v0 = vpop.f32.mrf.mxu0  ;;  %11901 = vmatpush3.msra.mxu1 %v5887_v52 }
 0x800   : > { %11902 = vmatprep.subr.mxu1 %v5882_v56 }
 0x801   : > { %v19163_v59 = vpop.f32.mrf.mxu0  ;;  %11903 = vmatpush3.msra.mxu1 %v5882_v56 }
 0x802   : > { %11904 = vmatprep.subr.mxu1 %v5877_v21 }
 0x803   : > { %v11758_v26 = vpop.f32.mrf.mxu0  ;;  %11905 = vmatpush3.msra.mxu1 %v5877_v21  ;;  %v6816_v21 = vld [vmem:[#allocation25 + $0x30] sm:$0xff] }
 0x804   : > { %11906 = vmatprep.subr.mxu1 %v5872_v41 }
 0x805   : > { %v19165_v44 = vpop.f32.mrf.mxu0  ;;  %11907 = vmatpush3.msra.mxu1 %v5872_v41  ;;  %v6818_v41 = vld [vmem:[#allocation25 + $0x40] sm:$0xff] }
 0x806   : > { %11908 = vmatprep.subr.mxu1 %v5867_v61 }
 0x807   : > { %v11761_v39 = vpop.f32.mrf.mxu0  ;;  %11909 = vmatpush3.msra.mxu1 %v5867_v61 }
 0x808   : > { %11910 = vmatprep.subr.mxu1 %v5862_v45 }
 0x809   : > { %v5902_v37 = vpop.f32.mrf.mxu0  ;;  %11911 = vmatpush3.msra.mxu1 %v5862_v45 }
 0x80a   : > { %11912 = vmatprep.subr.mxu1 %v5857_v30 }
 0x80b   : > { %v11764_v10 = vpop.f32.mrf.mxu0  ;;  %11913 = vmatpush3.msra.mxu1 %v5857_v30 }
 0x80c   : > { %11914 = vmatprep.subr.mxu1 %v5852_v34 }
 0x80d   : > { %v5907_v4 = vpop.f32.mrf.mxu0  ;;  %11915 = vmatpush3.msra.mxu1 %v5852_v34 }
 0x80e   : > { %11916 = vmatprep.subr.mxu1 %v19135_v57 }
 0x80f   : > { %v11767_v24 = vpop.f32.mrf.mxu0  ;;  %11917 = vmatpush3.msra.mxu1 %v19135_v57 }
 0x810   : > { %11918 = vmatprep.subr.mxu1 %v19133_v36 }
 0x811   : > { %v5912_v53 = vpop.f32.mrf.mxu0  ;;  %11919 = vmatpush3.msra.mxu1 %v19133_v36 }
 0x812   : > { %11920 = vmatprep.subr.mxu1 %v19131_v22 }
 0x813   : > { %v11770_v42 = vpop.f32.mrf.mxu0  ;;  %11921 = vmatpush3.msra.mxu1 %v19131_v22 }
 0x814   : > { %11923 = vmatmul.mubr.msk.f32.vlgmr.msra.gmra.mxu1 %vm5440_vm4, %v19055_v32 }
 0x815   : > { %v5917_v3 = vpop.f32.mrf.mxu0  ;;  %11925 = vmatprep.mubr.msk.f32.mxu1 %vm5440_vm4, %v19060_v51 }
 0x817   : > { %v11773_v54 = vpop.f32.mrf.mxu0 }
 0x818   : > { %11926 = vmatmul.mubr.msk.f32.gmra.mxu1 %vm5440_vm4, %v19070_v46 }
 0x819   : > { %v5922_v57 = vpop.f32.mrf.mxu0  ;;  %11928 = vmatprep.mubr.msk.f32.mxu1 %vm5440_vm4, %v19074_v60 }
 0x81b   : > { %v11776_v36 = vpop.f32.mrf.mxu0 }
 0x81c   : > { %11929 = vmatmul.mubr.msk.f32.gmra.mxu1 %vm5440_vm4, %v19083_v58 }
 0x81d   : > { %v5927_v22 = vpop.f32.mrf.mxu0  ;;  %11931 = vmatprep.mubr.msk.f32.mxu1 %vm5440_vm4, %v19085_v5 }
 0x81f   : > { %v11779_v34 = vpop.f32.mrf.mxu0 }
 0x820   : > { %11932 = vmatmul.mubr.msk.f32.gmra.mxu1 %vm5440_vm4, %v19091_v8 }
 0x821   : > { %v5932_v33 = vpop.f32.mrf.mxu0  ;;  %11934 = vmatprep.mubr.msk.f32.mxu1 %vm5440_vm4, %v19093_v27 }
 0x823   : > { %v11782_v30 = vpop.f32.mrf.mxu0 }
 0x824   : > { %11935 = vmatmul.mubr.msk.f32.gmra.mxu1 %vm5440_vm4, %v19099_v50 }
 0x825   : > { %v5937_v14 = vpop.f32.mrf.mxu0  ;;  %11959 = vmatprep.mubr.msk.f32.mxu1 %vm5440_vm4, %v18968_v63  ;;  %v6820_v63 = vld [vmem:[#allocation25 + $0x50] sm:$0xff] }
 0x827   : > { %v11785_v45 = vpop.f32.mrf.mxu0 }
 0x829   : > { %v5942_v25 = vpop.f32.mrf.mxu0 }
 0x82a   : > { %11937 = vmatprep.subr.mxu1 %v5942_v25 }
 0x82b   : > { %v11788_v61 = vpop.f32.mrf.mxu0  ;;  %11938 = vmatpush3.msra.mxu1 %v5942_v25 }
 0x82c   : > { %11939 = vmatprep.subr.mxu1 %v5937_v14 }
 0x82d   : > { %11940 = vmatpush3.msra.mxu1 %v5937_v14 }
 0x82e   : > { %11941 = vmatprep.subr.mxu1 %v5932_v33 }
 0x82f   : > { %11942 = vmatpush3.msra.mxu1 %v5932_v33 }
 0x830   : > { %11943 = vmatprep.subr.mxu1 %v5927_v22 }
 0x831   : > { %11944 = vmatpush3.msra.mxu1 %v5927_v22 }
 0x832   : > { %11945 = vmatprep.subr.mxu1 %v5922_v57 }
 0x833   : > { %11946 = vmatpush3.msra.mxu1 %v5922_v57 }
 0x834   : > { %11947 = vmatprep.subr.mxu1 %v5917_v3 }
 0x835   : > { %11948 = vmatpush3.msra.mxu1 %v5917_v3 }
 0x836   : > { %11949 = vmatprep.subr.mxu1 %v5912_v53 }
 0x837   : > { %11950 = vmatpush3.msra.mxu1 %v5912_v53 }
 0x838   : > { %11951 = vmatprep.subr.mxu1 %v5907_v4 }
 0x839   : > { %11952 = vmatpush3.msra.mxu1 %v5907_v4 }
 0x83a   : > { %11953 = vmatprep.subr.mxu1 %v5902_v37 }
 0x83b   : > { %11954 = vmatpush3.msra.mxu1 %v5902_v37 }
 0x83c   : > { %11955 = vmatprep.subr.mxu1 %v19165_v44 }
 0x83d   : > { %11956 = vmatpush3.msra.mxu1 %v19165_v44 }
 0x83e   : > { %11957 = vmatprep.subr.mxu1 %v19163_v59 }
 0x83f   : > { %11958 = vmatpush3.msra.mxu1 %v19163_v59 }
 0x840   : > { %11960 = vmatmul.mubr.msk.f32.vlgmr.msra.gmra.mxu1 %vm5440_vm4, %v19055_v32  ;;  %11974 = vmatprep.subr.mxu1 %v6820_v63  ;;  %v6815_v32 = vld [vmem:[#allocation25 + $0x28] sm:$0xff] }
 0x841   : > { %11975 = vmatpush3.msra.mxu1 %v6820_v63  ;;  %11962 = vmatprep.mubr.msk.f32.mxu1 %vm5440_vm4, %v19060_v51  ;;  %v6814_v51 = vld [vmem:[#allocation25 + $0x20] sm:$0xff] }
 0x842   : > { %11976 = vmatprep.subr.mxu1 %v6819_v49 }
 0x843   : > { %11977 = vmatpush3.msra.mxu1 %v6819_v49 }
 0x844   : > { %11963 = vmatmul.mubr.msk.f32.gmra.mxu1 %vm5440_vm4, %v19070_v46  ;;  %11978 = vmatprep.subr.mxu1 %v6818_v41  ;;  %v6813_v46 = vld [vmem:[#allocation25 + $0x18] sm:$0xff] }
 0x845   : > { %11979 = vmatpush3.msra.mxu1 %v6818_v41  ;;  %11965 = vmatprep.mubr.msk.f32.mxu1 %vm5440_vm4, %v19074_v60  ;;  %v6812_v60 = vld [vmem:[#allocation25 + $0x10] sm:$0xff] }
 0x846   : > { %11980 = vmatprep.subr.mxu1 %v6817_v20 }
 0x847   : > { %11981 = vmatpush3.msra.mxu1 %v6817_v20 }
 0x848   : > { %11966 = vmatmul.mubr.msk.f32.gmra.mxu1 %vm5440_vm4, %v19083_v58  ;;  %11982 = vmatprep.subr.mxu1 %v6816_v21  ;;  %v6811_v58 = vld [vmem:[#allocation25 + $0x8] sm:$0xff] }
 0x849   : > { %11983 = vmatpush3.msra.mxu1 %v6816_v21  ;;  %11968 = vmatprep.mubr.msk.f32.mxu1 %vm5440_vm4, %v19085_v5  ;;  %v6810_v5 = vld [vmem:[#allocation25] sm:$0xff] }
 0x84a   : > { %11984 = vmatprep.subr.mxu1 %v6815_v32 }
 0x84b   : > { %11985 = vmatpush3.msra.mxu1 %v6815_v32 }
 0x84c   : > { %11969 = vmatmul.mubr.msk.f32.gmra.mxu1 %vm5440_vm4, %v19091_v8  ;;  %11986 = vmatprep.subr.mxu1 %v6814_v51 }
 0x84d   : > { %11987 = vmatpush3.msra.mxu1 %v6814_v51  ;;  %11971 = vmatprep.mubr.msk.f32.mxu1 %vm5440_vm4, %v19093_v27 }
 0x84e   : > { %11988 = vmatprep.subr.mxu1 %v6813_v46 }
 0x84f   : > { %11989 = vmatpush3.msra.mxu1 %v6813_v46 }
 0x850   : > { %11972 = vmatmul.mubr.msk.f32.gmra.mxu1 %vm5440_vm4, %v19099_v50  ;;  %11990 = vmatprep.subr.mxu1 %v6812_v60 }
 0x851   : > { %11991 = vmatpush3.msra.mxu1 %v6812_v60  ;;  %11996 = vmatprep.mubr.msk.f32.mxu1 %vm5440_vm4, %v18752_v1  ;;  %v11813_v1 = vpop.f32.mrf.mxu1 }
 0x852   : > { %11992 = vmatprep.subr.mxu1 %v6811_v58  ;;  %v6552_v37 = vmul.f32 %v11813_v1, %v11813_v1 }
 0x853   : > { %11993 = vmatpush3.msra.mxu1 %v6811_v58 }
 0x854   : > { %11994 = vmatprep.subr.mxu1 %v6810_v5 }
 0x855   : > { %11995 = vmatpush3.msra.mxu1 %v6810_v5 }
 0x856   : > { %11997 = vmatmul.mubr.msk.f32.vlgmr.msra.gmra.mxu1 %vm5440_vm4, %v18758_v12  ;;  %v6042_v12 = vpop.f32.mrf.mxu1 }
 0x857   : > { %11999 = vmatprep.mubr.msk.f32.mxu1 %vm5440_vm4, %v18764_v18  ;;  %v6551_v24 = vmul.f32 %v6042_v12, %v6042_v12 }
 0x858   : > { %v19241_v18 = vpop.f32.mrf.mxu1 }
 0x859   : > { %v19313_v54 = vmul.f32 %v19241_v18, %v19241_v18 }
 0x85a   : > { %12000 = vmatmul.mubr.msk.f32.gmra.mxu1 %vm5440_vm4, %v18770_v9  ;;  %v6052_v9 = vpop.f32.mrf.mxu1 }
 0x85b   : > { %12002 = vmatprep.mubr.msk.f32.mxu1 %vm5440_vm4, %v18776_v40  ;;  %v19319_v34 = vmul.f32 %v6052_v9, %v6052_v9 }
 0x85c   : > { %v19251_v40 = vpop.f32.mrf.mxu1 }
 0x85d   : > { %v19323_v33 = vmul.f32 %v19251_v40, %v19251_v40 }
 0x85e   : > { %12003 = vmatmul.mubr.msk.f32.gmra.mxu1 %vm5440_vm4, %v18782_v13  ;;  %v19257_v13 = vpop.f32.mrf.mxu1 }
 0x85f   : > { %12005 = vmatprep.mubr.msk.f32.mxu1 %vm5440_vm4, %v18788_v43  ;;  %v19329_v45 = vmul.f32 %v19257_v13, %v19257_v13 }
 0x860   : > { %v19263_v43 = vpop.f32.mrf.mxu1 }
 0x861   : > { %v19336_v49 = vmul.f32 %v19263_v43, %v19263_v43 }
 0x862   : > { %12006 = vmatmul.mubr.msk.f32.gmra.mxu1 %vm5440_vm4, %v18794_v6  ;;  %v19267_v6 = vpop.f32.mrf.mxu1 }
 0x863   : > { %12008 = vmatprep.mubr.msk.f32.mxu1 %vm5440_vm4, %v18800_v16  ;;  %v19346_v32 = vmul.f32 %v19267_v6, %v19267_v6 }
 0x864   : > { %v19269_v16 = vpop.f32.mrf.mxu1 }
 0x865   : > { %v19350_v51 = vmul.f32 %v19269_v16, %v19269_v16 }
 0x866   : > { %12009 = vmatmul.mubr.msk.f32.gmra.mxu1 %vm5440_vm4, %v18806_v15  ;;  %v19271_v15 = vpop.f32.mrf.mxu1 }
 0x867   : > { %12011 = vmatprep.mubr.msk.f32.mxu1 %vm5440_vm4, %v18812_v17  ;;  %v19354_v46 = vmul.f32 %v19271_v15, %v19271_v15 }
 0x86a   : > { %12012 = vmatmul.mubr.msk.f32.gmra.mxu1 %vm5440_vm4, %v18818_v48 }
 0x86b   : > { %12014 = vmatprep.mubr.msk.f32.mxu1 %vm5440_vm4, %v18824_v11 }
 0x86e   : > { %12015 = vmatmul.mubr.msk.f32.gmra.mxu1 %vm5440_vm4, %v18830_v35 }
 0x86f   : > { %12017 = vmatprep.mubr.msk.f32.mxu1 %vm5440_vm4, %v18836_v62 }
 0x872   : > { %12018 = vmatmul.mubr.msk.f32.gmra.mxu1 %vm5440_vm4, %v18842_v55 }
 0x873   : > { %12020 = vmatprep.mubr.msk.f32.mxu1 %vm5440_vm4, %v18848_v2 }
 0x876   : > { %12021 = vmatmul.mubr.msk.f32.gmra.mxu1 %vm5440_vm4, %v18854_v31 }
 0x877   : > { %12023 = vmatprep.mubr.msk.f32.mxu1 %vm5440_vm4, %v18860_v23 }
 0x87a   : > { %12024 = vmatmul.mubr.msk.f32.gmra.mxu1 %vm5440_vm4, %v18866_v38 }
 0x87b   : > { %12026 = vmatprep.mubr.msk.f32.mxu1 %vm5440_vm4, %v18872_v19 }
 0x87c   : > { %v11850_v17 = vpop.f32.mrf.mxu1 }
 0x87d   : > { %v6562_v10 = vmul.f32 %v11850_v17, %v11850_v17  ;;  %v19309_v42 = vmul.f32 %v11850_v17, %v11813_v1 }
 0x87e   : > { %12027 = vmatmul.mubr.msk.f32.gmra.mxu1 %vm5440_vm4, %v18878_v7  ;;  %v6157_v48 = vpop.f32.mrf.mxu1 }
 0x87f   : > { %12082 = vmatprep.mubr.msk.f32.mxu1 %vm5440_vm4, %v6804_v28  ;;  %v6561_v53 = vmul.f32 %v6157_v48, %v6157_v48  ;;  %v6692_v3 = vadd.f32 %v6562_v10, %v6552_v37  ;;  %v19315_v36 = vmul.f32 %v6157_v48, %v6042_v12  ;;  %v6672_v25 = vmul.f32 2.0, %v19309_v42 }
 0x880   : > { %v11853_v11 = vpop.f32.mrf.mxu1 }
 0x881   : > { %v6564_v57 = vmul.f32 %v11853_v11, %v11853_v11  ;;  %v6691_v30 = vadd.f32 %v6561_v53, %v6551_v24  ;;  %v6702_v61 = vadd.f32 0.0001, %v6692_v3  ;;  %v19339_v41 = vmul.f32 %v11853_v11, %v19241_v18 }
 0x882   : > { %v6167_v35 = vpop.f32.mrf.mxu1  ;;  %v6671_v60 = vmul.f32 2.0, %v19315_v36 }
 0x883   : > { %v19325_v14 = vmul.f32 %v6167_v35, %v6167_v35  ;;  %v6694_v20 = vadd.f32 %v6564_v57, %v19313_v54  ;;  %v19342_v21 = vmul.f32 %v6167_v35, %v6052_v9  ;;  %v6701_v5 = vadd.f32 0.0001, %v6691_v30 }
 0x884   : > { %v11856_v62 = vpop.f32.mrf.mxu1  ;;  %v19366_v9 = vadd.f32 0.0001, %v6672_v25  ;;  %12993 = vrcp.f32 %v6702_v61  ;;  %v6674_v11 = vmul.f32 2.0, %v19339_v41 }
 0x885   : > { %v19332_v63 = vmul.f32 %v11856_v62, %v11856_v62  ;;  %v6693_v1 = vadd.f32 %v19325_v14, %v19319_v34  ;;  %v19362_v12 = vmul.f32 %v11856_v62, %v19251_v40  ;;  %v6704_v35 = vadd.f32 0.0001, %v6694_v20 }
 0x886   : > { %v6177_v55 = vpop.f32.mrf.mxu1  ;;  %v6673_v28 = vmul.f32 2.0, %v19342_v21  ;;  %v19376_v40 = vadd.f32 0.0001, %v6671_v60  ;;  %12995 = vrcp.f32 %v6701_v5 }
 0x887   : > { %v19364_v18 = vmul.f32 %v6177_v55, %v6177_v55  ;;  %v6696_v17 = vadd.f32 %v19332_v63, %v19323_v33  ;;  %v19379_v62 = vmul.f32 %v6177_v55, %v19257_v13  ;;  %v19390_v55 = vadd.f32 0.0001, %v6674_v11 }
 0x888   : > { %v19273_v2 = vpop.f32.mrf.mxu1  ;;  %21552 = vst [vmem:[#allocation156_spill] sm:$0xff] %v19376_v40  ;;  %12997 = vrcp.f32 %v6704_v35 }
 0x889   : > { %v19374_v3 = vmul.f32 %v19273_v2, %v19273_v2  ;;  %v6695_v20 = vadd.f32 %v19364_v18, %v19329_v45  ;;  %v6706_v29 = vadd.f32 0.0001, %v6696_v17 }
 0x88a   : > { %v19275_v31 = vpop.f32.mrf.mxu1 }
 0x88b   : > { %v6567_v17 = vmul.f32 %v19275_v31, %v19275_v31 }
 0x88c   : > { %v19277_v23 = vpop.f32.mrf.mxu1 }
 0x88e   : > { %v19279_v38 = vpop.f32.mrf.mxu1 }
 0x8a8   : > { %v19281_v19 = vpop.f32.mrf.mxu1 }
 0x8a9   : > { %v6582_v30 = vsub.f32 %v19281_v19, %v6552_v37  ;;  %v19392_v19 = vadd.f32 0.0001, %v6673_v28  ;;  %v6675_v37 = vmul.f32 2.0, %v19379_v62 }
 0x8aa   : > { %v19283_v7 = vpop.f32.mrf.mxu1 }
 0x8ab   : > { %v6581_v60 = vsub.f32 %v19283_v7, %v6551_v24  ;;  %v19417_v35 = vadd.f32 0.0001, %v6675_v37 }
 0x8ac   : > { %v19285_v8 = vpop.f32.mrf.mxu1 }
 0x8ad   : > { %v6584_v7 = vsub.f32 %v19285_v8, %v19313_v54 }
 0x8ae   : > { %v19287_v27 = vpop.f32.mrf.mxu1 }
 0x8af   : > { %v6583_v8 = vsub.f32 %v19287_v27, %v19319_v34  ;;  %v6697_v34 = vadd.f32 %v6567_v17, %v19346_v32 }
 0x8b0   : > { %v19289_v50 = vpop.f32.mrf.mxu1 }
 0x8b2   : > { %v19291_v47 = vpop.f32.mrf.mxu1 }
 0x8b4   : > { %v19293_v56 = vpop.f32.mrf.mxu1 }
 0x8b6   : > { %v19297_v52 = vpop.f32.mrf.mxu1 }
 0x8b8   : > { %v19299_v0 = vpop.f32.mrf.mxu1 }
 0x8ba   : > { %v19301_v59 = vpop.f32.mrf.mxu1 }
 0x8d4   : > { %v11924_v26 = vpop.f32.mrf.mxu1 }
 0x8d5   : > { %v6592_v48 = vsub.f32 %v11924_v26, %v6562_v10  ;;  %v6703_v26 = vadd.f32 0.0001, %v6693_v1  ;;  %v6676_v10 = vmul.f32 2.0, %v19362_v12 }
 0x8d6   : > { %v19303_v44 = vpop.f32.mrf.mxu1 }
 0x8d7   : > { %v6591_v25 = vsub.f32 %v19303_v44, %v6561_v53  ;;  %v6632_v40 = vadd.f32 %v6592_v48, %v6582_v30  ;;  %v6698_v44 = vadd.f32 %v19374_v3, %v19336_v49  ;;  %v19399_v53 = vmul.f32 %v19273_v2, %v19263_v43 }
 0x8d8   : > { %v19305_v39 = vpop.f32.mrf.mxu1  ;;  %12999 = vrcp.f32 %v6703_v26  ;;  %v19411_v2 = vmul.f32 %v19275_v31, %v19267_v6  ;;  %v6586_v6 = vsub.f32 %v19289_v50, %v19323_v33  ;;  %v6585_v30 = vsub.f32 %v19291_v47, %v19329_v45 }
 0x8d9   : > { %v6594_v13 = vsub.f32 %v19305_v39, %v6564_v57  ;;  %v6631_v24 = vadd.f32 %v6591_v25, %v6581_v60  ;;  %v19403_v39 = vadd.f32 0.0001, %v6676_v10  ;;  %v6705_v57 = vadd.f32 0.0001, %v6695_v20 }
 0x8da   : > { %v19307_v4 = vpop.f32.mrf.mxu1  ;;  %13001 = vrcp.f32 %v6706_v29  ;;  %v6642_v48 = vadd.f32 0.0009, %v6632_v40  ;;  %v6708_v43 = vadd.f32 0.0001, %v6698_v44  ;;  %v6678_v29 = vmul.f32 2.0, %v19399_v53  ;;  %v12994_v40 = vpop.eup %12993 }
 0x8db   : > { %v6593_v1 = vsub.f32 %v19307_v4, %v19325_v14  ;;  %v6634_v11 = vadd.f32 %v6594_v13, %v6584_v7  ;;  %v6570_v4 = vmul.f32 %v19277_v23, %v19277_v23  ;;  %v6641_v14 = vadd.f32 0.0009, %v6631_v24  ;;  %v12996_v45 = vpop.eup %12995 }
 0x8dc   : > { %v19317_v22 = vpop.f32.mrf.mxu1  ;;  %13003 = vrcp.f32 %v6705_v57  ;;  %v6677_v33 = vmul.f32 2.0, %v19411_v2  ;;  %v6588_v10 = vsub.f32 %v19293_v56, %v19336_v49  ;;  %v6707_v13 = vadd.f32 0.0001, %v6697_v34  ;;  %v12998_v7 = vpop.eup %12997 }
 0x8dd   : > { %v6596_v54 = vsub.f32 %v19317_v22, %v19332_v63  ;;  %v6633_v31 = vadd.f32 %v6593_v1, %v6583_v8  ;;  %v6569_v22 = vmul.f32 %v19279_v38, %v19279_v38  ;;  %13005 = vrcp.f32 %v6642_v48 }
 0x8de   : > { %v19357_v58 = vpop.f32.mrf.mxu1  ;;  %v6644_v63 = vadd.f32 0.0009, %v6634_v11  ;;  %13007 = vrcp.f32 %v6708_v43  ;;  %v6688_v24 = vadd.f32 0.0001, %v6678_v29  ;;  %v6590_v49 = vsub.f32 %v19299_v0, %v19350_v51 }
 0x8df   : > { %v6595_v27 = vsub.f32 %v19357_v58, %v19364_v18  ;;  %v6636_v25 = vadd.f32 %v6596_v54, %v6586_v6  ;;  %v19436_v58 = vmul.f32 %v19277_v23, %v19269_v16  ;;  %v6700_v18 = vadd.f32 %v6570_v4, %v19350_v51 }
 0x8e0   : > { %v19383_v61 = vpop.f32.mrf.mxu1  ;;  %13009 = vrcp.f32 %v6641_v14  ;;  %v6643_v20 = vadd.f32 0.0009, %v6633_v31  ;;  %v19451_v48 = vmul.f32 %v19279_v38, %v19271_v15  ;;  %v6714_v14 = vmul.f32 %v12994_v40, %v19366_v9 }
 0x8e1   : > { %v6598_v50 = vsub.f32 %v19383_v61, %v19374_v3  ;;  %v6635_v60 = vadd.f32 %v6595_v27, %v6585_v30  ;;  %v6699_v3 = vadd.f32 %v6569_v22, %v19354_v46  ;;  %v6587_v61 = vsub.f32 %v19297_v52, %v19346_v32 }
 0x8e2   : > { %v6417_v5 = vpop.f32.mrf.mxu1  ;;  %13011 = vrcp.f32 %v6644_v63  ;;  %v6646_v16 = vadd.f32 0.0009, %v6636_v25  ;;  %v6680_v57 = vmul.f32 2.0, %v19436_v58  ;;  %v6710_v56 = vadd.f32 0.0001, %v6700_v18 }
 0x8e3   : > { %v6597_v47 = vsub.f32 %v6417_v5, %v6567_v17  ;;  %v6638_v23 = vadd.f32 %v6598_v50, %v6588_v10  ;;  %v6589_v5 = vsub.f32 %v19301_v59, %v19354_v46  ;;  %13013 = vrcp.f32 %v6643_v20 }
 0x8e4   : > { %v11936_v28 = vpop.f32.mrf.mxu1  ;;  %v6645_v1 = vadd.f32 0.0009, %v6635_v60  ;;  %13015 = vrcp.f32 %v6707_v13  ;;  %v6709_v11 = vadd.f32 0.0001, %v6699_v3  ;;  %v19454_v46 = vadd.f32 0.0001, %v6677_v33 }
 0x8e5   : > { %v6600_v44 = vsub.f32 %v11936_v28, %v6570_v4  ;;  %v6637_v17 = vadd.f32 %v6597_v47, %v6587_v61  ;;  %v13000_v32 = vpop.eup %12999  ;;  %13017 = vrcp.f32 %v6646_v16  ;;  %v6648_v54 = vadd.f32 0.0009, %v6638_v23 }
 0x8e6   : > { %v6427_v26 = vpop.f32.mrf.mxu1  ;;  %13019 = vrcp.f32 %v6710_v56  ;;  %v19458_v15 = vadd.f32 0.0001, %v6680_v57  ;;  %v6718_v20 = vmul.f32 %v12998_v7, %v19390_v55 }
 0x8e7   : > { %v6599_v37 = vsub.f32 %v6427_v26, %v6569_v22  ;;  %v13002_v8 = vpop.eup %13001  ;;  %v6640_v0 = vadd.f32 %v6600_v44, %v6590_v49  ;;  %13021 = vrcp.f32 %v6645_v1  ;;  %v6647_v38 = vadd.f32 0.0009, %v6637_v17  ;;  %v21553_v26 = vld [vmem:[#allocation156_spill] sm:$0xff] }
 0x8e8   : > { %13023 = vrcp.f32 %v6709_v11  ;;  %v19462_v22 = vmul.f32 2.0, %v19451_v48  ;;  %v6712_v10 = vmul.f32 %v12996_v45, %v21553_v26  ;;  %v6722_v47 = vmul.f32 %v13002_v8, %v19403_v39 }
 0x8e9   : > { %v6639_v51 = vadd.f32 %v6599_v37, %v6589_v5  ;;  %v13004_v28 = vpop.eup %13003  ;;  %13025 = vrcp.f32 %v6648_v54  ;;  %v6650_v63 = vadd.f32 0.0009, %v6640_v0 }
 0x8ea   : > { %v13006_v34 = vpop.eup %13005  ;;  %13027 = vrcp.f32 %v6647_v38  ;;  %v6720_v23 = vmul.f32 %v13004_v28, %v19417_v35 }
 0x8eb   : > { %v13008_v9 = vpop.eup %13007  ;;  %13029 = vrcp.f32 %v6650_v63 }
 0x8ec   : > { %v19471_v45 = vmul.f32 %v13008_v9, %v6688_v24 }
 0x8ed   : > { %v13010_v18 = vpop.eup %13009 }
 0x8ef   : > { %v13012_v16 = vpop.eup %13011 }
 0x8f0   : > { %v13014_v5 = vpop.eup %13013 }
 0x8f1   : > { %v13016_v17 = vpop.eup %13015 }
 0x8f2   : > { %v13018_v54 = vpop.eup %13017 }
 0x900   : > { %v11961_v52 = vpop.f32.mrf.mxu1 }
 0x901   : > { %v6602_v43 = vsub.f32 %v11961_v52, %v19309_v42 }
 0x902   : > { %v6502_v59 = vpop.f32.mrf.mxu1 }
 0x903   : > { %v6612_v29 = vmul.f32 2.0, %v6602_v43  ;;  %v6601_v4 = vsub.f32 %v6502_v59, %v19315_v36  ;;  %v6649_v36 = vadd.f32 0.0009, %v6639_v51 }
 0x904   : > { %v11964_v42 = vpop.f32.mrf.mxu1 }
 0x905   : > { %v6622_v6 = vadd.f32 0.0009, %v6612_v29  ;;  %v6611_v31 = vmul.f32 2.0, %v6601_v4  ;;  %v6604_v27 = vsub.f32 %v11964_v42, %v19339_v41  ;;  %v6716_v41 = vmul.f32 %v13000_v32, %v19392_v19  ;;  %v13020_v29 = vpop.eup %13019 }
 0x906   : > { %v6512_v30 = vpop.f32.mrf.mxu1  ;;  %13031 = vrcp.f32 %v6649_v36 }
 0x907   : > { %v6654_v40 = vmul.f32 %v13006_v34, %v6622_v6  ;;  %v6621_v25 = vadd.f32 0.0009, %v6611_v31  ;;  %v6614_v50 = vmul.f32 2.0, %v6604_v27  ;;  %v6603_v33 = vsub.f32 %v6512_v30, %v19342_v21 }
 0x908   : > { %v11967_v60 = vpop.f32.mrf.mxu1 }
 0x909   : > { %v6732_v13 = vmul.f32 %v6714_v14, %v6654_v40  ;;  %v6652_v3 = vmul.f32 %v13010_v18, %v6621_v25  ;;  %v6624_v61 = vadd.f32 0.0009, %v6614_v50  ;;  %v6613_v44 = vmul.f32 2.0, %v6603_v33 }
 0x90a   : > { %v6606_v21 = vsub.f32 %v11967_v60, %v19362_v12  ;;  %v6522_v37 = vpop.f32.mrf.mxu1  ;;  %v6775_v1 = vsel %vm6741_vm0, %v6654_v40, 0.0 }
 0x90b   : > { %v6731_v55 = vmul.f32 %v6712_v10, %v6652_v3  ;;  %v6658_v19 = vmul.f32 %v13012_v16, %v6624_v61  ;;  %v6774_v7 = vsel %vm6741_vm0, %v6652_v3, 0.0  ;;  %v6623_v57 = vadd.f32 0.0009, %v6613_v44 }
 0x90c   : > { %v6616_v39 = vmul.f32 2.0, %v6606_v21  ;;  %v6605_v56 = vsub.f32 %v6522_v37, %v19379_v62  ;;  %v11970_v49 = vpop.f32.mrf.mxu1  ;;  %v6743_v35 = vsel %vm6741_vm0, %v6732_v13, 0.0  ;;  %v6776_v51 = vadd.f32 %v6775_v1, %v6774_v7 }
 0x90d   : > { %v6742_v12 = vsel %vm6741_vm0, %v6731_v55, 0.0  ;;  %v6608_v24 = vsub.f32 %v11970_v49, %v19399_v53  ;;  %v6734_v52 = vmul.f32 %v6718_v20, %v6658_v19  ;;  %v6656_v32 = vmul.f32 %v13014_v5, %v6623_v57  ;;  %v13022_v53 = vpop.eup %13021 }
 0x90e   : > { %v6626_v11 = vadd.f32 0.0009, %v6616_v39  ;;  %v6615_v43 = vmul.f32 2.0, %v6605_v56  ;;  %v6532_v8 = vpop.f32.mrf.mxu1  ;;  %v6744_v0 = vadd.f32 %v6743_v35, %v6742_v12  ;;  %v13024_v63 = vpop.eup %13023  ;;  %v6779_v30 = vsel %vm6741_vm0, %v6658_v19, 0.0 }
 0x90f   : > { %v6618_v62 = vmul.f32 2.0, %v6608_v24  ;;  %v6607_v59 = vsub.f32 %v6532_v8, %v19411_v2  ;;  %v6733_v4 = vmul.f32 %v6716_v41, %v6656_v32  ;;  %v6777_v14 = vsel %vm6741_vm0, %v6656_v32, 0.0  ;;  %v13026_v40 = vpop.eup %13025 }
 0x910   : > { %v6662_v38 = vmul.f32 %v13018_v54, %v6626_v11  ;;  %v6625_v42 = vadd.f32 0.0009, %v6615_v43  ;;  %v11973_v28 = vpop.f32.mrf.mxu1  ;;  %v6778_v6 = vadd.f32 %v6777_v14, %v6776_v51  ;;  %v6747_v36 = vsel %vm6741_vm0, %v6734_v52, 0.0 }
 0x911   : > { %v6628_v31 = vadd.f32 0.0009, %v6618_v62  ;;  %v6617_v27 = vmul.f32 2.0, %v6607_v59  ;;  %v6610_v34 = vsub.f32 %v11973_v28, %v19436_v58  ;;  %v6745_v2 = vsel %vm6741_vm0, %v6733_v4, 0.0  ;;  %v13028_v58 = vpop.eup %13027 }
 0x912   : > { %v6660_v9 = vmul.f32 %v13022_v53, %v6625_v42  ;;  %v6746_v25 = vadd.f32 %v6745_v2, %v6744_v0  ;;  %v6736_v50 = vmul.f32 %v6722_v47, %v6662_v38  ;;  %v6780_v33 = vadd.f32 %v6779_v30, %v6778_v6  ;;  %v6542_v26 = vpop.f32.mrf.mxu1 }
 0x913   : > { %v6627_v18 = vadd.f32 0.0009, %v6617_v27  ;;  %v6666_v41 = vmul.f32 %v13026_v40, %v6628_v31  ;;  %v6620_v60 = vmul.f32 2.0, %v6610_v34  ;;  %v6724_v13 = vmul.f32 %v13016_v17, %v19454_v46 }
 0x914   : > { %v6735_v10 = vmul.f32 %v6720_v23, %v6660_v9  ;;  %v6781_v20 = vsel %vm6741_vm0, %v6660_v9, 0.0  ;;  %v6783_v3 = vsel %vm6741_vm0, %v6662_v38, 0.0  ;;  %v6748_v61 = vadd.f32 %v6747_v36, %v6746_v25  ;;  %v13030_v23 = vpop.eup %13029 }
 0x915   : > { %v6782_v16 = vadd.f32 %v6781_v20, %v6780_v33  ;;  %v6664_v21 = vmul.f32 %v13028_v58, %v6627_v18  ;;  %v6630_v37 = vadd.f32 0.0009, %v6620_v60  ;;  %v6609_v47 = vsub.f32 %v6542_v26, %v19451_v48  ;;  %v13032_v46 = vpop.eup %13031  ;;  %v6805_v58 = vld [vmem:[#allocation24 + $0x8] sm:$0xff] }
 0x916   : > { %v6749_v44 = vsel %vm6741_vm0, %v6735_v10, 0.0  ;;  %v19490_v55 = vpop.f32.mrf.mxu1  ;;  %v6689_v19 = vadd.f32 0.0001, %v19462_v22  ;;  %v6751_v7 = vsel %vm6741_vm0, %v6736_v50, 0.0  ;;  %v6738_v56 = vmul.f32 %v19471_v45, %v6666_v41 }
 0x917   : > { %v6750_v57 = vadd.f32 %v6749_v44, %v6748_v61  ;;  %v6784_v39 = vadd.f32 %v6783_v3, %v6782_v16  ;;  %v6737_v49 = vmul.f32 %v6724_v13, %v6664_v21  ;;  %v6785_v5 = vsel %vm6741_vm0, %v6664_v21, 0.0  ;;  %v6806_v13 = vld [vmem:[#allocation24 + $0x10] sm:$0xff]  ;;  %v6807_v3 = vld [vmem:[#allocation24 + $0x18] sm:$0xff]  ;;  %v6808_v61 = vld [vmem:[#allocation24 + $0x20] sm:$0xff] }
 0x918   : > { %v6619_v35 = vmul.f32 2.0, %v6609_v47  ;;  %v19496_v1 = vpop.f32.mrf.mxu1  ;;  %v6787_v24 = vsel %vm6741_vm0, %v6666_v41, 0.0  ;;  %v6670_v17 = vmul.f32 %v13030_v23, %v6630_v37  ;;  %v6730_v8 = vmul.f32 %v13020_v29, %v19458_v15  ;;  %v6809_v16 = vld [vmem:[#allocation24 + $0x28] sm:$0xf]  ;;  %v7214_v21 = vld [vmem:[#allocation13 + $0x28] sm:$0xf] }
 0x919   : > { %v6752_v12 = vadd.f32 %v6751_v7, %v6750_v57  ;;  %v6786_v48 = vadd.f32 %v6785_v5, %v6784_v39  ;;  %v6753_v32 = vsel %vm6741_vm0, %v6737_v49, 0.0  ;;  %v6728_v45 = vmul.f32 %v13024_v63, %v6689_v19  ;;  %v7213_v37 = vld [vmem:[#allocation13 + $0x20] sm:$0xff]  ;;  %v7212_v47 = vld [vmem:[#allocation13 + $0x18] sm:$0xff]  ;;  %v7210_v23 = vld [vmem:[#allocation13 + $0x8] sm:$0xff] }
 0x91a   : > { %v6629_v52 = vadd.f32 0.0009, %v6619_v35  ;;  %v12001_v22 = vpop.f32.mrf.mxu1  ;;  %v6755_v51 = vsel %vm6741_vm0, %v6738_v56, 0.0  ;;  %v6740_v14 = vmul.f32 %v6730_v8, %v6670_v17  ;;  %v6791_v6 = vsel %vm6759_vm5, %v6670_v17, 0.0  ;;  %v7209_v19 = vld [vmem:[#allocation13] sm:$0xff] }
 0x91b   : > { %v6754_v11 = vadd.f32 %v6753_v32, %v6752_v12  ;;  %v6788_v43 = vadd.f32 %v6787_v24, %v6786_v48  ;;  %v21554_v44 = vmov 0.0  }
 0x91c   : > { %v6668_v54 = vmul.f32 %v13032_v46, %v6629_v52  ;;  %v6897_v0 = vpop.f32.mrf.mxu1  ;;  %v6760_v29 = vsel %vm6759_vm5, %v6740_v14, 0.0 }
 0x91d   : > { %v6756_v62 = vadd.f32 %v6755_v51, %v6754_v11 }
 0x91e   : > { %v12004_v59 = vpop.f32.mrf.mxu1  ;;  %v6739_v4 = vmul.f32 %v6728_v45, %v6668_v54  ;;  %v6789_v38 = vsel %vm6741_vm0, %v6668_v54, 0.0 }
 0x91f   : > { %v6790_v42 = vadd.f32 %v6789_v38, %v6788_v43 }
 0x920   : > { %v6907_v28 = vpop.f32.mrf.mxu1  ;;  %v6757_v53 = vsel %vm6741_vm0, %v6739_v4, 0.0 }
 0x921   : > { %v6758_v31 = vadd.f32 %v6757_v53, %v6756_v62  ;;  %v6792_v27 = vadd.f32 %v6791_v6, %v6790_v42 }
 0x922   : > { %v12007_v15 = vpop.f32.mrf.mxu1 }
 0x923   : > { %v6761_v34 = vadd.f32 %v6760_v29, %v6758_v31  ;;  %6793 = vadd.xlane.f32.xlu0 %v6792_v27 }
 0x924   : > { %v6917_v63 = vpop.f32.mrf.mxu1 }
 0x925   : > { %6762 = vadd.xlane.f32.xlu1 %v6761_v34 }
 0x926   : > { %v12010_v36 = vpop.f32.mrf.mxu1 }
 0x928   : > { %v6927_v30 = vpop.f32.mrf.mxu1 }
 0x92a   : > { %v19504_v2 = vpop.f32.mrf.mxu1 }
 0x92c   : > { %v6937_v9 = vpop.f32.mrf.mxu1 }
 0x92d   : > { %12029 = vmatprep.subr.mxu0 %v6937_v9 }
 0x92e   : > { %v12016_v40 = vpop.f32.mrf.mxu1  ;;  %12030 = vmatpush3.msra.mxu0 %v6937_v9 }
 0x92f   : > { %12031 = vmatprep.subr.mxu0 %v12010_v36 }
 0x930   : > { %v6947_v25 = vpop.f32.mrf.mxu1  ;;  %12032 = vmatpush3.msra.mxu0 %v12010_v36 }
 0x931   : > { %12033 = vmatprep.subr.mxu0 %v6927_v30 }
 0x932   : > { %v12019_v50 = vpop.f32.mrf.mxu1  ;;  %12034 = vmatpush3.msra.mxu0 %v6927_v30 }
 0x933   : > { %12035 = vmatprep.subr.mxu0 %v12007_v15 }
 0x934   : > { %v6957_v33 = vpop.f32.mrf.mxu1  ;;  %12036 = vmatpush3.msra.mxu0 %v12007_v15 }
 0x935   : > { %12037 = vmatprep.subr.mxu0 %v6917_v63 }
 0x936   : > { %v12022_v18 = vpop.f32.mrf.mxu1  ;;  %12038 = vmatpush3.msra.mxu0 %v6917_v63 }
 0x937   : > { %12039 = vmatprep.subr.mxu0 %v12004_v59 }
 0x938   : > { %v6967_v26 = vpop.f32.mrf.mxu1  ;;  %12040 = vmatpush3.msra.mxu0 %v12004_v59 }
 0x939   : > { %12041 = vmatprep.subr.mxu0 %v6907_v28 }
 0x93a   : > { %v12025_v10 = vpop.f32.mrf.mxu1  ;;  %12042 = vmatpush3.msra.mxu0 %v6907_v28 }
 0x93b   : > { %12043 = vmatprep.subr.mxu0 %v12001_v22 }
 0x93c   : > { %v6977_v20 = vpop.f32.mrf.mxu1  ;;  %12044 = vmatpush3.msra.mxu0 %v12001_v22 }
 0x93d   : > { %12045 = vmatprep.subr.mxu0 %v6897_v0 }
 0x93e   : > { %v12028_v41 = vpop.f32.mrf.mxu1  ;;  %12046 = vmatpush3.msra.mxu0 %v6897_v0 }
 0x93f   : > { %12047 = vmatprep.subr.mxu0 %v19490_v55  ;;  %12060 = vmatprep.subr.mxu1 %v12028_v41 }
 0x940   : > { %v6987_v60 = vpop.f32.mrf.mxu1  ;;  %12048 = vmatpush3.msra.mxu0 %v19490_v55  ;;  %12061 = vmatpush3.msra.mxu1 %v12028_v41  ;;  %v7211_v55 = vld [vmem:[#allocation13 + $0x10] sm:$0xff] }
 0x941   : > { %12049 = vmatprep.subr.mxu0 %v19496_v1  ;;  %12062 = vmatprep.subr.mxu1 %v6987_v60 }
 0x942   : > { %12050 = vmatpush3.msra.mxu0 %v19496_v1  ;;  %12063 = vmatpush3.msra.mxu1 %v6987_v60 }
 0x943   : > { %12064 = vmatprep.subr.mxu1 %v12025_v10  ;;  %12052 = vmatmul.mubr.msk.f32.vlgmr.msra.gmra.mxu0 %vm5440_vm4, %v6805_v58 }
 0x944   : > { %12065 = vmatpush3.msra.mxu1 %v12025_v10  ;;  %12054 = vmatprep.mubr.msk.f32.mxu0 %vm5440_vm4, %v6806_v13 }
 0x945   : > { %12066 = vmatprep.subr.mxu1 %v6977_v20  ;;  %12091 = vmatprep.subr.msk.mxu0 %vm7239_vm6, %v7214_v21 }
 0x946   : > { %12067 = vmatpush3.msra.mxu1 %v6977_v20  ;;  %12092 = vmatpush3.msk.msra.mxu0 %vm7239_vm6, %v7214_v21 }
 0x947   : > { %12068 = vmatprep.subr.mxu1 %v12022_v18  ;;  %12055 = vmatmul.mubr.msk.f32.gmra.mxu0 %vm5440_vm4, %v6807_v3 }
 0x948   : > { %12069 = vmatpush3.msra.mxu1 %v12022_v18  ;;  %12057 = vmatprep.mubr.msk.f32.mxu0 %vm5440_vm4, %v6808_v61 }
 0x949   : > { %12070 = vmatprep.subr.mxu1 %v6967_v26  ;;  %12093 = vmatprep.subr.mxu0 %v7213_v37 }
 0x94a   : > { %12071 = vmatpush3.msra.mxu1 %v6967_v26  ;;  %12094 = vmatpush3.msra.mxu0 %v7213_v37 }
 0x94b   : > { %12072 = vmatprep.subr.mxu1 %v12019_v50  ;;  %12058 = vmatmul.mubr.msk.f32.gmra.mxu0 %vm5440_vm4, %v6809_v16 }
 0x94c   : > { %12073 = vmatpush3.msra.mxu1 %v12019_v50  ;;  %12095 = vmatprep.subr.mxu0 %v7212_v47 }
 0x94d   : > { %12074 = vmatprep.subr.mxu1 %v6957_v33  ;;  %12096 = vmatpush3.msra.mxu0 %v7212_v47 }
 0x94e   : > { %12075 = vmatpush3.msra.mxu1 %v6957_v33  ;;  %12097 = vmatprep.subr.mxu0 %v7211_v55 }
 0x94f   : > { %12076 = vmatprep.subr.mxu1 %v12016_v40  ;;  %12098 = vmatpush3.msra.mxu0 %v7211_v55 }
 0x950   : > { %12077 = vmatpush3.msra.mxu1 %v12016_v40  ;;  %12099 = vmatprep.subr.mxu0 %v7210_v23 }
 0x951   : > { %12078 = vmatprep.subr.mxu1 %v6947_v25  ;;  %12100 = vmatpush3.msra.mxu0 %v7210_v23 }
 0x952   : > { %12079 = vmatpush3.msra.mxu1 %v6947_v25  ;;  %12101 = vmatprep.subr.mxu0 %v7209_v19 }
 0x953   : > { %12080 = vmatprep.subr.mxu1 %v19504_v2  ;;  %12102 = vmatpush3.msra.mxu0 %v7209_v19 }
 0x954   : > { %12081 = vmatpush3.msra.mxu1 %v19504_v2  ;;  %12226 = vmatprep.subr.mxu0 %v21554_v44 }
 0x955   : > { %12083 = vmatmul.mubr.msk.f32.vlgmr.msra.gmra.mxu1 %vm5440_vm4, %v6805_v58  ;;  %12145 = vmatprep.subr.mxu1 %v21554_v44 }
 0x956   : > { %12085 = vmatprep.mubr.msk.f32.mxu1 %vm5440_vm4, %v6806_v13 }
 0x959   : > { %12086 = vmatmul.mubr.msk.f32.gmra.mxu1 %vm5440_vm4, %v6807_v3 }
 0x95a   : > { %12088 = vmatprep.mubr.msk.f32.mxu1 %vm5440_vm4, %v6808_v61 }
 0x95d   : > { %12089 = vmatmul.mubr.msk.f32.gmra.mxu1 %vm5440_vm4, %v6809_v16  ;;  %vm9935_vm4 = vcmask 1046528  }
 0x95e   : > { %12157 = vmatprep.mubr.msk.f32.mxu1 %vm14005_vm3, %v21554_v44 }
 0x9ac   : > { %v6794_v7 = vpop.xlane.xlu0 %6793 }
 0x9ad   : > { %v6795_v57 = vrot.slane %v6794_v7, 4 }
 0x9ae   : > { %v6763_v39 = vpop.xlane.xlu1 %6762 }
 0x9af   : > { %v6764_v46 = vrot.slane %v6763_v39, 4  ;;  %v6796_v56 = vadd.f32 %v6795_v57, %v6794_v7 }
 0x9b1   : > { %v6765_v49 = vadd.f32 %v6764_v46, %v6763_v39  ;;  %v6797_v5 = vrot.slane %v6796_v56, 2 }
 0x9b3   : > { %v6766_v35 = vrot.slane %v6765_v49, 2  ;;  %v6798_v1 = vadd.f32 %v6797_v5, %v6796_v56 }
 0x9b5   : > { %v6767_v12 = vadd.f32 %v6766_v35, %v6765_v49  ;;  %v6799_v48 = vrot.slane %v6798_v1, 1 }
 0x9b7   : > { %v6768_v24 = vrot.slane %v6767_v12, 1  ;;  %v6800_v52 = vadd.f32 %v6799_v48, %v6798_v1 }
 0x9b9   : > { %v6769_v17 = vadd.f32 %v6768_v24, %v6767_v12 }
 0x9bb   : > { %12546 = vpush %v6769_v17 }
 0x9bc   : > { %12548 = vpush %v6800_v52 }
 0x9ec   : > { %s12547_s27 = spop %12546 }
 0x9ed   : > { %s12549_s7 = spop %12548 }
 0xa03   : > { %v19528_v22 = vpop.f32.mrf.mxu0 }
 0xa04   : > { %v7216_v30 = vmul.f32 %v19528_v22, %v19528_v22 }
 0xa05   : > { %v19530_v32 = vpop.f32.mrf.mxu0 }
 0xa06   : > { %12103 = vmatprep.mubr.msk.f32.mxu0 %vm7272_vm7, %v19530_v32  ;;  %v7215_v36 = vmul.f32 %v19530_v32, %v19530_v32 }
 0xa07   : > { %v19534_v11 = vpop.f32.mrf.mxu0  ;;  %12104 = vmatmul.mubr.msk.f32.vlgmr.msra.gmra.mxu0 %vm7272_vm7, %v19528_v22 }
 0xa08   : > { %v7218_v40 = vmul.f32 %v19534_v11, %v19534_v11 }
 0xa09   : > { %v19538_v43 = vpop.f32.mrf.mxu0 }
 0xa0a   : > { %12106 = vmatprep.mubr.msk.f32.mxu0 %vm7272_vm7, %v19538_v43  ;;  %v7217_v9 = vmul.f32 %v19538_v43, %v19538_v43 }
 0xa0b   : > { %v19542_v8 = vpop.f32.mrf.mxu0  ;;  %12107 = vmatmul.mubr.msk.f32.gmra.mxu0 %vm7272_vm7, %v19534_v11 }
 0xa0c   : > { %v7220_v18 = vmul.f32 %v19542_v8, %v19542_v8 }
 0xa0d   : > { %v19546_v45 = vpop.f32.mrf.mxu0 }
 0xa0e   : > { %12109 = vmatprep.mubr.msk.f32.mxu0 %vm7272_vm7, %v19546_v45  ;;  %v7219_v26 = vmul.f32 %v19546_v45, %v19546_v45 }
 0xa15   : > { %v12084_v54 = vpop.f32.mrf.mxu1 }
 0xa16   : > { %v7241_v62 = vrot.slane %v12084_v54, 4  ;;  %v7222_v33 = vmul.f32 %v12084_v54, %v12084_v54  ;;  %v7228_v7 = vmul.f32 %v12084_v54, %v19528_v22 }
 0xa17   : > { %v7175_v0 = vpop.f32.mrf.mxu1 }
 0xa18   : > { %v7240_v51 = vrot.slane %v7175_v0, 4  ;;  %v7221_v2 = vmul.f32 %v7175_v0, %v7175_v0  ;;  %v7259_v60 = vrot.slane %v7222_v33, 4  ;;  %v7227_v23 = vmul.f32 %v7175_v0, %v19530_v32 }
 0xa19   : > { %v12087_v59 = vpop.f32.mrf.mxu1 }
 0xa1a   : > { %v19552_v14 = vsel %vm7239_vm6, %v19542_v8, %v7240_v51  ;;  %v19555_v38 = vsel %vm7239_vm6, %v7240_v51, %v7241_v62  ;;  %v7245_v28 = vrot.slane %v12087_v59, 4  ;;  %v7258_v25 = vrot.slane %v7221_v2, 4  ;;  %v19639_v51 = vld [vmem:[#allocation12 + $0x8] sm:$0xff] }
 0xa1b   : > { %v7185_v4 = vpop.f32.mrf.mxu1  ;;  %12110 = vmatmul.mubr.msk.f32.gmra.mxu0 %vm7272_vm7, %v19552_v14  ;;  %v7224_v58 = vmul.f32 %v12087_v59, %v12087_v59  ;;  %v7230_v39 = vmul.f32 %v12087_v59, %v19534_v11 }
 0xa1c   : > { %v7243_v42 = vrot.slane %v7185_v4, 4  ;;  %12112 = vmatprep.mubr.msk.f32.mxu0 %vm7272_vm7, %v19555_v38  ;;  %v7223_v50 = vmul.f32 %v7185_v4, %v7185_v4  ;;  %v7271_v41 = vsel %vm7239_vm6, %v7220_v18, %v7258_v25  ;;  %v7260_v13 = vsel %vm7239_vm6, %v7258_v25, %v7259_v60 }
 0xa1d   : > { %v12090_v53 = vpop.f32.mrf.mxu1  ;;  %v7263_v16 = vrot.slane %v7224_v58, 4  ;;  %v7229_v57 = vmul.f32 %v7185_v4, %v19538_v43 }
 0xa1e   : > { %v19562_v31 = vsel %vm7239_vm6, %v7241_v62, %v7243_v42  ;;  %v19565_v27 = vsel %vm7239_vm6, %v7243_v42, %v7245_v28  ;;  %v7249_v15 = vrot.slane %v12090_v53, 4  ;;  %v7261_v10 = vrot.slane %v7223_v50, 4 }
 0xa1f   : > { %v7195_v6 = vpop.f32.mrf.mxu1  ;;  %12113 = vmatmul.mubr.msk.f32.gmra.mxu0 %vm7272_vm7, %v19562_v31  ;;  %v7226_v21 = vmul.f32 %v12090_v53, %v12090_v53  ;;  %v7232_v56 = vmul.f32 %v12090_v53, %v19542_v8  ;;  %v19629_v8 = vld [vmem:[#allocation12] sm:$0xff]  ;;  %v19647_v53 = vld [vmem:[#allocation12 + $0x10] sm:$0xff] }
 0xa20   : > { %v7247_v29 = vrot.slane %v7195_v6, 4  ;;  %12115 = vmatprep.mubr.msk.f32.mxu0 %vm7272_vm7, %v19565_v27  ;;  %v7225_v20 = vmul.f32 %v7195_v6, %v7195_v6  ;;  %v7262_v61 = vsel %vm7239_vm6, %v7259_v60, %v7261_v10  ;;  %v7264_v37 = vsel %vm7239_vm6, %v7261_v10, %v7263_v16 }
 0xa21   : > { %v7267_v55 = vrot.slane %v7226_v21, 4  ;;  %v7231_v46 = vmul.f32 %v7195_v6, %v19546_v45 }
 0xa22   : > { %v19572_v34 = vsel %vm7239_vm6, %v7245_v28, %v7247_v29  ;;  %v19575_v63 = vsel %vm7239_vm6, %v7247_v29, %v7249_v15  ;;  %v7265_v3 = vrot.slane %v7225_v20, 4 }
 0xa23   : > { %12116 = vmatmul.mubr.msk.f32.gmra.mxu0 %vm7272_vm7, %v19572_v34 }
 0xa24   : > { %12118 = vmatprep.mubr.msk.f32.mxu0 %vm7272_vm7, %v19575_v63  ;;  %v7266_v47 = vsel %vm7239_vm6, %v7263_v16, %v7265_v3  ;;  %v7268_v19 = vsel %vm7239_vm6, %v7265_v3, %v7267_v55 }
 0xa27   : > { %12119 = vmatmul.mubr.msk.f32.gmra.mxu0 %vm7272_vm7, %v7215_v36 }
 0xa28   : > { %12121 = vmatprep.mubr.msk.f32.mxu0 %vm7272_vm7, %v7216_v30 }
 0xa2b   : > { %12122 = vmatmul.mubr.msk.f32.gmra.mxu0 %vm7272_vm7, %v7217_v9  ;;  %v19660_v9 = vld [vmem:[#allocation12 + $0x18] sm:$0xff] }
 0xa2c   : > { %12124 = vmatprep.mubr.msk.f32.mxu0 %vm7272_vm7, %v7218_v40 }
 0xa2f   : > { %12125 = vmatmul.mubr.msk.f32.gmra.mxu0 %vm7272_vm7, %v7219_v26  ;;  %v19670_v26 = vld [vmem:[#allocation12 + $0x20] sm:$0x3] }
 0xa30   : > { %12127 = vmatprep.mubr.msk.f32.mxu0 %vm7272_vm7, %v7271_v41 }
 0xa33   : > { %12128 = vmatmul.mubr.msk.f32.gmra.mxu0 %vm7272_vm7, %v7260_v13 }
 0xa34   : > { %12130 = vmatprep.mubr.msk.f32.mxu0 %vm7272_vm7, %v7262_v61 }
 0xa37   : > { %12131 = vmatmul.mubr.msk.f32.gmra.mxu0 %vm7272_vm7, %v7264_v37 }
 0xa38   : > { %12133 = vmatprep.mubr.msk.f32.mxu0 %vm7272_vm7, %v7266_v47 }
 0xa3b   : > { %12134 = vmatmul.mubr.msk.f32.gmra.mxu0 %vm7272_vm7, %v7268_v19 }
 0xa3c   : > { %12136 = vmatprep.mubr.msk.f32.mxu0 %vm7272_vm7, %v7227_v23 }
 0xa3f   : > { %12137 = vmatmul.mubr.msk.f32.gmra.mxu0 %vm7272_vm7, %v7228_v7 }
 0xa40   : > { %12139 = vmatprep.mubr.msk.f32.mxu0 %vm7272_vm7, %v7229_v57 }
 0xa43   : > { %12140 = vmatmul.mubr.msk.f32.gmra.mxu0 %vm7272_vm7, %v7230_v39 }
 0xa44   : > { %12142 = vmatprep.mubr.msk.f32.mxu0 %vm7272_vm7, %v7231_v46 }
 0xa47   : > { %12143 = vmatmul.mubr.msk.f32.gmra.mxu0 %vm7272_vm7, %v7232_v56 }
 0xa48   : > { %12238 = vmatprep.mubr.msk.f32.mxu0 %vm14005_vm3, %v21554_v44 }
 0xac7   : > { %v12105_v49 = vpop.f32.mrf.mxu0 }
 0xac9   : > { %v7416_v5 = vpop.f32.mrf.mxu0 }
 0xacb   : > { %v12108_v35 = vpop.f32.mrf.mxu0 }
 0xacd   : > { %v7426_v1 = vpop.f32.mrf.mxu0 }
 0xadb   : > { %v12111_v12 = vpop.f32.mrf.mxu0 }
 0xadc   : > { %12146 = vmatpush3.msk.msra.mxu1 %vm7239_vm6, %v12111_v12  ;;  %v7668_v50 = vrot.slane %v12111_v12, 4  ;;  %v8219_v12 = vld [vmem:[#allocation28 + $0x18] sm:$0xff] }
 0xadd   : > { %v7436_v48 = vpop.f32.mrf.mxu0  ;;  %12147 = vmatprep.subr.mxu1 %v21554_v44 }
 0xade   : > { %12148 = vmatpush3.msra.mxu1 %v7436_v48 }
 0xadf   : > { %v12114_v24 = vpop.f32.mrf.mxu0  ;;  %12149 = vmatprep.subr.mxu1 %v21554_v44 }
 0xae0   : > { %12150 = vmatpush3.msra.mxu1 %v12108_v35  ;;  %v7671_v29 = vrot.slane %v12114_v24, 4  ;;  %v8218_v24 = vld [vmem:[#allocation28 + $0x10] sm:$0xff] }
 0xae1   : > { %v7446_v17 = vpop.f32.mrf.mxu0  ;;  %12151 = vmatprep.subr.mxu1 %v21554_v44 }
 0xae2   : > { %12152 = vmatpush3.msra.mxu1 %v7426_v1  ;;  %v7669_v36 = vrot.slane %v7446_v17, 4  ;;  %v8220_v1 = vld [vmem:[#allocation28 + $0x20] sm:$0xff]  ;;  %v8217_v17 = vld [vmem:[#allocation28 + $0x8] sm:$0xff] }
 0xae3   : > { %v12117_v52 = vpop.f32.mrf.mxu0  ;;  %12153 = vmatprep.subr.mxu1 %v21554_v44 }
 0xae4   : > { %12154 = vmatpush3.msra.mxu1 %v12105_v49  ;;  %v7675_v59 = vrot.slane %v12117_v52, 4  ;;  %v7672_v18 = vsel %vm7239_vm6, %v7669_v36, %v7671_v29  ;;  %v7670_v20 = vsel %vm7239_vm6, %v7668_v50, %v7669_v36  ;;  %v8216_v52 = vld [vmem:[#allocation28] sm:$0xff] }
 0xae5   : > { %v7456_v54 = vpop.f32.mrf.mxu0  ;;  %12155 = vmatprep.subr.mxu1 %v21554_v44 }
 0xae6   : > { %12156 = vmatpush3.msra.mxu1 %v7416_v5  ;;  %v7673_v42 = vrot.slane %v7456_v54, 4  ;;  %v8221_v5 = vld [vmem:[#allocation28 + $0x28] sm:$0xf] }
 0xae7   : > { %v19632_v0 = vpop.f32.mrf.mxu0  ;;  %12158 = vmatmul.mubr.msk.f32.vlgmr.msra.gmra.mxu1 %vm7272_vm7, %v19629_v8  ;;  %12172 = vmatprep.subr.mxu1 %v21554_v44 }
 0xae8   : > { %12160 = vmatprep.mubr.msk.f32.mxu1 %vm14005_vm3, %v21554_v44  ;;  %v7676_v2 = vsel %vm7239_vm6, %v7673_v42, %v7675_v59  ;;  %v7674_v25 = vsel %vm7239_vm6, %v7671_v29, %v7673_v42 }
 0xae9   : > { %v7466_v62 = vpop.f32.mrf.mxu0 }
 0xaea   : > { %v7677_v4 = vrot.slane %v7466_v62, 4 }
 0xaeb   : > { %v19641_v28 = vpop.f32.mrf.mxu0  ;;  %12161 = vmatmul.mubr.msk.f32.gmra.mxu1 %vm7272_vm7, %v19639_v51 }
 0xaec   : > { %12163 = vmatprep.mubr.msk.f32.mxu1 %vm14005_vm3, %v21554_v44  ;;  %12173 = vmatpush3.msk.msra.mxu1 %vm7239_vm6, %v7677_v4  ;;  %v7678_v6 = vsel %vm7239_vm6, %v7675_v59, %v7677_v4 }
 0xaed   : > { %v19651_v15 = vpop.f32.mrf.mxu0  ;;  %12174 = vmatprep.subr.mxu1 %v21554_v44 }
 0xaee   : > { %12175 = vmatpush3.msra.mxu1 %v7678_v6 }
 0xaef   : > { %v12126_v30 = vpop.f32.mrf.mxu0  ;;  %12164 = vmatmul.mubr.msk.f32.gmra.mxu1 %vm7272_vm7, %v19647_v53  ;;  %12176 = vmatprep.subr.mxu1 %v21554_v44 }
 0xaf0   : > { %12166 = vmatprep.mubr.msk.f32.mxu1 %vm14005_vm3, %v21554_v44  ;;  %12177 = vmatpush3.msra.mxu1 %v7676_v2 }
 0xaf1   : > { %v7486_v40 = vpop.f32.mrf.mxu0  ;;  %12178 = vmatprep.subr.mxu1 %v21554_v44 }
 0xaf2   : > { %12179 = vmatpush3.msra.mxu1 %v7674_v25 }
 0xaf3   : > { %v12129_v33 = vpop.f32.mrf.mxu0  ;;  %12167 = vmatmul.mubr.msk.f32.gmra.mxu1 %vm7272_vm7, %v19660_v9  ;;  %12180 = vmatprep.subr.mxu1 %v21554_v44 }
 0xaf4   : > { %12169 = vmatprep.mubr.msk.f32.mxu1 %vm14005_vm3, %v21554_v44  ;;  %12181 = vmatpush3.msra.mxu1 %v7672_v18  ;;  %v7875_v23 = vrot.slane %v12129_v33, 4 }
 0xaf5   : > { %v7496_v10 = vpop.f32.mrf.mxu0  ;;  %12182 = vmatprep.subr.mxu1 %v21554_v44 }
 0xaf6   : > { %12183 = vmatpush3.msra.mxu1 %v7670_v20  ;;  %v7874_v19 = vrot.slane %v7496_v10, 4 }
 0xaf7   : > { %v12132_v41 = vpop.f32.mrf.mxu0  ;;  %12170 = vmatmul.mubr.msk.f32.gmra.mxu1 %vm7272_vm7, %v19670_v26  ;;  %12199 = vmatprep.subr.mxu1 %v21554_v44 }
 0xaf8   : > { %12184 = vmatprep.mubr.msk.f32.mxu1 %vm14005_vm3, %v21554_v44  ;;  %v7879_v16 = vrot.slane %v12132_v41, 4  ;;  %v7876_v46 = vsel %vm7239_vm6, %v7874_v19, %v7875_v23 }
 0xaf9   : > { %v7506_v60 = vpop.f32.mrf.mxu0 }
 0xafa   : > { %v7877_v21 = vrot.slane %v7506_v60, 4 }
 0xafb   : > { %v12135_v58 = vpop.f32.mrf.mxu0  ;;  %12185 = vmatmul.mubr.msk.f32.vlgmr.msra.gmra.mxu1 %vm7272_vm7, %v19629_v8 }
 0xafc   : > { %v7883_v13 = vrot.slane %v12135_v58, 4  ;;  %12187 = vmatprep.mubr.msk.f32.mxu1 %vm14005_vm3, %v21554_v44  ;;  %12200 = vmatpush3.msk.msra.mxu1 %vm7239_vm6, %v7496_v10  ;;  %v7880_v7 = vsel %vm7239_vm6, %v7877_v21, %v7879_v16  ;;  %v7878_v39 = vsel %vm7239_vm6, %v7875_v23, %v7877_v21 }
 0xafd   : > { %v7516_v3 = vpop.f32.mrf.mxu0  ;;  %12201 = vmatprep.subr.mxu1 %v21554_v44 }
 0xafe   : > { %v7881_v61 = vrot.slane %v7516_v3, 4  ;;  %12227 = vmatpush3.msk.msra.mxu0 %vm7239_vm6, %v7883_v13  ;;  %12202 = vmatpush3.msra.mxu1 %v12126_v30 }
 0xaff   : > { %12188 = vmatmul.mubr.msk.f32.gmra.mxu1 %vm7272_vm7, %v19639_v51  ;;  %12228 = vmatprep.subr.mxu0 %v21554_v44  ;;  %v19693_v47 = vpop.f32.mrf.mxu0 }
 0xb00   : > { %v7884_v37 = vsel %vm7239_vm6, %v7881_v61, %v7883_v13  ;;  %12190 = vmatprep.mubr.msk.f32.mxu1 %vm14005_vm3, %v21554_v44  ;;  %12203 = vmatprep.subr.mxu1 %v21554_v44  ;;  %v7882_v55 = vsel %vm7239_vm6, %v7879_v16, %v7881_v61 }
 0xb01   : > { %12229 = vmatpush3.msra.mxu0 %v7884_v37  ;;  %12204 = vmatpush3.msra.mxu1 %v7486_v40  ;;  %v19704_v57 = vpop.f32.mrf.mxu0 }
 0xb02   : > { %12230 = vmatprep.subr.mxu0 %v21554_v44  ;;  %12205 = vmatprep.subr.mxu1 %v21554_v44 }
 0xb03   : > { %12191 = vmatmul.mubr.msk.f32.gmra.mxu1 %vm7272_vm7, %v19647_v53  ;;  %12231 = vmatpush3.msra.mxu0 %v7882_v55  ;;  %v12141_v56 = vpop.f32.mrf.mxu0 }
 0xb04   : > { %12232 = vmatprep.subr.mxu0 %v21554_v44  ;;  %12193 = vmatprep.mubr.msk.f32.mxu1 %vm14005_vm3, %v21554_v44 }
 0xb05   : > { %12233 = vmatpush3.msra.mxu0 %v7880_v7  ;;  %12206 = vmatpush3.msra.mxu1 %v19641_v28  ;;  %v7536_v49 = vpop.f32.mrf.mxu0 }
 0xb06   : > { %12234 = vmatprep.subr.mxu0 %v21554_v44  ;;  %12207 = vmatprep.subr.mxu1 %v21554_v44 }
 0xb07   : > { %12194 = vmatmul.mubr.msk.f32.gmra.mxu1 %vm7272_vm7, %v19660_v9  ;;  %12235 = vmatpush3.msra.mxu0 %v7878_v39  ;;  %v12144_v35 = vpop.f32.mrf.mxu0 }
 0xb08   : > { %12236 = vmatprep.subr.mxu0 %v21554_v44  ;;  %12196 = vmatprep.mubr.msk.f32.mxu1 %vm14005_vm3, %v21554_v44 }
 0xb09   : > { %12237 = vmatpush3.msra.mxu0 %v7876_v46  ;;  %12208 = vmatpush3.msra.mxu1 %v19651_v15  ;;  %v7546_v48 = vpop.f32.mrf.mxu0 }
 0xb0a   : > { %12239 = vmatmul.mubr.msk.f32.vlgmr.msra.gmra.mxu0 %vm7272_vm7, %v19629_v8  ;;  %12209 = vmatprep.subr.mxu1 %v21554_v44 }
 0xb0b   : > { %12197 = vmatmul.mubr.msk.f32.gmra.mxu1 %vm7272_vm7, %v19670_v26  ;;  %12241 = vmatprep.mubr.msk.f32.mxu0 %vm14005_vm3, %v21554_v44 }
 0xb0c   : > { %12210 = vmatpush3.msra.mxu1 %v19632_v0  ;;  %12211 = vmatprep.mubr.msk.f32.mxu1 %vm14005_vm3, %v21554_v44 }
 0xb0d   : > { %12280 = vmatprep.subr.mxu0 %v21554_v44  ;;  %12253 = vmatprep.subr.mxu1 %v21554_v44 }
 0xb0e   : > { %12242 = vmatmul.mubr.msk.f32.gmra.mxu0 %vm7272_vm7, %v19639_v51 }
 0xb0f   : > { %12212 = vmatmul.mubr.msk.f32.vlgmr.msra.gmra.mxu1 %vm7272_vm7, %v19629_v8  ;;  %12244 = vmatprep.mubr.msk.f32.mxu0 %vm14005_vm3, %v21554_v44 }
 0xb10   : > { %12214 = vmatprep.mubr.msk.f32.mxu1 %vm14005_vm3, %v21554_v44  ;;  %12281 = vmatpush3.msk.msra.mxu0 %vm7239_vm6, %v8221_v5 }
 0xb11   : > { %12282 = vmatprep.subr.mxu0 %v21554_v44  ;;  %12254 = vmatpush3.msk.msra.mxu1 %vm7239_vm6, %v12144_v35 }
 0xb12   : > { %12245 = vmatmul.mubr.msk.f32.gmra.mxu0 %vm7272_vm7, %v19647_v53  ;;  %12255 = vmatprep.subr.mxu1 %v21554_v44 }
 0xb13   : > { %12215 = vmatmul.mubr.msk.f32.gmra.mxu1 %vm7272_vm7, %v19639_v51  ;;  %12247 = vmatprep.mubr.msk.f32.mxu0 %vm14005_vm3, %v21554_v44 }
 0xb14   : > { %12283 = vmatpush3.msra.mxu0 %v8220_v1  ;;  %12217 = vmatprep.mubr.msk.f32.mxu1 %vm14005_vm3, %v21554_v44 }
 0xb15   : > { %12284 = vmatprep.subr.mxu0 %v21554_v44  ;;  %12256 = vmatpush3.msra.mxu1 %v7546_v48 }
 0xb16   : > { %12248 = vmatmul.mubr.msk.f32.gmra.mxu0 %vm7272_vm7, %v19660_v9  ;;  %12257 = vmatprep.subr.mxu1 %v21554_v44 }
 0xb17   : > { %12218 = vmatmul.mubr.msk.f32.gmra.mxu1 %vm7272_vm7, %v19647_v53  ;;  %12285 = vmatpush3.msra.mxu0 %v8219_v12 }
 0xb18   : > { %12286 = vmatprep.subr.mxu0 %v21554_v44  ;;  %12250 = vmatprep.mubr.msk.f32.mxu0 %vm14005_vm3, %v21554_v44 }
 0xb19   : > { %12287 = vmatpush3.msra.mxu0 %v8218_v24  ;;  %12220 = vmatprep.mubr.msk.f32.mxu1 %vm14005_vm3, %v21554_v44 }
 0xb1a   : > { %12251 = vmatmul.mubr.msk.f32.gmra.mxu0 %vm7272_vm7, %v19670_v26  ;;  %12288 = vmatprep.subr.mxu0 %v21554_v44 }
 0xb1b   : > { %12221 = vmatmul.mubr.msk.f32.gmra.mxu1 %vm7272_vm7, %v19660_v9  ;;  %12289 = vmatpush3.msra.mxu0 %v8217_v17 }
 0xb1c   : > { %12258 = vmatpush3.msra.mxu1 %v12141_v56  ;;  %12290 = vmatprep.subr.mxu0 %v21554_v44 }
 0xb1d   : > { %12259 = vmatprep.subr.mxu1 %v21554_v44  ;;  %12291 = vmatpush3.msra.mxu0 %v8216_v52 }
 0xb1e   : > { %12292 = vmatprep.mubr.msk.f32.mxu0 %vm14005_vm3, %v21554_v44  ;;  %12223 = vmatprep.mubr.msk.f32.mxu1 %vm14005_vm3, %v21554_v44 }
 0xb1f   : > { %12260 = vmatpush3.msra.mxu1 %v7536_v49  ;;  %12293 = vmatmul.mubr.msk.f32.vlgmr.msra.gmra.mxu0 %vm7272_vm7, %v19530_v32 }
 0xb20   : > { %12224 = vmatmul.mubr.msk.f32.gmra.mxu1 %vm7272_vm7, %v19670_v26  ;;  %12261 = vmatprep.subr.mxu1 %v21554_v44 }
 0xb21   : > { %12262 = vmatpush3.msra.mxu1 %v19693_v47  ;;  %12295 = vmatprep.mubr.msk.f32.mxu0 %vm14005_vm3, %v21554_v44 }
 0xb22   : > { %12263 = vmatprep.subr.mxu1 %v21554_v44  ;;  %12265 = vmatprep.mubr.msk.f32.mxu1 %vm14005_vm3, %v21554_v44 }
 0xb23   : > { %12264 = vmatpush3.msra.mxu1 %v19704_v57  ;;  %12296 = vmatmul.mubr.msk.f32.gmra.mxu0 %vm7272_vm7, %v19528_v22 }
 0xb24   : > { %12266 = vmatmul.mubr.msk.f32.vlgmr.msra.gmra.mxu1 %vm7272_vm7, %v19629_v8  ;;  %12298 = vmatprep.mubr.msk.f32.mxu0 %vm14005_vm3, %v21554_v44 }
 0xb25   : > { %12268 = vmatprep.mubr.msk.f32.mxu1 %vm14005_vm3, %v21554_v44  ;;  %12325 = vmatprep.subr.mxu1 %v21554_v44 }
 0xb27   : > { %12299 = vmatmul.mubr.msk.f32.gmra.mxu0 %vm7272_vm7, %v19538_v43 }
 0xb28   : > { %12269 = vmatmul.mubr.msk.f32.gmra.mxu1 %vm7272_vm7, %v19639_v51  ;;  %12301 = vmatprep.mubr.msk.f32.mxu0 %vm14005_vm3, %v21554_v44 }
 0xb29   : > { %12271 = vmatprep.mubr.msk.f32.mxu1 %vm14005_vm3, %v21554_v44 }
 0xb2b   : > { %12302 = vmatmul.mubr.msk.f32.gmra.mxu0 %vm7272_vm7, %v19534_v11 }
 0xb2c   : > { %12272 = vmatmul.mubr.msk.f32.gmra.mxu1 %vm7272_vm7, %v19647_v53  ;;  %12304 = vmatprep.mubr.msk.f32.mxu0 %vm14005_vm3, %v21554_v44 }
 0xb2d   : > { %12274 = vmatprep.mubr.msk.f32.mxu1 %vm14005_vm3, %v21554_v44 }
 0xb2f   : > { %12305 = vmatmul.mubr.msk.f32.gmra.mxu0 %vm7272_vm7, %v19546_v45 }
 0xb30   : > { %12275 = vmatmul.mubr.msk.f32.gmra.mxu1 %vm7272_vm7, %v19660_v9  ;;  %12307 = vmatprep.mubr.msk.f32.mxu0 %vm14005_vm3, %v21554_v44 }
 0xb31   : > { %12277 = vmatprep.mubr.msk.f32.mxu1 %vm14005_vm3, %v21554_v44 }
 0xb33   : > { %12308 = vmatmul.mubr.msk.f32.gmra.mxu0 %vm7272_vm7, %v19552_v14 }
 0xb34   : > { %12278 = vmatmul.mubr.msk.f32.gmra.mxu1 %vm7272_vm7, %v19670_v26  ;;  %12310 = vmatprep.mubr.msk.f32.mxu0 %vm14005_vm3, %v21554_v44 }
 0xb35   : > { %12337 = vmatprep.mubr.msk.f32.mxu1 %vm14005_vm3, %v21554_v44 }
 0xb37   : > { %12311 = vmatmul.mubr.msk.f32.gmra.mxu0 %vm7272_vm7, %v19555_v38 }
 0xb38   : > { %12313 = vmatprep.mubr.msk.f32.mxu0 %vm14005_vm3, %v21554_v44 }
 0xb3b   : > { %12314 = vmatmul.mubr.msk.f32.gmra.mxu0 %vm7272_vm7, %v19562_v31 }
 0xb3c   : > { %12316 = vmatprep.mubr.msk.f32.mxu0 %vm14005_vm3, %v21554_v44 }
 0xb3f   : > { %12317 = vmatmul.mubr.msk.f32.gmra.mxu0 %vm7272_vm7, %v19565_v27 }
 0xb40   : > { %12319 = vmatprep.mubr.msk.f32.mxu0 %vm14005_vm3, %v21554_v44 }
 0xb43   : > { %12320 = vmatmul.mubr.msk.f32.gmra.mxu0 %vm7272_vm7, %v19572_v34 }
 0xb44   : > { %12322 = vmatprep.mubr.msk.f32.mxu0 %vm14005_vm3, %v21554_v44 }
 0xb47   : > { %12323 = vmatmul.mubr.msk.f32.gmra.mxu0 %vm7272_vm7, %v19575_v63 }
 0xba7   : > { %v19842_v22 = vpop.f32.mrf.mxu1 }
 0xba8   : > { %v8075_v6 = vmul.f32 %v19842_v22, %v19842_v22 }
 0xba9   : > { %v12159_v32 = vpop.f32.mrf.mxu1 }
 0xbab   : > { %v19844_v11 = vpop.f32.mrf.mxu1 }
 0xbac   : > { %v8076_v9 = vmul.f32 %v19844_v11, %v19844_v11 }
 0xbad   : > { %v12162_v43 = vpop.f32.mrf.mxu1 }
 0xbaf   : > { %v19846_v45 = vpop.f32.mrf.mxu1 }
 0xbb0   : > { %v8077_v60 = vmul.f32 %v19846_v45, %v19846_v45 }
 0xbb1   : > { %v12165_v14 = vpop.f32.mrf.mxu1 }
 0xbb3   : > { %v19848_v38 = vpop.f32.mrf.mxu1 }
 0xbb4   : > { %v8078_v7 = vmul.f32 %v19848_v38, %v19848_v38 }
 0xbb5   : > { %v12168_v31 = vpop.f32.mrf.mxu1 }
 0xbb7   : > { %v19850_v27 = vpop.f32.mrf.mxu1 }
 0xbb8   : > { %v8079_v12 = vmul.f32 %v19850_v27, %v19850_v27 }
 0xbb9   : > { %v12171_v34 = vpop.f32.mrf.mxu1 }
 0xbbb   : > { %v7752_v8 = vpop.f32.mrf.mxu1 }
 0xbbc   : > { %v8080_v36 = vmul.f32 %v7752_v8, %v7752_v8 }
 0xbbd   : > { %v12186_v54 = vpop.f32.mrf.mxu1 }
 0xbbe   : > { %v8145_v18 = vadd.f32 %v8080_v36, %v8075_v6 }
 0xbbf   : > { %v19852_v0 = vpop.f32.mrf.mxu1 }
 0xbc0   : > { %v8081_v50 = vmul.f32 %v19852_v0, %v19852_v0  ;;  %v8150_v21 = vadd.f32 0.0001, %v8145_v18 }
 0xbc1   : > { %v12189_v63 = vpop.f32.mrf.mxu1 }
 0xbc2   : > { %v8146_v20 = vadd.f32 %v8081_v50, %v8076_v9  ;;  %13033 = vrcp.f32 %v8150_v21  ;;  %v8085_v63 = vmul.f32 %v7752_v8, %v19842_v22 }
 0xbc3   : > { %v19854_v51 = vpop.f32.mrf.mxu1 }
 0xbc4   : > { %v8082_v61 = vmul.f32 %v19854_v51, %v19854_v51  ;;  %v8151_v55 = vadd.f32 0.0001, %v8146_v20 }
 0xbc5   : > { %v12192_v62 = vpop.f32.mrf.mxu1 }
 0xbc6   : > { %v8147_v23 = vadd.f32 %v8082_v61, %v8077_v60  ;;  %13035 = vrcp.f32 %v8151_v55 }
 0xbc7   : > { %v19856_v59 = vpop.f32.mrf.mxu1 }
 0xbc8   : > { %v8083_v49 = vmul.f32 %v19856_v59, %v19856_v59  ;;  %v8152_v48 = vadd.f32 0.0001, %v8147_v23 }
 0xbc9   : > { %v12195_v4 = vpop.f32.mrf.mxu1 }
 0xbca   : > { %v7958_v42 = vpop.f32.mrf.mxu0  ;;  %v8148_v24 = vadd.f32 %v8083_v49, %v8078_v7 }
 0xbcb   : > { %v19858_v28 = vpop.f32.mrf.mxu1  ;;  %v8095_v26 = vsub.f32 %v7958_v42, %v8080_v36  ;;  %v8086_v36 = vmul.f32 %v19852_v0, %v19844_v11 }
 0xbcc   : > { %v12240_v53 = vpop.f32.mrf.mxu0  ;;  %v8084_v31 = vmul.f32 %v19858_v28, %v19858_v28  ;;  %v8153_v62 = vadd.f32 0.0001, %v8148_v24  ;;  %v8089_v24 = vmul.f32 %v19858_v28, %v19850_v27 }
 0xbcd   : > { %v12198_v15 = vpop.f32.mrf.mxu1 }
 0xbce   : > { %v7963_v29 = vpop.f32.mrf.mxu0  ;;  %v8149_v4 = vadd.f32 %v8084_v31, %v8079_v12 }
 0xbcf   : > { %v7845_v30 = vpop.f32.mrf.mxu1  ;;  %v8096_v37 = vsub.f32 %v7963_v29, %v8081_v50 }
 0xbd0   : > { %v12243_v2 = vpop.f32.mrf.mxu0  ;;  %v8090_v40 = vsub.f32 %v7845_v30, %v8075_v6  ;;  %v8154_v22 = vadd.f32 0.0001, %v8149_v4 }
 0xbd1   : > { %v12213_v25 = vpop.f32.mrf.mxu1  ;;  %v8135_v2 = vmul.f32 2.0, %v8085_v63 }
 0xbd2   : > { %v7968_v33 = vpop.f32.mrf.mxu0  ;;  %v8115_v58 = vadd.f32 %v8095_v26, %v8090_v40  ;;  %v8136_v25 = vmul.f32 2.0, %v8086_v36 }
 0xbd3   : > { %v7850_v10 = vpop.f32.mrf.mxu1  ;;  %v8097_v35 = vsub.f32 %v7968_v33, %v8082_v61 }
 0xbd4   : > { %v12246_v41 = vpop.f32.mrf.mxu0  ;;  %v8091_v13 = vsub.f32 %v7850_v10, %v8076_v9  ;;  %v8120_v57 = vadd.f32 0.0009, %v8115_v58  ;;  %v8087_v10 = vmul.f32 %v19854_v51, %v19846_v45  ;;  %v8141_v58 = vadd.f32 0.0001, %v8136_v25 }
 0xbd5   : > { %v12216_v3 = vpop.f32.mrf.mxu1  ;;  %v8140_v41 = vadd.f32 0.0001, %v8135_v2  ;;  %v8088_v45 = vmul.f32 %v19856_v59, %v19848_v38 }
 0xbd6   : > { %v7973_v16 = vpop.f32.mrf.mxu0  ;;  %v8116_v39 = vadd.f32 %v8096_v37, %v8091_v13  ;;  %13037 = vrcp.f32 %v8120_v57  ;;  %v8137_v13 = vmul.f32 2.0, %v8087_v10 }
 0xbd7   : > { %v7855_v47 = vpop.f32.mrf.mxu1  ;;  %v8098_v34 = vsub.f32 %v7973_v16, %v8083_v49  ;;  %13039 = vrcp.f32 %v8152_v48 }
 0xbd8   : > { %v12249_v19 = vpop.f32.mrf.mxu0  ;;  %v8092_v46 = vsub.f32 %v7855_v47, %v8077_v60  ;;  %v8121_v52 = vadd.f32 0.0009, %v8116_v39  ;;  %v13034_v60 = vpop.eup %13033  ;;  %v8142_v39 = vadd.f32 0.0001, %v8137_v13 }
 0xbd9   : > { %v12219_v56 = vpop.f32.mrf.mxu1  ;;  %v13036_v61 = vpop.eup %13035  ;;  %v8156_v23 = vmul.f32 %v13034_v60, %v8140_v41 }
 0xbda   : > { %v7978_v5 = vpop.f32.mrf.mxu0  ;;  %v8117_v32 = vadd.f32 %v8097_v35, %v8092_v46  ;;  %13041 = vrcp.f32 %v8121_v52  ;;  %v8138_v46 = vmul.f32 2.0, %v8088_v45 }
 0xbdb   : > { %v7860_v1 = vpop.f32.mrf.mxu1  ;;  %v8099_v9 = vsub.f32 %v7978_v5, %v8084_v31  ;;  %13043 = vrcp.f32 %v8153_v62  ;;  %v8158_v5 = vmul.f32 %v13036_v61, %v8141_v58  ;;  %v8139_v31 = vmul.f32 2.0, %v8089_v24 }
 0xbdc   : > { %v12252_v17 = vpop.f32.mrf.mxu0  ;;  %v8093_v43 = vsub.f32 %v7860_v1, %v8078_v7  ;;  %v8122_v53 = vadd.f32 0.0009, %v8117_v32 }
 0xbdd   : > { %v12222_v14 = vpop.f32.mrf.mxu1 }
 0xbde   : > { %v8118_v6 = vadd.f32 %v8098_v34, %v8093_v43  ;;  %13045 = vrcp.f32 %v8122_v53  ;;  %v8143_v14 = vadd.f32 0.0001, %v8138_v46 }
 0xbdf   : > { %v19878_v54 = vpop.f32.mrf.mxu0  ;;  %13047 = vrcp.f32 %v8154_v22  ;;  %v8144_v22 = vadd.f32 0.0001, %v8139_v31 }
 0xbe0   : > { %v7865_v42 = vpop.f32.mrf.mxu1  ;;  %v8123_v50 = vadd.f32 0.0009, %v8118_v6 }
 0xbe1   : > { %v8094_v15 = vsub.f32 %v7865_v42, %v8079_v12  ;;  %v12294_v29 = vpop.f32.mrf.mxu0 }
 0xbe2   : > { %v12225_v30 = vpop.f32.mrf.mxu1  ;;  %13049 = vrcp.f32 %v8123_v50 }
 0xbe3   : > { %v19883_v40 = vpop.f32.mrf.mxu0  ;;  %v8119_v33 = vadd.f32 %v8099_v9, %v8094_v15  ;;  %v13038_v55 = vpop.eup %13037 }
 0xbe4   : > { %v8051_v8 = vpop.f32.mrf.mxu1  ;;  %v13040_v49 = vpop.eup %13039 }
 0xbe5   : > { %v8100_v18 = vsub.f32 %v8051_v8, %v8085_v63  ;;  %v12297_v26 = vpop.f32.mrf.mxu0  ;;  %v8124_v16 = vadd.f32 0.0009, %v8119_v33  ;;  %v8160_v43 = vmul.f32 %v13040_v49, %v8142_v39 }
 0xbe6   : > { %v12267_v20 = vpop.f32.mrf.mxu1 }
 0xbe7   : > { %v8105_v11 = vmul.f32 2.0, %v8100_v18  ;;  %v19887_v0 = vpop.f32.mrf.mxu0  ;;  %13051 = vrcp.f32 %v8124_v16  ;;  %v13042_v48 = vpop.eup %13041 }
 0xbe8   : > { %v8056_v3 = vpop.f32.mrf.mxu1  ;;  %v13044_v62 = vpop.eup %13043 }
 0xbe9   : > { %v8110_v21 = vadd.f32 0.0009, %v8105_v11  ;;  %v8101_v37 = vsub.f32 %v8056_v3, %v8086_v36  ;;  %v12300_v47 = vpop.f32.mrf.mxu0  ;;  %v8162_v18 = vmul.f32 %v13044_v62, %v8143_v14 }
 0xbea   : > { %v12270_v51 = vpop.f32.mrf.mxu1 }
 0xbeb   : > { %v8126_v19 = vmul.f32 %v13038_v55, %v8110_v21  ;;  %v8106_v7 = vmul.f32 2.0, %v8101_v37  ;;  %v8306_v57 = vpop.f32.mrf.mxu0  ;;  %v13046_v29 = vpop.eup %13045 }
 0xbec   : > { %v8061_v56 = vpop.f32.mrf.mxu1  ;;  %v13048_v33 = vpop.eup %13047 }
 0xbed   : > { %v8111_v35 = vadd.f32 0.0009, %v8106_v7  ;;  %v8102_v1 = vsub.f32 %v8061_v56, %v8087_v10  ;;  %v12303_v12 = vpop.f32.mrf.mxu0  ;;  %v8165_v59 = vmul.f32 %v8156_v23, %v8126_v19  ;;  %v8193_v34 = vsel %vm8170_vm8, %v8126_v19, 0.0  ;;  %v8213_v56 = vld [vmem:[#allocation27] sm:$0xff] }
 0xbee   : > { %v12273_v38 = vpop.f32.mrf.mxu1  ;;  %v8164_v16 = vmul.f32 %v13048_v33, %v8144_v22 }
 0xbef   : > { %v8128_v17 = vmul.f32 %v13042_v48, %v8111_v35  ;;  %v8107_v52 = vmul.f32 2.0, %v8102_v1  ;;  %v8311_v32 = vpop.f32.mrf.mxu0  ;;  %v8171_v36 = vsel %vm8170_vm8, %v8165_v59, 0.0  ;;  %v13050_v11 = vpop.eup %13049 }
 0xbf0   : > { %v8066_v63 = vpop.f32.mrf.mxu1 }
 0xbf1   : > { %v8166_v4 = vmul.f32 %v8158_v5, %v8128_v17  ;;  %v8194_v42 = vsel %vm8170_vm8, %v8128_v17, 0.0  ;;  %v8112_v53 = vadd.f32 0.0009, %v8107_v52  ;;  %v8103_v6 = vsub.f32 %v8066_v63, %v8088_v45  ;;  %v12306_v15 = vpop.f32.mrf.mxu0 }
 0xbf2   : > { %v8195_v27 = vadd.f32 %v8194_v42, %v8193_v34  ;;  %v12276_v28 = vpop.f32.mrf.mxu1 }
 0xbf3   : > { %v8172_v30 = vsel %vm8170_vm8, %v8166_v4, 0.0  ;;  %v8130_v2 = vmul.f32 %v13046_v29, %v8112_v53  ;;  %v8108_v9 = vmul.f32 2.0, %v8103_v6  ;;  %v19897_v25 = vpop.f32.mrf.mxu0  ;;  %v8544_v29 = vld [vmem:[#allocation16 + $0x10] sm:$0x3f]  ;;  %v8542_v28 = vld [vmem:[#allocation16] sm:$0xff] }
 0xbf4   : > { %v8071_v8 = vpop.f32.mrf.mxu1  ;;  %12326 = vmatpush3.msk.msra.mxu1 %vm7239_vm6, %v19897_v25  ;;  %v8173_v50 = vadd.f32 %v8172_v30, %v8171_v36  ;;  %v13052_v51 = vpop.eup %13051  ;;  %v8442_v53 = vrot.slane %v19897_v25, 4 }
 0xbf5   : > { %v8167_v26 = vmul.f32 %v8160_v43, %v8130_v2  ;;  %v8113_v10 = vadd.f32 0.0009, %v8108_v9  ;;  %v8104_v20 = vsub.f32 %v8071_v8, %v8089_v24  ;;  %v12309_v41 = vpop.f32.mrf.mxu0  ;;  %12327 = vmatprep.subr.mxu1 %v21554_v44  ;;  %v8196_v58 = vsel %vm8170_vm8, %v8130_v2, 0.0 }
 0xbf6   : > { %12328 = vmatpush3.msra.mxu1 %v8311_v32  ;;  %v12279_v60 = vpop.f32.mrf.mxu1  ;;  %v8197_v23 = vadd.f32 %v8196_v58, %v8195_v27  ;;  %v8543_v27 = vld [vmem:[#allocation16 + $0x8] sm:$0xff] }
 0xbf7   : > { %v8132_v13 = vmul.f32 %v13050_v11, %v8113_v10  ;;  %v8109_v3 = vmul.f32 2.0, %v8104_v20  ;;  %v19903_v61 = vpop.f32.mrf.mxu0  ;;  %12329 = vmatprep.subr.mxu1 %v21554_v44  ;;  %v8174_v55 = vsel %vm8170_vm8, %v8167_v26, 0.0 }
 0xbf8   : > { %12330 = vmatpush3.msra.mxu1 %v8306_v57  ;;  %v8175_v57 = vadd.f32 %v8174_v55, %v8173_v50  ;;  %v8443_v4 = vrot.slane %v19903_v61, 4 }
 0xbf9   : > { %v8168_v21 = vmul.f32 %v8162_v18, %v8132_v13  ;;  %v8114_v37 = vadd.f32 0.0009, %v8109_v3  ;;  %v12312_v47 = vpop.f32.mrf.mxu0  ;;  %12331 = vmatprep.subr.mxu1 %v21554_v44  ;;  %v8198_v45 = vsel %vm8170_vm8, %v8132_v13, 0.0 }
 0xbfa   : > { %12332 = vmatpush3.msra.mxu1 %v19887_v0  ;;  %v8199_v46 = vadd.f32 %v8198_v45, %v8197_v23  ;;  %v8444_v15 = vsel %vm7239_vm6, %v8442_v53, %v8443_v4 }
 0xbfb   : > { %v8134_v19 = vmul.f32 %v13052_v51, %v8114_v37  ;;  %v8326_v7 = vpop.f32.mrf.mxu0  ;;  %v8176_v39 = vsel %vm8170_vm8, %v8168_v21, 0.0  ;;  %12333 = vmatprep.subr.mxu1 %v21554_v44 }
 0xbfc   : > { %12334 = vmatpush3.msra.mxu1 %v19883_v40  ;;  %v8177_v1 = vadd.f32 %v8176_v39, %v8175_v57  ;;  %v8214_v40 = vld [vmem:[#allocation27 + $0x8] sm:$0xff]  ;;  %v8445_v63 = vrot.slane %v8326_v7, 4 }
 0xbfd   : > { %v12315_v49 = vpop.f32.mrf.mxu0  ;;  %v8169_v5 = vmul.f32 %v8164_v16, %v8134_v19  ;;  %v8200_v35 = vsel %vm8178_vm9, %v8134_v19, 0.0  ;;  %12335 = vmatprep.subr.mxu1 %v21554_v44 }
 0xbfe   : > { %v8201_v12 = vadd.f32 %v8200_v35, %v8199_v46  ;;  %12336 = vmatpush3.msra.mxu1 %v19878_v54  ;;  %v8215_v54 = vld [vmem:[#allocation27 + $0x10] sm:$0x3f]  ;;  %v8446_v6 = vsel %vm7239_vm6, %v8443_v4, %v8445_v63 }
 0xbff   : > { %v8331_v0 = vpop.f32.mrf.mxu0  ;;  %v8179_v48 = vsel %vm8178_vm9, %v8169_v5, 0.0  ;;  %12338 = vmatmul.mubr.msk.f32.vlgmr.msra.gmra.mxu1 %vm7272_vm7, %v8213_v56  ;;  %12346 = vmatprep.subr.mxu1 %v21554_v44 }
 0xc00   : > { %v8180_v24 = vadd.f32 %v8179_v48, %v8177_v1  ;;  %8202 = vadd.xlane.f32.xlu0 %v8201_v12  ;;  %12340 = vmatprep.mubr.msk.f32.mxu1 %vm14005_vm3, %v21554_v44  ;;  %v8447_v34 = vrot.slane %v8331_v0, 4 }
 0xc01   : > { %v12318_v38 = vpop.f32.mrf.mxu0 }
 0xc02   : > { %8181 = vadd.xlane.f32.xlu1 %v8180_v24  ;;  %v8448_v42 = vsel %vm7239_vm6, %v8445_v63, %v8447_v34  ;;  %v19997_v63 = vld [vmem:[#allocation15] sm:$0xff] }
 0xc03   : > { %v8336_v59 = vpop.f32.mrf.mxu0  ;;  %12341 = vmatmul.mubr.msk.f32.gmra.mxu1 %vm7272_vm7, %v8214_v40  ;;  %12400 = vmatprep.mubr.msk.f32.mxu0 %vm8587_vm10, %v19997_v63 }
 0xc04   : > { %12343 = vmatprep.mubr.msk.f32.mxu1 %vm14005_vm3, %v21554_v44  ;;  %v8449_v32 = vrot.slane %v8336_v59, 4 }
 0xc05   : > { %v12321_v17 = vpop.f32.mrf.mxu0 }
 0xc06   : > { %v8450_v62 = vsel %vm7239_vm6, %v8447_v34, %v8449_v32 }
 0xc07   : > { %v8341_v52 = vpop.f32.mrf.mxu0  ;;  %12344 = vmatmul.mubr.msk.f32.gmra.mxu1 %vm7272_vm7, %v8215_v54 }
 0xc08   : > { %v8451_v43 = vrot.slane %v8341_v52, 4  ;;  %12358 = vmatprep.mubr.msk.f32.mxu1 %vm14005_vm3, %v21554_v44 }
 0xc09   : > { %v12324_v14 = vpop.f32.mrf.mxu0 }
 0xc0a   : > { %12347 = vmatpush3.msk.msra.mxu1 %vm7239_vm6, %v8451_v43  ;;  %v8452_v31 = vsel %vm7239_vm6, %v8449_v32, %v8451_v43 }
 0xc0b   : > { %12348 = vmatprep.subr.mxu1 %v21554_v44 }
 0xc0c   : > { %12349 = vmatpush3.msra.mxu1 %v8452_v31 }
 0xc0d   : > { %12350 = vmatprep.subr.mxu1 %v21554_v44 }
 0xc0e   : > { %12351 = vmatpush3.msra.mxu1 %v8450_v62 }
 0xc0f   : > { %12352 = vmatprep.subr.mxu1 %v21554_v44 }
 0xc10   : > { %12353 = vmatpush3.msra.mxu1 %v8448_v42 }
 0xc11   : > { %12354 = vmatprep.subr.mxu1 %v21554_v44 }
 0xc12   : > { %12355 = vmatpush3.msra.mxu1 %v8446_v6 }
 0xc13   : > { %12356 = vmatprep.subr.mxu1 %v21554_v44 }
 0xc14   : > { %12357 = vmatpush3.msra.mxu1 %v8444_v15  ;;  %v20005_v15 = vld [vmem:[#allocation15 + $0x8] sm:$0xf] }
 0xc15   : > { %12359 = vmatmul.mubr.msk.f32.vlgmr.msra.gmra.mxu1 %vm7272_vm7, %v8213_v56  ;;  %12367 = vmatprep.subr.msk.mxu1 %vm4692_vm1, %v8544_v29 }
 0xc16   : > { %12361 = vmatprep.mubr.msk.f32.mxu1 %vm14005_vm3, %v21554_v44  ;;  %12368 = vmatpush3.msk.msra.mxu1 %vm4692_vm1, %v8544_v29 }
 0xc17   : > { %12369 = vmatprep.subr.mxu1 %v8543_v27 }
 0xc18   : > { %12370 = vmatpush3.msra.mxu1 %v8543_v27 }
 0xc19   : > { %12362 = vmatmul.mubr.msk.f32.gmra.mxu1 %vm7272_vm7, %v8214_v40  ;;  %12371 = vmatprep.subr.mxu1 %v8542_v28 }
 0xc1a   : > { %12364 = vmatprep.mubr.msk.f32.mxu1 %vm14005_vm3, %v21554_v44  ;;  %12372 = vmatpush3.msra.mxu1 %v8542_v28 }
 0xc1d   : > { %12365 = vmatmul.mubr.msk.f32.gmra.mxu1 %vm7272_vm7, %v8215_v54 }
 0xc89   : > { %v8203_v36 = vpop.xlane.xlu0 %8202 }
 0xc8a   : > { %v8204_v30 = vrot.slane %v8203_v36, 4 }
 0xc8b   : > { %v8182_v2 = vpop.xlane.xlu1 %8181 }
 0xc8c   : > { %v8183_v9 = vrot.slane %v8182_v2, 4  ;;  %v8205_v25 = vadd.f32 %v8204_v30, %v8203_v36 }
 0xc8e   : > { %v8184_v22 = vadd.f32 %v8183_v9, %v8182_v2  ;;  %v8206_v8 = vrot.slane %v8205_v25, 2 }
 0xc90   : > { %v8185_v50 = vrot.slane %v8184_v22, 2  ;;  %v8207_v33 = vadd.f32 %v8206_v8, %v8205_v25 }
 0xc92   : > { %v8186_v18 = vadd.f32 %v8185_v50, %v8184_v22  ;;  %v8208_v26 = vrot.slane %v8207_v33, 1 }
 0xc94   : > { %v8187_v10 = vrot.slane %v8186_v18, 1  ;;  %v8209_v41 = vadd.f32 %v8208_v26, %v8207_v33 }
 0xc96   : > { %v8188_v20 = vadd.f32 %v8187_v10, %v8186_v18 }
 0xc98   : > { %12550 = vpush %v8188_v20 }
 0xc99   : > { %12552 = vpush %v8209_v41 }
 0xcbf   : > { %v19949_v11 = vpop.f32.mrf.mxu1 }
 0xcc0   : > { %12373 = vmatprep.mubr.msk.f32.mxu1 %vm8587_vm10, %v19949_v11  ;;  %v8545_v45 = vmul.f32 %v19949_v11, %v19949_v11 }
 0xcc1   : > { %v12339_v60 = vpop.f32.mrf.mxu1 }
 0xcc2   : > { %v8567_v46 = vrot.slane %v8545_v45, 4 }
 0xcc3   : > { %v19953_v58 = vpop.f32.mrf.mxu1 }
 0xcc4   : > { %12374 = vmatmul.mubr.msk.f32.vlgmr.msra.gmra.mxu1 %vm8587_vm10, %v19953_v58  ;;  %v8546_v51 = vmul.f32 %v19953_v58, %v19953_v58 }
 0xcc5   : > { %v12342_v13 = vpop.f32.mrf.mxu1 }
 0xcc6   : > { %v8568_v56 = vrot.slane %v8546_v51, 4  ;;  %v9261_v51 = vld [vmem:[#allocation31 + $0x10] sm:$0x3f] }
 0xcc7   : > { %v8433_v3 = vpop.f32.mrf.mxu1 }
 0xcc8   : > { %v8547_v39 = vmul.f32 %v8433_v3, %v8433_v3  ;;  %v8569_v38 = vsel %vm7239_vm6, %v8567_v46, %v8568_v56 }
 0xcc9   : > { %v12345_v61 = vpop.f32.mrf.mxu1  ;;  %s12551_s5 = spop %12550 }
 0xcca   : > { %v8570_v0 = vrot.slane %v8547_v39, 4  ;;  %v9259_v39 = vld [vmem:[#allocation31] sm:$0xff]  ;;  %s12553_s12 = spop %12552 }
 0xccc   : > { %v8571_v54 = vsel %vm7239_vm6, %v8568_v56, %v8570_v0 }
 0xcd5   : > { %v8526_v16 = vpop.f32.mrf.mxu1 }
 0xcd6   : > { %v8557_v21 = vrot.slane %v8526_v16, 2  ;;  %v8548_v49 = vmul.f32 %v8526_v16, %v8526_v16  ;;  %v8551_v14 = vmul.f32 %v8526_v16, %v19949_v11 }
 0xcd7   : > { %v12360_v37 = vpop.f32.mrf.mxu1 }
 0xcd8   : > { %v19958_v47 = vsel %vm4692_vm1, %v8433_v3, %v8557_v21  ;;  %v8578_v24 = vrot.slane %v8548_v49, 6 }
 0xcd9   : > { %v8531_v55 = vpop.f32.mrf.mxu1  ;;  %12376 = vmatprep.mubr.msk.f32.mxu1 %vm8587_vm10, %v19958_v47 }
 0xcda   : > { %v8558_v23 = vrot.slane %v8531_v55, 2  ;;  %v8549_v48 = vmul.f32 %v8531_v55, %v8531_v55  ;;  %v8586_v52 = vsel %vm8577_vm11, %v8570_v0, %v8578_v24  ;;  %v8552_v31 = vmul.f32 %v8531_v55, %v19953_v58 }
 0xcdb   : > { %v12363_v19 = vpop.f32.mrf.mxu1 }
 0xcdc   : > { %v19967_v7 = vsel %vm4692_vm1, %v8557_v21, %v8558_v23  ;;  %v8579_v59 = vrot.slane %v8549_v48, 6  ;;  %v9260_v19 = vld [vmem:[#allocation31 + $0x8] sm:$0xff] }
 0xcdd   : > { %v8536_v57 = vpop.f32.mrf.mxu1  ;;  %12377 = vmatmul.mubr.msk.f32.gmra.mxu1 %vm8587_vm10, %v19967_v7 }
 0xcde   : > { %v19971_v5 = vrot.slane %v8536_v57, 2  ;;  %v8550_v40 = vmul.f32 %v8536_v57, %v8536_v57  ;;  %v8580_v32 = vsel %vm8577_vm11, %v8578_v24, %v8579_v59  ;;  %v8553_v34 = vmul.f32 %v8536_v57, %v8433_v3 }
 0xcdf   : > { %v12366_v35 = vpop.f32.mrf.mxu1 }
 0xce0   : > { %v19975_v1 = vsel %vm4692_vm1, %v8558_v23, %v19971_v5  ;;  %v8585_v12 = vsel %vm7239_vm6, %v19971_v5, %v8567_v46  ;;  %v8581_v17 = vrot.slane %v8550_v40, 6 }
 0xce1   : > { %12379 = vmatprep.mubr.msk.f32.mxu1 %vm8587_vm10, %v19975_v1 }
 0xce2   : > { %12380 = vmatmul.mubr.msk.f32.gmra.mxu1 %vm8587_vm10, %v8585_v12  ;;  %v8582_v43 = vsel %vm8577_vm11, %v8579_v59, %v8581_v17 }
 0xce3   : > { %12382 = vmatprep.mubr.msk.f32.mxu1 %vm8587_vm10, %v8569_v38 }
 0xce6   : > { %12383 = vmatmul.mubr.msk.f32.gmra.mxu1 %vm8587_vm10, %v8571_v54 }
 0xce7   : > { %12385 = vmatprep.mubr.msk.f32.mxu1 %vm8587_vm10, %v8586_v52 }
 0xcea   : > { %12386 = vmatmul.mubr.msk.f32.gmra.mxu1 %vm8587_vm10, %v8580_v32 }
 0xceb   : > { %12388 = vmatprep.mubr.msk.f32.mxu1 %vm8587_vm10, %v8582_v43 }
 0xcee   : > { %12389 = vmatmul.mubr.msk.f32.gmra.mxu1 %vm8587_vm10, %v8551_v14 }
 0xcef   : > { %12391 = vmatprep.mubr.msk.f32.mxu1 %vm8587_vm10, %v8552_v31 }
 0xcf2   : > { %12392 = vmatmul.mubr.msk.f32.gmra.mxu1 %vm8587_vm10, %v8553_v34 }
 0xcf3   : > { %12427 = vmatprep.mubr.msk.f32.mxu1 %vm8587_vm10, %v19997_v63 }
 0xd84   : > { %v12375_v62 = vpop.f32.mrf.mxu1 }
 0xd86   : > { %v8693_v4 = vpop.f32.mrf.mxu1 }
 0xd9d   : > { %v12378_v42 = vpop.f32.mrf.mxu1 }
 0xd9e   : > { %v8850_v30 = vrot.slane %v12378_v42, 6 }
 0xd9f   : > { %v8703_v53 = vpop.f32.mrf.mxu1 }
 0xda0   : > { %12394 = vmatprep.subr.msk.mxu0 %vm4692_vm1, %v8703_v53  ;;  %v8849_v2 = vrot.slane %v8703_v53, 6 }
 0xda1   : > { %12395 = vmatpush3.msk.msra.mxu0 %vm4692_vm1, %v8703_v53 }
 0xda2   : > { %v12381_v6 = vpop.f32.mrf.mxu1  ;;  %12396 = vmatprep.subr.mxu0 %v12375_v62  ;;  %v8851_v50 = vsel %vm8577_vm11, %v8849_v2, %v8850_v30 }
 0xda3   : > { %12397 = vmatpush3.msra.mxu0 %v12375_v62  ;;  %v8854_v27 = vrot.slane %v12381_v6, 6  ;;  %v8938_v13 = vrot.slane %v12381_v6, 4 }
 0xda4   : > { %v8713_v29 = vpop.f32.mrf.mxu1  ;;  %12398 = vmatprep.subr.mxu0 %v8693_v4 }
 0xda5   : > { %v8852_v28 = vrot.slane %v8713_v29, 6  ;;  %12399 = vmatpush3.msra.mxu0 %v8693_v4 }
 0xda6   : > { %v12384_v36 = vpop.f32.mrf.mxu1  ;;  %12401 = vmatmul.mubr.msk.f32.vlgmr.msra.gmra.mxu0 %vm8587_vm10, %v20005_v15 }
 0xda7   : > { %v8855_v9 = vsel %vm8577_vm11, %v8852_v28, %v8854_v27  ;;  %12409 = vmatprep.mubr.msk.f32.mxu0 %vm8587_vm10, %v19997_v63  ;;  %v8853_v22 = vsel %vm8577_vm11, %v8850_v30, %v8852_v28  ;;  %v8941_v18 = vrot.slane %v12384_v36, 4 }
 0xda8   : > { %v8723_v25 = vpop.f32.mrf.mxu1  ;;  %12403 = vmatprep.subr.msk.mxu0 %vm4692_vm1, %v8855_v9 }
 0xda9   : > { %12404 = vmatpush3.msk.msra.mxu0 %vm4692_vm1, %v8855_v9  ;;  %v8939_v26 = vrot.slane %v8723_v25, 4 }
 0xdaa   : > { %v12387_v8 = vpop.f32.mrf.mxu1  ;;  %12405 = vmatprep.subr.mxu0 %v8853_v22 }
 0xdab   : > { %12406 = vmatpush3.msra.mxu0 %v8853_v22  ;;  %v9027_v3 = vrot.slane %v12387_v8, 2  ;;  %v8942_v16 = vsel %vm7239_vm6, %v8939_v26, %v8941_v18  ;;  %v8940_v55 = vsel %vm7239_vm6, %v8938_v13, %v8939_v26 }
 0xdac   : > { %v8733_v33 = vpop.f32.mrf.mxu1  ;;  %12407 = vmatprep.subr.mxu0 %v8851_v50 }
 0xdad   : > { %v8943_v10 = vrot.slane %v8733_v33, 4  ;;  %12408 = vmatpush3.msra.mxu0 %v8851_v50  ;;  %v9026_v21 = vrot.slane %v8733_v33, 2  ;;  %v9258_v33 = vld [vmem:[#allocation30 + $0x8] sm:$0x7] }
 0xdae   : > { %v12390_v20 = vpop.f32.mrf.mxu1  ;;  %12410 = vmatmul.mubr.msk.f32.vlgmr.msra.gmra.mxu0 %vm8587_vm10, %v20005_v15 }
 0xdaf   : > { %v8944_v41 = vsel %vm7239_vm6, %v8941_v18, %v8943_v10  ;;  %12418 = vmatprep.mubr.msk.f32.mxu0 %vm8587_vm10, %v19997_v63  ;;  %v9028_v45 = vsel %vm4692_vm1, %v9026_v21, %v9027_v3 }
 0xdb0   : > { %v8743_v60 = vpop.f32.mrf.mxu1  ;;  %12412 = vmatprep.subr.msk.mxu0 %vm4692_vm1, %v8944_v41 }
 0xdb1   : > { %v9029_v61 = vrot.slane %v8743_v60, 2  ;;  %12413 = vmatpush3.msk.msra.mxu0 %vm4692_vm1, %v8944_v41 }
 0xdb2   : > { %12414 = vmatprep.subr.mxu0 %v8942_v16  ;;  %v12393_v23 = vpop.f32.mrf.mxu1 }
 0xdb3   : > { %12421 = vmatprep.subr.msk.mxu1 %vm4692_vm1, %v9029_v61  ;;  %v9030_v37 = vsel %vm4692_vm1, %v9027_v3, %v9029_v61  ;;  %12415 = vmatpush3.msra.mxu0 %v8942_v16 }
 0xdb4   : > { %12422 = vmatpush3.msk.msra.mxu1 %vm4692_vm1, %v9029_v61  ;;  %12416 = vmatprep.subr.mxu0 %v8940_v55  ;;  %v8753_v57 = vpop.f32.mrf.mxu1 }
 0xdb5   : > { %12423 = vmatprep.subr.mxu1 %v9030_v37  ;;  %12417 = vmatpush3.msra.mxu0 %v8940_v55 }
 0xdb6   : > { %12424 = vmatpush3.msra.mxu1 %v9030_v37  ;;  %12419 = vmatmul.mubr.msk.f32.vlgmr.msra.gmra.mxu0 %vm8587_vm10, %v20005_v15 }
 0xdb7   : > { %12425 = vmatprep.subr.mxu1 %v9028_v45  ;;  %12430 = vmatprep.subr.msk.mxu0 %vm4692_vm1, %v12393_v23 }
 0xdb8   : > { %12426 = vmatpush3.msra.mxu1 %v9028_v45  ;;  %12431 = vmatpush3.msk.msra.mxu0 %vm4692_vm1, %v12393_v23 }
 0xdb9   : > { %12428 = vmatmul.mubr.msk.f32.vlgmr.msra.gmra.mxu1 %vm8587_vm10, %v20005_v15  ;;  %12439 = vmatprep.subr.msk.mxu1 %vm4692_vm1, %v9261_v51 }
 0xdba   : > { %12440 = vmatpush3.msk.msra.mxu1 %vm4692_vm1, %v9261_v51  ;;  %12445 = vmatprep.mubr.msk.f32.mxu1 %vm8587_vm10, %v19949_v11  ;;  %v20056_v11 = vld [vmem:[#allocation30] sm:$0xff] }
 0xdbb   : > { %12441 = vmatprep.subr.mxu1 %v9260_v19  ;;  %12432 = vmatprep.subr.mxu0 %v8753_v57 }
 0xdbc   : > { %12442 = vmatpush3.msra.mxu1 %v9260_v19  ;;  %12433 = vmatpush3.msra.mxu0 %v8753_v57 }
 0xdbd   : > { %12443 = vmatprep.subr.mxu1 %v9259_v39  ;;  %12434 = vmatprep.subr.mxu0 %v12390_v20 }
 0xdbe   : > { %12444 = vmatpush3.msra.mxu1 %v9259_v39  ;;  %12435 = vmatpush3.msra.mxu0 %v12390_v20 }
 0xdbf   : > { %12446 = vmatmul.mubr.msk.f32.vlgmr.msra.gmra.mxu1 %vm8587_vm10, %v19953_v58  ;;  %12436 = vmatprep.mubr.msk.f32.mxu0 %vm8587_vm10, %v19997_v63 }
 0xdc0   : > { %12448 = vmatprep.mubr.msk.f32.mxu1 %vm8587_vm10, %v19958_v47  ;;  %12437 = vmatmul.mubr.msk.f32.vlgmr.msra.gmra.mxu0 %vm8587_vm10, %v20005_v15 }
 0xdc1   : > { %12472 = vmatprep.subr.mxu1 %v21554_v44  ;;  %12460 = vmatprep.mubr.msk.f32.mxu0 %vm8587_vm10, %v20056_v11 }
 0xdc3   : > { %12449 = vmatmul.mubr.msk.f32.gmra.mxu1 %vm8587_vm10, %v19967_v7 }
 0xdc4   : > { %12451 = vmatprep.mubr.msk.f32.mxu1 %vm8587_vm10, %v19975_v1 }
 0xdc7   : > { %12452 = vmatmul.mubr.msk.f32.gmra.mxu1 %vm8587_vm10, %v19971_v5 }
 0xdc8   : > { %12476 = vmatprep.mubr.msk.f32.mxu1 %vm14005_vm3, %v21554_v44 }
 0xe66   : > { %v12402_v58 = vpop.f32.mrf.mxu0 }
 0xe67   : > { %v9189_v56 = vmul.f32 %v12402_v58, %v12402_v58 }
 0xe68   : > { %v8837_v47 = vpop.f32.mrf.mxu0 }
 0xe69   : > { %v9188_v12 = vmul.f32 %v8837_v47, %v8837_v47 }
 0xe6e   : > { %v12411_v46 = vpop.f32.mrf.mxu0 }
 0xe6f   : > { %v9191_v49 = vmul.f32 %v12411_v46, %v12411_v46  ;;  %v9193_v14 = vmul.f32 %v12411_v46, %v12402_v58 }
 0xe70   : > { %v8926_v7 = vpop.f32.mrf.mxu0 }
 0xe71   : > { %v9217_v35 = vadd.f32 %v9191_v49, %v9189_v56  ;;  %v9190_v1 = vmul.f32 %v8926_v7, %v8926_v7  ;;  %v9192_v62 = vmul.f32 %v8926_v7, %v8837_v47  ;;  %v9213_v29 = vmul.f32 2.0, %v9193_v14  ;;  %v9537_v7 = vld [vmem:[#allocation19 + $0x8] sm:$0x7] }
 0xe72   : > { %12473 = vmatpush3.msk.msra.mxu1 %vm9546_vm14, %v9537_v7 }
 0xe73   : > { %v9216_v0 = vadd.f32 %v9190_v1, %v9188_v12  ;;  %v9219_v5 = vadd.f32 0.0001, %v9217_v35  ;;  %v9212_v30 = vmul.f32 2.0, %v9192_v62  ;;  %v9215_v9 = vadd.f32 0.0001, %v9213_v29  ;;  %12474 = vmatprep.subr.mxu1 %v21554_v44  ;;  %v9536_v35 = vld [vmem:[#allocation19] sm:$0xff] }
 0xe74   : > { %12475 = vmatpush3.msra.mxu1 %v9536_v35 }
 0xe75   : > { %v9218_v59 = vadd.f32 0.0001, %v9216_v0  ;;  %13053 = vrcp.f32 %v9219_v5  ;;  %v9214_v18 = vadd.f32 0.0001, %v9212_v30 }
 0xe76   : > { %v12420_v48 = vpop.f32.mrf.mxu0 }
 0xe77   : > { %v9195_v24 = vsub.f32 %v12420_v48, %v9189_v56  ;;  %13055 = vrcp.f32 %v9218_v59 }
 0xe78   : > { %v9015_v40 = vpop.f32.mrf.mxu0 }
 0xe79   : > { %v12429_v38 = vpop.f32.mrf.mxu1  ;;  %v9194_v17 = vsub.f32 %v9015_v40, %v9188_v12 }
 0xe7a   : > { %v9197_v54 = vsub.f32 %v12429_v38, %v9191_v49 }
 0xe7b   : > { %v9101_v52 = vpop.f32.mrf.mxu1 }
 0xe7c   : > { %v9205_v32 = vadd.f32 %v9197_v54, %v9195_v24  ;;  %v9196_v43 = vsub.f32 %v9101_v52, %v9190_v1 }
 0xe7e   : > { %v9207_v31 = vadd.f32 0.0009, %v9205_v32  ;;  %v9204_v34 = vadd.f32 %v9196_v43, %v9194_v17 }
 0xe7f   : > { %v12447_v63 = vpop.f32.mrf.mxu1 }
 0xe80   : > { %13057 = vrcp.f32 %v9207_v31  ;;  %v9206_v4 = vadd.f32 0.0009, %v9204_v34  ;;  %v12438_v42 = vpop.f32.mrf.mxu0 }
 0xe81   : > { %v9333_v53 = vpop.f32.mrf.mxu1  ;;  %v9199_v6 = vsub.f32 %v12438_v42, %v9193_v14 }
 0xe82   : > { %13059 = vrcp.f32 %v9206_v4  ;;  %v9179_v15 = vpop.f32.mrf.mxu0  ;;  %v13054_v22 = vpop.eup %13053 }
 0xe83   : > { %v12450_v27 = vpop.f32.mrf.mxu1  ;;  %v9198_v28 = vsub.f32 %v9179_v15, %v9192_v62  ;;  %v9201_v2 = vmul.f32 2.0, %v9199_v6  ;;  %v9223_v60 = vmul.f32 %v13054_v22, %v9215_v9 }
 0xe84   : > { %v13056_v41 = vpop.eup %13055  ;;  %v9450_v13 = vrot.slane %v12450_v27, 6 }
 0xe85   : > { %v9343_v36 = vpop.f32.mrf.mxu1  ;;  %v9200_v8 = vmul.f32 2.0, %v9198_v28  ;;  %v9203_v26 = vadd.f32 0.0009, %v9201_v2  ;;  %v9221_v37 = vmul.f32 %v13056_v41, %v9214_v18 }
 0xe86   : > { %12454 = vmatprep.subr.msk.mxu0 %vm4692_vm1, %v9343_v36  ;;  %v9449_v3 = vrot.slane %v9343_v36, 6 }
 0xe87   : > { %v12453_v25 = vpop.f32.mrf.mxu1  ;;  %12455 = vmatpush3.msk.msra.mxu0 %vm4692_vm1, %v9343_v36  ;;  %v9202_v61 = vadd.f32 0.0009, %v9200_v8 }
 0xe88   : > { %12456 = vmatprep.subr.mxu0 %v12447_v63  ;;  %v9454_v10 = vrot.slane %v12453_v25, 6  ;;  %v9451_v19 = vsel %vm8577_vm11, %v9449_v3, %v9450_v13  ;;  %v9535_v3 = vld [vmem:[#allocation18] sm:$0x1] }
 0xe89   : > { %v9353_v50 = vpop.f32.mrf.mxu1  ;;  %12457 = vmatpush3.msra.mxu0 %v12447_v63 }
 0xe8a   : > { %v9452_v20 = vrot.slane %v9353_v50, 6  ;;  %12458 = vmatprep.subr.mxu0 %v9333_v53 }
 0xe8b   : > { %12459 = vmatpush3.msra.mxu0 %v9333_v53 }
 0xe8c   : > { %v9455_v16 = vsel %vm8577_vm11, %v9452_v20, %v9454_v10  ;;  %12461 = vmatmul.mubr.msk.f32.vlgmr.msra.gmra.mxu0 %vm8587_vm10, %v9258_v33  ;;  %v9453_v45 = vsel %vm8577_vm11, %v9450_v13, %v9452_v20 }
 0xe8d   : > { %v13058_v21 = vpop.eup %13057  ;;  %12463 = vmatprep.subr.msk.mxu0 %vm4692_vm1, %v9455_v16  ;;  %12469 = vmatprep.mubr.msk.f32.mxu0 %vm8587_vm10, %v20056_v11 }
 0xe8e   : > { %v9211_v55 = vmul.f32 %v13058_v21, %v9203_v26  ;;  %12464 = vmatpush3.msk.msra.mxu0 %vm4692_vm1, %v9455_v16 }
 0xe8f   : > { %v13060_v51 = vpop.eup %13059  ;;  %12465 = vmatprep.subr.mxu0 %v9453_v45 }
 0xe90   : > { %v9209_v23 = vmul.f32 %v13060_v51, %v9202_v61  ;;  %12466 = vmatpush3.msra.mxu0 %v9453_v45  ;;  %v9225_v39 = vmul.f32 %v9223_v60, %v9211_v55  ;;  %v9244_v57 = vsel %vm9228_vm12, %v9211_v55, 0.0 }
 0xe91   : > { %12467 = vmatprep.subr.mxu0 %v9451_v19 }
 0xe92   : > { %12468 = vmatpush3.msra.mxu0 %v9451_v19  ;;  %v9224_v11 = vmul.f32 %v9221_v37, %v9209_v23  ;;  %v9229_v58 = vsel %vm9228_vm12, %v9225_v39, 0.0  ;;  %v9243_v47 = vsel %vm9226_vm13, %v9209_v23, 0.0 }
 0xe93   : > { %12470 = vmatmul.mubr.msk.f32.vlgmr.msra.gmra.mxu0 %vm8587_vm10, %v9258_v33  ;;  %v9245_v46 = vadd.f32 %v9244_v57, %v9243_v47  ;;  %12497 = vmatprep.subr.mxu0 %v21554_v44 }
 0xe94   : > { %v9227_v56 = vsel %vm9226_vm13, %v9224_v11, 0.0  ;;  %12501 = vmatprep.mubr.msk.f32.mxu0 %vm14005_vm3, %v21554_v44 }
 0xe95   : > { %v9230_v49 = vadd.f32 %v9229_v58, %v9227_v56  ;;  %9246 = vadd.xlane.f32.xlu0 %v9245_v46 }
 0xe97   : > { %9231 = vadd.xlane.f32.xlu1 %v9230_v49 }
 0xf1e   : > { %v9247_v12 = vpop.xlane.xlu0 %9246 }
 0xf1f   : > { %v9248_v1 = vrot.slane %v9247_v12, 4 }
 0xf20   : > { %v9232_v0 = vpop.xlane.xlu1 %9231 }
 0xf21   : > { %v9233_v48 = vrot.slane %v9232_v0, 4  ;;  %v9249_v5 = vadd.f32 %v9248_v1, %v9247_v12 }
 0xf23   : > { %v9234_v24 = vadd.f32 %v9233_v48, %v9232_v0  ;;  %v9250_v40 = vrot.slane %v9249_v5, 2 }
 0xf25   : > { %v9235_v38 = vrot.slane %v9234_v24, 2  ;;  %v9251_v59 = vadd.f32 %v9250_v40, %v9249_v5 }
 0xf27   : > { %v9236_v54 = vadd.f32 %v9235_v38, %v9234_v24  ;;  %v9252_v17 = vrot.slane %v9251_v59, 1 }
 0xf29   : > { %v9237_v52 = vrot.slane %v9236_v54, 1  ;;  %v9253_v43 = vadd.f32 %v9252_v17, %v9251_v59 }
 0xf2b   : > { %v9238_v32 = vadd.f32 %v9237_v52, %v9236_v54 }
 0xf2d   : > { %12554 = vpush %v9238_v32 }
 0xf2e   : > { %12556 = vpush %v9253_v43 }
 0xf4c   : > { %v12462_v14 = vpop.f32.mrf.mxu0 }
 0xf4d   : > { %v9539_v53 = vmul.f32 %v12462_v14, %v12462_v14 }
 0xf4e   : > { %v9437_v31 = vpop.f32.mrf.mxu0 }
 0xf4f   : > { %12477 = vmatmul.mubr.msk.f32.vlgmr.msra.gmra.mxu1 %vm9577_vm15, %v9437_v31  ;;  %v9538_v62 = vmul.f32 %v9437_v31, %v9437_v31  ;;  %v9555_v27 = vrot.slane %v9539_v53, 2 }
 0xf50   : > { %12479 = vmatprep.mubr.msk.f32.mxu1 %vm14005_vm3, %v21554_v44 }
 0xf51   : > { %v9554_v29 = vrot.slane %v9538_v62, 2 }
 0xf53   : > { %v12471_v34 = vpop.f32.mrf.mxu0  ;;  %v9556_v25 = vsel %vm4692_vm1, %v9554_v29, %v9555_v27 }
 0xf54   : > { %v9548_v42 = vrot.slane %v12471_v34, 5  ;;  %v9541_v30 = vmul.f32 %v12471_v34, %v12471_v34  ;;  %v9543_v18 = vmul.f32 %v12471_v34, %v12462_v14 }
 0xf55   : > { %v9526_v63 = vpop.f32.mrf.mxu0 }
 0xf56   : > { %v9547_v4 = vrot.slane %v9526_v63, 5  ;;  %v9540_v28 = vmul.f32 %v9526_v63, %v9526_v63  ;;  %v9542_v2 = vmul.f32 %v9526_v63, %v9437_v31  ;;  %v9563_v22 = vrot.slane %v9541_v30, 7 }
 0xf57   : > { %v9570_v10 = vrot.slane %v9543_v18, 4  ;;  %v8190_v18 = vstv %s12551_s5 }
 0xf58   : > { %v9573_v6 = vsel %vm9546_vm14, %v12462_v14, %v9547_v4  ;;  %v9549_v15 = vsel %vm9546_vm14, %v9547_v4, %v9548_v42  ;;  %v9562_v9 = vrot.slane %v9540_v28, 7  ;;  %v9569_v8 = vrot.slane %v9542_v2, 4 }
 0xf59   : > { %12480 = vmatmul.mubr.msk.f32.gmra.mxu1 %vm9577_vm15, %v9573_v6  ;;  %v9574_v36 = vsel %vm4692_vm1, %v9549_v15, %v9554_v29  ;;  %vm9777_vm1 = vcmask 1044480  }
 0xf5a   : > { %12482 = vmatprep.mubr.msk.f32.mxu1 %vm14005_vm3, %v21554_v44  ;;  %v9575_v50 = vsel %vm9561_vm2, %v9555_v27, %v9562_v9  ;;  %v9564_v33 = vsel %vm9561_vm2, %v9562_v9, %v9563_v22  ;;  %v9571_v20 = vsel %vm7239_vm6, %v9569_v8, %v9570_v10  ;;  %v8211_v10 = vstv %s12553_s12 }
 0xf5b   : > { %v9576_v26 = vsel %vm7239_vm6, %v9564_v33, %v9569_v8  ;;  %v6802_v33 = vstv %s12549_s7 }
 0xf5d   : > { %12483 = vmatmul.mubr.msk.f32.gmra.mxu1 %vm9577_vm15, %v9574_v36 }
 0xf5e   : > { %12485 = vmatprep.mubr.msk.f32.mxu1 %vm14005_vm3, %v21554_v44  ;;  %s12555_s24 = spop %12554 }
 0xf5f   : > { %s12557_s13 = spop %12556 }
 0xf61   : > { %12486 = vmatmul.mubr.msk.f32.gmra.mxu1 %vm9577_vm15, %v9556_v25 }
 0xf62   : > { %12488 = vmatprep.mubr.msk.f32.mxu1 %vm14005_vm3, %v21554_v44 }
 0xf65   : > { %12489 = vmatmul.mubr.msk.f32.gmra.mxu1 %vm9577_vm15, %v9575_v50  ;;  %v6771_v50 = vstv %s12547_s27 }
 0xf66   : > { %12491 = vmatprep.mubr.msk.f32.mxu1 %vm14005_vm3, %v21554_v44 }
 0xf69   : > { %12492 = vmatmul.mubr.msk.f32.gmra.mxu1 %vm9577_vm15, %v9576_v26  ;;  %v4707_v26 = vstv %s12543_s9 }
 0xf6a   : > { %12494 = vmatprep.mubr.msk.f32.mxu1 %vm14005_vm3, %v21554_v44 }
 0xf6d   : > { %12495 = vmatmul.mubr.msk.f32.gmra.mxu1 %vm9577_vm15, %v9571_v20  ;;  %v9240_v20 = vstv %s12555_s24 }
0x100f   : > { %v9666_v41 = vpop.f32.mrf.mxu1 }
0x1011   : > { %v12478_v60 = vpop.f32.mrf.mxu1 }
0x1012   : > { %v6773_v60 = vmul.f32 0.00016436556, %v6771_v50 }
0x1019   : > { %v9671_v13 = vpop.f32.mrf.mxu1 }
0x101a   : > { %12498 = vmatpush3.msk.msra.mxu0 %vm9546_vm14, %v9671_v13  ;;  %v9778_v21 = vrot.slane %v9671_v13, 3  ;;  %v9255_v13 = vstv %s12557_s13 }
0x101b   : > { %v12481_v61 = vpop.f32.mrf.mxu1  ;;  %12499 = vmatprep.subr.mxu0 %v21554_v44 }
0x101c   : > { %12500 = vmatpush3.msra.mxu0 %v9666_v41  ;;  %v4782_v41 = vstv %s12545_s22  ;;  %v8192_v61 = vmul.f32 0.00086505193, %v8190_v18 }
0x101d   : > { %v9676_v16 = vpop.f32.mrf.mxu1  ;;  %12502 = vmatmul.mubr.msk.f32.vlgmr.msra.gmra.mxu0 %vm9577_vm15, %v9535_v3  ;;  %12504 = vmatprep.subr.mxu0 %v21554_v44 }
0x101e   : > { %v9779_v37 = vrot.slane %v9676_v16, 3  ;;  %12508 = vmatprep.mubr.msk.f32.mxu0 %vm14005_vm3, %v21554_v44  ;;  %v9856_v58 = vrot.slane %v9676_v16, 6  ;;  %v4709_v16 = vmul.f32 3.6289737e-05, %v4707_v26 }
0x101f   : > { %v12484_v55 = vpop.f32.mrf.mxu1 }
0x1020   : > { %12505 = vmatpush3.msk.msra.mxu0 %vm9546_vm14, %v9779_v37  ;;  %v9780_v45 = vsel %vm9777_vm1, %v9778_v21, %v9779_v37  ;;  %v8212_v21 = vmul.f32 0.00086505193, %v8211_v10  ;;  %v9242_v37 = vmul.f32 0.0069444445, %v9240_v20  ;;  %v4783_v55 = vmul.f32 3.6289737e-05, %v4782_v41 }
0x1021   : > { %v9681_v51 = vpop.f32.mrf.mxu1  ;;  %12506 = vmatprep.subr.mxu0 %v21554_v44 }
0x1022   : > { %12507 = vmatpush3.msra.mxu0 %v9780_v45  ;;  %v9857_v39 = vrot.slane %v9681_v51, 6  ;;  %v9256_v45 = vmul.f32 0.0069444445, %v9255_v13  ;;  %v10114_v51 = vsel %vm9561_vm2, %v4709_v16, %v6773_v60 }
0x1023   : > { %v12487_v23 = vpop.f32.mrf.mxu1  ;;  %12509 = vmatmul.mubr.msk.f32.vlgmr.msra.gmra.mxu0 %vm9577_vm15, %v9535_v3  ;;  %12511 = vmatprep.subr.mxu0 %v21554_v44 }
0x1024   : > { %12515 = vmatprep.mubr.msk.f32.mxu0 %vm14005_vm3, %v21554_v44  ;;  %v9858_v49 = vsel %vm8577_vm11, %v9856_v58, %v9857_v39 }
0x1025   : > { %v9686_v19 = vpop.f32.mrf.mxu1 }
0x1026   : > { %v9859_v57 = vrot.slane %v9686_v19, 6  ;;  %v9936_v35 = vrot.slane %v9686_v19, 1  ;;  %v10115_v19 = vsel %vm8577_vm11, %v10114_v51, %v8192_v61 }
0x1027   : > { %v12490_v11 = vpop.f32.mrf.mxu1 }
0x1028   : > { %v9860_v47 = vsel %vm8577_vm11, %v9857_v39, %v9859_v57  ;;  %v10116_v11 = vsel %vm9546_vm14, %v10115_v19, %v9242_v37 }
0x1029   : > { %12512 = vmatpush3.msk.msra.mxu0 %vm9546_vm14, %v9860_v47  ;;  %v9691_v46 = vpop.f32.mrf.mxu1 }
0x102a   : > { %v9937_v56 = vrot.slane %v9691_v46, 1  ;;  %12513 = vmatprep.subr.mxu0 %v21554_v44  ;;  %v10013_v5 = vrot.slane %v9691_v46, 4 }
0x102b   : > { %12514 = vmatpush3.msra.mxu0 %v9858_v49  ;;  %v12493_v7 = vpop.f32.mrf.mxu1 }
0x102c   : > { %12516 = vmatmul.mubr.msk.f32.vlgmr.msra.gmra.mxu0 %vm9577_vm15, %v9535_v3  ;;  %12518 = vmatprep.subr.mxu0 %v21554_v44  ;;  %v9938_v1 = vsel %vm9935_vm4, %v9936_v35, %v9937_v56 }
0x102d   : > { %12519 = vmatpush3.msk.msra.mxu0 %vm9546_vm14, %v9937_v56  ;;  %12522 = vmatprep.mubr.msk.f32.mxu0 %vm14005_vm3, %v21554_v44  ;;  %v9696_v12 = vpop.f32.mrf.mxu1 }
0x102e   : > { %12520 = vmatprep.subr.mxu0 %v21554_v44  ;;  %v10014_v0 = vrot.slane %v9696_v12, 4 }
0x102f   : > { %12521 = vmatpush3.msra.mxu0 %v9938_v1  ;;  %v12496_v48 = vpop.f32.mrf.mxu1 }
0x1030   : > { %12523 = vmatmul.mubr.msk.f32.vlgmr.msra.gmra.mxu0 %vm9577_vm15, %v9535_v3  ;;  %12525 = vmatprep.subr.mxu0 %v21554_v44  ;;  %v10015_v24 = vsel %vm7239_vm6, %v10013_v5, %v10014_v0 }
0x1031   : > { %12526 = vmatpush3.msk.msra.mxu0 %vm9546_vm14, %v10014_v0  ;;  %12529 = vmatprep.mubr.msk.f32.mxu0 %vm14005_vm3, %v21554_v44 }
0x1032   : > { %12527 = vmatprep.subr.mxu0 %v21554_v44 }
0x1033   : > { %12528 = vmatpush3.msra.mxu0 %v10015_v24 }
0x1034   : > { %12530 = vmatmul.mubr.msk.f32.vlgmr.msra.gmra.mxu0 %vm9577_vm15, %v9535_v3  ;;  %v6803_v3 = vmul.f32 0.00016436556, %v6802_v33 }
0x1036   : > { %v10119_v23 = vsel %vm9561_vm2, %v4783_v55, %v6803_v3 }
0x1037   : > { %v10120_v39 = vsel %vm8577_vm11, %v10119_v23, %v8212_v21 }
0x1038   : > { %v10121_v46 = vsel %vm9546_vm14, %v10120_v39, %v9256_v45 }
0x10dd   : > { %v9772_v40 = vpop.f32.mrf.mxu0 }
0x10de   : > { %v10089_v17 = vmul.f32 %v9772_v40, %v9772_v40 }
0x10df   : > { %v12503_v38 = vpop.f32.mrf.mxu0 }
0x10e3   : > { %v9850_v59 = vpop.f32.mrf.mxu0 }
0x10e4   : > { %v10090_v52 = vmul.f32 %v9850_v59, %v9850_v59  ;;  %v10091_v15 = vmul.f32 %v9850_v59, %v9772_v40 }
0x10e5   : > { %v12510_v54 = vpop.f32.mrf.mxu0 }
0x10e6   : > { %v10103_v43 = vadd.f32 %v10090_v52, %v10089_v17  ;;  %v10101_v27 = vmul.f32 2.0, %v10091_v15 }
0x10e8   : > { %v10104_v34 = vadd.f32 0.0001, %v10103_v43  ;;  %v10102_v30 = vadd.f32 0.0001, %v10101_v27 }
0x10ea   : > { %13061 = vrcp.f32 %v10104_v34 }
0x10ec   : > { %v9930_v32 = vpop.f32.mrf.mxu0 }
0x10ed   : > { %v10092_v63 = vsub.f32 %v9930_v32, %v10089_v17 }
0x10ee   : > { %v12517_v14 = vpop.f32.mrf.mxu0 }
0x10f0   : > { %v10008_v31 = vpop.f32.mrf.mxu0 }
0x10f1   : > { %v10093_v62 = vsub.f32 %v10008_v31, %v10090_v52 }
0x10f2   : > { %v12524_v4 = vpop.f32.mrf.mxu0 }
0x10f3   : > { %v10097_v44 = vadd.f32 %v10093_v62, %v10092_v63 }
0x10f4   : > { %v10085_v42 = vpop.f32.mrf.mxu0 }
0x10f5   : > { %v10098_v53 = vadd.f32 0.0009, %v10097_v44  ;;  %v10094_v29 = vsub.f32 %v10085_v42, %v10091_v15 }
0x10f6   : > { %v12531_v6 = vpop.f32.mrf.mxu0 }
0x10f7   : > { %13063 = vrcp.f32 %v10098_v53  ;;  %v10095_v28 = vmul.f32 2.0, %v10094_v29  ;;  %v13062_v36 = vpop.eup %13061 }
0x10f8   : > { %v10106_v22 = vmul.f32 %v13062_v36, %v10102_v30 }
0x10f9   : > { %v10096_v2 = vadd.f32 0.0009, %v10095_v28 }
0x1104   : > { %v13064_v9 = vpop.eup %13063 }
0x1105   : > { %v10100_v25 = vmul.f32 %v13064_v9, %v10096_v2 }
0x1107   : > { %v10107_v8 = vmul.f32 %v10106_v22, %v10100_v25 }
0x1109   : > { %12558 = vpush %v10107_v8 }
0x110a   : > { %12560 = vpush %v10100_v25 }
0x113a   : > { %s12559_s21 = spop %12558 }
0x113b   : > { %v10110_v57 = vstv %s12559_s21  ;;  %s12561_s8 = spop %12560 }
0x113c   : > { %v10117_v58 = vsel %vm7239_vm6, %v10116_v11, %v10110_v57  ;;  %v10113_v47 = vstv %s12561_s8 }
0x113d   : > { %10118 = vst [vmem:[%s1054_s15] sm:$0x1f] %v10117_v58  ;;  %v10122_v56 = vsel %vm7239_vm6, %v10121_v46, %v10113_v47 }
0x113e   : > { %10123 = vst [vmem:[%s1062_s30] sm:$0x1f] %v10122_v56 }
0x113f PF: > { %s21557_s11 = sld [smem:[#allocation48_spill]]  ;;  %s21558_s3 = smov %s13954_s28 }
0x1140   : > { %s21559_s28 = smov %s13958_s29  ;;  %s21560_s29 = smov %s14400_s10 }
0x1141   : > { %s21561_s30 = smov %s13970_s0  ;;  %s21562_s4 = smov %s13974_s23 }
0x1142   : > { %s21563_s0 = smov %s21566_s20  ;;  %s21564_s23 = smov %s21570_s6 }
0x1145   : > { %s48_s1 = sadd.s32 1, %s21557_s11  }
0x1146   : > { %p45_p2 = scmp.ge.s32.totalorder %s48_s1, 28  }
0x1148   :  { %47 = sbr.rel (!%p45_p2) target bundleno = 36 (0x24), region = 249 }
0x114d   :  { %10193 = vsyncpa [#allocation3], 1 }
0x114e   :  { %10195 = vsyncpa [#allocation3 + $0x1], 1 }
0x114f   :  { %10196 = vsyncpa [#allocation5], 1 }
0x1150   :  { %10198 = vsyncpa [#allocation5 + $0x1], 1 }
0x1151   :  { %10199 = vsyncpa [#allocation8], 1 }
0x1152   :  { %10200 = vsyncpa [#allocation11], 1 }
0x1153   :  { %10201 = vsyncpa [#allocation14], 1 }
0x1154   :  { %10202 = vsyncpa [#allocation17], 1 }
0x1155   :  { %10203 = vsyncpa [#allocation20], 1 }
0x1156   :  { %10204 = vsyncpa [#allocation23], 1 }
0x1157   :  { %10205 = vsyncpa [#allocation26], 1 }
0x1158   :  { %10206 = vsyncpa [#allocation29], 1 }
0x1159   :  { %10207 = vsyncpa [#allocation32], 1 }

</bundles_post_ra>
